<compile_context>
chip_gen: v6e
topology: v6e:2x2x1
jax: 0.10.0
libtpu: 0.0.40
codegen_flags: <defaults>
</compile_context>

<pallas_src>
import functools

import jax
import jax.numpy as jnp
from jax import lax
from jax.experimental import pallas as pl
from jax.experimental.pallas import tpu as pltpu

_VMEM = pl.BlockSpec(memory_space=pltpu.MemorySpace.VMEM)


# ----------------------------------------------------------------------------
# Pallas kernels
# ----------------------------------------------------------------------------
def _mm_bias_act_kernel(x_ref, w_ref, b_ref, o_ref, *, act):
    # bf16 operands, f32 accumulation on the MXU; bias/activation in f32.
    acc = jnp.dot(x_ref[...], w_ref[...], preferred_element_type=jnp.float32)
    acc = acc + b_ref[...]                    # (1, N) broadcasts over rows
    if act == "relu":
        acc = jnp.maximum(acc, 0.0)
    elif act == "sigmoid":
        acc = jax.nn.sigmoid(acc)
    o_ref[...] = acc.astype(o_ref.dtype)


def mm_bias_act(x, w, b2, act="none", out_dtype=jnp.bfloat16, tile_m=512):
    """Fused (x @ w + b) with optional activation.

    x: (M, K) bf16, w: (K, N) bf16, b2: (1, N) f32.
    For large M the rows are tiled with a parallel grid (pipelined, sharded
    across TensorCores); small operands run as a single whole-array call.
    """
    M, K = x.shape
    N = w.shape[1]
    kern = functools.partial(_mm_bias_act_kernel, act=act)
    out_shape = jax.ShapeDtypeStruct((M, N), out_dtype)

    if M >= 2 * tile_m:
        grid_m = pl.cdiv(M, tile_m)
        return pl.pallas_call(
            kern,
            out_shape=out_shape,
            grid_spec=pl.GridSpec(
                grid=(grid_m,),
                in_specs=[pl.BlockSpec((tile_m, K), lambda i: (i, 0)),
                          pl.BlockSpec((K, N), lambda i: (0, 0)),
                          pl.BlockSpec((1, N), lambda i: (0, 0))],
                out_specs=pl.BlockSpec((tile_m, N), lambda i: (i, 0))),
            compiler_params=pltpu.CompilerParams(
                dimension_semantics=("parallel",)),
        )(x, w, b2)

    return pl.pallas_call(
        kern,
        out_shape=out_shape,
        in_specs=[_VMEM, _VMEM, _VMEM],
        out_specs=_VMEM,
    )(x, w, b2)


def _head_kernel(hflat_ref, eps_ref,
                 fc1_w_ref, fc1_b_ref,
                 mu_w_ref, mu_b_ref,
                 lv_w_ref, lv_b_ref,
                 dec_w_ref, dec_b_ref,
                 mu_out_ref, lv_out_ref, d_out_ref):
    """Fused fc1 + ReLU + fc_mu + fc_logvar + reparameterize + decoder_input."""
    h = jnp.dot(hflat_ref[...], fc1_w_ref[...],
                preferred_element_type=jnp.float32)
    h = jnp.maximum(h + fc1_b_ref[...], 0.0)
    h16 = h.astype(jnp.bfloat16)

    mu = jnp.dot(h16, mu_w_ref[...],
                 preferred_element_type=jnp.float32) + mu_b_ref[...]
    lv = jnp.dot(h16, lv_w_ref[...],
                 preferred_element_type=jnp.float32) + lv_b_ref[...]

    std = jnp.exp(0.5 * lv)
    z = mu + eps_ref[...] * std               # reparameterization (f32)

    d = jnp.dot(z.astype(jnp.bfloat16), dec_w_ref[...],
                preferred_element_type=jnp.float32) + dec_b_ref[...]

    mu_out_ref[...] = mu
    lv_out_ref[...] = lv
    d_out_ref[...] = d.astype(d_out_ref.dtype)


def encode_decode_head(h_flat, eps, pp):
    B = h_flat.shape[0]
    L = pp["mu_w"].shape[1]
    D = pp["dec_in_w"].shape[1]
    mu, logvar, d = pl.pallas_call(
        _head_kernel,
        out_shape=(jax.ShapeDtypeStruct((B, L), jnp.float32),
                   jax.ShapeDtypeStruct((B, L), jnp.float32),
                   jax.ShapeDtypeStruct((B, D), jnp.bfloat16)),
        in_specs=[_VMEM] * 10,
        out_specs=(_VMEM, _VMEM, _VMEM),
    )(h_flat, eps,
      pp["fc1_w"], pp["fc1_b"], pp["mu_w"], pp["mu_b"],
      pp["lv_w"], pp["lv_b"], pp["dec_in_w"], pp["dec_in_b"])
    return mu, logvar, d


# ----------------------------------------------------------------------------
# im2col glue (pure data movement, plain JAX, bf16)
# ----------------------------------------------------------------------------
def _im2col(x, k, stride, pad_lo, pad_hi):
    """x: NHWC -> patches [B*Ho*Wo, k*k*C] ordered (ky, kx, ci)."""
    B, H, W, C = x.shape
    xp = jnp.pad(x, ((0, 0), (pad_lo, pad_hi), (pad_lo, pad_hi), (0, 0)))
    Hp = H + pad_lo + pad_hi
    Wp = W + pad_lo + pad_hi
    Ho = (Hp - k) // stride + 1
    Wo = (Wp - k) // stride + 1
    cols = []
    for ky in range(k):
        for kx in range(k):
            sl = xp[:, ky:ky + stride * (Ho - 1) + 1:stride,
                    kx:kx + stride * (Wo - 1) + 1:stride, :]
            cols.append(sl)
    patches = jnp.stack(cols, axis=3)           # [B, Ho, Wo, k*k, C]
    return patches.reshape(B * Ho * Wo, k * k * C), Ho, Wo


def conv2d(x, w_mat, b2, k, stride, pad, act, out_dtype=jnp.bfloat16):
    """nn.Conv2d semantics; x is NHWC bf16, w_mat is (k*k*Ci, Co) bf16."""
    B = x.shape[0]
    patches, Ho, Wo = _im2col(x.astype(jnp.bfloat16), k, stride, pad, pad)
    out = mm_bias_act(patches, w_mat, b2, act, out_dtype=out_dtype)
    return out.reshape(B, Ho, Wo, -1)


def conv_transpose2d(x, w_mat, b2, k, stride, pad, out_pad, act,
                     out_dtype=jnp.bfloat16):
    """nn.ConvTranspose2d semantics via dilate+pad then a stride-1 conv with
    the spatially flipped, channel-swapped kernel (pre-baked into w_mat)."""
    B = x.shape[0]
    plo = k - 1 - pad
    phi = k - 1 - pad + out_pad
    x = x.astype(jnp.bfloat16)
    xd = lax.pad(x, jnp.asarray(0.0, x.dtype),
                 ((0, 0, 0), (plo, phi, stride - 1),
                  (plo, phi, stride - 1), (0, 0, 0)))
    patches, Ho, Wo = _im2col(xd, k, 1, 0, 0)
    out = mm_bias_act(patches, w_mat, b2, act, out_dtype=out_dtype)
    return out.reshape(B, Ho, Wo, -1)


# ----------------------------------------------------------------------------
# Parameters (deterministic synthetic init, PyTorch-like uniform(+-1/sqrt(fan)))
# ----------------------------------------------------------------------------
def _uniform(key, shape, fan_in):
    bound = 1.0 / (fan_in ** 0.5)
    return jax.random.uniform(key, shape, jnp.float32, -bound, bound)


def init_params(key, latent_dim=20):
    ks = jax.random.split(key, 20)
    p = {}
    p["conv1_w"] = _uniform(ks[0], (32, 1, 3, 3), 1 * 9)
    p["conv1_b"] = _uniform(ks[1], (32,), 1 * 9)
    p["conv2_w"] = _uniform(ks[2], (64, 32, 3, 3), 32 * 9)
    p["conv2_b"] = _uniform(ks[3], (64,), 32 * 9)
    p["conv3_w"] = _uniform(ks[4], (64, 64, 3, 3), 64 * 9)
    p["conv3_b"] = _uniform(ks[5], (64,), 64 * 9)
    p["fc1_w"] = _uniform(ks[6], (64 * 7 * 7, 256), 64 * 7 * 7)   # stored (in, out)
    p["fc1_b"] = _uniform(ks[7], (256,), 64 * 7 * 7)
    p["mu_w"] = _uniform(ks[8], (256, latent_dim), 256)
    p["mu_b"] = _uniform(ks[9], (latent_dim,), 256)
    p["lv_w"] = _uniform(ks[10], (256, latent_dim), 256)
    p["lv_b"] = _uniform(ks[11], (latent_dim,), 256)
    p["dec_in_w"] = _uniform(ks[12], (latent_dim, 64 * 7 * 7), latent_dim)
    p["dec_in_b"] = _uniform(ks[13], (64 * 7 * 7,), latent_dim)
    p["deconv1_w"] = _uniform(ks[14], (64, 64, 3, 3), 64 * 9)     # (Cin, Cout, k, k)
    p["deconv1_b"] = _uniform(ks[15], (64,), 64 * 9)
    p["deconv2_w"] = _uniform(ks[16], (64, 32, 3, 3), 64 * 9)
    p["deconv2_b"] = _uniform(ks[17], (32,), 64 * 9)
    p["deconv3_w"] = _uniform(ks[18], (32, 1, 3, 3), 32 * 9)
    p["deconv3_b"] = _uniform(ks[19], (1,), 32 * 9)
    return p


def prepare_params(p, latent_dim=20):
    """One-time (outside jit) conversion of PyTorch-layout params into
    kernel-friendly form: matmul-shaped bf16 weights, (1, N) f32 biases,
    flatten/view permutations folded into fc1 / decoder_input, deconv3 Cout
    zero-padded to 128 lanes."""
    def conv_w(w_oihw):                       # (Co,Ci,k,k) -> (k*k*Ci, Co)
        Co, Ci, k, _ = w_oihw.shape
        return jnp.transpose(w_oihw, (2, 3, 1, 0)).reshape(k * k * Ci, Co) \
                  .astype(jnp.bfloat16)

    def deconv_w(w_iohw):                     # (Ci,Co,k,k) -> flipped (k*k*Ci, Co)
        Ci, Co, k, _ = w_iohw.shape
        wf = w_iohw[:, :, ::-1, ::-1]
        return jnp.transpose(wf, (2, 3, 0, 1)).reshape(k * k * Ci, Co) \
                  .astype(jnp.bfloat16)

    def b2(b):
        return b.reshape(1, -1).astype(jnp.float32)

    pp = {}
    pp["conv1_w"] = conv_w(p["conv1_w"]); pp["conv1_b"] = b2(p["conv1_b"])
    pp["conv2_w"] = conv_w(p["conv2_w"]); pp["conv2_b"] = b2(p["conv2_b"])
    pp["conv3_w"] = conv_w(p["conv3_w"]); pp["conv3_b"] = b2(p["conv3_b"])

    # fc1: permute rows from NCHW-flatten (c,y,x) to NHWC-flatten (y,x,c)
    fc1 = p["fc1_w"].reshape(64, 7, 7, 256).transpose(1, 2, 0, 3) \
                    .reshape(64 * 49, 256)
    pp["fc1_w"] = fc1.astype(jnp.bfloat16); pp["fc1_b"] = b2(p["fc1_b"])

    pp["mu_w"] = p["mu_w"].astype(jnp.bfloat16); pp["mu_b"] = b2(p["mu_b"])
    pp["lv_w"] = p["lv_w"].astype(jnp.bfloat16); pp["lv_b"] = b2(p["lv_b"])

    # decoder_input: permute columns (and bias) from NCHW to NHWC order
    dw = p["dec_in_w"].reshape(latent_dim, 64, 7, 7).transpose(0, 2, 3, 1) \
                      .reshape(latent_dim, 64 * 49)
    db = p["dec_in_b"].reshape(64, 7, 7).transpose(1, 2, 0).reshape(1, 64 * 49)
    pp["dec_in_w"] = dw.astype(jnp.bfloat16)
    pp["dec_in_b"] = db.astype(jnp.float32)

    pp["deconv1_w"] = deconv_w(p["deconv1_w"]); pp["deconv1_b"] = b2(p["deconv1_b"])
    pp["deconv2_w"] = deconv_w(p["deconv2_w"]); pp["deconv2_b"] = b2(p["deconv2_b"])

    # deconv3: zero-pad Cout 1 -> 128 for a lane-dense MXU output / full vst
    w3 = deconv_w(p["deconv3_w"])                           # (288, 1) bf16
    pp["deconv3_w"] = jnp.pad(w3, ((0, 0), (0, 127)))
    pp["deconv3_b"] = jnp.pad(b2(p["deconv3_b"]), ((0, 0), (0, 127)))
    return pp


# ----------------------------------------------------------------------------
# Forward pass (mirrors Simple_VAE.forward)
# ----------------------------------------------------------------------------
def vae_forward(pp, x_nchw, eps):
    B = x_nchw.shape[0]
    # NCHW -> NHWC is a pure reshape here since C == 1.
    x = x_nchw.reshape(B, 28, 28, 1).astype(jnp.bfloat16)

    # encoder
    h = conv2d(x, pp["conv1_w"], pp["conv1_b"], 3, 2, 1, "relu")   # B,14,14,32
    h = conv2d(h, pp["conv2_w"], pp["conv2_b"], 3, 2, 1, "relu")   # B,7,7,64
    h = conv2d(h, pp["conv3_w"], pp["conv3_b"], 3, 1, 1, "relu")   # B,7,7,64
    h_flat = h.reshape(B, -1)      # NHWC flatten; fc1 rows pre-permuted to match

    # fused fc1 + mu/logvar + reparameterize + decoder_input (one pallas_call)
    mu, logvar, d = encode_decode_head(h_flat, eps, pp)

    # decoder
    d = d.reshape(B, 7, 7, 64)     # NHWC; decoder_input cols pre-permuted
    d = conv_transpose2d(d, pp["deconv1_w"], pp["deconv1_b"], 3, 1, 1, 0, "relu")  # 7x7x64
    d = conv_transpose2d(d, pp["deconv2_w"], pp["deconv2_b"], 3, 2, 1, 1, "relu")  # 14x14x32

    # deconv3 (stride 2, pad 1, out_pad 1) with lane-padded Cout, sigmoid in f32
    dd = lax.pad(d.astype(jnp.bfloat16), jnp.asarray(0.0, jnp.bfloat16),
                 ((0, 0, 0), (1, 2, 1), (1, 2, 1), (0, 0, 0)))
    patches, Ho, Wo = _im2col(dd, 3, 1, 0, 0)                       # (B*784, 288)
    out = mm_bias_act(patches, pp["deconv3_w"], pp["deconv3_b"], "sigmoid",
                      out_dtype=jnp.float32)                        # (B*784, 128)
    # channel 0 is the real output; NHWC->NCHW is a pure reshape since C == 1
    x_recon = out[:, 0].reshape(B, 1, Ho, Wo)
    return x_recon, mu, logvar


if __name__ == "__main__":
    key = jax.random.PRNGKey(0)
    k_param, k_x, k_eps = jax.random.split(key, 3)

    latent_dim = 20
    raw_params = init_params(k_param, latent_dim)
    pp = prepare_params(raw_params, latent_dim)   # one-time, outside jit

    # MNIST-like input implied by the 64*7*7 flatten: B=2, 1x28x28, values in [0,1]
    x = jax.random.uniform(k_x, (2, 1, 28, 28), jnp.float32)
    eps = jax.random.normal(k_eps, (2, latent_dim), jnp.float32)

    fwd = jax.jit(vae_forward)
    x_recon, mu, logvar = fwd(pp, x, eps)
    jax.block_until_ready((x_recon, mu, logvar))

    assert x_recon.shape == (2, 1, 28, 28)
    assert mu.shape == (2, latent_dim) and logvar.shape == (2, latent_dim)
    assert bool(jnp.all(jnp.isfinite(x_recon)))
    assert bool(jnp.all((x_recon >= 0.0) & (x_recon <= 1.0)))   # sigmoid output range

    print("KERNEL_OK")
</pallas_src>

<mosaic_0001>
module attributes {stable_mosaic.version = 11 : i64} {
  func.func @_mm_bias_act_kernel(%arg0: memref<392x9xbf16, #tpu.memory_space<vmem>>, %arg1: memref<9x32xbf16, #tpu.memory_space<vmem>>, %arg2: memref<1x32xf32, #tpu.memory_space<vmem>>, %arg3: memref<392x32xbf16, #tpu.memory_space<vmem>>) attributes {dimension_semantics = [], scalar_prefetch = 0 : i64, scratch_operands = 0 : i64, tpu.core_type = #tpu.core_type<tc>} {
    %c0 = arith.constant 0 : index
    %c0_0 = arith.constant 0 : index
    %0 = vector.load %arg0[%c0, %c0_0] : memref<392x9xbf16, #tpu.memory_space<vmem>>, vector<392x9xbf16>
    %c0_1 = arith.constant 0 : index
    %c0_2 = arith.constant 0 : index
    %1 = vector.load %arg1[%c0_1, %c0_2] : memref<9x32xbf16, #tpu.memory_space<vmem>>, vector<9x32xbf16>
    %cst = arith.constant dense<0.000000e+00> : vector<392x32xf32>
    %2 = tpu.matmul %0, %1, %cst {dimension_numbers = #tpu.dot_dimension_numbers<[1], [0], [0], [1], [0, 0, 1, 1], [], []>} : vector<392x9xbf16>, vector<9x32xbf16>, vector<392x32xf32> -> vector<392x32xf32>
    %c0_3 = arith.constant 0 : index
    %c0_4 = arith.constant 0 : index
    %3 = vector.load %arg2[%c0_3, %c0_4] : memref<1x32xf32, #tpu.memory_space<vmem>>, vector<1x32xf32>
    %4 = vector.broadcast %3 : vector<1x32xf32> to vector<392x32xf32>
    %5 = arith.addf %2, %4 : vector<392x32xf32>
    %cst_5 = arith.constant 0.000000e+00 : f32
    %6 = vector.broadcast %cst_5 : f32 to vector<392x32xf32>
    %7 = arith.maximumf %5, %6 : vector<392x32xf32>
    %8 = arith.truncf %7 : vector<392x32xf32> to vector<392x32xbf16>
    %c0_6 = arith.constant 0 : index
    %c0_7 = arith.constant 0 : index
    %9 = vector.load %arg3[%c0_6, %c0_7] : memref<392x32xbf16, #tpu.memory_space<vmem>>, vector<392x32xbf16>
    tpu.vector_store %arg3[%c0_6, %c0_7], %8 {strides = array<i32>} : memref<392x32xbf16, #tpu.memory_space<vmem>>, vector<392x32xbf16>,
    return
  }
}

module attributes {stable_mosaic.version = 11 : i64} {
  func.func @_mm_bias_act_kernel(%arg0: memref<98x288xbf16, #tpu.memory_space<vmem>>, %arg1: memref<288x64xbf16, #tpu.memory_space<vmem>>, %arg2: memref<1x64xf32, #tpu.memory_space<vmem>>, %arg3: memref<98x64xbf16, #tpu.memory_space<vmem>>) attributes {dimension_semantics = [], scalar_prefetch = 0 : i64, scratch_operands = 0 : i64, tpu.core_type = #tpu.core_type<tc>} {
    %c0 = arith.constant 0 : index
    %c0_0 = arith.constant 0 : index
    %0 = vector.load %arg0[%c0, %c0_0] : memref<98x288xbf16, #tpu.memory_space<vmem>>, vector<98x288xbf16>
    %c0_1 = arith.constant 0 : index
    %c0_2 = arith.constant 0 : index
    %1 = vector.load %arg1[%c0_1, %c0_2] : memref<288x64xbf16, #tpu.memory_space<vmem>>, vector<288x64xbf16>
    %cst = arith.constant dense<0.000000e+00> : vector<98x64xf32>
    %2 = tpu.matmul %0, %1, %cst {dimension_numbers = #tpu.dot_dimension_numbers<[1], [0], [0], [1], [0, 0, 1, 1], [], []>} : vector<98x288xbf16>, vector<288x64xbf16>, vector<98x64xf32> -> vector<98x64xf32>
    %c0_3 = arith.constant 0 : index
    %c0_4 = arith.constant 0 : index
    %3 = vector.load %arg2[%c0_3, %c0_4] : memref<1x64xf32, #tpu.memory_space<vmem>>, vector<1x64xf32>
    %4 = vector.broadcast %3 : vector<1x64xf32> to vector<98x64xf32>
    %5 = arith.addf %2, %4 : vector<98x64xf32>
    %cst_5 = arith.constant 0.000000e+00 : f32
    %6 = vector.broadcast %cst_5 : f32 to vector<98x64xf32>
    %7 = arith.maximumf %5, %6 : vector<98x64xf32>
    %8 = arith.truncf %7 : vector<98x64xf32> to vector<98x64xbf16>
    %c0_6 = arith.constant 0 : index
    %c0_7 = arith.constant 0 : index
    %9 = vector.load %arg3[%c0_6, %c0_7] : memref<98x64xbf16, #tpu.memory_space<vmem>>, vector<98x64xbf16>
    tpu.vector_store %arg3[%c0_6, %c0_7], %8 {strides = array<i32>} : memref<98x64xbf16, #tpu.memory_space<vmem>>, vector<98x64xbf16>,
    return
  }
}

module attributes {stable_mosaic.version = 11 : i64} {
  func.func @_mm_bias_act_kernel(%arg0: memref<98x576xbf16, #tpu.memory_space<vmem>>, %arg1: memref<576x64xbf16, #tpu.memory_space<vmem>>, %arg2: memref<1x64xf32, #tpu.memory_space<vmem>>, %arg3: memref<98x64xbf16, #tpu.memory_space<vmem>>) attributes {dimension_semantics = [], scalar_prefetch = 0 : i64, scratch_operands = 0 : i64, tpu.core_type = #tpu.core_type<tc>} {
    %c0 = arith.constant 0 : index
    %c0_0 = arith.constant 0 : index
    %0 = vector.load %arg0[%c0, %c0_0] : memref<98x576xbf16, #tpu.memory_space<vmem>>, vector<98x576xbf16>
    %c0_1 = arith.constant 0 : index
    %c0_2 = arith.constant 0 : index
    %1 = vector.load %arg1[%c0_1, %c0_2] : memref<576x64xbf16, #tpu.memory_space<vmem>>, vector<576x64xbf16>
    %cst = arith.constant dense<0.000000e+00> : vector<98x64xf32>
    %2 = tpu.matmul %0, %1, %cst {dimension_numbers = #tpu.dot_dimension_numbers<[1], [0], [0], [1], [0, 0, 1, 1], [], []>} : vector<98x576xbf16>, vector<576x64xbf16>, vector<98x64xf32> -> vector<98x64xf32>
    %c0_3 = arith.constant 0 : index
    %c0_4 = arith.constant 0 : index
    %3 = vector.load %arg2[%c0_3, %c0_4] : memref<1x64xf32, #tpu.memory_space<vmem>>, vector<1x64xf32>
    %4 = vector.broadcast %3 : vector<1x64xf32> to vector<98x64xf32>
    %5 = arith.addf %2, %4 : vector<98x64xf32>
    %cst_5 = arith.constant 0.000000e+00 : f32
    %6 = vector.broadcast %cst_5 : f32 to vector<98x64xf32>
    %7 = arith.maximumf %5, %6 : vector<98x64xf32>
    %8 = arith.truncf %7 : vector<98x64xf32> to vector<98x64xbf16>
    %c0_6 = arith.constant 0 : index
    %c0_7 = arith.constant 0 : index
    %9 = vector.load %arg3[%c0_6, %c0_7] : memref<98x64xbf16, #tpu.memory_space<vmem>>, vector<98x64xbf16>
    tpu.vector_store %arg3[%c0_6, %c0_7], %8 {strides = array<i32>} : memref<98x64xbf16, #tpu.memory_space<vmem>>, vector<98x64xbf16>,
    return
  }
}

module attributes {stable_mosaic.version = 11 : i64} {
  func.func @_head_kernel(%arg0: memref<2x3136xbf16, #tpu.memory_space<vmem>>, %arg1: memref<2x20xf32, #tpu.memory_space<vmem>>, %arg2: memref<3136x256xbf16, #tpu.memory_space<vmem>>, %arg3: memref<1x256xf32, #tpu.memory_space<vmem>>, %arg4: memref<256x20xbf16, #tpu.memory_space<vmem>>, %arg5: memref<1x20xf32, #tpu.memory_space<vmem>>, %arg6: memref<256x20xbf16, #tpu.memory_space<vmem>>, %arg7: memref<1x20xf32, #tpu.memory_space<vmem>>, %arg8: memref<20x3136xbf16, #tpu.memory_space<vmem>>, %arg9: memref<1x3136xf32, #tpu.memory_space<vmem>>, %arg10: memref<2x20xf32, #tpu.memory_space<vmem>>, %arg11: memref<2x20xf32, #tpu.memory_space<vmem>>, %arg12: memref<2x3136xbf16, #tpu.memory_space<vmem>>) attributes {dimension_semantics = [], scalar_prefetch = 0 : i64, scratch_operands = 0 : i64, tpu.core_type = #tpu.core_type<tc>} {
    %c0 = arith.constant 0 : index
    %c0_0 = arith.constant 0 : index
    %0 = vector.load %arg0[%c0, %c0_0] : memref<2x3136xbf16, #tpu.memory_space<vmem>>, vector<2x3136xbf16>
    %c0_1 = arith.constant 0 : index
    %c0_2 = arith.constant 0 : index
    %1 = vector.load %arg2[%c0_1, %c0_2] : memref<3136x256xbf16, #tpu.memory_space<vmem>>, vector<3136x256xbf16>
    %cst = arith.constant dense<0.000000e+00> : vector<2x256xf32>
    %2 = tpu.matmul %0, %1, %cst {dimension_numbers = #tpu.dot_dimension_numbers<[1], [0], [0], [1], [0, 0, 1, 1], [], []>} : vector<2x3136xbf16>, vector<3136x256xbf16>, vector<2x256xf32> -> vector<2x256xf32>
    %c0_3 = arith.constant 0 : index
    %c0_4 = arith.constant 0 : index
    %3 = vector.load %arg3[%c0_3, %c0_4] : memref<1x256xf32, #tpu.memory_space<vmem>>, vector<1x256xf32>
    %4 = vector.broadcast %3 : vector<1x256xf32> to vector<2x256xf32>
    %5 = arith.addf %2, %4 : vector<2x256xf32>
    %cst_5 = arith.constant 0.000000e+00 : f32
    %6 = vector.broadcast %cst_5 : f32 to vector<2x256xf32>
    %7 = arith.maximumf %5, %6 : vector<2x256xf32>
    %8 = arith.truncf %7 : vector<2x256xf32> to vector<2x256xbf16>
    %c0_6 = arith.constant 0 : index
    %c0_7 = arith.constant 0 : index
    %9 = vector.load %arg4[%c0_6, %c0_7] : memref<256x20xbf16, #tpu.memory_space<vmem>>, vector<256x20xbf16>
    %cst_8 = arith.constant dense<0.000000e+00> : vector<2x20xf32>
    %10 = tpu.matmul %8, %9, %cst_8 {dimension_numbers = #tpu.dot_dimension_numbers<[1], [0], [0], [1], [0, 0, 1, 1], [], []>} : vector<2x256xbf16>, vector<256x20xbf16>, vector<2x20xf32> -> vector<2x20xf32>
    %c0_9 = arith.constant 0 : index
    %c0_10 = arith.constant 0 : index
    %11 = vector.load %arg5[%c0_9, %c0_10] : memref<1x20xf32, #tpu.memory_space<vmem>>, vector<1x20xf32>
    %12 = vector.broadcast %11 : vector<1x20xf32> to vector<2x20xf32>
    %13 = arith.addf %10, %12 : vector<2x20xf32>
    %c0_11 = arith.constant 0 : index
    %c0_12 = arith.constant 0 : index
    %14 = vector.load %arg6[%c0_11, %c0_12] : memref<256x20xbf16, #tpu.memory_space<vmem>>, vector<256x20xbf16>
    %cst_13 = arith.constant dense<0.000000e+00> : vector<2x20xf32>
    %15 = tpu.matmul %8, %14, %cst_13 {dimension_numbers = #tpu.dot_dimension_numbers<[1], [0], [0], [1], [0, 0, 1, 1], [], []>} : vector<2x256xbf16>, vector<256x20xbf16>, vector<2x20xf32> -> vector<2x20xf32>
    %c0_14 = arith.constant 0 : index
    %c0_15 = arith.constant 0 : index
    %16 = vector.load %arg7[%c0_14, %c0_15] : memref<1x20xf32, #tpu.memory_space<vmem>>, vector<1x20xf32>
    %17 = vector.broadcast %16 : vector<1x20xf32> to vector<2x20xf32>
    %18 = arith.addf %15, %17 : vector<2x20xf32>
    %cst_16 = arith.constant 5.000000e-01 : f32
    %19 = vector.broadcast %cst_16 : f32 to vector<2x20xf32>
    %20 = arith.mulf %19, %18 : vector<2x20xf32>
    %21 = math.exp %20 : vector<2x20xf32>
    %c0_17 = arith.constant 0 : index
    %c0_18 = arith.constant 0 : index
    %22 = vector.load %arg1[%c0_17, %c0_18] : memref<2x20xf32, #tpu.memory_space<vmem>>, vector<2x20xf32>
    %23 = arith.mulf %22, %21 : vector<2x20xf32>
    %24 = arith.addf %13, %23 : vector<2x20xf32>
    %25 = arith.truncf %24 : vector<2x20xf32> to vector<2x20xbf16>
    %c0_19 = arith.constant 0 : index
    %c0_20 = arith.constant 0 : index
    %26 = vector.load %arg8[%c0_19, %c0_20] : memref<20x3136xbf16, #tpu.memory_space<vmem>>, vector<20x3136xbf16>
    %cst_21 = arith.constant dense<0.000000e+00> : vector<2x3136xf32>
    %27 = tpu.matmul %25, %26, %cst_21 {dimension_numbers = #tpu.dot_dimension_numbers<[1], [0], [0], [1], [0, 0, 1, 1], [], []>} : vector<2x20xbf16>, vector<20x3136xbf16>, vector<2x3136xf32> -> vector<2x3136xf32>
    %c0_22 = arith.constant 0 : index
    %c0_23 = arith.constant 0 : index
    %28 = vector.load %arg9[%c0_22, %c0_23] : memref<1x3136xf32, #tpu.memory_space<vmem>>, vector<1x3136xf32>
    %29 = vector.broadcast %28 : vector<1x3136xf32> to vector<2x3136xf32>
    %30 = arith.addf %27, %29 : vector<2x3136xf32>
    %c0_24 = arith.constant 0 : index
    %c0_25 = arith.constant 0 : index
    %31 = vector.load %arg10[%c0_24, %c0_25] : memref<2x20xf32, #tpu.memory_space<vmem>>, vector<2x20xf32>
    tpu.vector_store %arg10[%c0_24, %c0_25], %13 {strides = array<i32>} : memref<2x20xf32, #tpu.memory_space<vmem>>, vector<2x20xf32>,
    %c0_26 = arith.constant 0 : index
    %c0_27 = arith.constant 0 : index
    %32 = vector.load %arg11[%c0_26, %c0_27] : memref<2x20xf32, #tpu.memory_space<vmem>>, vector<2x20xf32>
    tpu.vector_store %arg11[%c0_26, %c0_27], %18 {strides = array<i32>} : memref<2x20xf32, #tpu.memory_space<vmem>>, vector<2x20xf32>,
    %33 = arith.truncf %30 : vector<2x3136xf32> to vector<2x3136xbf16>
    %c0_28 = arith.constant 0 : index
    %c0_29 = arith.constant 0 : index
    %34 = vector.load %arg12[%c0_28, %c0_29] : memref<2x3136xbf16, #tpu.memory_space<vmem>>, vector<2x3136xbf16>
    tpu.vector_store %arg12[%c0_28, %c0_29], %33 {strides = array<i32>} : memref<2x3136xbf16, #tpu.memory_space<vmem>>, vector<2x3136xbf16>,
    return
  }
}

module attributes {stable_mosaic.version = 11 : i64} {
  func.func @_mm_bias_act_kernel(%arg0: memref<392x576xbf16, #tpu.memory_space<vmem>>, %arg1: memref<576x32xbf16, #tpu.memory_space<vmem>>, %arg2: memref<1x32xf32, #tpu.memory_space<vmem>>, %arg3: memref<392x32xbf16, #tpu.memory_space<vmem>>) attributes {dimension_semantics = [], scalar_prefetch = 0 : i64, scratch_operands = 0 : i64, tpu.core_type = #tpu.core_type<tc>} {
    %c0 = arith.constant 0 : index
    %c0_0 = arith.constant 0 : index
    %0 = vector.load %arg0[%c0, %c0_0] : memref<392x576xbf16, #tpu.memory_space<vmem>>, vector<392x576xbf16>
    %c0_1 = arith.constant 0 : index
    %c0_2 = arith.constant 0 : index
    %1 = vector.load %arg1[%c0_1, %c0_2] : memref<576x32xbf16, #tpu.memory_space<vmem>>, vector<576x32xbf16>
    %cst = arith.constant dense<0.000000e+00> : vector<392x32xf32>
    %2 = tpu.matmul %0, %1, %cst {dimension_numbers = #tpu.dot_dimension_numbers<[1], [0], [0], [1], [0, 0, 1, 1], [], []>} : vector<392x576xbf16>, vector<576x32xbf16>, vector<392x32xf32> -> vector<392x32xf32>
    %c0_3 = arith.constant 0 : index
    %c0_4 = arith.constant 0 : index
    %3 = vector.load %arg2[%c0_3, %c0_4] : memref<1x32xf32, #tpu.memory_space<vmem>>, vector<1x32xf32>
    %4 = vector.broadcast %3 : vector<1x32xf32> to vector<392x32xf32>
    %5 = arith.addf %2, %4 : vector<392x32xf32>
    %cst_5 = arith.constant 0.000000e+00 : f32
    %6 = vector.broadcast %cst_5 : f32 to vector<392x32xf32>
    %7 = arith.maximumf %5, %6 : vector<392x32xf32>
    %8 = arith.truncf %7 : vector<392x32xf32> to vector<392x32xbf16>
    %c0_6 = arith.constant 0 : index
    %c0_7 = arith.constant 0 : index
    %9 = vector.load %arg3[%c0_6, %c0_7] : memref<392x32xbf16, #tpu.memory_space<vmem>>, vector<392x32xbf16>
    tpu.vector_store %arg3[%c0_6, %c0_7], %8 {strides = array<i32>} : memref<392x32xbf16, #tpu.memory_space<vmem>>, vector<392x32xbf16>,
    return
  }
}

module attributes {stable_mosaic.version = 11 : i64} {
  func.func @_mm_bias_act_kernel(%arg0: i32, %arg1: memref<512x288xbf16, #tpu.memory_space<vmem>>, %arg2: memref<288x128xbf16, #tpu.memory_space<vmem>>, %arg3: memref<1x128xf32, #tpu.memory_space<vmem>>, %arg4: memref<512x128xf32, #tpu.memory_space<vmem>>) attributes {dimension_semantics = [#tpu.dimension_semantics<parallel>], iteration_bounds = array<i64: 4>, scalar_prefetch = 0 : i64, scratch_operands = 0 : i64, tpu.core_type = #tpu.core_type<tc>, window_params = [{transform_indices = @transform_0, window_bounds = array<i64: 512, 288>}, {pipeline_mode = #tpu.pipeline_mode<synchronous>, transform_indices = @transform_1, window_bounds = array<i64: 288, 128>}, {pipeline_mode = #tpu.pipeline_mode<synchronous>, transform_indices = @transform_2, window_bounds = array<i64: 1, 128>}, {transform_indices = @transform_3, window_bounds = array<i64: 512, 128>}]} {
    %c0 = arith.constant 0 : index
    %c0_0 = arith.constant 0 : index
    %0 = vector.load %arg1[%c0, %c0_0] : memref<512x288xbf16, #tpu.memory_space<vmem>>, vector<512x288xbf16>
    %c0_1 = arith.constant 0 : index
    %c0_2 = arith.constant 0 : index
    %1 = vector.load %arg2[%c0_1, %c0_2] : memref<288x128xbf16, #tpu.memory_space<vmem>>, vector<288x128xbf16>
    %cst = arith.constant dense<0.000000e+00> : vector<512x128xf32>
    %2 = tpu.matmul %0, %1, %cst {dimension_numbers = #tpu.dot_dimension_numbers<[1], [0], [0], [1], [0, 0, 1, 1], [], []>} : vector<512x288xbf16>, vector<288x128xbf16>, vector<512x128xf32> -> vector<512x128xf32>
    %c0_3 = arith.constant 0 : index
    %c0_4 = arith.constant 0 : index
    %3 = vector.load %arg3[%c0_3, %c0_4] : memref<1x128xf32, #tpu.memory_space<vmem>>, vector<1x128xf32>
    %4 = vector.broadcast %3 : vector<1x128xf32> to vector<512x128xf32>
    %5 = arith.addf %2, %4 : vector<512x128xf32>
    %6 = arith.negf %5 : vector<512x128xf32>
    %7 = math.exp %6 : vector<512x128xf32>
    %cst_5 = arith.constant 1.000000e+00 : f32
    %8 = vector.broadcast %cst_5 : f32 to vector<512x128xf32>
    %9 = arith.addf %8, %7 : vector<512x128xf32>
    %10 = arith.divf %8, %9 : vector<512x128xf32>
    %c0_6 = arith.constant 0 : index
    %c0_7 = arith.constant 0 : index
    %11 = vector.load %arg4[%c0_6, %c0_7] : memref<512x128xf32, #tpu.memory_space<vmem>>, vector<512x128xf32>
    tpu.vector_store %arg4[%c0_6, %c0_7], %10 {strides = array<i32>} : memref<512x128xf32, #tpu.memory_space<vmem>>, vector<512x128xf32>,
    return
  }
  func.func @transform_0(%arg0: i32) -> (i32, i32) {
    %c0_i32 = arith.constant 0 : i32
    %c0_i32_0 = arith.constant 0 : i32
    return %arg0, %c0_i32 : i32, i32
  }
  func.func @transform_1(%arg0: i32) -> (i32, i32) {
    %c0_i32 = arith.constant 0 : i32
    %c0_i32_0 = arith.constant 0 : i32
    %c0_i32_1 = arith.constant 0 : i32
    return %c0_i32, %c0_i32_0 : i32, i32
  }
  func.func @transform_2(%arg0: i32) -> (i32, i32) {
    %c0_i32 = arith.constant 0 : i32
    %c0_i32_0 = arith.constant 0 : i32
    %c0_i32_1 = arith.constant 0 : i32
    return %c0_i32, %c0_i32_0 : i32, i32
  }
  func.func @transform_3(%arg0: i32) -> (i32, i32) {
    %c0_i32 = arith.constant 0 : i32
    %c0_i32_0 = arith.constant 0 : i32
    return %arg0, %c0_i32 : i32, i32
  }
}

</mosaic_0001>

<bundles_post_ra>
// kernel: vae_forward.7
= control target key start
LH: loop header
LB: loop body
LE: loop exit
PB: predicated region body
PF: predicated region fallthrough
CT: control target
= control target key end

     0   :  { %8 = vsyncpa [#allocation3], 0  ;;  %s1633_s0 = inlined_call_operand.vmem [shape: bf16[392,9], index: 0, kind: input, shape index: {}]   ;;  %s1634_s1 = inlined_call_operand.hbm [shape: bf16[9,32], index: 1, kind: input, shape index: {}]   ;;  %s1635_s2 = inlined_call_operand.hbm [shape: f32[1,32], index: 2, kind: input, shape index: {}]   ;;  %s1636_s3 = inlined_call_operand.vmem [shape: bf16[392,32], index: 3, kind: output, shape index: {}]  }
   0x1   :  { %9 = vsyncpa [#allocation5], 0  ;;  %s1201_s12 = smov [#allocation2]  }
   0x2   :  { %s17_s13 = sshll.u32 %s1201_s12, 4  ;;  %s18_s13 = int_to_ptr.vmem [resolvable:$true] %s17_s13 }
   0x3   :  { %s1165_s14 = scalar_lea.vmem %s18_s13, 128  ;;  %p1170_p1 = scmp.lt.s32.totalorder %s18_s13, %s18_s13 }
   0x4   :  { %p1166_p0 = scmp.ne.s32.totalorder %s18_s13, %s1165_s14  ;;  %p1171_p2 = scmp.lt.s32.totalorder %s1165_s14, %s1165_s14 }
   0x6   :  { %p1172_p3 = por %p1171_p2, %p1170_p1 }
   0x8   :  { %p1173_p4 = pnand %p1172_p3, %p1166_p0 }
   0xa   :  { %1176 = shalt.err (!%p1173_p4)
}
   0xb   :  { %s1202_s15 = smov 64   ;;  %s1203_s16 = smov 4  }
   0xc   :  { %23 = dma.hbm_to_vmem [thread:$0]  %s1634_s1, 128, %s18_s13, [#allocation3], %s1202_s15, %s1202_s15, %s1203_s16  }
   0xd   :  { %s1204_s19 = smov [#allocation4]  }
   0xe   :  { %s30_s20 = sshll.u32 %s1204_s19, 4  ;;  %s31_s20 = int_to_ptr.vmem [resolvable:$true] %s30_s20 }
   0xf   :  { %s1185_s21 = scalar_lea.vmem %s31_s20, 16  ;;  %s1189_s22 = scalar_lea.vmem %s31_s20, 32 }
  0x10   :  { %p1186_p5 = scmp.ne.s32.totalorder %s31_s20, %s1185_s21  ;;  %p1190_p6 = scmp.lt.s32.totalorder %s31_s20, %s31_s20 }
  0x11   :  { %p1191_p7 = scmp.lt.s32.totalorder %s1189_s22, %s1185_s21 }
  0x13   :  { %p1192_p8 = por %p1191_p7, %p1190_p6 }
  0x15   :  { %p1193_p9 = pnand %p1192_p8, %p1186_p5 }
  0x17   :  { %1196 = shalt.err (!%p1193_p9)
}
  0x18   :  { %33 = dma.hbm_to_vmem [thread:$0]  %s1635_s2, 16, %s31_s20, [#allocation5]  }
  0x19   :  { %1197 = dma.done.wait [#allocation3], 128  }
  0x1a   :  { %1198 = vsyncadd [#allocation3], 4294967168 }
  0x1b   :  { %1199 = dma.done.wait [#allocation5], 16  }
  0x1c   :  { %1200 = vsyncadd [#allocation5], 4294967280  ;;  %vm303_vm0 = vcmask 1043456   ;;  %v1205_v0 = vmov 0.0   ;;  %vm1206_vm1 = vmmov 0   ;;  %vm304_vm2 = vcmask 1044480  }
  0x1d   :  { %1020 = vmatprep.subr.bf16.mxu0 %v1205_v0  ;;  %1122 = vmatprep.subr.bf16.mxu1 %v1205_v0  ;;  %v1207_v1 = vmov 65535   ;;  %v1131_v4 = vld [vmem:[#allocation2] sm:$0x1f]   ;;  %v1133_v7 = vld [vmem:[%s1633_s0 + $0x68] sm:$0xff]   ;;  %vm227_vm3 = vcmask 72704   ;;  %v1135_v9 = vld [vmem:[%s1633_s0 + $0x70] sm:$0xff]  }
  0x1e   :  { %1022 = vmatprep.mubr.msk.bf16.mxu0 %vm1206_vm1, %v1205_v0  ;;  %1074 = vmatprep.mubr.msk.bf16.mxu1 %vm1206_vm1, %v1205_v0  ;;  %v305_v2 = vsel %vm303_vm0, 4294967295, %v1207_v1  ;;  %v1132_v6 = vld [vmem:[%s1633_s0] sm:$0xff]   ;;  %v1134_v8 = vld [vmem:[%s1633_s0 + $0x8] sm:$0xff]   ;;  %v1136_v10 = vld [vmem:[%s1633_s0 + $0x10] sm:$0xff]   ;;  %vm788_vm4 = vcmask 257024  }
  0x1f   :  { %v306_v3 = vsel %vm304_vm2, %v305_v2, 0  ;;  %v1137_v11 = vld [vmem:[%s1633_s0 + $0x78] sm:$0xff]   ;;  %v1139_v13 = vld [vmem:[%s1633_s0 + $0x80] sm:$0xff]   ;;  %v1141_v15 = vld [vmem:[%s1633_s0 + $0x88] sm:$0xff]  }
  0x20   :  { %v308_v5 = vand.u32 %v1131_v4, %v306_v3  ;;  %v1138_v12 = vld [vmem:[%s1633_s0 + $0x18] sm:$0xff]   ;;  %v1140_v14 = vld [vmem:[%s1633_s0 + $0x20] sm:$0xff]   ;;  %v1142_v16 = vld [vmem:[%s1633_s0 + $0x28] sm:$0xff]  }
  0x21   :  { %v1143_v17 = vld [vmem:[%s1633_s0 + $0x90] sm:$0xff]   ;;  %v1145_v19 = vld [vmem:[%s1633_s0 + $0x98] sm:$0xff]   ;;  %v1147_v21 = vld [vmem:[%s1633_s0 + $0xa0] sm:$0xff]  }
  0x22   :  { %1021 = vmatpush3.bf16.msra.mxu0 %v308_v5  ;;  %1123 = vmatpush3.bf16.msra.mxu1 %v308_v5  ;;  %v1144_v18 = vld [vmem:[%s1633_s0 + $0x30] sm:$0xff]   ;;  %v1146_v20 = vld [vmem:[%s1633_s0 + $0x38] sm:$0xff]   ;;  %v1148_v22 = vld [vmem:[%s1633_s0 + $0x40] sm:$0xff]  }
  0x23   :  { %v1149_v23 = vld [vmem:[%s1633_s0 + $0xa8] sm:$0xff]   ;;  %v1151_v25 = vld [vmem:[%s1633_s0 + $0xb0] sm:$0xff]   ;;  %v1153_v27 = vld [vmem:[%s1633_s0 + $0xb8] sm:$0xff]  }
  0x24   :  { %v1150_v24 = vld [vmem:[%s1633_s0 + $0x48] sm:$0xff]   ;;  %v1152_v26 = vld [vmem:[%s1633_s0 + $0x50] sm:$0xff]   ;;  %v1154_v28 = vld [vmem:[%s1633_s0 + $0x58] sm:$0xff]  }
  0x25   :  { %1023 = vmatmul.mubr.msk.bf16.vlgmr.msra.gmra.mxu0 %vm227_vm3, %v1132_v6  ;;  %1075 = vmatmul.mubr.msk.bf16.vlgmr.msra.gmra.mxu1 %vm227_vm3, %v1133_v7  ;;  %v1155_v29 = vld [vmem:[%s1633_s0 + $0xc0] ss:$0 sps:$4 sm:$0xff]   ;;  %v1386_v31 = vld [vmem:[#allocation4] ss:$0 sm:$0xff] }
  0x26   :  { %1026 = vmatprep.mubr.msk.bf16.mxu0 %vm1206_vm1, %v1205_v0  ;;  %1078 = vmatprep.mubr.msk.bf16.mxu1 %vm1206_vm1, %v1205_v0  ;;  %v1156_v30 = vld [vmem:[%s1633_s0 + $0x60] sm:$0xff]  }
  0x2d   :  { %1027 = vmatmul.mubr.msk.bf16.gmra.mxu0 %vm227_vm3, %v1134_v8  ;;  %1079 = vmatmul.mubr.msk.bf16.gmra.mxu1 %vm227_vm3, %v1135_v9 }
  0x2e   :  { %1030 = vmatprep.mubr.msk.bf16.mxu0 %vm1206_vm1, %v1205_v0  ;;  %1082 = vmatprep.mubr.msk.bf16.mxu1 %vm1206_vm1, %v1205_v0 }
  0x35   :  { %1031 = vmatmul.mubr.msk.bf16.gmra.mxu0 %vm227_vm3, %v1136_v10  ;;  %1083 = vmatmul.mubr.msk.bf16.gmra.mxu1 %vm227_vm3, %v1137_v11 }
  0x36   :  { %1034 = vmatprep.mubr.msk.bf16.mxu0 %vm1206_vm1, %v1205_v0  ;;  %1086 = vmatprep.mubr.msk.bf16.mxu1 %vm1206_vm1, %v1205_v0 }
  0x3d   :  { %1035 = vmatmul.mubr.msk.bf16.gmra.mxu0 %vm227_vm3, %v1138_v12  ;;  %1087 = vmatmul.mubr.msk.bf16.gmra.mxu1 %vm227_vm3, %v1139_v13 }
  0x3e   :  { %1038 = vmatprep.mubr.msk.bf16.mxu0 %vm1206_vm1, %v1205_v0  ;;  %1090 = vmatprep.mubr.msk.bf16.mxu1 %vm1206_vm1, %v1205_v0 }
  0x45   :  { %1039 = vmatmul.mubr.msk.bf16.gmra.mxu0 %vm227_vm3, %v1140_v14  ;;  %1091 = vmatmul.mubr.msk.bf16.gmra.mxu1 %vm227_vm3, %v1141_v15 }
  0x46   :  { %1042 = vmatprep.mubr.msk.bf16.mxu0 %vm1206_vm1, %v1205_v0  ;;  %1094 = vmatprep.mubr.msk.bf16.mxu1 %vm1206_vm1, %v1205_v0 }
  0x4d   :  { %1043 = vmatmul.mubr.msk.bf16.gmra.mxu0 %vm227_vm3, %v1142_v16  ;;  %1095 = vmatmul.mubr.msk.bf16.gmra.mxu1 %vm227_vm3, %v1143_v17 }
  0x4e   :  { %1046 = vmatprep.mubr.msk.bf16.mxu0 %vm1206_vm1, %v1205_v0  ;;  %1098 = vmatprep.mubr.msk.bf16.mxu1 %vm1206_vm1, %v1205_v0 }
  0x55   :  { %1047 = vmatmul.mubr.msk.bf16.gmra.mxu0 %vm227_vm3, %v1144_v18  ;;  %1099 = vmatmul.mubr.msk.bf16.gmra.mxu1 %vm227_vm3, %v1145_v19 }
  0x56   :  { %1050 = vmatprep.mubr.msk.bf16.mxu0 %vm1206_vm1, %v1205_v0  ;;  %1102 = vmatprep.mubr.msk.bf16.mxu1 %vm1206_vm1, %v1205_v0 }
  0x5d   :  { %1051 = vmatmul.mubr.msk.bf16.gmra.mxu0 %vm227_vm3, %v1146_v20  ;;  %1103 = vmatmul.mubr.msk.bf16.gmra.mxu1 %vm227_vm3, %v1147_v21 }
  0x5e   :  { %1054 = vmatprep.mubr.msk.bf16.mxu0 %vm1206_vm1, %v1205_v0  ;;  %1106 = vmatprep.mubr.msk.bf16.mxu1 %vm1206_vm1, %v1205_v0 }
  0x65   :  { %1055 = vmatmul.mubr.msk.bf16.gmra.mxu0 %vm227_vm3, %v1148_v22  ;;  %1107 = vmatmul.mubr.msk.bf16.gmra.mxu1 %vm227_vm3, %v1149_v23 }
  0x66   :  { %1058 = vmatprep.mubr.msk.bf16.mxu0 %vm1206_vm1, %v1205_v0  ;;  %1110 = vmatprep.mubr.msk.bf16.mxu1 %vm1206_vm1, %v1205_v0 }
  0x6d   :  { %1059 = vmatmul.mubr.msk.bf16.gmra.mxu0 %vm227_vm3, %v1150_v24  ;;  %1111 = vmatmul.mubr.msk.bf16.gmra.mxu1 %vm227_vm3, %v1151_v25 }
  0x6e   :  { %1062 = vmatprep.mubr.msk.bf16.mxu0 %vm1206_vm1, %v1205_v0  ;;  %1114 = vmatprep.mubr.msk.bf16.mxu1 %vm1206_vm1, %v1205_v0 }
  0x75   :  { %1063 = vmatmul.mubr.msk.bf16.gmra.mxu0 %vm227_vm3, %v1152_v26  ;;  %1115 = vmatmul.mubr.msk.bf16.gmra.mxu1 %vm227_vm3, %v1153_v27 }
  0x76   :  { %1066 = vmatprep.mubr.msk.bf16.mxu0 %vm1206_vm1, %v1205_v0  ;;  %1118 = vmatprep.mubr.msk.bf16.mxu1 %vm1206_vm1, %v1205_v0 }
  0x7d   :  { %1067 = vmatmul.mubr.msk.bf16.gmra.mxu0 %vm227_vm3, %v1154_v28  ;;  %1119 = vmatmul.mubr.msk.bf16.gmra.mxu1 %vm227_vm3, %v1155_v29 }
  0x7e   :  { %1070 = vmatprep.mubr.msk.bf16.mxu0 %vm1206_vm1, %v1205_v0 }
  0x85   :  { %1071 = vmatmul.mubr.msk.bf16.gmra.mxu0 %vm227_vm3, %v1156_v30 }
  0xe5   :  { %v344_v32 = vpop.f32.mrf.mxu0  ;;  %v448_v33 = vpop.f32.mrf.mxu1 }
  0xe6   :  { %v345_v34 = vadd.f32 %v1386_v31, %v344_v32  ;;  %v449_v35 = vadd.f32 %v1386_v31, %v448_v33 }
  0xe7   :  { %v1024_v36 = vpop.f32.mrf.mxu0  ;;  %v1076_v37 = vpop.f32.mrf.mxu1 }
  0xe8   :  { %v542_v38 = vmax.f32 %v345_v34, 0.0  ;;  %v568_v39 = vmax.f32 %v449_v35, 0.0 }
  0xe9   :  { %v347_v40 = vpop.f32.mrf.mxu0  ;;  %v451_v41 = vpop.f32.mrf.mxu1 }
  0xea   :  { %v945_v42 = vpack.c.bf16 %v542_v38, %v542_v38  ;;  %v348_v43 = vadd.f32 %v1386_v31, %v347_v40  ;;  %v971_v44 = vpack.c.bf16 %v568_v39, %v568_v39  ;;  %v452_v45 = vadd.f32 %v1386_v31, %v451_v41 }
  0xeb   :  { %v1025_v46 = vpop.f32.mrf.mxu0  ;;  %v1077_v47 = vpop.f32.mrf.mxu1 }
  0xec   :  { %789 = vst.msk [vmem:[%s1636_s3] sm:$0xf] %vm788_vm4, %v945_v42  ;;  %v543_v48 = vmax.f32 %v348_v43, 0.0  ;;  %815 = vst.msk [vmem:[%s1636_s3 + $0x68] sm:$0xf] %vm788_vm4, %v971_v44  ;;  %v569_v49 = vmax.f32 %v452_v45, 0.0 }
  0xed   :  { %v352_v50 = vpop.f32.mrf.mxu0  ;;  %v456_v51 = vpop.f32.mrf.mxu1 }
  0xee   :  { %v946_v52 = vpack.c.bf16 %v543_v48, %v543_v48  ;;  %v353_v53 = vadd.f32 %v1386_v31, %v352_v50  ;;  %v972_v54 = vpack.c.bf16 %v569_v49, %v569_v49  ;;  %v457_v55 = vadd.f32 %v1386_v31, %v456_v51 }
  0xef   :  { %v1028_v56 = vpop.f32.mrf.mxu0  ;;  %v1080_v57 = vpop.f32.mrf.mxu1 }
  0xf0   :  { %790 = vst.msk [vmem:[%s1636_s3 + $0x4] sm:$0xf] %vm788_vm4, %v946_v52  ;;  %v544_v58 = vmax.f32 %v353_v53, 0.0  ;;  %816 = vst.msk [vmem:[%s1636_s3 + $0x6c] sm:$0xf] %vm788_vm4, %v972_v54  ;;  %v570_v59 = vmax.f32 %v457_v55, 0.0 }
  0xf1   :  { %v355_v60 = vpop.f32.mrf.mxu0  ;;  %v459_v61 = vpop.f32.mrf.mxu1 }
  0xf2   :  { %v947_v62 = vpack.c.bf16 %v544_v58, %v544_v58  ;;  %v356_v63 = vadd.f32 %v1386_v31, %v355_v60  ;;  %v973_v0 = vpack.c.bf16 %v570_v59, %v570_v59  ;;  %v460_v1 = vadd.f32 %v1386_v31, %v459_v61 }
  0xf3   :  { %v1029_v2 = vpop.f32.mrf.mxu0  ;;  %v1081_v3 = vpop.f32.mrf.mxu1 }
  0xf4   :  { %791 = vst.msk [vmem:[%s1636_s3 + $0x8] sm:$0xf] %vm788_vm4, %v947_v62  ;;  %v545_v4 = vmax.f32 %v356_v63, 0.0  ;;  %817 = vst.msk [vmem:[%s1636_s3 + $0x70] sm:$0xf] %vm788_vm4, %v973_v0  ;;  %v571_v5 = vmax.f32 %v460_v1, 0.0 }
  0xf5   :  { %v360_v6 = vpop.f32.mrf.mxu0  ;;  %v464_v7 = vpop.f32.mrf.mxu1 }
  0xf6   :  { %v948_v8 = vpack.c.bf16 %v545_v4, %v545_v4  ;;  %v361_v9 = vadd.f32 %v1386_v31, %v360_v6  ;;  %v974_v10 = vpack.c.bf16 %v571_v5, %v571_v5  ;;  %v465_v11 = vadd.f32 %v1386_v31, %v464_v7 }
  0xf7   :  { %v1032_v12 = vpop.f32.mrf.mxu0  ;;  %v1084_v13 = vpop.f32.mrf.mxu1 }
  0xf8   :  { %792 = vst.msk [vmem:[%s1636_s3 + $0xc] sm:$0xf] %vm788_vm4, %v948_v8  ;;  %v546_v14 = vmax.f32 %v361_v9, 0.0  ;;  %818 = vst.msk [vmem:[%s1636_s3 + $0x74] sm:$0xf] %vm788_vm4, %v974_v10  ;;  %v572_v15 = vmax.f32 %v465_v11, 0.0 }
  0xf9   :  { %v363_v16 = vpop.f32.mrf.mxu0  ;;  %v467_v17 = vpop.f32.mrf.mxu1 }
  0xfa   :  { %v949_v18 = vpack.c.bf16 %v546_v14, %v546_v14  ;;  %v364_v19 = vadd.f32 %v1386_v31, %v363_v16  ;;  %v975_v20 = vpack.c.bf16 %v572_v15, %v572_v15  ;;  %v468_v21 = vadd.f32 %v1386_v31, %v467_v17 }
  0xfb   :  { %v1033_v22 = vpop.f32.mrf.mxu0  ;;  %v1085_v23 = vpop.f32.mrf.mxu1 }
  0xfc   :  { %793 = vst.msk [vmem:[%s1636_s3 + $0x10] sm:$0xf] %vm788_vm4, %v949_v18  ;;  %v547_v24 = vmax.f32 %v364_v19, 0.0  ;;  %819 = vst.msk [vmem:[%s1636_s3 + $0x78] sm:$0xf] %vm788_vm4, %v975_v20  ;;  %v573_v25 = vmax.f32 %v468_v21, 0.0 }
  0xfd   :  { %v368_v26 = vpop.f32.mrf.mxu0  ;;  %v472_v27 = vpop.f32.mrf.mxu1 }
  0xfe   :  { %v950_v28 = vpack.c.bf16 %v547_v24, %v547_v24  ;;  %v369_v29 = vadd.f32 %v1386_v31, %v368_v26  ;;  %v976_v30 = vpack.c.bf16 %v573_v25, %v573_v25  ;;  %v473_v32 = vadd.f32 %v1386_v31, %v472_v27 }
  0xff   :  { %v1036_v33 = vpop.f32.mrf.mxu0  ;;  %v1088_v34 = vpop.f32.mrf.mxu1 }
 0x100   :  { %794 = vst.msk [vmem:[%s1636_s3 + $0x14] sm:$0xf] %vm788_vm4, %v950_v28  ;;  %v548_v35 = vmax.f32 %v369_v29, 0.0  ;;  %820 = vst.msk [vmem:[%s1636_s3 + $0x7c] sm:$0xf] %vm788_vm4, %v976_v30  ;;  %v574_v36 = vmax.f32 %v473_v32, 0.0 }
 0x101   :  { %v371_v37 = vpop.f32.mrf.mxu0  ;;  %v475_v38 = vpop.f32.mrf.mxu1 }
 0x102   :  { %v951_v39 = vpack.c.bf16 %v548_v35, %v548_v35  ;;  %v372_v40 = vadd.f32 %v1386_v31, %v371_v37  ;;  %v977_v41 = vpack.c.bf16 %v574_v36, %v574_v36  ;;  %v476_v42 = vadd.f32 %v1386_v31, %v475_v38 }
 0x103   :  { %v1037_v43 = vpop.f32.mrf.mxu0  ;;  %v1089_v44 = vpop.f32.mrf.mxu1 }
 0x104   :  { %795 = vst.msk [vmem:[%s1636_s3 + $0x18] sm:$0xf] %vm788_vm4, %v951_v39  ;;  %v549_v45 = vmax.f32 %v372_v40, 0.0  ;;  %821 = vst.msk [vmem:[%s1636_s3 + $0x80] sm:$0xf] %vm788_vm4, %v977_v41  ;;  %v575_v46 = vmax.f32 %v476_v42, 0.0 }
 0x105   :  { %v376_v47 = vpop.f32.mrf.mxu0  ;;  %v480_v48 = vpop.f32.mrf.mxu1 }
 0x106   :  { %v952_v49 = vpack.c.bf16 %v549_v45, %v549_v45  ;;  %v377_v50 = vadd.f32 %v1386_v31, %v376_v47  ;;  %v978_v51 = vpack.c.bf16 %v575_v46, %v575_v46  ;;  %v481_v52 = vadd.f32 %v1386_v31, %v480_v48 }
 0x107   :  { %v1040_v53 = vpop.f32.mrf.mxu0  ;;  %v1092_v54 = vpop.f32.mrf.mxu1 }
 0x108   :  { %796 = vst.msk [vmem:[%s1636_s3 + $0x1c] sm:$0xf] %vm788_vm4, %v952_v49  ;;  %v550_v55 = vmax.f32 %v377_v50, 0.0  ;;  %822 = vst.msk [vmem:[%s1636_s3 + $0x84] sm:$0xf] %vm788_vm4, %v978_v51  ;;  %v576_v56 = vmax.f32 %v481_v52, 0.0 }
 0x109   :  { %v379_v57 = vpop.f32.mrf.mxu0  ;;  %v483_v58 = vpop.f32.mrf.mxu1 }
 0x10a   :  { %v953_v59 = vpack.c.bf16 %v550_v55, %v550_v55  ;;  %v380_v60 = vadd.f32 %v1386_v31, %v379_v57  ;;  %v979_v61 = vpack.c.bf16 %v576_v56, %v576_v56  ;;  %v484_v62 = vadd.f32 %v1386_v31, %v483_v58 }
 0x10b   :  { %v1041_v63 = vpop.f32.mrf.mxu0  ;;  %v1093_v0 = vpop.f32.mrf.mxu1 }
 0x10c   :  { %797 = vst.msk [vmem:[%s1636_s3 + $0x20] sm:$0xf] %vm788_vm4, %v953_v59  ;;  %v551_v1 = vmax.f32 %v380_v60, 0.0  ;;  %823 = vst.msk [vmem:[%s1636_s3 + $0x88] sm:$0xf] %vm788_vm4, %v979_v61  ;;  %v577_v2 = vmax.f32 %v484_v62, 0.0 }
 0x10d   :  { %v384_v3 = vpop.f32.mrf.mxu0  ;;  %v488_v4 = vpop.f32.mrf.mxu1 }
 0x10e   :  { %v954_v5 = vpack.c.bf16 %v551_v1, %v551_v1  ;;  %v385_v6 = vadd.f32 %v1386_v31, %v384_v3  ;;  %v980_v7 = vpack.c.bf16 %v577_v2, %v577_v2  ;;  %v489_v8 = vadd.f32 %v1386_v31, %v488_v4 }
 0x10f   :  { %v1044_v9 = vpop.f32.mrf.mxu0  ;;  %v1096_v10 = vpop.f32.mrf.mxu1 }
 0x110   :  { %798 = vst.msk [vmem:[%s1636_s3 + $0x24] sm:$0xf] %vm788_vm4, %v954_v5  ;;  %v552_v11 = vmax.f32 %v385_v6, 0.0  ;;  %824 = vst.msk [vmem:[%s1636_s3 + $0x8c] sm:$0xf] %vm788_vm4, %v980_v7  ;;  %v578_v12 = vmax.f32 %v489_v8, 0.0 }
 0x111   :  { %v387_v13 = vpop.f32.mrf.mxu0  ;;  %v491_v14 = vpop.f32.mrf.mxu1 }
 0x112   :  { %v955_v15 = vpack.c.bf16 %v552_v11, %v552_v11  ;;  %v388_v16 = vadd.f32 %v1386_v31, %v387_v13  ;;  %v981_v17 = vpack.c.bf16 %v578_v12, %v578_v12  ;;  %v492_v18 = vadd.f32 %v1386_v31, %v491_v14 }
 0x113   :  { %v1045_v19 = vpop.f32.mrf.mxu0  ;;  %v1097_v20 = vpop.f32.mrf.mxu1 }
 0x114   :  { %799 = vst.msk [vmem:[%s1636_s3 + $0x28] sm:$0xf] %vm788_vm4, %v955_v15  ;;  %v553_v21 = vmax.f32 %v388_v16, 0.0  ;;  %825 = vst.msk [vmem:[%s1636_s3 + $0x90] sm:$0xf] %vm788_vm4, %v981_v17  ;;  %v579_v22 = vmax.f32 %v492_v18, 0.0 }
 0x115   :  { %v392_v23 = vpop.f32.mrf.mxu0  ;;  %v496_v24 = vpop.f32.mrf.mxu1 }
 0x116   :  { %v956_v25 = vpack.c.bf16 %v553_v21, %v553_v21  ;;  %v393_v26 = vadd.f32 %v1386_v31, %v392_v23  ;;  %v982_v27 = vpack.c.bf16 %v579_v22, %v579_v22  ;;  %v497_v28 = vadd.f32 %v1386_v31, %v496_v24 }
 0x117   :  { %v1048_v29 = vpop.f32.mrf.mxu0  ;;  %v1100_v30 = vpop.f32.mrf.mxu1 }
 0x118   :  { %800 = vst.msk [vmem:[%s1636_s3 + $0x2c] sm:$0xf] %vm788_vm4, %v956_v25  ;;  %v554_v32 = vmax.f32 %v393_v26, 0.0  ;;  %826 = vst.msk [vmem:[%s1636_s3 + $0x94] sm:$0xf] %vm788_vm4, %v982_v27  ;;  %v580_v33 = vmax.f32 %v497_v28, 0.0 }
 0x119   :  { %v395_v34 = vpop.f32.mrf.mxu0  ;;  %v499_v35 = vpop.f32.mrf.mxu1 }
 0x11a   :  { %v957_v36 = vpack.c.bf16 %v554_v32, %v554_v32  ;;  %v396_v37 = vadd.f32 %v1386_v31, %v395_v34  ;;  %v983_v38 = vpack.c.bf16 %v580_v33, %v580_v33  ;;  %v500_v39 = vadd.f32 %v1386_v31, %v499_v35 }
 0x11b   :  { %v1049_v40 = vpop.f32.mrf.mxu0  ;;  %v1101_v41 = vpop.f32.mrf.mxu1 }
 0x11c   :  { %801 = vst.msk [vmem:[%s1636_s3 + $0x30] sm:$0xf] %vm788_vm4, %v957_v36  ;;  %v555_v42 = vmax.f32 %v396_v37, 0.0  ;;  %827 = vst.msk [vmem:[%s1636_s3 + $0x98] sm:$0xf] %vm788_vm4, %v983_v38  ;;  %v581_v43 = vmax.f32 %v500_v39, 0.0 }
 0x11d   :  { %v400_v44 = vpop.f32.mrf.mxu0  ;;  %v504_v45 = vpop.f32.mrf.mxu1 }
 0x11e   :  { %v958_v46 = vpack.c.bf16 %v555_v42, %v555_v42  ;;  %v401_v47 = vadd.f32 %v1386_v31, %v400_v44  ;;  %v984_v48 = vpack.c.bf16 %v581_v43, %v581_v43  ;;  %v505_v49 = vadd.f32 %v1386_v31, %v504_v45 }
 0x11f   :  { %v1052_v50 = vpop.f32.mrf.mxu0  ;;  %v1104_v51 = vpop.f32.mrf.mxu1 }
 0x120   :  { %802 = vst.msk [vmem:[%s1636_s3 + $0x34] sm:$0xf] %vm788_vm4, %v958_v46  ;;  %v556_v52 = vmax.f32 %v401_v47, 0.0  ;;  %828 = vst.msk [vmem:[%s1636_s3 + $0x9c] sm:$0xf] %vm788_vm4, %v984_v48  ;;  %v582_v53 = vmax.f32 %v505_v49, 0.0 }
 0x121   :  { %v403_v54 = vpop.f32.mrf.mxu0  ;;  %v507_v55 = vpop.f32.mrf.mxu1 }
 0x122   :  { %v959_v56 = vpack.c.bf16 %v556_v52, %v556_v52  ;;  %v404_v57 = vadd.f32 %v1386_v31, %v403_v54  ;;  %v985_v58 = vpack.c.bf16 %v582_v53, %v582_v53  ;;  %v508_v59 = vadd.f32 %v1386_v31, %v507_v55 }
 0x123   :  { %v1053_v60 = vpop.f32.mrf.mxu0  ;;  %v1105_v61 = vpop.f32.mrf.mxu1 }
 0x124   :  { %803 = vst.msk [vmem:[%s1636_s3 + $0x38] sm:$0xf] %vm788_vm4, %v959_v56  ;;  %v557_v62 = vmax.f32 %v404_v57, 0.0  ;;  %829 = vst.msk [vmem:[%s1636_s3 + $0xa0] sm:$0xf] %vm788_vm4, %v985_v58  ;;  %v583_v63 = vmax.f32 %v508_v59, 0.0 }
 0x125   :  { %v408_v0 = vpop.f32.mrf.mxu0  ;;  %v512_v1 = vpop.f32.mrf.mxu1 }
 0x126   :  { %v960_v2 = vpack.c.bf16 %v557_v62, %v557_v62  ;;  %v409_v3 = vadd.f32 %v1386_v31, %v408_v0  ;;  %v986_v4 = vpack.c.bf16 %v583_v63, %v583_v63  ;;  %v513_v5 = vadd.f32 %v1386_v31, %v512_v1 }
 0x127   :  { %v1056_v6 = vpop.f32.mrf.mxu0  ;;  %v1108_v7 = vpop.f32.mrf.mxu1 }
 0x128   :  { %804 = vst.msk [vmem:[%s1636_s3 + $0x3c] sm:$0xf] %vm788_vm4, %v960_v2  ;;  %v558_v8 = vmax.f32 %v409_v3, 0.0  ;;  %830 = vst.msk [vmem:[%s1636_s3 + $0xa4] sm:$0xf] %vm788_vm4, %v986_v4  ;;  %v584_v9 = vmax.f32 %v513_v5, 0.0 }
 0x129   :  { %v411_v10 = vpop.f32.mrf.mxu0  ;;  %v515_v11 = vpop.f32.mrf.mxu1 }
 0x12a   :  { %v961_v12 = vpack.c.bf16 %v558_v8, %v558_v8  ;;  %v412_v13 = vadd.f32 %v1386_v31, %v411_v10  ;;  %v987_v14 = vpack.c.bf16 %v584_v9, %v584_v9  ;;  %v516_v15 = vadd.f32 %v1386_v31, %v515_v11 }
 0x12b   :  { %v1057_v16 = vpop.f32.mrf.mxu0  ;;  %v1109_v17 = vpop.f32.mrf.mxu1 }
 0x12c   :  { %805 = vst.msk [vmem:[%s1636_s3 + $0x40] sm:$0xf] %vm788_vm4, %v961_v12  ;;  %v559_v18 = vmax.f32 %v412_v13, 0.0  ;;  %831 = vst.msk [vmem:[%s1636_s3 + $0xa8] sm:$0xf] %vm788_vm4, %v987_v14  ;;  %v585_v19 = vmax.f32 %v516_v15, 0.0 }
 0x12d   :  { %v416_v20 = vpop.f32.mrf.mxu0  ;;  %v520_v21 = vpop.f32.mrf.mxu1 }
 0x12e   :  { %v962_v22 = vpack.c.bf16 %v559_v18, %v559_v18  ;;  %v417_v23 = vadd.f32 %v1386_v31, %v416_v20  ;;  %v988_v24 = vpack.c.bf16 %v585_v19, %v585_v19  ;;  %v521_v25 = vadd.f32 %v1386_v31, %v520_v21 }
 0x12f   :  { %v1060_v26 = vpop.f32.mrf.mxu0  ;;  %v1112_v27 = vpop.f32.mrf.mxu1 }
 0x130   :  { %806 = vst.msk [vmem:[%s1636_s3 + $0x44] sm:$0xf] %vm788_vm4, %v962_v22  ;;  %v560_v28 = vmax.f32 %v417_v23, 0.0  ;;  %832 = vst.msk [vmem:[%s1636_s3 + $0xac] sm:$0xf] %vm788_vm4, %v988_v24  ;;  %v586_v29 = vmax.f32 %v521_v25, 0.0 }
 0x131   :  { %v419_v30 = vpop.f32.mrf.mxu0  ;;  %v523_v32 = vpop.f32.mrf.mxu1 }
 0x132   :  { %v963_v33 = vpack.c.bf16 %v560_v28, %v560_v28  ;;  %v420_v34 = vadd.f32 %v1386_v31, %v419_v30  ;;  %v989_v35 = vpack.c.bf16 %v586_v29, %v586_v29  ;;  %v524_v36 = vadd.f32 %v1386_v31, %v523_v32 }
 0x133   :  { %v1061_v37 = vpop.f32.mrf.mxu0  ;;  %v1113_v38 = vpop.f32.mrf.mxu1 }
 0x134   :  { %807 = vst.msk [vmem:[%s1636_s3 + $0x48] sm:$0xf] %vm788_vm4, %v963_v33  ;;  %v561_v39 = vmax.f32 %v420_v34, 0.0  ;;  %833 = vst.msk [vmem:[%s1636_s3 + $0xb0] sm:$0xf] %vm788_vm4, %v989_v35  ;;  %v587_v40 = vmax.f32 %v524_v36, 0.0 }
 0x135   :  { %v424_v41 = vpop.f32.mrf.mxu0  ;;  %v528_v42 = vpop.f32.mrf.mxu1 }
 0x136   :  { %v964_v43 = vpack.c.bf16 %v561_v39, %v561_v39  ;;  %v425_v44 = vadd.f32 %v1386_v31, %v424_v41  ;;  %v990_v45 = vpack.c.bf16 %v587_v40, %v587_v40  ;;  %v529_v46 = vadd.f32 %v1386_v31, %v528_v42 }
 0x137   :  { %v1064_v47 = vpop.f32.mrf.mxu0  ;;  %v1116_v48 = vpop.f32.mrf.mxu1 }
 0x138   :  { %808 = vst.msk [vmem:[%s1636_s3 + $0x4c] sm:$0xf] %vm788_vm4, %v964_v43  ;;  %v562_v49 = vmax.f32 %v425_v44, 0.0  ;;  %834 = vst.msk [vmem:[%s1636_s3 + $0xb4] sm:$0xf] %vm788_vm4, %v990_v45  ;;  %v588_v50 = vmax.f32 %v529_v46, 0.0 }
 0x139   :  { %v427_v51 = vpop.f32.mrf.mxu0  ;;  %v531_v52 = vpop.f32.mrf.mxu1 }
 0x13a   :  { %v965_v53 = vpack.c.bf16 %v562_v49, %v562_v49  ;;  %v428_v54 = vadd.f32 %v1386_v31, %v427_v51  ;;  %v991_v55 = vpack.c.bf16 %v588_v50, %v588_v50  ;;  %v532_v56 = vadd.f32 %v1386_v31, %v531_v52 }
 0x13b   :  { %v1065_v57 = vpop.f32.mrf.mxu0  ;;  %v1117_v58 = vpop.f32.mrf.mxu1 }
 0x13c   :  { %809 = vst.msk [vmem:[%s1636_s3 + $0x50] sm:$0xf] %vm788_vm4, %v965_v53  ;;  %v563_v59 = vmax.f32 %v428_v54, 0.0  ;;  %835 = vst.msk [vmem:[%s1636_s3 + $0xb8] sm:$0xf] %vm788_vm4, %v991_v55  ;;  %v589_v60 = vmax.f32 %v532_v56, 0.0 }
 0x13d   :  { %v432_v61 = vpop.f32.mrf.mxu0  ;;  %v536_v62 = vpop.f32.mrf.mxu1 }
 0x13e   :  { %v966_v63 = vpack.c.bf16 %v563_v59, %v563_v59  ;;  %v433_v0 = vadd.f32 %v1386_v31, %v432_v61  ;;  %v992_v1 = vpack.c.bf16 %v589_v60, %v589_v60  ;;  %v537_v2 = vadd.f32 %v1386_v31, %v536_v62 }
 0x13f   :  { %v1068_v3 = vpop.f32.mrf.mxu0  ;;  %v1120_v4 = vpop.f32.mrf.mxu1 }
 0x140   :  { %810 = vst.msk [vmem:[%s1636_s3 + $0x54] sm:$0xf] %vm788_vm4, %v966_v63  ;;  %v564_v5 = vmax.f32 %v433_v0, 0.0  ;;  %836 = vst.msk [vmem:[%s1636_s3 + $0xbc] sm:$0xf] %vm788_vm4, %v992_v1  ;;  %v590_v6 = vmax.f32 %v537_v2, 0.0 }
 0x141   :  { %v435_v7 = vpop.f32.mrf.mxu0  ;;  %v539_v8 = vpop.f32.mrf.mxu1 }
 0x142   :  { %v967_v9 = vpack.c.bf16 %v564_v5, %v564_v5  ;;  %v436_v10 = vadd.f32 %v1386_v31, %v435_v7  ;;  %v993_v11 = vpack.c.bf16 %v590_v6, %v590_v6 }
 0x143   :  { %v1069_v12 = vpop.f32.mrf.mxu0  ;;  %v1121_v13 = vpop.f32.mrf.mxu1 }
 0x144   :  { %811 = vst.msk [vmem:[%s1636_s3 + $0x58] sm:$0xf] %vm788_vm4, %v967_v9  ;;  %v565_v14 = vmax.f32 %v436_v10, 0.0  ;;  %837 = vst.msk [vmem:[%s1636_s3 + $0xc0] sm:$0xf] %vm788_vm4, %v993_v11 }
 0x145   :  { %v440_v15 = vpop.f32.mrf.mxu0 }
 0x146   :  { %v968_v16 = vpack.c.bf16 %v565_v14, %v565_v14  ;;  %v441_v17 = vadd.f32 %v1386_v31, %v440_v15 }
 0x147   :  { %v1072_v18 = vpop.f32.mrf.mxu0 }
 0x148   :  { %812 = vst.msk [vmem:[%s1636_s3 + $0x5c] sm:$0xf] %vm788_vm4, %v968_v16  ;;  %v566_v19 = vmax.f32 %v441_v17, 0.0 }
 0x149   :  { %v443_v20 = vpop.f32.mrf.mxu0 }
 0x14a   :  { %v969_v21 = vpack.c.bf16 %v566_v19, %v566_v19  ;;  %v444_v22 = vadd.f32 %v1386_v31, %v443_v20 }
 0x14b   :  { %v1073_v23 = vpop.f32.mrf.mxu0 }
 0x14c   :  { %813 = vst.msk [vmem:[%s1636_s3 + $0x60] sm:$0xf] %vm788_vm4, %v969_v21  ;;  %v567_v24 = vmax.f32 %v444_v22, 0.0 }
 0x14e   :  { %v970_v25 = vpack.c.bf16 %v567_v24, %v567_v24 }
 0x150   :  { %814 = vst.msk [vmem:[%s1636_s3 + $0x64] sm:$0xf] %vm788_vm4, %v970_v25 }
 0x151   :  { %842 = vsyncpa [#allocation3], 1 }
 0x152   :  { %843 = vsyncpa [#allocation5], 1 }

// kernel: vae_forward.8
= control target key start
LH: loop header
LB: loop body
LE: loop exit
PB: predicated region body
PF: predicated region fallthrough
CT: control target
= control target key end

     0   :  { %v794_v1 = vmov 0.0   ;;  %vm795_vm0 = vmmov 0   ;;  %vm292_vm1 = vcmask 261120   ;;  %vm556_vm2 = vcmask 519168   ;;  %s1022_s1 = inlined_call_operand.vmem [shape: bf16[288,64], index: 1, kind: input, shape index: {}]   ;;  %s1023_s0 = inlined_call_operand.vmem [shape: bf16[98,288], index: 0, kind: input, shape index: {}]   ;;  %s1024_s2 = inlined_call_operand.vmem [shape: f32[1,64], index: 2, kind: input, shape index: {}]   ;;  %s1025_s3 = inlined_call_operand.vmem [shape: bf16[98,64], index: 3, kind: output, shape index: {}]  }
   0x1   :  { %v749_v0 = vld [vmem:[%s1022_s1 + $0x78] sm:$0xff]   ;;  %715 = vmatprep.subr.bf16.mxu1 %v794_v1  ;;  %719 = vmatprep.mubr.msk.bf16.mxu1 %vm795_vm0, %v794_v1  ;;  %v751_v3 = vld [vmem:[%s1022_s1 + $0x70] sm:$0xff]   ;;  %v753_v5 = vld [vmem:[%s1022_s1 + $0x68] sm:$0xff]   ;;  %vm569_vm3 = vcmask 516096  }
   0x2   :  { %v750_v2 = vld [vmem:[%s1022_s1 + $0x38] sm:$0xff]   ;;  %648 = vmatprep.subr.bf16.mxu0 %v749_v0  ;;  %v752_v4 = vld [vmem:[%s1022_s1 + $0x30] sm:$0xff]   ;;  %v754_v6 = vld [vmem:[%s1022_s1 + $0x28] sm:$0xff]  }
   0x3   :  { %649 = vmatpush3.bf16.msra.mxu0 %v750_v2  ;;  %v755_v7 = vld [vmem:[%s1022_s1 + $0x60] sm:$0xff]   ;;  %v757_v9 = vld [vmem:[%s1022_s1 + $0x58] sm:$0xff]   ;;  %v763_v10 = vld [vmem:[%s1022_s1 + $0x88] sm:$0xff]  }
   0x4   :  { %650 = vmatprep.subr.bf16.mxu0 %v751_v3  ;;  %v756_v8 = vld [vmem:[%s1022_s1 + $0x20] sm:$0xff]   ;;  %v758_v11 = vld [vmem:[%s1022_s1 + $0x18] sm:$0xff]   ;;  %v759_v12 = vld [vmem:[%s1022_s1 + $0x50] sm:$0xff]   ;;  %716 = vmatpush3.bf16.msra.mxu1 %v763_v10 }
   0x5   :  { %v760_v13 = vld [vmem:[%s1022_s1 + $0x10] sm:$0xff]   ;;  %717 = vmatprep.subr.bf16.mxu1 %v794_v1  ;;  %v766_v14 = vld [vmem:[%s1022_s1 + $0x80] sm:$0xff]   ;;  %v761_v15 = vld [vmem:[%s1022_s1 + $0x48] sm:$0xff]  }
   0x6   :  { %v769_v16 = vld [vmem:[%s1023_s0 + $0x4] ss:$12 sps:$4 sm:$0xff]   ;;  %v770_v17 = vld [vmem:[%s1023_s0 + $0x8] ss:$12 sps:$4 sm:$0xff]   ;;  %v774_v21 = vld [vmem:[%s1023_s0 + $0x20] ss:$12 sps:$4 sm:$0xff]  }
   0x7   :  { %651 = vmatpush3.bf16.msra.mxu0 %v752_v4  ;;  %346 = vmatprep.mubr.bf16.mxu0 %v769_v16  ;;  %v762_v18 = vld [vmem:[%s1022_s1 + $0x8] sm:$0xff]   ;;  %v764_v19 = vld [vmem:[%s1022_s1 + $0x40] sm:$0xff]   ;;  %v782_v27 = vld [vmem:[%s1023_s0 + $0x50] ss:$12 sps:$4 sm:$0xff]  }
   0x8   :  { %652 = vmatprep.subr.bf16.mxu0 %v753_v5  ;;  %718 = vmatpush3.bf16.msra.mxu1 %v766_v14  ;;  %v765_v20 = vld [vmem:[%s1022_s1] sm:$0xff]   ;;  %v771_v23 = vld [vmem:[%s1023_s0 + $0x1c] ss:$12 sps:$4 sm:$0xff]   ;;  %v779_v29 = vld [vmem:[%s1023_s0 + $0x4c] ss:$12 sps:$4 sm:$0xff]  }
   0x9   :  { %v767_v22 = vld [vmem:[%s1023_s0] ss:$12 sps:$4 sm:$0xff]   ;;  %v778_v24 = vld [vmem:[%s1023_s0 + $0x38] ss:$12 sps:$4 sm:$0xff]   ;;  %v777_v28 = vld [vmem:[%s1023_s0 + $0x30] ss:$12 sps:$4 sm:$0xff]  }
   0xa   :  { %v773_v25 = vld [vmem:[%s1023_s0 + $0x18] ss:$12 sps:$4 sm:$0xff]   ;;  %v775_v26 = vld [vmem:[%s1023_s0 + $0x34] ss:$12 sps:$4 sm:$0xff]   ;;  %v787_v35 = vld [vmem:[%s1023_s0 + $0x7c] ss:$12 sps:$4 sm:$0xff]  }
   0xb   :  { %653 = vmatpush3.bf16.msra.mxu0 %v754_v6  ;;  %720 = vmatmul.mubr.msk.bf16.vlgmr.msra.gmra.mxu1 %vm292_vm1, %v770_v17  ;;  %v786_v30 = vld [vmem:[%s1023_s0 + $0x68] ss:$12 sps:$4 sm:$0xff]   ;;  %v783_v32 = vld [vmem:[%s1023_s0 + $0x64] ss:$12 sps:$4 sm:$0xff]   ;;  %v790_v33 = vld [vmem:[%s1023_s0 + $0x80] ss:$12 sps:$4 sm:$0xff]  }
   0xc   :  { %654 = vmatprep.subr.bf16.mxu0 %v755_v7  ;;  %723 = vmatprep.mubr.msk.bf16.mxu1 %vm795_vm0, %v794_v1  ;;  %v781_v31 = vld [vmem:[%s1023_s0 + $0x48] ss:$12 sps:$4 sm:$0xff]   ;;  %v785_v34 = vld [vmem:[%s1023_s0 + $0x60] ss:$12 sps:$4 sm:$0xff]   ;;  %v789_v38 = vld [vmem:[%s1023_s0 + $0x78] ss:$12 sps:$4 sm:$0xff]  }
   0xd   :  { %v793_v36 = vld [vmem:[%s1023_s0 + $0x98] ss:$0 sps:$4 sm:$0x11]   ;;  %v39_v37 = vld [vmem:[%s1023_s0 + $0x90] sm:$0x11] }
   0xe   :  { %v595_v39 = vcombine.high %v39_v37, %v39_v37  ;;  %v594_v40 = vcombine.low %v39_v37, %v39_v37  ;;  %v956_v49 = vld [vmem:[%s1024_s2] ss:$0 sm:$0xff] }
   0xf   :  { %655 = vmatpush3.bf16.msra.mxu0 %v756_v8 }
  0x10   :  { %656 = vmatprep.subr.bf16.mxu0 %v757_v9 }
  0x13   :  { %657 = vmatpush3.bf16.msra.mxu0 %v758_v11  ;;  %724 = vmatmul.mubr.msk.bf16.gmra.mxu1 %vm292_vm1, %v774_v21 }
  0x14   :  { %658 = vmatprep.subr.bf16.mxu0 %v759_v12  ;;  %727 = vmatprep.mubr.msk.bf16.mxu1 %vm795_vm0, %v794_v1 }
  0x17   :  { %659 = vmatpush3.bf16.msra.mxu0 %v760_v13 }
  0x18   :  { %660 = vmatprep.subr.bf16.mxu0 %v761_v15 }
  0x1b   :  { %661 = vmatpush3.bf16.msra.mxu0 %v762_v18  ;;  %728 = vmatmul.mubr.msk.bf16.gmra.mxu1 %vm292_vm1, %v778_v24 }
  0x1c   :  { %662 = vmatprep.subr.bf16.mxu0 %v764_v19  ;;  %731 = vmatprep.mubr.msk.bf16.mxu1 %vm795_vm0, %v794_v1 }
  0x1f   :  { %663 = vmatpush3.bf16.msra.mxu0 %v765_v20 }
  0x22   :  { %347 = vmatmul.mubr.bf16.vlgmr.msra.gmra.mxu0 %v767_v22 }
  0x23   :  { %354 = vmatprep.mubr.bf16.mxu0 %v771_v23  ;;  %732 = vmatmul.mubr.msk.bf16.gmra.mxu1 %vm292_vm1, %v782_v27 }
  0x24   :  { %735 = vmatprep.mubr.msk.bf16.mxu1 %vm795_vm0, %v794_v1 }
  0x2a   :  { %355 = vmatmul.mubr.bf16.gmra.mxu0 %v773_v25 }
  0x2b   :  { %362 = vmatprep.mubr.bf16.mxu0 %v775_v26  ;;  %736 = vmatmul.mubr.msk.bf16.gmra.mxu1 %vm292_vm1, %v786_v30 }
  0x2c   :  { %739 = vmatprep.mubr.msk.bf16.mxu1 %vm795_vm0, %v794_v1 }
  0x32   :  { %363 = vmatmul.mubr.bf16.gmra.mxu0 %v777_v28 }
  0x33   :  { %370 = vmatprep.mubr.bf16.mxu0 %v779_v29  ;;  %740 = vmatmul.mubr.msk.bf16.gmra.mxu1 %vm292_vm1, %v790_v33 }
  0x34   :  { %743 = vmatprep.mubr.msk.bf16.mxu1 %vm795_vm0, %v794_v1 }
  0x3a   :  { %371 = vmatmul.mubr.bf16.gmra.mxu0 %v781_v31 }
  0x3b   :  { %378 = vmatprep.mubr.bf16.mxu0 %v783_v32  ;;  %744 = vmatmul.mubr.msk.bf16.gmra.mxu1 %vm292_vm1, %v793_v36 }
  0x42   :  { %379 = vmatmul.mubr.bf16.gmra.mxu0 %v785_v34 }
  0x43   :  { %386 = vmatprep.mubr.bf16.mxu0 %v787_v35 }
  0x4a   :  { %387 = vmatmul.mubr.bf16.gmra.mxu0 %v789_v38 }
  0x4b   :  { %394 = vmatprep.mubr.bf16.mxu0 %v595_v39 }
  0x52   :  { %395 = vmatmul.mubr.bf16.gmra.mxu0 %v594_v40 }
  0xcb   :  { %v436_v41 = vpop.f32.mrf.mxu1 }
  0xcd   :  { %v721_v42 = vpop.f32.mrf.mxu1 }
  0xcf   :  { %v439_v43 = vpop.f32.mrf.mxu1 }
  0xd1   :  { %v722_v44 = vpop.f32.mrf.mxu1 }
  0xd3   :  { %v444_v45 = vpop.f32.mrf.mxu1 }
  0xd5   :  { %v725_v46 = vpop.f32.mrf.mxu1 }
  0xd7   :  { %v447_v48 = vpop.f32.mrf.mxu1 }
  0xd9   :  { %v726_v52 = vpop.f32.mrf.mxu1 }
  0xdb   :  { %v452_v55 = vpop.f32.mrf.mxu1 }
  0xdd   :  { %v729_v59 = vpop.f32.mrf.mxu1 }
  0xdf   :  { %v455_v63 = vpop.f32.mrf.mxu1 }
  0xe1   :  { %v730_v4 = vpop.f32.mrf.mxu1 }
  0xe2   :  { %v664_v47 = vpop.f32.mrf.mxu0 }
  0xe3   :  { %v460_v8 = vpop.f32.mrf.mxu1 }
  0xe4   :  { %v665_v50 = vpop.f32.mrf.mxu0 }
  0xe5   :  { %v666_v51 = vadd.f32 %v665_v50, %v664_v47  ;;  %v733_v13 = vpop.f32.mrf.mxu1 }
  0xe6   :  { %v667_v53 = vpop.f32.mrf.mxu0 }
  0xe7   :  { %v349_v54 = vadd.f32 %v666_v51, %v956_v49  ;;  %v463_v17 = vpop.f32.mrf.mxu1 }
  0xe8   :  { %v668_v56 = vpop.f32.mrf.mxu0 }
  0xe9   :  { %v437_v57 = vadd.f32 %v436_v41, %v349_v54  ;;  %v669_v58 = vadd.f32 %v668_v56, %v667_v53  ;;  %v734_v22 = vpop.f32.mrf.mxu1 }
  0xea   :  { %v670_v60 = vpop.f32.mrf.mxu0 }
  0xeb   :  { %v490_v61 = vmax.f32 %v437_v57, 0.0  ;;  %v352_v62 = vadd.f32 %v669_v58, %v956_v49  ;;  %v468_v26 = vpop.f32.mrf.mxu1 }
  0xec   :  { %v671_v0 = vpop.f32.mrf.mxu0 }
  0xed   :  { %v635_v1 = vpack.c.bf16 %v490_v61, %v490_v61  ;;  %v440_v2 = vadd.f32 %v439_v43, %v352_v62  ;;  %v672_v3 = vadd.f32 %v671_v0, %v670_v60  ;;  %v737_v31 = vpop.f32.mrf.mxu1 }
  0xee   :  { %v673_v5 = vpop.f32.mrf.mxu0 }
  0xef   :  { %557 = vst.msk [vmem:[%s1025_s3] sm:$0xf] %vm556_vm2, %v635_v1  ;;  %v491_v6 = vmax.f32 %v440_v2, 0.0  ;;  %v357_v7 = vadd.f32 %v672_v3, %v956_v49  ;;  %v471_v35 = vpop.f32.mrf.mxu1 }
  0xf0   :  { %v674_v9 = vpop.f32.mrf.mxu0 }
  0xf1   :  { %v636_v10 = vpack.c.bf16 %v491_v6, %v491_v6  ;;  %v445_v11 = vadd.f32 %v444_v45, %v357_v7  ;;  %v675_v12 = vadd.f32 %v674_v9, %v673_v5  ;;  %v738_v40 = vpop.f32.mrf.mxu1 }
  0xf2   :  { %v676_v14 = vpop.f32.mrf.mxu0 }
  0xf3   :  { %558 = vst.msk [vmem:[%s1025_s3 + $0x4] sm:$0xf] %vm556_vm2, %v636_v10  ;;  %v492_v15 = vmax.f32 %v445_v11, 0.0  ;;  %v360_v16 = vadd.f32 %v675_v12, %v956_v49  ;;  %v476_v44 = vpop.f32.mrf.mxu1 }
  0xf4   :  { %v677_v18 = vpop.f32.mrf.mxu0 }
  0xf5   :  { %v637_v19 = vpack.c.bf16 %v492_v15, %v492_v15  ;;  %v448_v20 = vadd.f32 %v447_v48, %v360_v16  ;;  %v678_v21 = vadd.f32 %v677_v18, %v676_v14  ;;  %v741_v50 = vpop.f32.mrf.mxu1 }
  0xf6   :  { %v679_v23 = vpop.f32.mrf.mxu0 }
  0xf7   :  { %559 = vst.msk [vmem:[%s1025_s3 + $0x8] sm:$0xf] %vm556_vm2, %v637_v19  ;;  %v493_v24 = vmax.f32 %v448_v20, 0.0  ;;  %v365_v25 = vadd.f32 %v678_v21, %v956_v49  ;;  %v479_v54 = vpop.f32.mrf.mxu1 }
  0xf8   :  { %v680_v27 = vpop.f32.mrf.mxu0 }
  0xf9   :  { %v638_v28 = vpack.c.bf16 %v493_v24, %v493_v24  ;;  %v453_v29 = vadd.f32 %v452_v55, %v365_v25  ;;  %v681_v30 = vadd.f32 %v680_v27, %v679_v23  ;;  %v742_v59 = vpop.f32.mrf.mxu1 }
  0xfa   :  { %v682_v32 = vpop.f32.mrf.mxu0 }
  0xfb   :  { %560 = vst.msk [vmem:[%s1025_s3 + $0xc] sm:$0xf] %vm556_vm2, %v638_v28  ;;  %v494_v33 = vmax.f32 %v453_v29, 0.0  ;;  %v368_v34 = vadd.f32 %v681_v30, %v956_v49 }
  0xfc   :  { %v683_v36 = vpop.f32.mrf.mxu0 }
  0xfd   :  { %v639_v37 = vpack.c.bf16 %v494_v33, %v494_v33  ;;  %v456_v38 = vadd.f32 %v455_v63, %v368_v34  ;;  %v684_v39 = vadd.f32 %v683_v36, %v682_v32  ;;  %v484_v63 = vpop.f32.mrf.mxu1 }
  0xfe   :  { %v685_v41 = vpop.f32.mrf.mxu0 }
  0xff   :  { %561 = vst.msk [vmem:[%s1025_s3 + $0x10] sm:$0xf] %vm556_vm2, %v639_v37  ;;  %v495_v42 = vmax.f32 %v456_v38, 0.0  ;;  %v373_v43 = vadd.f32 %v684_v39, %v956_v49  ;;  %v745_v4 = vpop.f32.mrf.mxu1 }
 0x100   :  { %v686_v45 = vpop.f32.mrf.mxu0 }
 0x101   :  { %v640_v46 = vpack.c.bf16 %v495_v42, %v495_v42  ;;  %v461_v47 = vadd.f32 %v460_v8, %v373_v43  ;;  %v687_v48 = vadd.f32 %v686_v45, %v685_v41  ;;  %v487_v8 = vpop.f32.mrf.mxu1 }
 0x102   :  { %v688_v51 = vpop.f32.mrf.mxu0 }
 0x103   :  { %562 = vst.msk [vmem:[%s1025_s3 + $0x14] sm:$0xf] %vm556_vm2, %v640_v46  ;;  %v496_v52 = vmax.f32 %v461_v47, 0.0  ;;  %v376_v53 = vadd.f32 %v687_v48, %v956_v49  ;;  %v746_v13 = vpop.f32.mrf.mxu1 }
 0x104   :  { %v689_v55 = vpop.f32.mrf.mxu0 }
 0x105   :  { %v641_v56 = vpack.c.bf16 %v496_v52, %v496_v52  ;;  %v464_v57 = vadd.f32 %v463_v17, %v376_v53  ;;  %v690_v58 = vadd.f32 %v689_v55, %v688_v51 }
 0x106   :  { %v691_v60 = vpop.f32.mrf.mxu0 }
 0x107   :  { %563 = vst.msk [vmem:[%s1025_s3 + $0x18] sm:$0xf] %vm556_vm2, %v641_v56  ;;  %v497_v61 = vmax.f32 %v464_v57, 0.0  ;;  %v381_v62 = vadd.f32 %v690_v58, %v956_v49 }
 0x108   :  { %v692_v0 = vpop.f32.mrf.mxu0 }
 0x109   :  { %v642_v1 = vpack.c.bf16 %v497_v61, %v497_v61  ;;  %v469_v2 = vadd.f32 %v468_v26, %v381_v62  ;;  %v693_v3 = vadd.f32 %v692_v0, %v691_v60 }
 0x10a   :  { %v694_v5 = vpop.f32.mrf.mxu0 }
 0x10b   :  { %564 = vst.msk [vmem:[%s1025_s3 + $0x1c] sm:$0xf] %vm556_vm2, %v642_v1  ;;  %v498_v6 = vmax.f32 %v469_v2, 0.0  ;;  %v384_v7 = vadd.f32 %v693_v3, %v956_v49 }
 0x10c   :  { %v695_v9 = vpop.f32.mrf.mxu0 }
 0x10d   :  { %v643_v10 = vpack.c.bf16 %v498_v6, %v498_v6  ;;  %v472_v11 = vadd.f32 %v471_v35, %v384_v7  ;;  %v696_v12 = vadd.f32 %v695_v9, %v694_v5 }
 0x10e   :  { %v697_v14 = vpop.f32.mrf.mxu0 }
 0x10f   :  { %565 = vst.msk [vmem:[%s1025_s3 + $0x20] sm:$0xf] %vm556_vm2, %v643_v10  ;;  %v499_v15 = vmax.f32 %v472_v11, 0.0  ;;  %v389_v16 = vadd.f32 %v696_v12, %v956_v49 }
 0x110   :  { %v698_v17 = vpop.f32.mrf.mxu0 }
 0x111   :  { %v644_v18 = vpack.c.bf16 %v499_v15, %v499_v15  ;;  %v477_v19 = vadd.f32 %v476_v44, %v389_v16  ;;  %v699_v20 = vadd.f32 %v698_v17, %v697_v14 }
 0x112   :  { %v700_v21 = vpop.f32.mrf.mxu0 }
 0x113   :  { %566 = vst.msk [vmem:[%s1025_s3 + $0x24] sm:$0xf] %vm556_vm2, %v644_v18  ;;  %v500_v22 = vmax.f32 %v477_v19, 0.0  ;;  %v392_v23 = vadd.f32 %v699_v20, %v956_v49 }
 0x114   :  { %v701_v24 = vpop.f32.mrf.mxu0 }
 0x115   :  { %v645_v25 = vpack.c.bf16 %v500_v22, %v500_v22  ;;  %v480_v26 = vadd.f32 %v479_v54, %v392_v23  ;;  %v702_v27 = vadd.f32 %v701_v24, %v700_v21 }
 0x116   :  { %v703_v28 = vpop.f32.mrf.mxu0 }
 0x117   :  { %567 = vst.msk [vmem:[%s1025_s3 + $0x28] sm:$0xf] %vm556_vm2, %v645_v25  ;;  %v501_v29 = vmax.f32 %v480_v26, 0.0  ;;  %v397_v30 = vadd.f32 %v702_v27, %v956_v49 }
 0x118   :  { %v704_v31 = vpop.f32.mrf.mxu0 }
 0x119   :  { %v646_v32 = vpack.c.bf16 %v501_v29, %v501_v29  ;;  %v485_v33 = vadd.f32 %v484_v63, %v397_v30 }
 0x11b   :  { %568 = vst.msk [vmem:[%s1025_s3 + $0x2c] sm:$0xf] %vm556_vm2, %v646_v32  ;;  %v502_v34 = vmax.f32 %v485_v33, 0.0 }
 0x11d   :  { %v647_v35 = vpack.c.bf16 %v502_v34, %v502_v34 }
 0x11f   :  { %570 = vst.msk [vmem:[%s1025_s3 + $0x30] sm:$0x1] %vm569_vm3, %v647_v35 }

// kernel: vae_forward.9
= control target key start
LH: loop header
LB: loop body
LE: loop exit
PB: predicated region body
PF: predicated region fallthrough
CT: control target
= control target key end

     0   :  { %v1248_v34 = vmov 0.0   ;;  %vm1249_vm0 = vmmov 0   ;;  %vm516_vm1 = vcmask 523264   ;;  %vm868_vm2 = vcmask 519168   ;;  %s1647_s1 = inlined_call_operand.vmem [shape: bf16[576,64], index: 1, kind: input, shape index: {}]   ;;  %s1648_s0 = inlined_call_operand.vmem [shape: bf16[98,576], index: 0, kind: input, shape index: {}]   ;;  %s1649_s2 = inlined_call_operand.vmem [shape: f32[1,64], index: 2, kind: input, shape index: {}]   ;;  %s1650_s3 = inlined_call_operand.vmem [shape: bf16[98,64], index: 3, kind: output, shape index: {}]  }
   0x1   :  { %v1165_v0 = vld [vmem:[%s1647_s1 + $0x78] sm:$0xff]   ;;  %v1169_v4 = vld [vmem:[%s1647_s1 + $0x70] sm:$0xff]   ;;  %v1173_v8 = vld [vmem:[%s1647_s1 + $0x68] sm:$0xff]   ;;  %vm881_vm3 = vcmask 516096  }
   0x2   :  { %v1166_v1 = vld [vmem:[%s1647_s1 + $0xf8] sm:$0xff]   ;;  %992 = vmatprep.subr.bf16.mxu0 %v1165_v0  ;;  %v1170_v5 = vld [vmem:[%s1647_s1 + $0xf0] sm:$0xff]   ;;  %v1174_v9 = vld [vmem:[%s1647_s1 + $0xe8] sm:$0xff]  }
   0x3   :  { %v1167_v2 = vld [vmem:[%s1647_s1 + $0x38] sm:$0xff]   ;;  %1050 = vmatprep.subr.bf16.mxu1 %v1166_v1  ;;  %v1171_v6 = vld [vmem:[%s1647_s1 + $0x30] sm:$0xff]   ;;  %v1175_v10 = vld [vmem:[%s1647_s1 + $0x28] sm:$0xff]  }
   0x4   :  { %v1168_v3 = vld [vmem:[%s1647_s1 + $0xb8] sm:$0xff]   ;;  %993 = vmatpush3.bf16.msra.mxu0 %v1167_v2  ;;  %v1172_v7 = vld [vmem:[%s1647_s1 + $0xb0] sm:$0xff]   ;;  %v1176_v11 = vld [vmem:[%s1647_s1 + $0xa8] sm:$0xff]  }
   0x5   :  { %1051 = vmatpush3.bf16.msra.mxu1 %v1168_v3  ;;  %994 = vmatprep.subr.bf16.mxu0 %v1169_v4  ;;  %v1177_v12 = vld [vmem:[%s1647_s1 + $0x60] sm:$0xff]   ;;  %v1181_v16 = vld [vmem:[%s1647_s1 + $0x58] sm:$0xff]   ;;  %v1185_v20 = vld [vmem:[%s1647_s1 + $0x50] sm:$0xff]  }
   0x6   :  { %1052 = vmatprep.subr.bf16.mxu1 %v1170_v5  ;;  %v1178_v13 = vld [vmem:[%s1647_s1 + $0xe0] sm:$0xff]   ;;  %v1182_v17 = vld [vmem:[%s1647_s1 + $0xd8] sm:$0xff]   ;;  %v1186_v21 = vld [vmem:[%s1647_s1 + $0xd0] sm:$0xff]  }
   0x7   :  { %v1179_v14 = vld [vmem:[%s1647_s1 + $0x20] sm:$0xff]   ;;  %v1183_v18 = vld [vmem:[%s1647_s1 + $0x18] sm:$0xff]   ;;  %v1187_v22 = vld [vmem:[%s1647_s1 + $0x10] sm:$0xff]  }
   0x8   :  { %995 = vmatpush3.bf16.msra.mxu0 %v1171_v6  ;;  %v1180_v15 = vld [vmem:[%s1647_s1 + $0xa0] sm:$0xff]   ;;  %v1184_v19 = vld [vmem:[%s1647_s1 + $0x98] sm:$0xff]   ;;  %v1188_v23 = vld [vmem:[%s1647_s1 + $0x90] sm:$0xff]  }
   0x9   :  { %1053 = vmatpush3.bf16.msra.mxu1 %v1172_v7  ;;  %996 = vmatprep.subr.bf16.mxu0 %v1173_v8  ;;  %v1189_v24 = vld [vmem:[%s1647_s1 + $0x48] sm:$0xff]   ;;  %v1193_v28 = vld [vmem:[%s1647_s1 + $0x40] sm:$0xff]   ;;  %v1203_v37 = vld [vmem:[%s1647_s1 + $0x118] sm:$0xff]  }
   0xa   :  { %1054 = vmatprep.subr.bf16.mxu1 %v1174_v9  ;;  %v1190_v25 = vld [vmem:[%s1647_s1 + $0xc8] sm:$0xff]   ;;  %v1194_v29 = vld [vmem:[%s1647_s1 + $0xc0] sm:$0xff]   ;;  %v1214_v43 = vld [vmem:[%s1647_s1 + $0x110] sm:$0xff]  }
   0xb   :  { %v1191_v26 = vld [vmem:[%s1647_s1 + $0x8] sm:$0xff]   ;;  %v1195_v30 = vld [vmem:[%s1647_s1] sm:$0xff]   ;;  %v1212_v44 = vld [vmem:[%s1648_s0 + $0x5c] ss:$20 sps:$4 sm:$0xff]  }
   0xc   :  { %997 = vmatpush3.bf16.msra.mxu0 %v1175_v10  ;;  %v1192_v27 = vld [vmem:[%s1647_s1 + $0x88] sm:$0xff]   ;;  %v1196_v31 = vld [vmem:[%s1647_s1 + $0x80] sm:$0xff]   ;;  %v1217_v48 = vld [vmem:[%s1648_s0 + $0x7c] ss:$20 sps:$4 sm:$0xff]  }
   0xd   :  { %1055 = vmatpush3.bf16.msra.mxu1 %v1176_v11  ;;  %998 = vmatprep.subr.bf16.mxu0 %v1177_v12  ;;  %v1197_v32 = vld [vmem:[%s1648_s0] ss:$20 sps:$4 sm:$0xff]   ;;  %v1199_v33 = vld [vmem:[%s1648_s0 + $0x4] ss:$20 sps:$4 sm:$0xff]   ;;  %v1200_v35 = vld [vmem:[%s1648_s0 + $0x8] ss:$20 sps:$4 sm:$0xff]  }
   0xe   :  { %1056 = vmatprep.subr.bf16.mxu1 %v1178_v13  ;;  %v1202_v36 = vld [vmem:[%s1648_s0 + $0xc] ss:$20 sps:$4 sm:$0xff]   ;;  %570 = vmatprep.mubr.bf16.mxu0 %v1199_v33  ;;  %v1206_v39 = vld [vmem:[%s1648_s0 + $0x34] ss:$20 sps:$4 sm:$0xff]   ;;  %v1209_v41 = vld [vmem:[%s1648_s0 + $0x30] ss:$20 sps:$4 sm:$0xff]  }
   0xf   :  { %658 = vmatprep.mubr.bf16.mxu1 %v1202_v36  ;;  %v1204_v38 = vld [vmem:[%s1648_s0 + $0x2c] ss:$20 sps:$4 sm:$0xff]   ;;  %v1208_v40 = vld [vmem:[%s1648_s0 + $0x28] ss:$20 sps:$4 sm:$0xff]   ;;  %v1215_v46 = vld [vmem:[%s1648_s0 + $0x50] ss:$20 sps:$4 sm:$0xff]  }
  0x10   :  { %999 = vmatpush3.bf16.msra.mxu0 %v1179_v14  ;;  %v1210_v42 = vld [vmem:[%s1648_s0 + $0x54] ss:$20 sps:$4 sm:$0xff]   ;;  %v1216_v47 = vld [vmem:[%s1648_s0 + $0x58] ss:$20 sps:$4 sm:$0xff]   ;;  %v1236_v50 = vld [vmem:[%s1647_s1 + $0x100] sm:$0xff]  }
  0x11   :  { %1057 = vmatpush3.bf16.msra.mxu1 %v1180_v15  ;;  %1000 = vmatprep.subr.bf16.mxu0 %v1181_v16  ;;  %v1223_v45 = vld [vmem:[%s1647_s1 + $0x108] sm:$0xff]   ;;  %v1219_v49 = vld [vmem:[%s1648_s0 + $0x84] ss:$20 sps:$4 sm:$0xff]   ;;  %v1222_v52 = vld [vmem:[%s1648_s0 + $0x80] ss:$20 sps:$4 sm:$0xff]  }
  0x12   :  { %1058 = vmatprep.subr.bf16.mxu1 %v1182_v17  ;;  %v1221_v51 = vld [vmem:[%s1648_s0 + $0x78] ss:$20 sps:$4 sm:$0xff]   ;;  %v1228_v55 = vld [vmem:[%s1648_s0 + $0xa0] ss:$20 sps:$4 sm:$0xff]   ;;  %v1229_v56 = vld [vmem:[%s1648_s0 + $0xa8] ss:$20 sps:$4 sm:$0xff]  }
  0x13   :  { %v1224_v53 = vld [vmem:[%s1648_s0 + $0xa4] ss:$20 sps:$4 sm:$0xff]   ;;  %v1226_v54 = vld [vmem:[%s1648_s0 + $0xac] ss:$20 sps:$4 sm:$0xff]   ;;  %v1232_v58 = vld [vmem:[%s1648_s0 + $0xd4] ss:$20 sps:$4 sm:$0xff]  }
  0x14   :  { %1001 = vmatpush3.bf16.msra.mxu0 %v1183_v18  ;;  %v1230_v57 = vld [vmem:[%s1648_s0 + $0xcc] ss:$20 sps:$4 sm:$0xff]   ;;  %v51_v59 = vld [vmem:[%s1648_s0 + $0xf0] sm:$0x11]  ;;  %v52_v60 = vld [vmem:[%s1648_s0 + $0xf8] sm:$0x11] }
  0x15   :  { %1059 = vmatpush3.bf16.msra.mxu1 %v1184_v19  ;;  %1002 = vmatprep.subr.bf16.mxu0 %v1185_v20  ;;  %v1234_v61 = vld [vmem:[%s1648_s0 + $0xc8] ss:$20 sps:$4 sm:$0xff]   ;;  %v1235_v62 = vld [vmem:[%s1648_s0 + $0xd0] ss:$20 sps:$4 sm:$0xff]   ;;  %v919_v63 = vcombine.high %v51_v59, %v51_v59  ;;  %v921_v0 = vcombine.high %v52_v60, %v52_v60  ;;  %v918_v1 = vcombine.low %v51_v59, %v51_v59  ;;  %v1243_v5 = vld [vmem:[%s1648_s0 + $0x38] ss:$20 sps:$4 sm:$0xff]  }
  0x16   :  { %1060 = vmatprep.subr.bf16.mxu1 %v1186_v21  ;;  %v920_v2 = vcombine.low %v52_v60, %v52_v60  ;;  %v1241_v3 = vld [vmem:[%s1648_s0 + $0x10] ss:$20 sps:$4 sm:$0xff]   ;;  %v1244_v6 = vld [vmem:[%s1648_s0 + $0xd8] ss:$20 sps:$4 sm:$0xff]   ;;  %v1245_v7 = vld [vmem:[%s1648_s0 + $0x60] ss:$20 sps:$4 sm:$0xff]  }
  0x17   :  { %v1242_v4 = vld [vmem:[%s1648_s0 + $0xb0] ss:$20 sps:$4 sm:$0xff]   ;;  %v1246_v8 = vld [vmem:[%s1648_s0 + $0x100] ss:$0 sps:$4 sm:$0x11]  }
  0x18   :  { %1003 = vmatpush3.bf16.msra.mxu0 %v1187_v22  ;;  %v1247_v9 = vld [vmem:[%s1648_s0 + $0x88] ss:$20 sps:$4 sm:$0xff]   ;;  %v1553_v59 = vld [vmem:[%s1649_s2] ss:$0 sm:$0xff] }
  0x19   :  { %1061 = vmatpush3.bf16.msra.mxu1 %v1188_v23  ;;  %1004 = vmatprep.subr.bf16.mxu0 %v1189_v24 }
  0x1a   :  { %1062 = vmatprep.subr.bf16.mxu1 %v1190_v25 }
  0x1c   :  { %1005 = vmatpush3.bf16.msra.mxu0 %v1191_v26 }
  0x1d   :  { %1063 = vmatpush3.bf16.msra.mxu1 %v1192_v27  ;;  %1006 = vmatprep.subr.bf16.mxu0 %v1193_v28 }
  0x1e   :  { %1064 = vmatprep.subr.bf16.mxu1 %v1194_v29 }
  0x20   :  { %1007 = vmatpush3.bf16.msra.mxu0 %v1195_v30 }
  0x21   :  { %1065 = vmatpush3.bf16.msra.mxu1 %v1196_v31  ;;  %1119 = vmatprep.subr.bf16.mxu0 %v1248_v34 }
  0x22   :  { %1155 = vmatprep.subr.bf16.mxu1 %v1248_v34 }
  0x23   :  { %571 = vmatmul.mubr.bf16.vlgmr.msra.gmra.mxu0 %v1197_v32 }
  0x24   :  { %659 = vmatmul.mubr.bf16.vlgmr.msra.gmra.mxu1 %v1200_v35  ;;  %1120 = vmatpush3.bf16.msra.mxu0 %v1203_v37 }
  0x25   :  { %578 = vmatprep.mubr.bf16.mxu0 %v1204_v38  ;;  %1159 = vmatpush3.bf16.msra.mxu1 %v1203_v37 }
  0x26   :  { %666 = vmatprep.mubr.bf16.mxu1 %v1206_v39  ;;  %1121 = vmatprep.subr.bf16.mxu0 %v1248_v34 }
  0x27   :  { %1156 = vmatprep.subr.bf16.mxu1 %v1248_v34 }
  0x28   :  { %1122 = vmatpush3.bf16.msra.mxu0 %v1214_v43 }
  0x29   :  { %1160 = vmatpush3.bf16.msra.mxu1 %v1214_v43  ;;  %1123 = vmatprep.subr.bf16.mxu0 %v1248_v34 }
  0x2a   :  { %1157 = vmatprep.subr.bf16.mxu1 %v1248_v34 }
  0x2b   :  { %579 = vmatmul.mubr.bf16.gmra.mxu0 %v1208_v40 }
  0x2c   :  { %667 = vmatmul.mubr.bf16.gmra.mxu1 %v1209_v41  ;;  %586 = vmatprep.mubr.bf16.mxu0 %v1210_v42 }
  0x2d   :  { %674 = vmatprep.mubr.bf16.mxu1 %v1212_v44  ;;  %1124 = vmatpush3.bf16.msra.mxu0 %v1223_v45 }
  0x2e   :  { %1161 = vmatpush3.bf16.msra.mxu1 %v1223_v45  ;;  %1125 = vmatprep.subr.bf16.mxu0 %v1248_v34 }
  0x2f   :  { %1158 = vmatprep.subr.bf16.mxu1 %v1248_v34 }
  0x31   :  { %1126 = vmatpush3.bf16.msra.mxu0 %v1236_v50 }
  0x32   :  { %1162 = vmatpush3.bf16.msra.mxu1 %v1236_v50 }
  0x33   :  { %587 = vmatmul.mubr.bf16.gmra.mxu0 %v1215_v46 }
  0x34   :  { %675 = vmatmul.mubr.bf16.gmra.mxu1 %v1216_v47  ;;  %594 = vmatprep.mubr.bf16.mxu0 %v1217_v48 }
  0x35   :  { %682 = vmatprep.mubr.bf16.mxu1 %v1219_v49 }
  0x3b   :  { %595 = vmatmul.mubr.bf16.gmra.mxu0 %v1221_v51 }
  0x3c   :  { %683 = vmatmul.mubr.bf16.gmra.mxu1 %v1222_v52  ;;  %602 = vmatprep.mubr.bf16.mxu0 %v1224_v53 }
  0x3d   :  { %690 = vmatprep.mubr.bf16.mxu1 %v1226_v54 }
  0x43   :  { %603 = vmatmul.mubr.bf16.gmra.mxu0 %v1228_v55 }
  0x44   :  { %691 = vmatmul.mubr.bf16.gmra.mxu1 %v1229_v56  ;;  %610 = vmatprep.mubr.bf16.mxu0 %v1230_v57 }
  0x45   :  { %698 = vmatprep.mubr.bf16.mxu1 %v1232_v58 }
  0x4b   :  { %611 = vmatmul.mubr.bf16.gmra.mxu0 %v1234_v61 }
  0x4c   :  { %699 = vmatmul.mubr.bf16.gmra.mxu1 %v1235_v62  ;;  %618 = vmatprep.mubr.bf16.mxu0 %v919_v63 }
  0x4d   :  { %706 = vmatprep.mubr.bf16.mxu1 %v921_v0 }
  0x53   :  { %619 = vmatmul.mubr.bf16.gmra.mxu0 %v918_v1 }
  0x54   :  { %707 = vmatmul.mubr.bf16.gmra.mxu1 %v920_v2  ;;  %1127 = vmatprep.mubr.msk.bf16.mxu0 %vm1249_vm0, %v1248_v34 }
  0x55   :  { %1143 = vmatprep.mubr.msk.bf16.mxu1 %vm1249_vm0, %v1248_v34 }
  0x5b   :  { %1128 = vmatmul.mubr.msk.bf16.vlgmr.msra.gmra.mxu0 %vm516_vm1, %v1241_v3 }
  0x5c   :  { %1144 = vmatmul.mubr.msk.bf16.vlgmr.msra.gmra.mxu1 %vm516_vm1, %v1242_v4  ;;  %1131 = vmatprep.mubr.msk.bf16.mxu0 %vm1249_vm0, %v1248_v34 }
  0x5d   :  { %1147 = vmatprep.mubr.msk.bf16.mxu1 %vm1249_vm0, %v1248_v34 }
  0x63   :  { %1132 = vmatmul.mubr.msk.bf16.gmra.mxu0 %vm516_vm1, %v1243_v5 }
  0x64   :  { %1148 = vmatmul.mubr.msk.bf16.gmra.mxu1 %vm516_vm1, %v1244_v6  ;;  %1135 = vmatprep.mubr.msk.bf16.mxu0 %vm1249_vm0, %v1248_v34 }
  0x65   :  { %1151 = vmatprep.mubr.msk.bf16.mxu1 %vm1249_vm0, %v1248_v34 }
  0x6b   :  { %1136 = vmatmul.mubr.msk.bf16.gmra.mxu0 %vm516_vm1, %v1245_v7 }
  0x6c   :  { %1152 = vmatmul.mubr.msk.bf16.gmra.mxu1 %vm516_vm1, %v1246_v8  ;;  %1139 = vmatprep.mubr.msk.bf16.mxu0 %vm1249_vm0, %v1248_v34 }
  0x73   :  { %1140 = vmatmul.mubr.msk.bf16.gmra.mxu0 %vm516_vm1, %v1247_v9 }
  0xe3   :  { %v1008_v10 = vpop.f32.mrf.mxu0 }
  0xe4   :  { %v1066_v11 = vpop.f32.mrf.mxu1 }
  0xe5   :  { %v1009_v12 = vpop.f32.mrf.mxu0 }
  0xe6   :  { %v1067_v13 = vpop.f32.mrf.mxu1  ;;  %v1010_v57 = vadd.f32 %v1009_v12, %v1008_v10 }
  0xe7   :  { %v1011_v14 = vpop.f32.mrf.mxu0  ;;  %v1068_v2 = vadd.f32 %v1067_v13, %v1066_v11 }
  0xe8   :  { %v1069_v15 = vpop.f32.mrf.mxu1  ;;  %v573_v1 = vadd.f32 %v1010_v57, %v1553_v59 }
  0xe9   :  { %v1012_v16 = vpop.f32.mrf.mxu0 }
  0xea   :  { %v1070_v17 = vpop.f32.mrf.mxu1  ;;  %v1013_v63 = vadd.f32 %v1012_v16, %v1011_v14  ;;  %v661_v14 = vadd.f32 %v1068_v2, %v573_v1 }
  0xeb   :  { %v1014_v18 = vpop.f32.mrf.mxu0  ;;  %v1071_v10 = vadd.f32 %v1070_v17, %v1069_v15 }
  0xec   :  { %v1506_v19 = vpop.f32.mrf.mxu1  ;;  %v576_v9 = vadd.f32 %v1013_v63, %v1553_v59 }
  0xed   :  { %v1015_v20 = vpop.f32.mrf.mxu0 }
  0xee   :  { %v1508_v21 = vpop.f32.mrf.mxu1  ;;  %v1016_v12 = vadd.f32 %v1015_v20, %v1014_v18  ;;  %v664_v15 = vadd.f32 %v1071_v10, %v576_v9 }
  0xef   :  { %v1510_v22 = vpop.f32.mrf.mxu0 }
  0xf0   :  { %v1512_v23 = vpop.f32.mrf.mxu1 }
  0xf1   :  { %v1514_v24 = vpop.f32.mrf.mxu0 }
  0xf2   :  { %v1516_v25 = vpop.f32.mrf.mxu1  ;;  %v1019_v17 = vadd.f32 %v1514_v24, %v1510_v22 }
  0xf3   :  { %v1518_v26 = vpop.f32.mrf.mxu0 }
  0xf4   :  { %v1520_v27 = vpop.f32.mrf.mxu1  ;;  %v584_v24 = vadd.f32 %v1019_v17, %v1553_v59 }
  0xf5   :  { %v1522_v28 = vpop.f32.mrf.mxu0 }
  0xf6   :  { %v1524_v29 = vpop.f32.mrf.mxu1 }
  0xf7   :  { %v1526_v30 = vpop.f32.mrf.mxu0 }
  0xf8   :  { %v1528_v31 = vpop.f32.mrf.mxu1 }
  0xf9   :  { %v1530_v32 = vpop.f32.mrf.mxu0 }
  0xfa   :  { %v1532_v33 = vpop.f32.mrf.mxu1 }
  0xfb   :  { %v1534_v34 = vpop.f32.mrf.mxu0 }
  0xfc   :  { %v1536_v35 = vpop.f32.mrf.mxu1 }
  0xfd   :  { %v1538_v36 = vpop.f32.mrf.mxu0 }
  0xfe   :  { %v1540_v37 = vpop.f32.mrf.mxu1 }
  0xff   :  { %v1542_v38 = vpop.f32.mrf.mxu0 }
 0x100   :  { %v1544_v39 = vpop.f32.mrf.mxu1 }
 0x101   :  { %1651 = vst [vmem:[#allocation2_spill] sm:$0xff] %v1544_v39  ;;  %v1546_v40 = vpop.f32.mrf.mxu0 }
 0x102   :  { %1652 = vst [vmem:[#allocation3_spill] sm:$0xff] %v1546_v40  ;;  %v1548_v41 = vpop.f32.mrf.mxu1 }
 0x103   :  { %1653 = vst [vmem:[#allocation4_spill] sm:$0xff] %v1548_v41  ;;  %v1032_v42 = vpop.f32.mrf.mxu0 }
 0x104   :  { %v1090_v43 = vpop.f32.mrf.mxu1 }
 0x105   :  { %v1033_v44 = vpop.f32.mrf.mxu0 }
 0x106   :  { %v1091_v45 = vpop.f32.mrf.mxu1  ;;  %v1034_v60 = vadd.f32 %v1033_v44, %v1032_v42 }
 0x107   :  { %v1035_v46 = vpop.f32.mrf.mxu0  ;;  %v1092_v5 = vadd.f32 %v1091_v45, %v1090_v43  ;;  %v581_v43 = vadd.f32 %v1016_v12, %v1553_v59  ;;  %v1074_v45 = vadd.f32 %v1508_v21, %v1506_v19  ;;  %v1077_v19 = vadd.f32 %v1516_v25, %v1512_v23 }
 0x108   :  { %v1093_v47 = vpop.f32.mrf.mxu1  ;;  %v605_v4 = vadd.f32 %v1034_v60, %v1553_v59 }
 0x109   :  { %v1036_v48 = vpop.f32.mrf.mxu0  ;;  %v669_v22 = vadd.f32 %v1074_v45, %v581_v43 }
 0x10a   :  { %v1094_v49 = vpop.f32.mrf.mxu1  ;;  %v1037_v6 = vadd.f32 %v1036_v48, %v1035_v46  ;;  %v693_v13 = vadd.f32 %v1092_v5, %v605_v4 }
 0x10b   :  { %v1038_v50 = vpop.f32.mrf.mxu0  ;;  %v1095_v57 = vadd.f32 %v1094_v49, %v1093_v47 }
 0x10c   :  { %v1096_v51 = vpop.f32.mrf.mxu1  ;;  %v608_v16 = vadd.f32 %v1037_v6, %v1553_v59 }
 0x10d   :  { %v1039_v52 = vpop.f32.mrf.mxu0 }
 0x10e   :  { %v1097_v53 = vpop.f32.mrf.mxu1  ;;  %v1040_v44 = vadd.f32 %v1039_v52, %v1038_v50  ;;  %v696_v60 = vadd.f32 %v1095_v57, %v608_v16 }
 0x10f   :  { %v1041_v54 = vpop.f32.mrf.mxu0  ;;  %v1098_v20 = vadd.f32 %v1097_v53, %v1096_v51 }
 0x110   :  { %v1099_v55 = vpop.f32.mrf.mxu1  ;;  %v613_v18 = vadd.f32 %v1040_v44, %v1553_v59 }
 0x111   :  { %v1042_v56 = vpop.f32.mrf.mxu0 }
 0x112   :  { %v1100_v58 = vpop.f32.mrf.mxu1  ;;  %v1043_v49 = vadd.f32 %v1042_v56, %v1041_v54  ;;  %v701_v54 = vadd.f32 %v1098_v20, %v613_v18 }
 0x113   :  { %v1044_v61 = vpop.f32.mrf.mxu0  ;;  %v1101_v23 = vadd.f32 %v1100_v58, %v1099_v55  ;;  %v1080_v55 = vadd.f32 %v1524_v29, %v1520_v27 }
 0x114   :  { %v1555_v62 = vpop.f32.mrf.mxu1  ;;  %v616_v56 = vadd.f32 %v1043_v49, %v1553_v59 }
 0x115   :  { %v1045_v0 = vpop.f32.mrf.mxu0 }
 0x116   :  { %v1558_v3 = vpop.f32.mrf.mxu1  ;;  %v1046_v25 = vadd.f32 %v1045_v0, %v1044_v61  ;;  %v672_v0 = vadd.f32 %v1077_v19, %v584_v24  ;;  %v704_v29 = vadd.f32 %v1101_v23, %v616_v56  ;;  %v1655_v24 = vld [vmem:[#allocation2_spill] sm:$0xff] }
 0x117   :  { %v1047_v7 = vpop.f32.mrf.mxu0 }
 0x118   :  { %v1105_v8 = vpop.f32.mrf.mxu1  ;;  %v621_v44 = vadd.f32 %v1046_v25, %v1553_v59 }
 0x119   :  { %v1048_v42 = vpop.f32.mrf.mxu0  ;;  %v1025_v8 = vadd.f32 %v1530_v32, %v1526_v30  ;;  %v1104_v30 = vadd.f32 %v1558_v3, %v1555_v62  ;;  %v1028_v62 = vadd.f32 %v1538_v36, %v1534_v34 }
 0x11a   :  { %v1106_v41 = vpop.f32.mrf.mxu1 }
 0x11b   :  { %v748_v11 = vpop.f32.mrf.mxu0  ;;  %v709_v17 = vadd.f32 %v1104_v30, %v621_v44 }
 0x11c   :  { %v749_v39 = vadd.f32 %v748_v11, %v661_v14  ;;  %v780_v40 = vpop.f32.mrf.mxu1  ;;  %v592_v11 = vadd.f32 %v1025_v8, %v1553_v59 }
 0x11d   :  { %v781_v46 = vadd.f32 %v780_v40, %v693_v13  ;;  %v1129_v48 = vpop.f32.mrf.mxu0  ;;  %v1083_v13 = vadd.f32 %v1532_v33, %v1528_v31 }
 0x11e   :  { %v802_v41 = vmax.f32 %v749_v39, 0.0  ;;  %v1145_v47 = vpop.f32.mrf.mxu1  ;;  %v1022_v39 = vadd.f32 %v1522_v28, %v1518_v26 }
 0x11f   :  { %v810_v50 = vmax.f32 %v781_v46, 0.0  ;;  %v751_v52 = vpop.f32.mrf.mxu0  ;;  %v680_v49 = vadd.f32 %v1083_v13, %v592_v11 }
 0x120   :  { %v979_v63 = vpack.c.bf16 %v802_v41, %v802_v41  ;;  %v752_v1 = vadd.f32 %v751_v52, %v664_v15  ;;  %v783_v2 = vpop.f32.mrf.mxu1  ;;  %v589_v42 = vadd.f32 %v1022_v39, %v1553_v59  ;;  %v1086_v52 = vadd.f32 %v1540_v37, %v1536_v35  ;;  %v1656_v39 = vld [vmem:[#allocation4_spill] sm:$0xff] }
 0x121   :  { %v987_v21 = vpack.c.bf16 %v810_v50, %v810_v50  ;;  %v784_v40 = vadd.f32 %v783_v2, %v696_v60  ;;  %v1130_v4 = vpop.f32.mrf.mxu0  ;;  %v597_v50 = vadd.f32 %v1028_v62, %v1553_v59  ;;  %v1654_v60 = vld [vmem:[#allocation3_spill] sm:$0xff] }
 0x122   :  { %869 = vst.msk [vmem:[%s1650_s3] sm:$0xf] %vm868_vm2, %v979_v63  ;;  %v803_v51 = vmax.f32 %v752_v1, 0.0  ;;  %v1146_v53 = vpop.f32.mrf.mxu1  ;;  %v677_v15 = vadd.f32 %v1080_v55, %v589_v42  ;;  %v1031_v63 = vadd.f32 %v1654_v60, %v1542_v38 }
 0x123   :  { %877 = vst.msk [vmem:[%s1650_s3 + $0x20] sm:$0xf] %vm868_vm2, %v987_v21  ;;  %v811_v5 = vmax.f32 %v784_v40, 0.0  ;;  %v756_v6 = vpop.f32.mrf.mxu0 }
 0x124   :  { %v980_v26 = vpack.c.bf16 %v803_v51, %v803_v51  ;;  %v757_v28 = vadd.f32 %v756_v6, %v669_v22  ;;  %v788_v7 = vpop.f32.mrf.mxu1  ;;  %v600_v22 = vadd.f32 %v1031_v63, %v1553_v59  ;;  %v1089_v51 = vadd.f32 %v1656_v39, %v1655_v24 }
 0x125   :  { %v988_v9 = vpack.c.bf16 %v811_v5, %v811_v5  ;;  %v789_v10 = vadd.f32 %v788_v7, %v701_v54  ;;  %v1133_v12 = vpop.f32.mrf.mxu0  ;;  %v685_v54 = vadd.f32 %v1086_v52, %v597_v50 }
 0x126   :  { %870 = vst.msk [vmem:[%s1650_s3 + $0x4] sm:$0xf] %vm868_vm2, %v980_v26  ;;  %v804_v58 = vmax.f32 %v757_v28, 0.0  ;;  %v1149_v61 = vpop.f32.mrf.mxu1  ;;  %v688_v26 = vadd.f32 %v1089_v51, %v600_v22 }
 0x127   :  { %878 = vst.msk [vmem:[%s1650_s3 + $0x24] sm:$0xf] %vm868_vm2, %v988_v9  ;;  %v812_v32 = vmax.f32 %v789_v10, 0.0  ;;  %v759_v27 = vpop.f32.mrf.mxu0 }
 0x128   :  { %v981_v14 = vpack.c.bf16 %v804_v58, %v804_v58  ;;  %v760_v16 = vadd.f32 %v759_v27, %v672_v0  ;;  %v791_v57 = vpop.f32.mrf.mxu1 }
 0x129   :  { %v989_v43 = vpack.c.bf16 %v812_v32, %v812_v32  ;;  %v792_v45 = vadd.f32 %v791_v57, %v704_v29  ;;  %v1134_v46 = vpop.f32.mrf.mxu0 }
 0x12a   :  { %871 = vst.msk [vmem:[%s1650_s3 + $0x8] sm:$0xf] %vm868_vm2, %v981_v14  ;;  %v805_v3 = vmax.f32 %v760_v16, 0.0  ;;  %v1150_v48 = vpop.f32.mrf.mxu1 }
 0x12b   :  { %879 = vst.msk [vmem:[%s1650_s3 + $0x28] sm:$0xf] %vm868_vm2, %v989_v43  ;;  %v813_v31 = vmax.f32 %v792_v45, 0.0  ;;  %v764_v33 = vpop.f32.mrf.mxu0 }
 0x12c   :  { %v982_v18 = vpack.c.bf16 %v805_v3, %v805_v3  ;;  %v765_v20 = vadd.f32 %v764_v33, %v677_v15  ;;  %v796_v41 = vpop.f32.mrf.mxu1 }
 0x12d   :  { %v990_v34 = vpack.c.bf16 %v813_v31, %v813_v31  ;;  %v797_v36 = vadd.f32 %v796_v41, %v709_v17  ;;  %v1137_v47 = vpop.f32.mrf.mxu0 }
 0x12e   :  { %872 = vst.msk [vmem:[%s1650_s3 + $0xc] sm:$0xf] %vm868_vm2, %v982_v18  ;;  %v806_v1 = vmax.f32 %v765_v20, 0.0  ;;  %v1153_v2 = vpop.f32.mrf.mxu1 }
 0x12f   :  { %880 = vst.msk [vmem:[%s1650_s3 + $0x2c] sm:$0xf] %vm868_vm2, %v990_v34  ;;  %v814_v19 = vmax.f32 %v797_v36, 0.0  ;;  %v767_v21 = vpop.f32.mrf.mxu0 }
 0x130   :  { %v983_v40 = vpack.c.bf16 %v806_v1, %v806_v1  ;;  %v768_v35 = vadd.f32 %v767_v21, %v680_v49  ;;  %v799_v37 = vpop.f32.mrf.mxu1 }
 0x131   :  { %v991_v4 = vpack.c.bf16 %v814_v19, %v814_v19  ;;  %v1138_v38 = vpop.f32.mrf.mxu0 }
 0x132   :  { %873 = vst.msk [vmem:[%s1650_s3 + $0x10] sm:$0xf] %vm868_vm2, %v983_v40  ;;  %v807_v53 = vmax.f32 %v768_v35, 0.0  ;;  %v1154_v56 = vpop.f32.mrf.mxu1 }
 0x133   :  { %882 = vst.msk [vmem:[%s1650_s3 + $0x30] sm:$0x1] %vm881_vm3, %v991_v4  ;;  %v772_v23 = vpop.f32.mrf.mxu0 }
 0x134   :  { %v984_v25 = vpack.c.bf16 %v807_v53, %v807_v53  ;;  %v773_v5 = vadd.f32 %v772_v23, %v685_v54 }
 0x135   :  { %v1141_v6 = vpop.f32.mrf.mxu0 }
 0x136   :  { %874 = vst.msk [vmem:[%s1650_s3 + $0x14] sm:$0xf] %vm868_vm2, %v984_v25  ;;  %v808_v59 = vmax.f32 %v773_v5, 0.0 }
 0x137   :  { %v775_v28 = vpop.f32.mrf.mxu0 }
 0x138   :  { %v985_v7 = vpack.c.bf16 %v808_v59, %v808_v59  ;;  %v776_v8 = vadd.f32 %v775_v28, %v688_v26 }
 0x139   :  { %v1142_v9 = vpop.f32.mrf.mxu0 }
 0x13a   :  { %875 = vst.msk [vmem:[%s1650_s3 + $0x18] sm:$0xf] %vm868_vm2, %v985_v7  ;;  %v809_v10 = vmax.f32 %v776_v8, 0.0 }
 0x13c   :  { %v986_v12 = vpack.c.bf16 %v809_v10, %v809_v10 }
 0x13e   :  { %876 = vst.msk [vmem:[%s1650_s3 + $0x1c] sm:$0xf] %vm868_vm2, %v986_v12 }

// kernel: vae_forward.10
= control target key start
LH: loop header
LB: loop body
LE: loop exit
PB: predicated region body
PF: predicated region fallthrough
CT: control target
= control target key end

     0   :  { %18 = vsyncpa [#allocation3], 0  ;;  %v439_v35 = vlaneseq  ;;  %v6032_v36 = vmov 1966171168   ;;  %s7756_s0 = inlined_call_operand.vmem [shape: bf16[2,3136], index: 0, kind: input, shape index: {}]   ;;  %s7757_s1 = inlined_call_operand.vmem [shape: f32[2,20], index: 1, kind: input, shape index: {}]   ;;  %s7758_s2 = inlined_call_operand.vmem [shape: bf16[3136,256], index: 2, kind: input, shape index: {}]   ;;  %s7759_s3 = inlined_call_operand.vmem [shape: f32[1,256], index: 3, kind: input, shape index: {}]   ;;  %s7760_s4 = inlined_call_operand.vmem [shape: bf16[256,20], index: 4, kind: input, shape index: {}]   ;;  %s7761_s5 = inlined_call_operand.vmem [shape: f32[1,20], index: 5, kind: input, shape index: {}]   ;;  %s7762_s6 = inlined_call_operand.vmem [shape: bf16[256,20], index: 6, kind: input, shape index: {}]   ;;  %s7763_s7 = inlined_call_operand.vmem [shape: f32[1,20], index: 7, kind: input, shape index: {}]   ;;  %s7764_s8 = inlined_call_operand.vmem [shape: bf16[20,3136], index: 8, kind: input, shape index: {}]   ;;  %s7765_s9 = inlined_call_operand.vmem [shape: f32[1,3136], index: 9, kind: input, shape index: {}]   ;;  %s7766_s10 = inlined_call_operand.hbm [shape: f32[2,20], index: 10, kind: output, shape index: {0}]   ;;  %s7767_s11 = inlined_call_operand.hbm [shape: f32[2,20], index: 11, kind: output, shape index: {1}]   ;;  %s7768_s12 = inlined_call_operand.vmem [shape: bf16[2,3136], index: 12, kind: output, shape index: {2}]  }
   0x1   :  { %v5301_v0 = vld [vmem:[%s7758_s2 + $0x74] ss:$8 sps:$4 sm:$0xff]   ;;  %v5303_v1 = vld [vmem:[%s7758_s2 + $0x70] ss:$8 sps:$4 sm:$0xff]   ;;  %v5307_v4 = vld [vmem:[%s7758_s2 + $0x64] ss:$8 sps:$4 sm:$0xff]   ;;  %v455_v37 = vunpack.c.l.s4 %v6032_v36 }
   0x2   :  { %2602 = vmatprep.subr.bf16.mxu0 %v5301_v0  ;;  %v5304_v2 = vld [vmem:[%s7758_s2 + $0x174] ss:$8 sps:$4 sm:$0xff]   ;;  %v5306_v3 = vld [vmem:[%s7758_s2 + $0x170] ss:$8 sps:$4 sm:$0xff]   ;;  %v5309_v5 = vld [vmem:[%s7758_s2 + $0x60] ss:$8 sps:$4 sm:$0xff]  }
   0x3   :  { %2603 = vmatpush1.bf16.msra.mxu0 %v5303_v1  ;;  %2643 = vmatprep.subr.bf16.mxu1 %v5304_v2  ;;  %v5310_v6 = vld [vmem:[%s7758_s2 + $0x164] ss:$8 sps:$4 sm:$0xff]   ;;  %v5312_v7 = vld [vmem:[%s7758_s2 + $0x160] ss:$8 sps:$4 sm:$0xff]   ;;  %v5313_v8 = vld [vmem:[%s7758_s2 + $0x54] ss:$8 sps:$4 sm:$0xff]   ;;  %v456_v43 = vunpack.c.0.s8 %v455_v37 }
   0x4   :  { %2644 = vmatpush1.bf16.msra.mxu1 %v5306_v3  ;;  %2604 = vmatprep.subr.bf16.mxu0 %v5307_v4  ;;  %v5315_v9 = vld [vmem:[%s7758_s2 + $0x50] ss:$8 sps:$4 sm:$0xff]   ;;  %v5316_v10 = vld [vmem:[%s7758_s2 + $0x154] ss:$8 sps:$4 sm:$0xff]   ;;  %v5319_v11 = vld [vmem:[%s7758_s2 + $0x44] ss:$8 sps:$4 sm:$0xff]  }
   0x5   :  { %2645 = vmatprep.subr.bf16.mxu1 %v5310_v6  ;;  %v5318_v12 = vld [vmem:[%s7758_s2 + $0x150] ss:$8 sps:$4 sm:$0xff]   ;;  %v5322_v13 = vld [vmem:[%s7758_s2 + $0x144] ss:$8 sps:$4 sm:$0xff]   ;;  %v5321_v14 = vld [vmem:[%s7758_s2 + $0x40] ss:$8 sps:$4 sm:$0xff]  }
   0x6   :  { %v5325_v15 = vld [vmem:[%s7758_s2 + $0x34] ss:$8 sps:$4 sm:$0xff]   ;;  %v5324_v16 = vld [vmem:[%s7758_s2 + $0x140] ss:$8 sps:$4 sm:$0xff]   ;;  %v5327_v18 = vld [vmem:[%s7758_s2 + $0x30] ss:$8 sps:$4 sm:$0xff]  }
   0x7   :  { %2605 = vmatpush1.bf16.msra.mxu0 %v5309_v5  ;;  %v5328_v17 = vld [vmem:[%s7758_s2 + $0x134] ss:$8 sps:$4 sm:$0xff]   ;;  %v5331_v19 = vld [vmem:[%s7758_s2 + $0x24] ss:$8 sps:$4 sm:$0xff]   ;;  %v5330_v20 = vld [vmem:[%s7758_s2 + $0x130] ss:$8 sps:$4 sm:$0xff]  }
   0x8   :  { %2606 = vmatprep.subr.bf16.mxu0 %v5313_v8  ;;  %2646 = vmatpush1.bf16.msra.mxu1 %v5312_v7  ;;  %v5334_v21 = vld [vmem:[%s7758_s2 + $0x124] ss:$8 sps:$4 sm:$0xff]   ;;  %v5333_v22 = vld [vmem:[%s7758_s2 + $0x20] ss:$8 sps:$4 sm:$0xff]   ;;  %v5337_v23 = vld [vmem:[%s7758_s2 + $0x14] ss:$8 sps:$4 sm:$0xff]  }
   0x9   :  { %2647 = vmatprep.subr.bf16.mxu1 %v5316_v10  ;;  %v5336_v24 = vld [vmem:[%s7758_s2 + $0x120] ss:$8 sps:$4 sm:$0xff]   ;;  %v5340_v25 = vld [vmem:[%s7758_s2 + $0x114] ss:$8 sps:$4 sm:$0xff]   ;;  %v5339_v26 = vld [vmem:[%s7758_s2 + $0x10] ss:$8 sps:$4 sm:$0xff]  }
   0xa   :  { %v5343_v27 = vld [vmem:[%s7758_s2 + $0x4] ss:$8 sps:$4 sm:$0xff]   ;;  %v5342_v28 = vld [vmem:[%s7758_s2 + $0x110] ss:$8 sps:$4 sm:$0xff]   ;;  %v5345_v30 = vld [vmem:[%s7758_s2] ss:$8 sps:$4 sm:$0xff]  }
   0xb   :  { %2607 = vmatpush1.bf16.msra.mxu0 %v5315_v9  ;;  %v5346_v29 = vld [vmem:[%s7758_s2 + $0x104] ss:$8 sps:$4 sm:$0xff]   ;;  %v5349_v31 = vld [vmem:[%s7758_s2 + $0xf4] ss:$8 sps:$4 sm:$0xff]   ;;  %v5348_v32 = vld [vmem:[%s7758_s2 + $0x100] ss:$8 sps:$4 sm:$0xff]  }
   0xc   :  { %2608 = vmatprep.subr.bf16.mxu0 %v5319_v11  ;;  %2648 = vmatpush1.bf16.msra.mxu1 %v5318_v12  ;;  %v5352_v33 = vld [vmem:[%s7758_s2 + $0x1f4] ss:$8 sps:$4 sm:$0xff]   ;;  %v5351_v34 = vld [vmem:[%s7758_s2 + $0xf0] ss:$8 sps:$4 sm:$0xff]   ;;  %v5355_v38 = vld [vmem:[%s7758_s2 + $0xe4] ss:$8 sps:$4 sm:$0xff]  }
   0xd   :  { %2649 = vmatprep.subr.bf16.mxu1 %v5322_v13  ;;  %v5354_v39 = vld [vmem:[%s7758_s2 + $0x1f0] ss:$8 sps:$4 sm:$0xff]   ;;  %v5358_v40 = vld [vmem:[%s7758_s2 + $0x1e4] ss:$8 sps:$4 sm:$0xff]   ;;  %v5357_v41 = vld [vmem:[%s7758_s2 + $0xe0] ss:$8 sps:$4 sm:$0xff]  }
   0xe   :  { %v6220_v42 = vshrl.u32 %v439_v35, 7  ;;  %v5361_v44 = vld [vmem:[%s7758_s2 + $0xd4] ss:$8 sps:$4 sm:$0xff]   ;;  %v5360_v45 = vld [vmem:[%s7758_s2 + $0x1e0] ss:$8 sps:$4 sm:$0xff]  }
   0xf   :  { %2609 = vmatpush1.bf16.msra.mxu0 %v5321_v14  ;;  %v5364_v46 = vld [vmem:[%s7758_s2 + $0x1d4] ss:$8 sps:$4 sm:$0xff]   ;;  %v5363_v47 = vld [vmem:[%s7758_s2 + $0xd0] ss:$8 sps:$4 sm:$0xff]   ;;  %v5367_v49 = vld [vmem:[%s7758_s2 + $0xc4] ss:$8 sps:$4 sm:$0xff]  }
  0x10   :  { %2610 = vmatprep.subr.bf16.mxu0 %v5325_v15  ;;  %2650 = vmatpush1.bf16.msra.mxu1 %v5324_v16  ;;  %v6235_v48 = vsub.s32 %v456_v43, %v6220_v42  ;;  %v5366_v50 = vld [vmem:[%s7758_s2 + $0x1d0] ss:$8 sps:$4 sm:$0xff]   ;;  %v5370_v51 = vld [vmem:[%s7758_s2 + $0x1c4] ss:$8 sps:$4 sm:$0xff]   ;;  %v5369_v53 = vld [vmem:[%s7758_s2 + $0xc0] ss:$8 sps:$4 sm:$0xff]  }
  0x11   :  { %2651 = vmatprep.subr.bf16.mxu1 %v5328_v17  ;;  %v41_v52 = vld [vmem:[%s7756_s0] sm:$0xff]  ;;  %v5373_v55 = vld [vmem:[%s7758_s2 + $0xb4] ss:$8 sps:$4 sm:$0xff]   ;;  %v5375_v59 = vld [vmem:[%s7758_s2 + $0xb0] ss:$8 sps:$4 sm:$0xff]  }
  0x12   :  { %v460_v54 = vrot.slane %v41_v52, %v6235_v48  ;;  %v5372_v56 = vld [vmem:[%s7758_s2 + $0x1c0] ss:$8 sps:$4 sm:$0xff]   ;;  %v5376_v58 = vld [vmem:[%s7758_s2 + $0x1b4] ss:$8 sps:$4 sm:$0xff]   ;;  %v5379_v61 = vld [vmem:[%s7758_s2 + $0xa4] ss:$8 sps:$4 sm:$0xff]   ;;  %v453_v63 = vcombine.high %v41_v52, %v41_v52 }
  0x13   :  { %2611 = vmatpush1.bf16.msra.mxu0 %v5327_v18  ;;  %v5378_v62 = vld [vmem:[%s7758_s2 + $0x1b0] ss:$8 sps:$4 sm:$0xff]   ;;  %v5382_v1 = vld [vmem:[%s7758_s2 + $0x1a4] ss:$8 sps:$4 sm:$0xff]   ;;  %v5381_v2 = vld [vmem:[%s7758_s2 + $0xa0] ss:$8 sps:$4 sm:$0xff]  }
  0x14   :  { %2612 = vmatprep.subr.bf16.mxu0 %v5331_v19  ;;  %2652 = vmatpush1.bf16.msra.mxu1 %v5330_v20  ;;  %v468_v57 = vcombine.high %v460_v54, %v460_v54  ;;  %v5385_v3 = vld [vmem:[%s7758_s2 + $0x94] ss:$8 sps:$4 sm:$0xff]   ;;  %v5384_v4 = vld [vmem:[%s7758_s2 + $0x1a0] ss:$8 sps:$4 sm:$0xff]   ;;  %v6285_v5 = vrot.slane %v453_v63, %v6235_v48  ;;  %v5387_v7 = vld [vmem:[%s7758_s2 + $0x90] ss:$8 sps:$4 sm:$0xff]   ;;  %v476_v13 = vrot.slane %v460_v54, %v6235_v48 }
  0x15   :  { %2653 = vmatprep.subr.bf16.mxu1 %v5334_v21  ;;  %v5388_v6 = vld [vmem:[%s7758_s2 + $0x194] ss:$8 sps:$4 sm:$0xff]   ;;  %v5391_v8 = vld [vmem:[%s7758_s2 + $0x84] ss:$8 sps:$4 sm:$0xff]   ;;  %v5390_v9 = vld [vmem:[%s7758_s2 + $0x190] ss:$8 sps:$4 sm:$0xff]  }
  0x16   :  { %v490_v60 = vrot.slane %v468_v57, %v6235_v48  ;;  %v469_v10 = vcombine.high %v6285_v5, %v6285_v5  ;;  %v5394_v11 = vld [vmem:[%s7758_s2 + $0x184] ss:$8 sps:$4 sm:$0xff]   ;;  %v5393_v12 = vld [vmem:[%s7758_s2 + $0x80] ss:$8 sps:$4 sm:$0xff]   ;;  %v5400_v14 = vld [vmem:[%s7758_s2 + $0x274] ss:$8 sps:$4 sm:$0xff]   ;;  %v498_v19 = vcombine.high %v476_v13, %v476_v13 }
  0x17   :  { %2613 = vmatpush1.bf16.msra.mxu0 %v5333_v22  ;;  %v5397_v15 = vld [vmem:[%s7758_s2 + $0x180] ss:$8 sps:$4 sm:$0xff]   ;;  %v5403_v17 = vld [vmem:[%s7758_s2 + $0x374] ss:$8 sps:$4 sm:$0xff]   ;;  %v5398_v18 = vld [vmem:[%s7758_s2 + $0x270] ss:$8 sps:$4 sm:$0xff]  }
  0x18   :  { %2614 = vmatprep.subr.bf16.mxu0 %v5337_v23  ;;  %2654 = vmatpush1.bf16.msra.mxu1 %v5336_v24  ;;  %v500_v0 = vcombine.high %v490_v60, %v490_v60  ;;  %v497_v16 = vrot.slane %v469_v10, %v6235_v48  ;;  %v5406_v20 = vld [vmem:[%s7758_s2 + $0x264] ss:$8 sps:$4 sm:$0xff]   ;;  %v5401_v21 = vld [vmem:[%s7758_s2 + $0x370] ss:$8 sps:$4 sm:$0xff]   ;;  %v5404_v24 = vld [vmem:[%s7758_s2 + $0x260] ss:$8 sps:$4 sm:$0xff]  }
  0x19   :  { %2655 = vmatprep.subr.bf16.mxu1 %v5340_v25  ;;  %2634 = vmatprep.mubr.bf16.mxu0 %v490_v60  ;;  %v5409_v23 = vld [vmem:[%s7758_s2 + $0x364] ss:$8 sps:$4 sm:$0xff]   ;;  %v5412_v25 = vld [vmem:[%s7758_s2 + $0x254] ss:$8 sps:$4 sm:$0xff]   ;;  %v5422_v36 = vld [vmem:[%s7758_s2 + $0x230] ss:$8 sps:$4 sm:$0xff]  }
  0x1a   :  { %2675 = vmatprep.mubr.bf16.mxu1 %v500_v0  ;;  %v501_v22 = vcombine.high %v497_v16, %v497_v16  ;;  %v5427_v35 = vld [vmem:[%s7758_s2 + $0x334] ss:$8 sps:$4 sm:$0xff]   ;;  %v5430_v37 = vld [vmem:[%s7758_s2 + $0x224] ss:$8 sps:$4 sm:$0xff]   ;;  %v5431_v43 = vld [vmem:[%s7758_s2 + $0x320] ss:$8 sps:$4 sm:$0xff]  }
  0x1b   :  { %2615 = vmatpush1.bf16.msra.mxu0 %v5339_v26  ;;  %v5407_v26 = vld [vmem:[%s7758_s2 + $0x360] ss:$8 sps:$4 sm:$0xff]   ;;  %v5446_v54 = vld [vmem:[%s7758_s2 + $0x2f0] ss:$8 sps:$4 sm:$0xff]   ;;  %v5457_v57 = vld [vmem:[%s7758_s2 + $0x3e4] ss:$8 sps:$4 sm:$0xff]  }
  0x1c   :  { %2616 = vmatprep.subr.bf16.mxu0 %v5343_v27  ;;  %2656 = vmatpush1.bf16.msra.mxu1 %v5342_v28  ;;  %v5415_v27 = vld [vmem:[%s7758_s2 + $0x354] ss:$8 sps:$4 sm:$0xff]   ;;  %v5410_v28 = vld [vmem:[%s7758_s2 + $0x250] ss:$8 sps:$4 sm:$0xff]   ;;  %v5443_v52 = vld [vmem:[%s7758_s2 + $0x300] ss:$8 sps:$4 sm:$0xff]  }
  0x1d   :  { %2657 = vmatprep.subr.bf16.mxu1 %v5346_v29  ;;  %v5418_v29 = vld [vmem:[%s7758_s2 + $0x244] ss:$8 sps:$4 sm:$0xff]   ;;  %v5455_v60 = vld [vmem:[%s7758_s2 + $0x3e0] ss:$8 sps:$4 sm:$0xff]   ;;  %v5461_v0 = vld [vmem:[%s7758_s2 + $0x3d0] ss:$8 sps:$4 sm:$0xff]  }
  0x1e   :  { %v5466_v63 = vld [vmem:[%s7758_s2 + $0x2c4] ss:$8 sps:$4 sm:$0xff]  }
  0x1f   :  { %2617 = vmatpush1.bf16.msra.mxu0 %v5345_v30  ;;  %v5413_v30 = vld [vmem:[%s7758_s2 + $0x350] ss:$8 sps:$4 sm:$0xff]   ;;  %v5481_v10 = vld [vmem:[%s7758_s2 + $0x3a4] ss:$8 sps:$4 sm:$0xff]  }
  0x20   :  { %2618 = vmatprep.subr.bf16.mxu0 %v5349_v31  ;;  %2658 = vmatpush1.bf16.msra.mxu1 %v5348_v32  ;;  %v5421_v31 = vld [vmem:[%s7758_s2 + $0x344] ss:$8 sps:$4 sm:$0xff]   ;;  %v5416_v32 = vld [vmem:[%s7758_s2 + $0x240] ss:$8 sps:$4 sm:$0xff]  }
  0x21   :  { %2659 = vmatprep.subr.bf16.mxu1 %v5352_v33  ;;  %v5424_v33 = vld [vmem:[%s7758_s2 + $0x234] ss:$8 sps:$4 sm:$0xff]  }
  0x23   :  { %2619 = vmatpush2.bf16.msra.mxu0 %v5351_v34  ;;  %v5419_v34 = vld [vmem:[%s7758_s2 + $0x340] ss:$8 sps:$4 sm:$0xff]  }
  0x24   :  { %2620 = vmatprep.subr.bf16.mxu0 %v5355_v38  ;;  %2660 = vmatpush2.bf16.msra.mxu1 %v5354_v39  ;;  %v5425_v38 = vld [vmem:[%s7758_s2 + $0x330] ss:$8 sps:$4 sm:$0xff]   ;;  %v5433_v39 = vld [vmem:[%s7758_s2 + $0x324] ss:$8 sps:$4 sm:$0xff]  }
  0x25   :  { %2661 = vmatprep.subr.bf16.mxu1 %v5358_v40  ;;  %v5428_v40 = vld [vmem:[%s7758_s2 + $0x220] ss:$8 sps:$4 sm:$0xff]  }
  0x27   :  { %2621 = vmatpush2.bf16.msra.mxu0 %v5357_v41  ;;  %v5436_v41 = vld [vmem:[%s7758_s2 + $0x214] ss:$8 sps:$4 sm:$0xff]  }
  0x28   :  { %2622 = vmatprep.subr.bf16.mxu0 %v5361_v44  ;;  %2662 = vmatpush2.bf16.msra.mxu1 %v5360_v45  ;;  %v5439_v44 = vld [vmem:[%s7758_s2 + $0x314] ss:$8 sps:$4 sm:$0xff]   ;;  %v5434_v45 = vld [vmem:[%s7758_s2 + $0x210] ss:$8 sps:$4 sm:$0xff]  }
  0x29   :  { %2663 = vmatprep.subr.bf16.mxu1 %v5364_v46  ;;  %v5442_v46 = vld [vmem:[%s7758_s2 + $0x204] ss:$8 sps:$4 sm:$0xff]  }
  0x2b   :  { %2623 = vmatpush2.bf16.msra.mxu0 %v5363_v47  ;;  %v5437_v47 = vld [vmem:[%s7758_s2 + $0x310] ss:$8 sps:$4 sm:$0xff]  }
  0x2c   :  { %2624 = vmatprep.subr.bf16.mxu0 %v5367_v49  ;;  %2664 = vmatpush2.bf16.msra.mxu1 %v5366_v50  ;;  %v5445_v49 = vld [vmem:[%s7758_s2 + $0x304] ss:$8 sps:$4 sm:$0xff]   ;;  %v5440_v50 = vld [vmem:[%s7758_s2 + $0x200] ss:$8 sps:$4 sm:$0xff]  }
  0x2d   :  { %2665 = vmatprep.subr.bf16.mxu1 %v5370_v51  ;;  %v5448_v51 = vld [vmem:[%s7758_s2 + $0x2f4] ss:$8 sps:$4 sm:$0xff]  }
  0x2f   :  { %2625 = vmatpush2.bf16.msra.mxu0 %v5369_v53  ;;  %v5451_v53 = vld [vmem:[%s7758_s2 + $0x3f4] ss:$8 sps:$4 sm:$0xff]  }
  0x30   :  { %2626 = vmatprep.subr.bf16.mxu0 %v5373_v55  ;;  %2666 = vmatpush2.bf16.msra.mxu1 %v5372_v56  ;;  %v5454_v55 = vld [vmem:[%s7758_s2 + $0x2e4] ss:$8 sps:$4 sm:$0xff]   ;;  %v5449_v56 = vld [vmem:[%s7758_s2 + $0x3f0] ss:$8 sps:$4 sm:$0xff]  }
  0x31   :  { %2667 = vmatprep.subr.bf16.mxu1 %v5376_v58  ;;  %v5452_v58 = vld [vmem:[%s7758_s2 + $0x2e0] ss:$8 sps:$4 sm:$0xff]  }
  0x33   :  { %2627 = vmatpush2.bf16.msra.mxu0 %v5375_v59  ;;  %v5460_v59 = vld [vmem:[%s7758_s2 + $0x2d4] ss:$8 sps:$4 sm:$0xff]  }
  0x34   :  { %2628 = vmatprep.subr.bf16.mxu0 %v5379_v61  ;;  %2668 = vmatpush2.bf16.msra.mxu1 %v5378_v62  ;;  %v5463_v61 = vld [vmem:[%s7758_s2 + $0x3d4] ss:$8 sps:$4 sm:$0xff]   ;;  %v5458_v62 = vld [vmem:[%s7758_s2 + $0x2d0] ss:$8 sps:$4 sm:$0xff]  }
  0x35   :  { %2669 = vmatprep.subr.bf16.mxu1 %v5382_v1  ;;  %v5469_v1 = vld [vmem:[%s7758_s2 + $0x3c4] ss:$8 sps:$4 sm:$0xff]  }
  0x37   :  { %2629 = vmatpush2.bf16.msra.mxu0 %v5381_v2  ;;  %v5464_v2 = vld [vmem:[%s7758_s2 + $0x2c0] ss:$8 sps:$4 sm:$0xff]  }
  0x38   :  { %2630 = vmatprep.subr.bf16.mxu0 %v5385_v3  ;;  %2670 = vmatpush2.bf16.msra.mxu1 %v5384_v4  ;;  %v5472_v3 = vld [vmem:[%s7758_s2 + $0x2b4] ss:$8 sps:$4 sm:$0xff]   ;;  %v5467_v4 = vld [vmem:[%s7758_s2 + $0x3c0] ss:$8 sps:$4 sm:$0xff]  }
  0x39   :  { %2671 = vmatprep.subr.bf16.mxu1 %v5388_v6  ;;  %v5475_v6 = vld [vmem:[%s7758_s2 + $0x3b4] ss:$8 sps:$4 sm:$0xff]  }
  0x3b   :  { %2631 = vmatpush2.bf16.msra.mxu0 %v5387_v7  ;;  %v5470_v7 = vld [vmem:[%s7758_s2 + $0x2b0] ss:$8 sps:$4 sm:$0xff]  }
  0x3c   :  { %2632 = vmatprep.subr.bf16.mxu0 %v5391_v8  ;;  %2672 = vmatpush2.bf16.msra.mxu1 %v5390_v9  ;;  %v5478_v8 = vld [vmem:[%s7758_s2 + $0x2a4] ss:$8 sps:$4 sm:$0xff]   ;;  %v5473_v9 = vld [vmem:[%s7758_s2 + $0x3b0] ss:$8 sps:$4 sm:$0xff]  }
  0x3d   :  { %2673 = vmatprep.subr.bf16.mxu1 %v5394_v11  ;;  %v5476_v11 = vld [vmem:[%s7758_s2 + $0x2a0] ss:$8 sps:$4 sm:$0xff]  }
  0x3f   :  { %2633 = vmatpush2.bf16.msra.mxu0 %v5393_v12  ;;  %v5484_v12 = vld [vmem:[%s7758_s2 + $0x294] ss:$8 sps:$4 sm:$0xff]  }
  0x40   :  { %2684 = vmatprep.subr.bf16.mxu0 %v5400_v14  ;;  %2674 = vmatpush2.bf16.msra.mxu1 %v5397_v15  ;;  %v5487_v14 = vld [vmem:[%s7758_s2 + $0x394] ss:$8 sps:$4 sm:$0xff]   ;;  %v5482_v15 = vld [vmem:[%s7758_s2 + $0x290] ss:$8 sps:$4 sm:$0xff]  }
  0x41   :  { %2725 = vmatprep.subr.bf16.mxu1 %v5403_v17  ;;  %v5485_v17 = vld [vmem:[%s7758_s2 + $0x390] ss:$8 sps:$4 sm:$0xff]  }
  0x42   :  { %2635 = vmatmul.mubr.bf16.vlgmr.msra.gmra.mxu0 %v476_v13  ;;  %v5479_v13 = vld [vmem:[%s7758_s2 + $0x3a0] ss:$8 sps:$4 sm:$0xff]  }
  0x43   :  { %2685 = vmatpush1.bf16.msra.mxu0 %v5398_v18  ;;  %2716 = vmatprep.mubr.bf16.mxu0 %v497_v16  ;;  %v5490_v16 = vld [vmem:[%s7758_s2 + $0x284] ss:$8 sps:$4 sm:$0xff]  }
  0x44   :  { %2676 = vmatmul.mubr.bf16.vlgmr.msra.gmra.mxu1 %v498_v19  ;;  %2686 = vmatprep.subr.bf16.mxu0 %v5406_v20  ;;  %v5493_v18 = vld [vmem:[%s7758_s2 + $0x384] ss:$8 sps:$4 sm:$0xff]   ;;  %v5488_v19 = vld [vmem:[%s7758_s2 + $0x280] ss:$8 sps:$4 sm:$0xff]   ;;  %v483_v20 = vrot.slane %v6285_v5, %v6235_v48 }
  0x45   :  { %2726 = vmatpush1.bf16.msra.mxu1 %v5401_v21  ;;  %2757 = vmatprep.mubr.bf16.mxu1 %v501_v22  ;;  %v5496_v21 = vld [vmem:[%s7758_s2 + $0x474] ss:$8 sps:$4 sm:$0xff]   ;;  %v5491_v22 = vld [vmem:[%s7758_s2 + $0x380] ss:$8 sps:$4 sm:$0xff]  }
  0x46   :  { %2727 = vmatprep.subr.bf16.mxu1 %v5409_v23  ;;  %v5499_v23 = vld [vmem:[%s7758_s2 + $0x574] ss:$8 sps:$4 sm:$0xff]   ;;  %v499_v5 = vcombine.high %v483_v20, %v483_v20 }
  0x47   :  { %2687 = vmatpush1.bf16.msra.mxu0 %v5404_v24  ;;  %v5494_v24 = vld [vmem:[%s7758_s2 + $0x470] ss:$8 sps:$4 sm:$0xff]  }
  0x48   :  { %2688 = vmatprep.subr.bf16.mxu0 %v5412_v25  ;;  %v5502_v25 = vld [vmem:[%s7758_s2 + $0x464] ss:$8 sps:$4 sm:$0xff]  }
  0x49   :  { %2728 = vmatpush1.bf16.msra.mxu1 %v5407_v26  ;;  %v6521_v26 = vld [vmem:[%s7756_s0 + $0x8] sm:$0xff] }
  0x4a   :  { %2729 = vmatprep.subr.bf16.mxu1 %v5415_v27  ;;  %v5497_v27 = vld [vmem:[%s7758_s2 + $0x570] ss:$8 sps:$4 sm:$0xff]  }
  0x4b   :  { %2689 = vmatpush1.bf16.msra.mxu0 %v5410_v28  ;;  %v6528_v28 = vrot.slane %v6521_v26, %v6235_v48 }
  0x4c   :  { %2690 = vmatprep.subr.bf16.mxu0 %v5418_v29  ;;  %v5505_v29 = vld [vmem:[%s7758_s2 + $0x564] ss:$8 sps:$4 sm:$0xff]  }
  0x4d   :  { %2730 = vmatpush1.bf16.msra.mxu1 %v5413_v30  ;;  %v5500_v30 = vld [vmem:[%s7758_s2 + $0x460] ss:$8 sps:$4 sm:$0xff]  }
  0x4e   :  { %2731 = vmatprep.subr.bf16.mxu1 %v5421_v31  ;;  %v517_v31 = vcombine.high %v6528_v28, %v6528_v28 }
  0x4f   :  { %2691 = vmatpush1.bf16.msra.mxu0 %v5416_v32  ;;  %v5508_v32 = vld [vmem:[%s7758_s2 + $0x454] ss:$8 sps:$4 sm:$0xff]  }
  0x50   :  { %2692 = vmatprep.subr.bf16.mxu0 %v5424_v33  ;;  %v5503_v33 = vld [vmem:[%s7758_s2 + $0x560] ss:$8 sps:$4 sm:$0xff]  }
  0x51   :  { %2732 = vmatpush1.bf16.msra.mxu1 %v5419_v34  ;;  %v539_v34 = vrot.slane %v517_v31, %v6235_v48  ;;  %v5584_v31 = vld [vmem:[%s7758_s2 + $0x480] ss:$8 sps:$4 sm:$0xff]  }
  0x52   :  { %2733 = vmatprep.subr.bf16.mxu1 %v5427_v35  ;;  %v5511_v35 = vld [vmem:[%s7758_s2 + $0x554] ss:$8 sps:$4 sm:$0xff]  }
  0x53   :  { %2693 = vmatpush1.bf16.msra.mxu0 %v5422_v36  ;;  %v5506_v36 = vld [vmem:[%s7758_s2 + $0x450] ss:$8 sps:$4 sm:$0xff]  }
  0x54   :  { %2694 = vmatprep.subr.bf16.mxu0 %v5430_v37  ;;  %v549_v37 = vcombine.high %v539_v34, %v539_v34 }
  0x55   :  { %2734 = vmatpush1.bf16.msra.mxu1 %v5425_v38  ;;  %v5514_v38 = vld [vmem:[%s7758_s2 + $0x444] ss:$8 sps:$4 sm:$0xff]  }
  0x56   :  { %2735 = vmatprep.subr.bf16.mxu1 %v5433_v39  ;;  %v5509_v39 = vld [vmem:[%s7758_s2 + $0x550] ss:$8 sps:$4 sm:$0xff]  }
  0x57   :  { %2695 = vmatpush1.bf16.msra.mxu0 %v5428_v40  ;;  %v5517_v40 = vld [vmem:[%s7758_s2 + $0x544] ss:$8 sps:$4 sm:$0xff]  }
  0x58   :  { %2696 = vmatprep.subr.bf16.mxu0 %v5436_v41  ;;  %v5512_v41 = vld [vmem:[%s7758_s2 + $0x440] ss:$8 sps:$4 sm:$0xff]  }
  0x59   :  { %2736 = vmatpush1.bf16.msra.mxu1 %v5431_v43  ;;  %v5520_v43 = vld [vmem:[%s7758_s2 + $0x434] ss:$8 sps:$4 sm:$0xff]  }
  0x5a   :  { %2737 = vmatprep.subr.bf16.mxu1 %v5439_v44  ;;  %v5515_v44 = vld [vmem:[%s7758_s2 + $0x540] ss:$8 sps:$4 sm:$0xff]  }
  0x5b   :  { %2697 = vmatpush1.bf16.msra.mxu0 %v5434_v45  ;;  %v5523_v45 = vld [vmem:[%s7758_s2 + $0x534] ss:$8 sps:$4 sm:$0xff]  }
  0x5c   :  { %2698 = vmatprep.subr.bf16.mxu0 %v5442_v46  ;;  %v5518_v46 = vld [vmem:[%s7758_s2 + $0x430] ss:$8 sps:$4 sm:$0xff]  }
  0x5d   :  { %2738 = vmatpush1.bf16.msra.mxu1 %v5437_v47  ;;  %v5526_v47 = vld [vmem:[%s7758_s2 + $0x424] ss:$8 sps:$4 sm:$0xff]  }
  0x5e   :  { %2739 = vmatprep.subr.bf16.mxu1 %v5445_v49  ;;  %v5521_v49 = vld [vmem:[%s7758_s2 + $0x530] ss:$8 sps:$4 sm:$0xff]  }
  0x5f   :  { %2699 = vmatpush1.bf16.msra.mxu0 %v5440_v50  ;;  %v5529_v50 = vld [vmem:[%s7758_s2 + $0x524] ss:$8 sps:$4 sm:$0xff]  }
  0x60   :  { %2700 = vmatprep.subr.bf16.mxu0 %v5448_v51  ;;  %v5524_v51 = vld [vmem:[%s7758_s2 + $0x420] ss:$8 sps:$4 sm:$0xff]  }
  0x61   :  { %2740 = vmatpush1.bf16.msra.mxu1 %v5443_v52  ;;  %v5532_v52 = vld [vmem:[%s7758_s2 + $0x414] ss:$8 sps:$4 sm:$0xff]  }
  0x62   :  { %2741 = vmatprep.subr.bf16.mxu1 %v5451_v53  ;;  %v5527_v53 = vld [vmem:[%s7758_s2 + $0x520] ss:$8 sps:$4 sm:$0xff]  }
  0x63   :  { %2701 = vmatpush2.bf16.msra.mxu0 %v5446_v54  ;;  %v5535_v54 = vld [vmem:[%s7758_s2 + $0x514] ss:$8 sps:$4 sm:$0xff]  }
  0x64   :  { %2702 = vmatprep.subr.bf16.mxu0 %v5454_v55  ;;  %v5530_v55 = vld [vmem:[%s7758_s2 + $0x410] ss:$8 sps:$4 sm:$0xff]  }
  0x65   :  { %2742 = vmatpush2.bf16.msra.mxu1 %v5449_v56  ;;  %v5538_v56 = vld [vmem:[%s7758_s2 + $0x404] ss:$8 sps:$4 sm:$0xff]  }
  0x66   :  { %2743 = vmatprep.subr.bf16.mxu1 %v5457_v57  ;;  %v5533_v57 = vld [vmem:[%s7758_s2 + $0x510] ss:$8 sps:$4 sm:$0xff]  }
  0x67   :  { %2703 = vmatpush2.bf16.msra.mxu0 %v5452_v58  ;;  %v5541_v58 = vld [vmem:[%s7758_s2 + $0x504] ss:$8 sps:$4 sm:$0xff]  }
  0x68   :  { %2704 = vmatprep.subr.bf16.mxu0 %v5460_v59  ;;  %v5536_v59 = vld [vmem:[%s7758_s2 + $0x400] ss:$8 sps:$4 sm:$0xff]  }
  0x69   :  { %2744 = vmatpush2.bf16.msra.mxu1 %v5455_v60  ;;  %v5544_v60 = vld [vmem:[%s7758_s2 + $0x4f4] ss:$8 sps:$4 sm:$0xff]  }
  0x6a   :  { %2745 = vmatprep.subr.bf16.mxu1 %v5463_v61  ;;  %v5539_v61 = vld [vmem:[%s7758_s2 + $0x500] ss:$8 sps:$4 sm:$0xff]  }
  0x6b   :  { %2705 = vmatpush2.bf16.msra.mxu0 %v5458_v62  ;;  %v5547_v62 = vld [vmem:[%s7758_s2 + $0x5f4] ss:$8 sps:$4 sm:$0xff]  }
  0x6c   :  { %2706 = vmatprep.subr.bf16.mxu0 %v5466_v63  ;;  %v5542_v63 = vld [vmem:[%s7758_s2 + $0x4f0] ss:$8 sps:$4 sm:$0xff]  }
  0x6d   :  { %2746 = vmatpush2.bf16.msra.mxu1 %v5461_v0  ;;  %v5550_v0 = vld [vmem:[%s7758_s2 + $0x4e4] ss:$8 sps:$4 sm:$0xff]  }
  0x6e   :  { %2747 = vmatprep.subr.bf16.mxu1 %v5469_v1  ;;  %v5545_v1 = vld [vmem:[%s7758_s2 + $0x5f0] ss:$8 sps:$4 sm:$0xff]  }
  0x6f   :  { %2707 = vmatpush2.bf16.msra.mxu0 %v5464_v2  ;;  %v5553_v2 = vld [vmem:[%s7758_s2 + $0x5e4] ss:$8 sps:$4 sm:$0xff]  }
  0x70   :  { %2708 = vmatprep.subr.bf16.mxu0 %v5472_v3  ;;  %v5548_v3 = vld [vmem:[%s7758_s2 + $0x4e0] ss:$8 sps:$4 sm:$0xff]  }
  0x71   :  { %2748 = vmatpush2.bf16.msra.mxu1 %v5467_v4  ;;  %v5556_v4 = vld [vmem:[%s7758_s2 + $0x4d4] ss:$8 sps:$4 sm:$0xff]  }
  0x72   :  { %2749 = vmatprep.subr.bf16.mxu1 %v5475_v6  ;;  %v5551_v6 = vld [vmem:[%s7758_s2 + $0x5e0] ss:$8 sps:$4 sm:$0xff]  }
  0x73   :  { %2709 = vmatpush2.bf16.msra.mxu0 %v5470_v7  ;;  %v5559_v7 = vld [vmem:[%s7758_s2 + $0x5d4] ss:$8 sps:$4 sm:$0xff]  }
  0x74   :  { %2710 = vmatprep.subr.bf16.mxu0 %v5478_v8  ;;  %v5554_v8 = vld [vmem:[%s7758_s2 + $0x4d0] ss:$8 sps:$4 sm:$0xff]  }
  0x75   :  { %2750 = vmatpush2.bf16.msra.mxu1 %v5473_v9  ;;  %v5562_v9 = vld [vmem:[%s7758_s2 + $0x4c4] ss:$8 sps:$4 sm:$0xff]  }
  0x76   :  { %2751 = vmatprep.subr.bf16.mxu1 %v5481_v10  ;;  %v5557_v10 = vld [vmem:[%s7758_s2 + $0x5d0] ss:$8 sps:$4 sm:$0xff]  }
  0x77   :  { %2711 = vmatpush2.bf16.msra.mxu0 %v5476_v11  ;;  %v5565_v11 = vld [vmem:[%s7758_s2 + $0x5c4] ss:$8 sps:$4 sm:$0xff]  }
  0x78   :  { %2712 = vmatprep.subr.bf16.mxu0 %v5484_v12  ;;  %v5560_v12 = vld [vmem:[%s7758_s2 + $0x4c0] ss:$8 sps:$4 sm:$0xff]  }
  0x79   :  { %2752 = vmatpush2.bf16.msra.mxu1 %v5479_v13  ;;  %v5568_v13 = vld [vmem:[%s7758_s2 + $0x4b4] ss:$8 sps:$4 sm:$0xff]  }
  0x7a   :  { %2753 = vmatprep.subr.bf16.mxu1 %v5487_v14  ;;  %v5563_v14 = vld [vmem:[%s7758_s2 + $0x5c0] ss:$8 sps:$4 sm:$0xff]  }
  0x7b   :  { %2713 = vmatpush2.bf16.msra.mxu0 %v5482_v15  ;;  %v5571_v15 = vld [vmem:[%s7758_s2 + $0x5b4] ss:$8 sps:$4 sm:$0xff]  }
  0x7c   :  { %2714 = vmatprep.subr.bf16.mxu0 %v5490_v16  ;;  %v5566_v16 = vld [vmem:[%s7758_s2 + $0x4b0] ss:$8 sps:$4 sm:$0xff]  }
  0x7d   :  { %2754 = vmatpush2.bf16.msra.mxu1 %v5485_v17  ;;  %v5574_v17 = vld [vmem:[%s7758_s2 + $0x4a4] ss:$8 sps:$4 sm:$0xff]  }
  0x7e   :  { %2755 = vmatprep.subr.bf16.mxu1 %v5493_v18  ;;  %v5569_v18 = vld [vmem:[%s7758_s2 + $0x5b0] ss:$8 sps:$4 sm:$0xff]  }
  0x7f   :  { %2715 = vmatpush2.bf16.msra.mxu0 %v5488_v19  ;;  %v502_v19 = vcombine.high %v6521_v26, %v6521_v26  ;;  %v5586_v26 = vld [vmem:[%s7758_s2 + $0x484] ss:$8 sps:$4 sm:$0xff]  }
  0x80   :  { %2766 = vmatprep.subr.bf16.mxu0 %v5496_v21  ;;  %v5572_v21 = vld [vmem:[%s7758_s2 + $0x4a0] ss:$8 sps:$4 sm:$0xff]  }
  0x81   :  { %2756 = vmatpush2.bf16.msra.mxu1 %v5491_v22  ;;  %v5580_v22 = vld [vmem:[%s7758_s2 + $0x494] ss:$8 sps:$4 sm:$0xff]  }
  0x82   :  { %2717 = vmatmul.mubr.bf16.vlgmr.msra.gmra.mxu0 %v483_v20  ;;  %2807 = vmatprep.subr.bf16.mxu1 %v5499_v23  ;;  %v5577_v20 = vld [vmem:[%s7758_s2 + $0x5a4] ss:$8 sps:$4 sm:$0xff]   ;;  %v5575_v23 = vld [vmem:[%s7758_s2 + $0x5a0] ss:$8 sps:$4 sm:$0xff]  }
  0x83   :  { %2767 = vmatpush1.bf16.msra.mxu0 %v5494_v24  ;;  %2798 = vmatprep.mubr.bf16.mxu0 %v539_v34  ;;  %v6692_v24 = vrot.slane %v502_v19, %v6235_v48  ;;  %v5587_v34 = vld [vmem:[%s7758_s2 + $0x580] ss:$8 sps:$4 sm:$0xff]   ;;  %v5653_v19 = vld [vmem:[%s7758_s2 + $0x7d0] ss:$8 sps:$4 sm:$0xff]  }
  0x84   :  { %2758 = vmatmul.mubr.bf16.vlgmr.msra.gmra.mxu1 %v499_v5  ;;  %2768 = vmatprep.subr.bf16.mxu0 %v5502_v25  ;;  %v5583_v5 = vld [vmem:[%s7758_s2 + $0x594] ss:$8 sps:$4 sm:$0xff]   ;;  %v5578_v25 = vld [vmem:[%s7758_s2 + $0x490] ss:$8 sps:$4 sm:$0xff]  }
  0x85   :  { %2808 = vmatpush1.bf16.msra.mxu1 %v5497_v27  ;;  %2839 = vmatprep.mubr.bf16.mxu1 %v549_v37  ;;  %v5581_v27 = vld [vmem:[%s7758_s2 + $0x590] ss:$8 sps:$4 sm:$0xff]  }
  0x86   :  { %2809 = vmatprep.subr.bf16.mxu1 %v5505_v29  ;;  %v518_v29 = vcombine.high %v6692_v24, %v6692_v24 }
  0x87   :  { %2769 = vmatpush1.bf16.msra.mxu0 %v5500_v30  ;;  %v5589_v30 = vld [vmem:[%s7758_s2 + $0x584] ss:$8 sps:$4 sm:$0xff]  }
  0x88   :  { %2770 = vmatprep.subr.bf16.mxu0 %v5508_v32  ;;  %v525_v32 = vrot.slane %v6528_v28, %v6235_v48  ;;  %v5590_v28 = vld [vmem:[%s7758_s2 + $0x670] ss:$8 sps:$4 sm:$0xff]  }
  0x89   :  { %2810 = vmatpush1.bf16.msra.mxu1 %v5503_v33  ;;  %v5592_v33 = vld [vmem:[%s7758_s2 + $0x674] ss:$8 sps:$4 sm:$0xff]  }
  0x8a   :  { %2811 = vmatprep.subr.bf16.mxu1 %v5511_v35  ;;  %v546_v35 = vrot.slane %v518_v29, %v6235_v48  ;;  %v547_v37 = vcombine.high %v525_v32, %v525_v32  ;;  %v5673_v29 = vld [vmem:[%s7758_s2 + $0x7a4] ss:$8 sps:$4 sm:$0xff]  }
  0x8b   :  { %2771 = vmatpush1.bf16.msra.mxu0 %v5506_v36  ;;  %v5595_v36 = vld [vmem:[%s7758_s2 + $0x774] ss:$8 sps:$4 sm:$0xff]  }
  0x8c   :  { %2772 = vmatprep.subr.bf16.mxu0 %v5514_v38  ;;  %v5598_v38 = vld [vmem:[%s7758_s2 + $0x664] ss:$8 sps:$4 sm:$0xff]  }
  0x8d   :  { %2812 = vmatpush1.bf16.msra.mxu1 %v5509_v39  ;;  %v5593_v39 = vld [vmem:[%s7758_s2 + $0x770] ss:$8 sps:$4 sm:$0xff]  }
  0x8e   :  { %2813 = vmatprep.subr.bf16.mxu1 %v5517_v40  ;;  %v550_v40 = vcombine.high %v546_v35, %v546_v35 }
  0x8f   :  { %2773 = vmatpush1.bf16.msra.mxu0 %v5512_v41  ;;  %v5601_v41 = vld [vmem:[%s7758_s2 + $0x764] ss:$8 sps:$4 sm:$0xff]  }
  0x90   :  { %2774 = vmatprep.subr.bf16.mxu0 %v5520_v43  ;;  %v5596_v43 = vld [vmem:[%s7758_s2 + $0x660] ss:$8 sps:$4 sm:$0xff]  }
  0x91   :  { %2814 = vmatpush1.bf16.msra.mxu1 %v5515_v44  ;;  %v5604_v44 = vld [vmem:[%s7758_s2 + $0x654] ss:$8 sps:$4 sm:$0xff]  }
  0x92   :  { %2815 = vmatprep.subr.bf16.mxu1 %v5523_v45  ;;  %v5599_v45 = vld [vmem:[%s7758_s2 + $0x760] ss:$8 sps:$4 sm:$0xff]  }
  0x93   :  { %2775 = vmatpush1.bf16.msra.mxu0 %v5518_v46  ;;  %v5607_v46 = vld [vmem:[%s7758_s2 + $0x754] ss:$8 sps:$4 sm:$0xff]  }
  0x94   :  { %2776 = vmatprep.subr.bf16.mxu0 %v5526_v47  ;;  %v5602_v47 = vld [vmem:[%s7758_s2 + $0x650] ss:$8 sps:$4 sm:$0xff]  }
  0x95   :  { %2816 = vmatpush1.bf16.msra.mxu1 %v5521_v49  ;;  %v5610_v49 = vld [vmem:[%s7758_s2 + $0x644] ss:$8 sps:$4 sm:$0xff]  }
  0x96   :  { %2817 = vmatprep.subr.bf16.mxu1 %v5529_v50  ;;  %v5605_v50 = vld [vmem:[%s7758_s2 + $0x750] ss:$8 sps:$4 sm:$0xff]  }
  0x97   :  { %2777 = vmatpush1.bf16.msra.mxu0 %v5524_v51  ;;  %v5613_v51 = vld [vmem:[%s7758_s2 + $0x744] ss:$8 sps:$4 sm:$0xff]  }
  0x98   :  { %2778 = vmatprep.subr.bf16.mxu0 %v5532_v52  ;;  %v5608_v52 = vld [vmem:[%s7758_s2 + $0x640] ss:$8 sps:$4 sm:$0xff]  }
  0x99   :  { %2818 = vmatpush1.bf16.msra.mxu1 %v5527_v53  ;;  %v5616_v53 = vld [vmem:[%s7758_s2 + $0x634] ss:$8 sps:$4 sm:$0xff]  }
  0x9a   :  { %2819 = vmatprep.subr.bf16.mxu1 %v5535_v54  ;;  %v5611_v54 = vld [vmem:[%s7758_s2 + $0x740] ss:$8 sps:$4 sm:$0xff]  }
  0x9b   :  { %2779 = vmatpush1.bf16.msra.mxu0 %v5530_v55  ;;  %v5619_v55 = vld [vmem:[%s7758_s2 + $0x734] ss:$8 sps:$4 sm:$0xff]  }
  0x9c   :  { %2780 = vmatprep.subr.bf16.mxu0 %v5538_v56  ;;  %v5614_v56 = vld [vmem:[%s7758_s2 + $0x630] ss:$8 sps:$4 sm:$0xff]  }
  0x9d   :  { %2820 = vmatpush1.bf16.msra.mxu1 %v5533_v57  ;;  %v5622_v57 = vld [vmem:[%s7758_s2 + $0x624] ss:$8 sps:$4 sm:$0xff]  }
  0x9e   :  { %2821 = vmatprep.subr.bf16.mxu1 %v5541_v58  ;;  %v5617_v58 = vld [vmem:[%s7758_s2 + $0x730] ss:$8 sps:$4 sm:$0xff]  }
  0x9f   :  { %2781 = vmatpush1.bf16.msra.mxu0 %v5536_v59  ;;  %v5625_v59 = vld [vmem:[%s7758_s2 + $0x724] ss:$8 sps:$4 sm:$0xff]  }
  0xa0   :  { %2782 = vmatprep.subr.bf16.mxu0 %v5544_v60  ;;  %v5620_v60 = vld [vmem:[%s7758_s2 + $0x620] ss:$8 sps:$4 sm:$0xff]  }
  0xa1   :  { %2822 = vmatpush1.bf16.msra.mxu1 %v5539_v61  ;;  %v5628_v61 = vld [vmem:[%s7758_s2 + $0x614] ss:$8 sps:$4 sm:$0xff]  }
  0xa2   :  { %2823 = vmatprep.subr.bf16.mxu1 %v5547_v62  ;;  %v5623_v62 = vld [vmem:[%s7758_s2 + $0x720] ss:$8 sps:$4 sm:$0xff]  }
  0xa3   :  { %2783 = vmatpush2.bf16.msra.mxu0 %v5542_v63  ;;  %v5631_v63 = vld [vmem:[%s7758_s2 + $0x714] ss:$8 sps:$4 sm:$0xff]  }
  0xa4   :  { %2784 = vmatprep.subr.bf16.mxu0 %v5550_v0  ;;  %v5626_v0 = vld [vmem:[%s7758_s2 + $0x610] ss:$8 sps:$4 sm:$0xff]  }
  0xa5   :  { %2824 = vmatpush2.bf16.msra.mxu1 %v5545_v1  ;;  %v5634_v1 = vld [vmem:[%s7758_s2 + $0x604] ss:$8 sps:$4 sm:$0xff]  }
  0xa6   :  { %2825 = vmatprep.subr.bf16.mxu1 %v5553_v2  ;;  %v5629_v2 = vld [vmem:[%s7758_s2 + $0x710] ss:$8 sps:$4 sm:$0xff]  }
  0xa7   :  { %2785 = vmatpush2.bf16.msra.mxu0 %v5548_v3  ;;  %v5637_v3 = vld [vmem:[%s7758_s2 + $0x704] ss:$8 sps:$4 sm:$0xff]  }
  0xa8   :  { %2786 = vmatprep.subr.bf16.mxu0 %v5556_v4  ;;  %v5632_v4 = vld [vmem:[%s7758_s2 + $0x600] ss:$8 sps:$4 sm:$0xff]  }
  0xa9   :  { %2826 = vmatpush2.bf16.msra.mxu1 %v5551_v6  ;;  %v5640_v6 = vld [vmem:[%s7758_s2 + $0x6f4] ss:$8 sps:$4 sm:$0xff]  }
  0xaa   :  { %2827 = vmatprep.subr.bf16.mxu1 %v5559_v7  ;;  %v5635_v7 = vld [vmem:[%s7758_s2 + $0x700] ss:$8 sps:$4 sm:$0xff]  }
  0xab   :  { %2787 = vmatpush2.bf16.msra.mxu0 %v5554_v8  ;;  %v5643_v8 = vld [vmem:[%s7758_s2 + $0x7f4] ss:$8 sps:$4 sm:$0xff]  }
  0xac   :  { %2788 = vmatprep.subr.bf16.mxu0 %v5562_v9  ;;  %v5638_v9 = vld [vmem:[%s7758_s2 + $0x6f0] ss:$8 sps:$4 sm:$0xff]  }
  0xad   :  { %2828 = vmatpush2.bf16.msra.mxu1 %v5557_v10  ;;  %v5646_v10 = vld [vmem:[%s7758_s2 + $0x6e4] ss:$8 sps:$4 sm:$0xff]  }
  0xae   :  { %2829 = vmatprep.subr.bf16.mxu1 %v5565_v11  ;;  %v5641_v11 = vld [vmem:[%s7758_s2 + $0x7f0] ss:$8 sps:$4 sm:$0xff]  }
  0xaf   :  { %2789 = vmatpush2.bf16.msra.mxu0 %v5560_v12  ;;  %v5649_v12 = vld [vmem:[%s7758_s2 + $0x7e4] ss:$8 sps:$4 sm:$0xff]  }
  0xb0   :  { %2790 = vmatprep.subr.bf16.mxu0 %v5568_v13  ;;  %v5644_v13 = vld [vmem:[%s7758_s2 + $0x6e0] ss:$8 sps:$4 sm:$0xff]  }
  0xb1   :  { %2830 = vmatpush2.bf16.msra.mxu1 %v5563_v14  ;;  %v5652_v14 = vld [vmem:[%s7758_s2 + $0x6d4] ss:$8 sps:$4 sm:$0xff]  }
  0xb2   :  { %2831 = vmatprep.subr.bf16.mxu1 %v5571_v15  ;;  %v5647_v15 = vld [vmem:[%s7758_s2 + $0x7e0] ss:$8 sps:$4 sm:$0xff]  }
  0xb3   :  { %2791 = vmatpush2.bf16.msra.mxu0 %v5566_v16  ;;  %v5655_v16 = vld [vmem:[%s7758_s2 + $0x7d4] ss:$8 sps:$4 sm:$0xff]  }
  0xb4   :  { %2792 = vmatprep.subr.bf16.mxu0 %v5574_v17  ;;  %v5650_v17 = vld [vmem:[%s7758_s2 + $0x6d0] ss:$8 sps:$4 sm:$0xff]  }
  0xb5   :  { %2832 = vmatpush2.bf16.msra.mxu1 %v5569_v18  ;;  %v5658_v18 = vld [vmem:[%s7758_s2 + $0x6c4] ss:$8 sps:$4 sm:$0xff]  }
  0xb6   :  { %2833 = vmatprep.subr.bf16.mxu1 %v5577_v20  ;;  %v5661_v20 = vld [vmem:[%s7758_s2 + $0x7c4] ss:$8 sps:$4 sm:$0xff]  }
  0xb7   :  { %2793 = vmatpush2.bf16.msra.mxu0 %v5572_v21  ;;  %v5656_v21 = vld [vmem:[%s7758_s2 + $0x6c0] ss:$8 sps:$4 sm:$0xff]  }
  0xb8   :  { %2794 = vmatprep.subr.bf16.mxu0 %v5580_v22  ;;  %v5664_v22 = vld [vmem:[%s7758_s2 + $0x6b4] ss:$8 sps:$4 sm:$0xff]  }
  0xb9   :  { %2834 = vmatpush2.bf16.msra.mxu1 %v5575_v23  ;;  %v5659_v23 = vld [vmem:[%s7758_s2 + $0x7c0] ss:$8 sps:$4 sm:$0xff]  }
  0xba   :  { %2835 = vmatprep.subr.bf16.mxu1 %v5583_v5  ;;  %v5667_v5 = vld [vmem:[%s7758_s2 + $0x7b4] ss:$8 sps:$4 sm:$0xff]  }
  0xbb   :  { %2795 = vmatpush2.bf16.msra.mxu0 %v5578_v25  ;;  %v5662_v25 = vld [vmem:[%s7758_s2 + $0x6b0] ss:$8 sps:$4 sm:$0xff]  }
  0xbc   :  { %2796 = vmatprep.subr.bf16.mxu0 %v5586_v26  ;;  %v5670_v26 = vld [vmem:[%s7758_s2 + $0x6a4] ss:$8 sps:$4 sm:$0xff]  }
  0xbd   :  { %2836 = vmatpush2.bf16.msra.mxu1 %v5581_v27  ;;  %v5665_v27 = vld [vmem:[%s7758_s2 + $0x7b0] ss:$8 sps:$4 sm:$0xff]  }
  0xbe   :  { %2837 = vmatprep.subr.bf16.mxu1 %v5589_v30  ;;  %v6885_v30 = vld [vmem:[%s7756_s0 + $0x10] sm:$0xff] }
  0xbf   :  { %2797 = vmatpush2.bf16.msra.mxu0 %v5584_v31  ;;  %v5668_v31 = vld [vmem:[%s7758_s2 + $0x6a0] ss:$8 sps:$4 sm:$0xff]  }
  0xc0   :  { %2848 = vmatprep.subr.bf16.mxu0 %v5592_v33  ;;  %v5671_v33 = vld [vmem:[%s7758_s2 + $0x7a0] ss:$8 sps:$4 sm:$0xff]  }
  0xc1   :  { %2838 = vmatpush2.bf16.msra.mxu1 %v5587_v34  ;;  %v6898_v34 = vrot.slane %v6885_v30, %v6235_v48 }
  0xc2   :  { %2799 = vmatmul.mubr.bf16.vlgmr.msra.gmra.mxu0 %v525_v32  ;;  %2889 = vmatprep.subr.bf16.mxu1 %v5595_v36  ;;  %v5676_v32 = vld [vmem:[%s7758_s2 + $0x694] ss:$8 sps:$4 sm:$0xff]   ;;  %v5674_v36 = vld [vmem:[%s7758_s2 + $0x690] ss:$8 sps:$4 sm:$0xff]  }
  0xc3   :  { %2849 = vmatpush1.bf16.msra.mxu0 %v5590_v28  ;;  %2880 = vmatprep.mubr.bf16.mxu0 %v546_v35  ;;  %v5679_v35 = vld [vmem:[%s7758_s2 + $0x794] ss:$8 sps:$4 sm:$0xff]   ;;  %v5682_v28 = vld [vmem:[%s7758_s2 + $0x684] ss:$8 sps:$4 sm:$0xff]  }
  0xc4   :  { %2840 = vmatmul.mubr.bf16.vlgmr.msra.gmra.mxu1 %v547_v37  ;;  %2850 = vmatprep.subr.bf16.mxu0 %v5598_v38  ;;  %v5677_v37 = vld [vmem:[%s7758_s2 + $0x790] ss:$8 sps:$4 sm:$0xff]   ;;  %v566_v38 = vcombine.high %v6898_v34, %v6898_v34 }
  0xc5   :  { %2890 = vmatpush1.bf16.msra.mxu1 %v5593_v39  ;;  %2921 = vmatprep.mubr.bf16.mxu1 %v550_v40  ;;  %v5685_v39 = vld [vmem:[%s7758_s2 + $0x784] ss:$8 sps:$4 sm:$0xff]   ;;  %v5680_v40 = vld [vmem:[%s7758_s2 + $0x680] ss:$8 sps:$4 sm:$0xff]  }
  0xc6   :  { %2891 = vmatprep.subr.bf16.mxu1 %v5601_v41  ;;  %v437_v41 = vld [vmem:[%s7759_s3] sm:$0x3] }
  0xc7   :  { %2851 = vmatpush1.bf16.msra.mxu0 %v5596_v43  ;;  %v6924_v43 = vsub.s32 0, %v6220_v42 }
  0xc8   :  { %2852 = vmatprep.subr.bf16.mxu0 %v5604_v44  ;;  %v532_v44 = vrot.slane %v6692_v24, %v6235_v48 }
  0xc9   :  { %2892 = vmatpush1.bf16.msra.mxu1 %v5599_v45  ;;  %v5689_v45 = vld [vmem:[%s7758_s2 + $0x874] ss:$8 sps:$4 sm:$0xff]   ;;  %v442_v24 = vrot.slane %v437_v41, %v6924_v43 }
  0xca   :  { %2893 = vmatprep.subr.bf16.mxu1 %v5607_v46  ;;  %v5683_v46 = vld [vmem:[%s7758_s2 + $0x780] ss:$8 sps:$4 sm:$0xff]  }
  0xcb   :  { %2853 = vmatpush1.bf16.msra.mxu0 %v5602_v47  ;;  %v6935_v47 = vsub.s32 1, %v6220_v42 }
  0xcc   :  { %2854 = vmatprep.subr.bf16.mxu0 %v5610_v49  ;;  %v588_v49 = vrot.slane %v566_v38, %v6235_v48  ;;  %v5743_v38 = vld [vmem:[%s7758_s2 + $0x8e4] ss:$8 sps:$4 sm:$0xff]  }
  0xcd   :  { %2894 = vmatpush1.bf16.msra.mxu1 %v5605_v50  ;;  %v5692_v50 = vld [vmem:[%s7758_s2 + $0x974] ss:$8 sps:$4 sm:$0xff]  }
  0xce   :  { %2895 = vmatprep.subr.bf16.mxu1 %v5613_v51  ;;  %v5687_v51 = vld [vmem:[%s7758_s2 + $0x870] ss:$8 sps:$4 sm:$0xff]  }
  0xcf   :  { %2855 = vmatpush1.bf16.msra.mxu0 %v5608_v52  ;;  %v548_v52 = vcombine.high %v532_v44, %v532_v44 }
  0xd0   :  { %2856 = vmatprep.subr.bf16.mxu0 %v5616_v53  ;;  %v5695_v53 = vld [vmem:[%s7758_s2 + $0x864] ss:$8 sps:$4 sm:$0xff]  }
  0xd1   :  { %2896 = vmatpush1.bf16.msra.mxu1 %v5611_v54  ;;  %v446_v54 = vrot.slane %v437_v41, %v6935_v47  ;;  %v5741_v41 = vld [vmem:[%s7758_s2 + $0x8e0] ss:$8 sps:$4 sm:$0xff]  }
  0xd2   :  { %2897 = vmatprep.subr.bf16.mxu1 %v5619_v55  ;;  %v5690_v55 = vld [vmem:[%s7758_s2 + $0x970] ss:$8 sps:$4 sm:$0xff]  }
  0xd3   :  { %2857 = vmatpush1.bf16.msra.mxu0 %v5614_v56  ;;  %v598_v56 = vcombine.high %v588_v49, %v588_v49 }
  0xd4   :  { %2858 = vmatprep.subr.bf16.mxu0 %v5622_v57 }
  0xd5   :  { %2898 = vmatpush1.bf16.msra.mxu1 %v5617_v58  ;;  %v5693_v58 = vld [vmem:[%s7758_s2 + $0x860] ss:$8 sps:$4 sm:$0xff]  }
  0xd6   :  { %2899 = vmatprep.subr.bf16.mxu1 %v5625_v59  ;;  %v5698_v59 = vld [vmem:[%s7758_s2 + $0x964] ss:$8 sps:$4 sm:$0xff]  }
  0xd7   :  { %2859 = vmatpush1.bf16.msra.mxu0 %v5620_v60 }
  0xd8   :  { %2860 = vmatprep.subr.bf16.mxu0 %v5628_v61  ;;  %v5696_v61 = vld [vmem:[%s7758_s2 + $0x960] ss:$8 sps:$4 sm:$0xff]  }
  0xd9   :  { %2900 = vmatpush1.bf16.msra.mxu1 %v5623_v62 }
  0xda   :  { %2901 = vmatprep.subr.bf16.mxu1 %v5631_v63 }
  0xdb   :  { %2861 = vmatpush1.bf16.msra.mxu0 %v5626_v0  ;;  %v5701_v0 = vld [vmem:[%s7758_s2 + $0x854] ss:$8 sps:$4 sm:$0xff]  }
  0xdc   :  { %2862 = vmatprep.subr.bf16.mxu0 %v5634_v1 }
  0xdd   :  { %2902 = vmatpush1.bf16.msra.mxu1 %v5629_v2 }
  0xde   :  { %2903 = vmatprep.subr.bf16.mxu1 %v5637_v3  ;;  %v5699_v3 = vld [vmem:[%s7758_s2 + $0x850] ss:$8 sps:$4 sm:$0xff]  }
  0xdf   :  { %2863 = vmatpush1.bf16.msra.mxu0 %v5632_v4  ;;  %v5704_v4 = vld [vmem:[%s7758_s2 + $0x954] ss:$8 sps:$4 sm:$0xff]  }
  0xe0   :  { %2864 = vmatprep.subr.bf16.mxu0 %v5640_v6 }
  0xe1   :  { %2904 = vmatpush1.bf16.msra.mxu1 %v5635_v7 }
  0xe2   :  { %2905 = vmatprep.subr.bf16.mxu1 %v5643_v8 }
  0xe3   :  { %2865 = vmatpush2.bf16.msra.mxu0 %v5638_v9  ;;  %v5702_v9 = vld [vmem:[%s7758_s2 + $0x950] ss:$8 sps:$4 sm:$0xff]  }
  0xe4   :  { %2866 = vmatprep.subr.bf16.mxu0 %v5646_v10 }
  0xe5   :  { %2906 = vmatpush2.bf16.msra.mxu1 %v5641_v11  ;;  %v5707_v11 = vld [vmem:[%s7758_s2 + $0x844] ss:$8 sps:$4 sm:$0xff]  }
  0xe6   :  { %2907 = vmatprep.subr.bf16.mxu1 %v5649_v12 }
  0xe7   :  { %2867 = vmatpush2.bf16.msra.mxu0 %v5644_v13  ;;  %v5710_v13 = vld [vmem:[%s7758_s2 + $0x944] ss:$8 sps:$4 sm:$0xff]  }
  0xe8   :  { %2868 = vmatprep.subr.bf16.mxu0 %v5652_v14  ;;  %v5705_v14 = vld [vmem:[%s7758_s2 + $0x840] ss:$8 sps:$4 sm:$0xff]  }
  0xe9   :  { %2908 = vmatpush2.bf16.msra.mxu1 %v5647_v15 }
  0xea   :  { %2909 = vmatprep.subr.bf16.mxu1 %v5655_v16  ;;  %v5708_v16 = vld [vmem:[%s7758_s2 + $0x940] ss:$8 sps:$4 sm:$0xff]  }
  0xeb   :  { %2869 = vmatpush2.bf16.msra.mxu0 %v5650_v17  ;;  %v5713_v17 = vld [vmem:[%s7758_s2 + $0x834] ss:$8 sps:$4 sm:$0xff]  }
  0xec   :  { %2870 = vmatprep.subr.bf16.mxu0 %v5658_v18  ;;  %v5716_v18 = vld [vmem:[%s7758_s2 + $0x934] ss:$8 sps:$4 sm:$0xff]  }
  0xed   :  { %2910 = vmatpush2.bf16.msra.mxu1 %v5653_v19  ;;  %v5711_v19 = vld [vmem:[%s7758_s2 + $0x830] ss:$8 sps:$4 sm:$0xff]  }
  0xee   :  { %2911 = vmatprep.subr.bf16.mxu1 %v5661_v20  ;;  %v5714_v20 = vld [vmem:[%s7758_s2 + $0x930] ss:$8 sps:$4 sm:$0xff]  }
  0xef   :  { %2871 = vmatpush2.bf16.msra.mxu0 %v5656_v21  ;;  %v5719_v21 = vld [vmem:[%s7758_s2 + $0x824] ss:$8 sps:$4 sm:$0xff]  }
  0xf0   :  { %2872 = vmatprep.subr.bf16.mxu0 %v5664_v22  ;;  %v5722_v22 = vld [vmem:[%s7758_s2 + $0x924] ss:$8 sps:$4 sm:$0xff]  }
  0xf1   :  { %2912 = vmatpush2.bf16.msra.mxu1 %v5659_v23  ;;  %v5717_v23 = vld [vmem:[%s7758_s2 + $0x820] ss:$8 sps:$4 sm:$0xff]  }
  0xf2   :  { %2913 = vmatprep.subr.bf16.mxu1 %v5667_v5  ;;  %v5725_v5 = vld [vmem:[%s7758_s2 + $0x814] ss:$8 sps:$4 sm:$0xff]  }
  0xf3   :  { %2873 = vmatpush2.bf16.msra.mxu0 %v5662_v25  ;;  %v5720_v25 = vld [vmem:[%s7758_s2 + $0x920] ss:$8 sps:$4 sm:$0xff]  }
  0xf4   :  { %2874 = vmatprep.subr.bf16.mxu0 %v5670_v26  ;;  %v5728_v26 = vld [vmem:[%s7758_s2 + $0x914] ss:$8 sps:$4 sm:$0xff]  }
  0xf5   :  { %2914 = vmatpush2.bf16.msra.mxu1 %v5665_v27  ;;  %v5723_v27 = vld [vmem:[%s7758_s2 + $0x810] ss:$8 sps:$4 sm:$0xff]  }
  0xf6   :  { %2915 = vmatprep.subr.bf16.mxu1 %v5673_v29  ;;  %v5731_v29 = vld [vmem:[%s7758_s2 + $0x804] ss:$8 sps:$4 sm:$0xff]  }
  0xf7   :  { %2875 = vmatpush2.bf16.msra.mxu0 %v5668_v31  ;;  %v5726_v31 = vld [vmem:[%s7758_s2 + $0x910] ss:$8 sps:$4 sm:$0xff]  }
  0xf8   :  { %2876 = vmatprep.subr.bf16.mxu0 %v5676_v32  ;;  %v5734_v32 = vld [vmem:[%s7758_s2 + $0x904] ss:$8 sps:$4 sm:$0xff]  }
  0xf9   :  { %2916 = vmatpush2.bf16.msra.mxu1 %v5671_v33  ;;  %v5729_v33 = vld [vmem:[%s7758_s2 + $0x800] ss:$8 sps:$4 sm:$0xff]  }
  0xfa   :  { %2917 = vmatprep.subr.bf16.mxu1 %v5679_v35  ;;  %v5737_v35 = vld [vmem:[%s7758_s2 + $0x8f4] ss:$8 sps:$4 sm:$0xff]  }
  0xfb   :  { %2877 = vmatpush2.bf16.msra.mxu0 %v5674_v36  ;;  %v5732_v36 = vld [vmem:[%s7758_s2 + $0x900] ss:$8 sps:$4 sm:$0xff]  }
  0xfc   :  { %2878 = vmatprep.subr.bf16.mxu0 %v5682_v28  ;;  %v5740_v28 = vld [vmem:[%s7758_s2 + $0x9f4] ss:$8 sps:$4 sm:$0xff]  }
  0xfd   :  { %2918 = vmatpush2.bf16.msra.mxu1 %v5677_v37  ;;  %v5735_v37 = vld [vmem:[%s7758_s2 + $0x8f0] ss:$8 sps:$4 sm:$0xff]  }
  0xfe   :  { %2919 = vmatprep.subr.bf16.mxu1 %v5685_v39  ;;  %v5738_v39 = vld [vmem:[%s7758_s2 + $0x9f0] ss:$8 sps:$4 sm:$0xff]  }
  0xff   :  { %2879 = vmatpush2.bf16.msra.mxu0 %v5680_v40  ;;  %v5746_v40 = vld [vmem:[%s7758_s2 + $0x9e4] ss:$8 sps:$4 sm:$0xff]  }
 0x100   :  { %2930 = vmatprep.subr.bf16.mxu0 %v5689_v45  ;;  %v5744_v45 = vld [vmem:[%s7758_s2 + $0x9e0] ss:$8 sps:$4 sm:$0xff]  }
 0x101   :  { %2920 = vmatpush2.bf16.msra.mxu1 %v5683_v46  ;;  %v5752_v46 = vld [vmem:[%s7758_s2 + $0x9d4] ss:$8 sps:$4 sm:$0xff]  }
 0x102   :  { %v2636_v57 = vpop.f32.mrf.mxu0  ;;  %2881 = vmatmul.mubr.bf16.vlgmr.msra.gmra.mxu0 %v532_v44  ;;  %2971 = vmatprep.subr.bf16.mxu1 %v5692_v50  ;;  %v5749_v44 = vld [vmem:[%s7758_s2 + $0x8d4] ss:$8 sps:$4 sm:$0xff]  }
 0x103   :  { %v2637_v60 = vadd.f32 %v2636_v57, %v442_v24  ;;  %2931 = vmatpush1.bf16.msra.mxu0 %v5687_v51  ;;  %2962 = vmatprep.mubr.bf16.mxu0 %v588_v49 }
 0x104   :  { %v2638_v62 = vpop.f32.mrf.mxu0  ;;  %v2677_v63 = vpop.f32.mrf.mxu1  ;;  %2922 = vmatmul.mubr.bf16.vlgmr.msra.gmra.mxu1 %v548_v52  ;;  %2932 = vmatprep.subr.bf16.mxu0 %v5695_v53 }
 0x105   :  { %v2639_v1 = vadd.f32 %v2638_v62, %v446_v54  ;;  %v6964_v2 = vadd.f32 %v2677_v63, %v2637_v60  ;;  %2972 = vmatpush1.bf16.msra.mxu1 %v5690_v55  ;;  %3003 = vmatprep.mubr.bf16.mxu1 %v598_v56 }
 0x106   :  { %v2640_v6 = vpop.f32.mrf.mxu0  ;;  %v2679_v7 = vpop.f32.mrf.mxu1  ;;  %2973 = vmatprep.subr.bf16.mxu1 %v5698_v59 }
 0x107   :  { %v6972_v8 = vadd.f32 %v2679_v7, %v2639_v1  ;;  %2933 = vmatpush1.bf16.msra.mxu0 %v5693_v58 }
 0x108   :  { %v2641_v10 = vpop.f32.mrf.mxu0  ;;  %2934 = vmatprep.subr.bf16.mxu0 %v5701_v0  ;;  %v2681_v12 = vpop.f32.mrf.mxu1 }
 0x109   :  { %2974 = vmatpush1.bf16.msra.mxu1 %v5696_v61 }
 0x10a   :  { %2975 = vmatprep.subr.bf16.mxu1 %v5704_v4  ;;  %v2682_v15 = vpop.f32.mrf.mxu1 }
 0x10b   :  { %2935 = vmatpush1.bf16.msra.mxu0 %v5699_v3 }
 0x10c   :  { %2936 = vmatprep.subr.bf16.mxu0 %v5707_v11 }
 0x10d   :  { %2976 = vmatpush1.bf16.msra.mxu1 %v5702_v9 }
 0x10e   :  { %2977 = vmatprep.subr.bf16.mxu1 %v5710_v13 }
 0x10f   :  { %2937 = vmatpush1.bf16.msra.mxu0 %v5705_v14 }
 0x110   :  { %2938 = vmatprep.subr.bf16.mxu0 %v5713_v17 }
 0x111   :  { %2978 = vmatpush1.bf16.msra.mxu1 %v5708_v16 }
 0x112   :  { %2979 = vmatprep.subr.bf16.mxu1 %v5716_v18 }
 0x113   :  { %2939 = vmatpush1.bf16.msra.mxu0 %v5711_v19 }
 0x114   :  { %2940 = vmatprep.subr.bf16.mxu0 %v5719_v21 }
 0x115   :  { %2980 = vmatpush1.bf16.msra.mxu1 %v5714_v20 }
 0x116   :  { %2981 = vmatprep.subr.bf16.mxu1 %v5722_v22 }
 0x117   :  { %2941 = vmatpush1.bf16.msra.mxu0 %v5717_v23 }
 0x118   :  { %2942 = vmatprep.subr.bf16.mxu0 %v5725_v5 }
 0x119   :  { %2982 = vmatpush1.bf16.msra.mxu1 %v5720_v25 }
 0x11a   :  { %2983 = vmatprep.subr.bf16.mxu1 %v5728_v26 }
 0x11b   :  { %2943 = vmatpush1.bf16.msra.mxu0 %v5723_v27 }
 0x11c   :  { %2944 = vmatprep.subr.bf16.mxu0 %v5731_v29 }
 0x11d   :  { %2984 = vmatpush1.bf16.msra.mxu1 %v5726_v31 }
 0x11e   :  { %2985 = vmatprep.subr.bf16.mxu1 %v5734_v32 }
 0x11f   :  { %2945 = vmatpush1.bf16.msra.mxu0 %v5729_v33 }
 0x120   :  { %2946 = vmatprep.subr.bf16.mxu0 %v5737_v35 }
 0x121   :  { %2986 = vmatpush1.bf16.msra.mxu1 %v5732_v36 }
 0x122   :  { %2987 = vmatprep.subr.bf16.mxu1 %v5740_v28 }
 0x123   :  { %2947 = vmatpush2.bf16.msra.mxu0 %v5735_v37 }
 0x124   :  { %2948 = vmatprep.subr.bf16.mxu0 %v5743_v38 }
 0x125   :  { %2988 = vmatpush2.bf16.msra.mxu1 %v5738_v39 }
 0x126   :  { %2989 = vmatprep.subr.bf16.mxu1 %v5746_v40 }
 0x127   :  { %19 = vsyncpa [#allocation5], 0  ;;  %2949 = vmatpush2.bf16.msra.mxu0 %v5741_v41  ;;  %v5747_v49 = vld [vmem:[%s7758_s2 + $0x8d0] ss:$8 sps:$4 sm:$0xff]   ;;  %v5755_v50 = vld [vmem:[%s7758_s2 + $0x8c4] ss:$8 sps:$4 sm:$0xff]   ;;  %v551_v59 = vcombine.high %v6885_v30, %v6885_v30  ;;  %v574_v10 = vrot.slane %v6898_v34, %v6235_v48 }
 0x128   :  { %2950 = vmatprep.subr.bf16.mxu0 %v5749_v44  ;;  %v5750_v24 = vld [vmem:[%s7758_s2 + $0x9d0] ss:$8 sps:$4 sm:$0xff]   ;;  %v5758_v51 = vld [vmem:[%s7758_s2 + $0x9c4] ss:$8 sps:$4 sm:$0xff]   ;;  %v5753_v52 = vld [vmem:[%s7758_s2 + $0x8c0] ss:$8 sps:$4 sm:$0xff]  }
 0x129   :  { %2990 = vmatpush2.bf16.msra.mxu1 %v5744_v45  ;;  %v5761_v53 = vld [vmem:[%s7758_s2 + $0x8b4] ss:$8 sps:$4 sm:$0xff]   ;;  %v5756_v54 = vld [vmem:[%s7758_s2 + $0x9c0] ss:$8 sps:$4 sm:$0xff]   ;;  %v5759_v56 = vld [vmem:[%s7758_s2 + $0x8b0] ss:$8 sps:$4 sm:$0xff]   ;;  %v7115_v63 = vrot.slane %v551_v59, %v6235_v48  ;;  %v596_v15 = vcombine.high %v574_v10, %v574_v10 }
 0x12a   :  { %2991 = vmatprep.subr.bf16.mxu1 %v5752_v46  ;;  %v5764_v55 = vld [vmem:[%s7758_s2 + $0x9b4] ss:$8 sps:$4 sm:$0xff]   ;;  %v5767_v57 = vld [vmem:[%s7758_s2 + $0x8a4] ss:$8 sps:$4 sm:$0xff]   ;;  %v5762_v58 = vld [vmem:[%s7758_s2 + $0x9b0] ss:$8 sps:$4 sm:$0xff]  }
 0x12b   :  { %2951 = vmatpush2.bf16.msra.mxu0 %v5747_v49  ;;  %v5770_v60 = vld [vmem:[%s7758_s2 + $0x9a4] ss:$8 sps:$4 sm:$0xff]   ;;  %v5765_v61 = vld [vmem:[%s7758_s2 + $0x8a0] ss:$8 sps:$4 sm:$0xff]   ;;  %v5773_v62 = vld [vmem:[%s7758_s2 + $0x894] ss:$8 sps:$4 sm:$0xff]   ;;  %v567_v6 = vcombine.high %v7115_v63, %v7115_v63 }
 0x12c   :  { %2952 = vmatprep.subr.bf16.mxu0 %v5755_v50  ;;  %v5768_v30 = vld [vmem:[%s7758_s2 + $0x9a0] ss:$8 sps:$4 sm:$0xff]   ;;  %v5776_v0 = vld [vmem:[%s7758_s2 + $0x994] ss:$8 sps:$4 sm:$0xff]   ;;  %v5771_v1 = vld [vmem:[%s7758_s2 + $0x890] ss:$8 sps:$4 sm:$0xff]  }
 0x12d   :  { %2992 = vmatpush2.bf16.msra.mxu1 %v5750_v24  ;;  %v5779_v3 = vld [vmem:[%s7758_s2 + $0x884] ss:$8 sps:$4 sm:$0xff]   ;;  %v5774_v4 = vld [vmem:[%s7758_s2 + $0x990] ss:$8 sps:$4 sm:$0xff]   ;;  %v5777_v9 = vld [vmem:[%s7758_s2 + $0x880] ss:$8 sps:$4 sm:$0xff]   ;;  %v595_v13 = vrot.slane %v567_v6, %v6235_v48 }
 0x12e   :  { %2993 = vmatprep.subr.bf16.mxu1 %v5758_v51  ;;  %v5782_v7 = vld [vmem:[%s7758_s2 + $0x984] ss:$8 sps:$4 sm:$0xff]   ;;  %v5785_v11 = vld [vmem:[%s7758_s2 + $0xa74] ss:$8 sps:$4 sm:$0xff]   ;;  %v5780_v12 = vld [vmem:[%s7758_s2 + $0x980] ss:$8 sps:$4 sm:$0xff]  }
 0x12f   :  { %2953 = vmatpush2.bf16.msra.mxu0 %v5753_v52  ;;  %v5788_v14 = vld [vmem:[%s7758_s2 + $0xb74] ss:$8 sps:$4 sm:$0xff]   ;;  %v5783_v34 = vld [vmem:[%s7758_s2 + $0xa70] ss:$8 sps:$4 sm:$0xff]   ;;  %v5791_v16 = vld [vmem:[%s7758_s2 + $0xa64] ss:$8 sps:$4 sm:$0xff]   ;;  %v599_v18 = vcombine.high %v595_v13, %v595_v13 }
 0x130   :  { %2954 = vmatprep.subr.bf16.mxu0 %v5761_v53  ;;  %v5786_v17 = vld [vmem:[%s7758_s2 + $0xb70] ss:$8 sps:$4 sm:$0xff]   ;;  %v5794_v20 = vld [vmem:[%s7758_s2 + $0xb64] ss:$8 sps:$4 sm:$0xff]   ;;  %v5789_v22 = vld [vmem:[%s7758_s2 + $0xa60] ss:$8 sps:$4 sm:$0xff]  }
 0x131   :  { %2994 = vmatpush2.bf16.msra.mxu1 %v5756_v54  ;;  %v5797_v25 = vld [vmem:[%s7758_s2 + $0xa54] ss:$8 sps:$4 sm:$0xff]   ;;  %v5803_v36 = vld [vmem:[%s7758_s2 + $0xa44] ss:$8 sps:$4 sm:$0xff]   ;;  %v5798_v37 = vld [vmem:[%s7758_s2 + $0xb50] ss:$8 sps:$4 sm:$0xff]  }
 0x132   :  { %2995 = vmatprep.subr.bf16.mxu1 %v5764_v55  ;;  %v5800_v32 = vld [vmem:[%s7758_s2 + $0xb54] ss:$8 sps:$4 sm:$0xff]   ;;  %v5806_v38 = vld [vmem:[%s7758_s2 + $0xb44] ss:$8 sps:$4 sm:$0xff]   ;;  %v5801_v40 = vld [vmem:[%s7758_s2 + $0xa40] ss:$8 sps:$4 sm:$0xff]  }
 0x133   :  { %2955 = vmatpush2.bf16.msra.mxu0 %v5759_v56  ;;  %v5809_v41 = vld [vmem:[%s7758_s2 + $0xa34] ss:$8 sps:$4 sm:$0xff]   ;;  %v5804_v44 = vld [vmem:[%s7758_s2 + $0xb40] ss:$8 sps:$4 sm:$0xff]   ;;  %v5807_v46 = vld [vmem:[%s7758_s2 + $0xa30] ss:$8 sps:$4 sm:$0xff]  }
 0x134   :  { %2956 = vmatprep.subr.bf16.mxu0 %v5767_v57  ;;  %v5812_v45 = vld [vmem:[%s7758_s2 + $0xb34] ss:$8 sps:$4 sm:$0xff]   ;;  %v5815_v49 = vld [vmem:[%s7758_s2 + $0xa24] ss:$8 sps:$4 sm:$0xff]   ;;  %v5810_v50 = vld [vmem:[%s7758_s2 + $0xb30] ss:$8 sps:$4 sm:$0xff]  }
 0x135   :  { %2996 = vmatpush2.bf16.msra.mxu1 %v5762_v58  ;;  %v5818_v24 = vld [vmem:[%s7758_s2 + $0xb24] ss:$8 sps:$4 sm:$0xff]   ;;  %v5813_v51 = vld [vmem:[%s7758_s2 + $0xa20] ss:$8 sps:$4 sm:$0xff]   ;;  %v5821_v52 = vld [vmem:[%s7758_s2 + $0xa14] ss:$8 sps:$4 sm:$0xff]  }
 0x136   :  { %2997 = vmatprep.subr.bf16.mxu1 %v5770_v60  ;;  %v5816_v53 = vld [vmem:[%s7758_s2 + $0xb20] ss:$8 sps:$4 sm:$0xff]   ;;  %v5824_v54 = vld [vmem:[%s7758_s2 + $0xb14] ss:$8 sps:$4 sm:$0xff]   ;;  %v5819_v55 = vld [vmem:[%s7758_s2 + $0xa10] ss:$8 sps:$4 sm:$0xff]  }
 0x137   :  { %2957 = vmatpush2.bf16.msra.mxu0 %v5765_v61  ;;  %v5827_v56 = vld [vmem:[%s7758_s2 + $0xa04] ss:$8 sps:$4 sm:$0xff]   ;;  %v5822_v57 = vld [vmem:[%s7758_s2 + $0xb10] ss:$8 sps:$4 sm:$0xff]   ;;  %v5825_v59 = vld [vmem:[%s7758_s2 + $0xa00] ss:$8 sps:$4 sm:$0xff]  }
 0x138   :  { %2958 = vmatprep.subr.bf16.mxu0 %v5773_v62  ;;  %v5830_v58 = vld [vmem:[%s7758_s2 + $0xb04] ss:$8 sps:$4 sm:$0xff]   ;;  %v5833_v60 = vld [vmem:[%s7758_s2 + $0xaf4] ss:$8 sps:$4 sm:$0xff]   ;;  %v5828_v61 = vld [vmem:[%s7758_s2 + $0xb00] ss:$8 sps:$4 sm:$0xff]  }
 0x139   :  { %2998 = vmatpush2.bf16.msra.mxu1 %v5768_v30  ;;  %v5836_v62 = vld [vmem:[%s7758_s2 + $0xbf4] ss:$8 sps:$4 sm:$0xff]   ;;  %v5831_v30 = vld [vmem:[%s7758_s2 + $0xaf0] ss:$8 sps:$4 sm:$0xff]   ;;  %vm2598_vm0 = vcmask 523264   ;;  %vm3861_vm1 = vcmask 1041408  }
 0x13a   :  { %2999 = vmatprep.subr.bf16.mxu1 %v5776_v0  ;;  %v5839_v0 = vld [vmem:[%s7758_s2 + $0xae4] ss:$8 sps:$4 sm:$0xff]   ;;  %v5845_v6 = vld [vmem:[%s7758_s2 + $0xad4] ss:$8 sps:$4 sm:$0xff]   ;;  %vm4469_vm2 = vcmask 156672   ;;  %vm3857_vm3 = vcmask 162816  }
 0x13b   :  { %2959 = vmatpush2.bf16.msra.mxu0 %v5771_v1  ;;  %v5834_v1 = vld [vmem:[%s7758_s2 + $0xbf0] ss:$8 sps:$4 sm:$0xff]   ;;  %vm6035_vm4 = vmmov 0   ;;  %s6036_s29 = smov [#allocation2]   ;;  %s6037_s13 = smov [#allocation4]  }
 0x13c   :  { %2960 = vmatprep.subr.bf16.mxu0 %v5779_v3  ;;  %v5842_v3 = vld [vmem:[%s7758_s2 + $0xbe4] ss:$8 sps:$4 sm:$0xff]   ;;  %s4698_s30 = sshll.u32 %s6036_s29, 4  ;;  %s4699_s30 = int_to_ptr.vmem [resolvable:$true] %s4698_s30 }
 0x13d   :  { %3000 = vmatpush2.bf16.msra.mxu1 %v5774_v4  ;;  %v5837_v4 = vld [vmem:[%s7758_s2 + $0xae0] ss:$8 sps:$4 sm:$0xff]   ;;  %s5988_s14 = scalar_lea.vmem %s4699_s30, 32  ;;  %p5993_p1 = scmp.lt.s32.totalorder %s4699_s30, %s4699_s30 }
 0x13e   :  { %3001 = vmatprep.subr.bf16.mxu1 %v5782_v7  ;;  %v5840_v7 = vld [vmem:[%s7758_s2 + $0xbe0] ss:$8 sps:$4 sm:$0xff]   ;;  %p5989_p0 = scmp.ne.s32.totalorder %s4699_s30, %s5988_s14  ;;  %p5994_p2 = scmp.lt.s32.totalorder %s5988_s14, %s5988_s14 }
 0x13f   :  { %2961 = vmatpush2.bf16.msra.mxu0 %v5777_v9  ;;  %v5848_v9 = vld [vmem:[%s7758_s2 + $0xbd4] ss:$8 sps:$4 sm:$0xff]  }
 0x140   :  { %3012 = vmatprep.subr.bf16.mxu0 %v5785_v11  ;;  %v5851_v11 = vld [vmem:[%s7758_s2 + $0xac4] ss:$8 sps:$4 sm:$0xff]   ;;  %p5995_p3 = por %p5994_p2, %p5993_p1 }
 0x141   :  { %3002 = vmatpush2.bf16.msra.mxu1 %v5780_v12  ;;  %v5846_v12 = vld [vmem:[%s7758_s2 + $0xbd0] ss:$8 sps:$4 sm:$0xff]  }
 0x142   :  { %v2718_v19 = vpop.f32.mrf.mxu0  ;;  %2963 = vmatmul.mubr.bf16.vlgmr.msra.gmra.mxu0 %v574_v10  ;;  %3053 = vmatprep.subr.bf16.mxu1 %v5788_v14  ;;  %v5843_v10 = vld [vmem:[%s7758_s2 + $0xad0] ss:$8 sps:$4 sm:$0xff]   ;;  %v5849_v14 = vld [vmem:[%s7758_s2 + $0xac0] ss:$8 sps:$4 sm:$0xff]   ;;  %p5996_p4 = pnand %p5995_p3, %p5989_p0 }
 0x143   :  { %v2719_v21 = vadd.f32 %v2718_v19, %v6964_v2  ;;  %3013 = vmatpush1.bf16.msra.mxu0 %v5783_v34  ;;  %3044 = vmatprep.mubr.bf16.mxu0 %v595_v13  ;;  %v5792_v2 = vld [vmem:[%s7758_s2 + $0xb60] ss:$8 sps:$4 sm:$0xff]   ;;  %v5854_v13 = vld [vmem:[%s7758_s2 + $0xbc4] ss:$8 sps:$4 sm:$0xff]   ;;  %v5857_v34 = vld [vmem:[%s7758_s2 + $0xab4] ss:$8 sps:$4 sm:$0xff]  }
 0x144   :  { %v2720_v23 = vpop.f32.mrf.mxu0  ;;  %v2759_v5 = vpop.f32.mrf.mxu1  ;;  %3004 = vmatmul.mubr.bf16.vlgmr.msra.gmra.mxu1 %v596_v15  ;;  %3014 = vmatprep.subr.bf16.mxu0 %v5791_v16  ;;  %v5852_v15 = vld [vmem:[%s7758_s2 + $0xbc0] ss:$8 sps:$4 sm:$0xff]   ;;  %v5860_v16 = vld [vmem:[%s7758_s2 + $0xbb4] ss:$8 sps:$4 sm:$0xff]   ;;  %v5858_v19 = vld [vmem:[%s7758_s2 + $0xbb0] ss:$8 sps:$4 sm:$0xff]  }
 0x145   :  { %v2721_v26 = vadd.f32 %v2720_v23, %v6972_v8  ;;  %v7169_v27 = vadd.f32 %v2759_v5, %v2719_v21  ;;  %3054 = vmatpush1.bf16.msra.mxu1 %v5786_v17  ;;  %3085 = vmatprep.mubr.bf16.mxu1 %v599_v18  ;;  %v5795_v8 = vld [vmem:[%s7758_s2 + $0xa50] ss:$8 sps:$4 sm:$0xff]   ;;  %v5863_v18 = vld [vmem:[%s7758_s2 + $0xaa4] ss:$8 sps:$4 sm:$0xff]   ;;  %v5861_v21 = vld [vmem:[%s7758_s2 + $0xaa0] ss:$8 sps:$4 sm:$0xff]  }
 0x146   :  { %v2722_v29 = vpop.f32.mrf.mxu0  ;;  %v2761_v31 = vpop.f32.mrf.mxu1  ;;  %3055 = vmatprep.subr.bf16.mxu1 %v5794_v20  ;;  %v5855_v17 = vld [vmem:[%s7758_s2 + $0xab0] ss:$8 sps:$4 sm:$0xff]   ;;  %v5866_v20 = vld [vmem:[%s7758_s2 + $0xba4] ss:$8 sps:$4 sm:$0xff]   ;;  %v5864_v23 = vld [vmem:[%s7758_s2 + $0xba0] ss:$8 sps:$4 sm:$0xff]  }
 0x147   :  { %v7177_v33 = vadd.f32 %v2761_v31, %v2721_v26  ;;  %3015 = vmatpush1.bf16.msra.mxu0 %v5789_v22  ;;  %v5869_v22 = vld [vmem:[%s7758_s2 + $0xa94] ss:$8 sps:$4 sm:$0xff]   ;;  %v5875_v26 = vld [vmem:[%s7758_s2 + $0xa84] ss:$8 sps:$4 sm:$0xff]   ;;  %v5873_v31 = vld [vmem:[%s7758_s2 + $0xa80] ss:$8 sps:$4 sm:$0xff]  }
 0x148   :  { %v2723_v35 = vpop.f32.mrf.mxu0  ;;  %3016 = vmatprep.subr.bf16.mxu0 %v5797_v25  ;;  %v2763_v28 = vpop.f32.mrf.mxu1  ;;  %v5872_v5 = vld [vmem:[%s7758_s2 + $0xb94] ss:$8 sps:$4 sm:$0xff]   ;;  %v5867_v25 = vld [vmem:[%s7758_s2 + $0xa90] ss:$8 sps:$4 sm:$0xff]   ;;  %v5878_v29 = vld [vmem:[%s7758_s2 + $0xb84] ss:$8 sps:$4 sm:$0xff]  }
 0x149   :  { %3056 = vmatpush1.bf16.msra.mxu1 %v5792_v2  ;;  %v5870_v2 = vld [vmem:[%s7758_s2 + $0xb90] ss:$8 sps:$4 sm:$0xff]   ;;  %v5876_v35 = vld [vmem:[%s7758_s2 + $0xb80] ss:$8 sps:$4 sm:$0xff]  }
 0x14a   :  { %3057 = vmatprep.subr.bf16.mxu1 %v5800_v32  ;;  %v2764_v39 = vpop.f32.mrf.mxu1  ;;  %v581_v32 = vrot.slane %v7115_v63, %v6235_v48  ;;  %v5885_v63 = vld [vmem:[%s7758_s2 + $0xc24] ss:$8 sps:$4 sm:$0xff]  }
 0x14b   :  { %3017 = vmatpush1.bf16.msra.mxu0 %v5795_v8  ;;  %v5882_v8 = vld [vmem:[%s7758_s2 + $0xc34] ss:$8 sps:$4 sm:$0xff]   ;;  %v5883_v39 = vld [vmem:[%s7758_s2 + $0xc20] ss:$8 sps:$4 sm:$0xff]  }
 0x14c   :  { %3018 = vmatprep.subr.bf16.mxu0 %v5803_v36  ;;  %v5880_v36 = vld [vmem:[%s7758_s2 + $0xc30] ss:$8 sps:$4 sm:$0xff]   ;;  %v597_v28 = vcombine.high %v581_v32, %v581_v32 }
 0x14d   :  { %3058 = vmatpush1.bf16.msra.mxu1 %v5798_v37 }
 0x14e   :  { %3059 = vmatprep.subr.bf16.mxu1 %v5806_v38 }
 0x14f   :  { %3019 = vmatpush1.bf16.msra.mxu0 %v5801_v40  ;;  %v6033_v40 = vmov 0  }
 0x150   :  { %3020 = vmatprep.subr.bf16.mxu0 %v5809_v41 }
 0x151   :  { %3060 = vmatpush1.bf16.msra.mxu1 %v5804_v44 }
 0x152   :  { %3061 = vmatprep.subr.bf16.mxu1 %v5812_v45  ;;  %v5888_v45 = vld [vmem:[%s7758_s2 + $0xc14] ss:$8 sps:$4 sm:$0xff]  }
 0x153   :  { %3021 = vmatpush1.bf16.msra.mxu0 %v5807_v46 }
 0x154   :  { %3022 = vmatprep.subr.bf16.mxu0 %v5815_v49 }
 0x155   :  { %3062 = vmatpush1.bf16.msra.mxu1 %v5810_v50 }
 0x156   :  { %3063 = vmatprep.subr.bf16.mxu1 %v5818_v24 }
 0x157   :  { %3023 = vmatpush1.bf16.msra.mxu0 %v5813_v51  ;;  %v5886_v51 = vld [vmem:[%s7758_s2 + $0xc10] ss:$8 sps:$4 sm:$0xff]  }
 0x158   :  { %3024 = vmatprep.subr.bf16.mxu0 %v5821_v52 }
 0x159   :  { %3064 = vmatpush1.bf16.msra.mxu1 %v5816_v53  ;;  %v5891_v53 = vld [vmem:[%s7758_s2 + $0xc04] ss:$8 sps:$4 sm:$0xff]  }
 0x15a   :  { %3065 = vmatprep.subr.bf16.mxu1 %v5824_v54 }
 0x15b   :  { %3025 = vmatpush1.bf16.msra.mxu0 %v5819_v55 }
 0x15c   :  { %3026 = vmatprep.subr.bf16.mxu0 %v5827_v56  ;;  %v5892_v56 = vld [vmem:[%s7760_s4 + $0x78] sm:$0xff]  }
 0x15d   :  { %3066 = vmatpush1.bf16.msra.mxu1 %v5822_v57  ;;  %v5894_v57 = vld [vmem:[%s7760_s4 + $0x38] sm:$0xff]  }
 0x15e   :  { %3067 = vmatprep.subr.bf16.mxu1 %v5830_v58  ;;  %v4724_v58 = vld.sshfl [vmem:[%s7756_s0 + $0x18] sm:$0x1 pattern:$0x75316420] }
 0x15f   :  { %3027 = vmatpush1.bf16.msra.mxu0 %v5825_v59  ;;  %v5896_v59 = vld [vmem:[%s7760_s4 + $0x70] sm:$0xff]  }
 0x160   :  { %3028 = vmatprep.subr.bf16.mxu0 %v5833_v60  ;;  %v5893_v60 = vld [vmem:[%s7762_s6 + $0x78] sm:$0xff]  }
 0x161   :  { %3068 = vmatpush1.bf16.msra.mxu1 %v5828_v61  ;;  %v5898_v61 = vld [vmem:[%s7760_s4 + $0x30] sm:$0xff]  }
 0x162   :  { %3069 = vmatprep.subr.bf16.mxu1 %v5836_v62  ;;  %v613_v62 = vrot.slane %v4724_v58, %v6235_v48 }
 0x163   :  { %3029 = vmatpush2.bf16.msra.mxu0 %v5831_v30  ;;  %v5895_v30 = vld [vmem:[%s7762_s6 + $0x38] sm:$0xff]  }
 0x164   :  { %3030 = vmatprep.subr.bf16.mxu0 %v5839_v0  ;;  %v5897_v0 = vld [vmem:[%s7762_s6 + $0x70] sm:$0xff]  }
 0x165   :  { %3070 = vmatpush2.bf16.msra.mxu1 %v5834_v1  ;;  %v5899_v1 = vld [vmem:[%s7762_s6 + $0x30] sm:$0xff]  }
 0x166   :  { %3071 = vmatprep.subr.bf16.mxu1 %v5842_v3 }
 0x167   :  { %3031 = vmatpush2.bf16.msra.mxu0 %v5837_v4  ;;  %v5900_v4 = vld [vmem:[%s7760_s4 + $0x68] sm:$0xff]  }
 0x168   :  { %3032 = vmatprep.subr.bf16.mxu0 %v5845_v6  ;;  %v5901_v6 = vld [vmem:[%s7762_s6 + $0x68] sm:$0xff]  }
 0x169   :  { %3072 = vmatpush2.bf16.msra.mxu1 %v5840_v7 }
 0x16a   :  { %3073 = vmatprep.subr.bf16.mxu1 %v5848_v9  ;;  %v5902_v9 = vld [vmem:[%s7760_s4 + $0x28] sm:$0xff]  }
 0x16b   :  { %3033 = vmatpush2.bf16.msra.mxu0 %v5843_v10  ;;  %v5903_v10 = vld [vmem:[%s7762_s6 + $0x28] sm:$0xff]  }
 0x16c   :  { %3034 = vmatprep.subr.bf16.mxu0 %v5851_v11 }
 0x16d   :  { %3074 = vmatpush2.bf16.msra.mxu1 %v5846_v12 }
 0x16e   :  { %3075 = vmatprep.subr.bf16.mxu1 %v5854_v13 }
 0x16f   :  { %3035 = vmatpush2.bf16.msra.mxu0 %v5849_v14 }
 0x170   :  { %3036 = vmatprep.subr.bf16.mxu0 %v5857_v34 }
 0x171   :  { %3076 = vmatpush2.bf16.msra.mxu1 %v5852_v15 }
 0x172   :  { %3077 = vmatprep.subr.bf16.mxu1 %v5860_v16  ;;  %v5904_v16 = vld [vmem:[%s7760_s4 + $0x60] sm:$0xff]  }
 0x173   :  { %3037 = vmatpush2.bf16.msra.mxu0 %v5855_v17  ;;  %v5905_v17 = vld [vmem:[%s7762_s6 + $0x60] sm:$0xff]  }
 0x174   :  { %3038 = vmatprep.subr.bf16.mxu0 %v5863_v18 }
 0x175   :  { %3078 = vmatpush2.bf16.msra.mxu1 %v5858_v19  ;;  %v5906_v19 = vld [vmem:[%s7760_s4 + $0x20] sm:$0xff]  }
 0x176   :  { %3079 = vmatprep.subr.bf16.mxu1 %v5866_v20  ;;  %v5907_v20 = vld [vmem:[%s7762_s6 + $0x20] sm:$0xff]  }
 0x177   :  { %3039 = vmatpush2.bf16.msra.mxu0 %v5861_v21 }
 0x178   :  { %3040 = vmatprep.subr.bf16.mxu0 %v5869_v22 }
 0x179   :  { %3080 = vmatpush2.bf16.msra.mxu1 %v5864_v23  ;;  %v5908_v23 = vld [vmem:[%s7760_s4 + $0x58] sm:$0xff]  }
 0x17a   :  { %3081 = vmatprep.subr.bf16.mxu1 %v5872_v5  ;;  %v5909_v5 = vld [vmem:[%s7762_s6 + $0x58] sm:$0xff]  }
 0x17b   :  { %3041 = vmatpush2.bf16.msra.mxu0 %v5867_v25  ;;  %v5910_v25 = vld [vmem:[%s7760_s4 + $0x18] sm:$0xff]  }
 0x17c   :  { %3042 = vmatprep.subr.bf16.mxu0 %v5875_v26  ;;  %v5911_v26 = vld [vmem:[%s7762_s6 + $0x18] sm:$0xff]  }
 0x17d   :  { %3082 = vmatpush2.bf16.msra.mxu1 %v5870_v2 }
 0x17e   :  { %3083 = vmatprep.subr.bf16.mxu1 %v5878_v29  ;;  %v5912_v29 = vld [vmem:[%s7760_s4 + $0x50] sm:$0xff]  }
 0x17f   :  { %3043 = vmatpush2.bf16.msra.mxu0 %v5873_v31  ;;  %v5913_v31 = vld [vmem:[%s7762_s6 + $0x50] sm:$0xff]  }
 0x180   :  { %3102 = vmatprep.subr.bf16.mxu0 %v5882_v8  ;;  %v5915_v8 = vld [vmem:[%s7762_s6 + $0x10] sm:$0xff]  }
 0x181   :  { %3084 = vmatpush2.bf16.msra.mxu1 %v5876_v35  ;;  %v5916_v35 = vld [vmem:[%s7760_s4 + $0x48] sm:$0xff]  }
 0x182   :  { %v2800_v37 = vpop.f32.mrf.mxu0  ;;  %3045 = vmatmul.mubr.bf16.vlgmr.msra.gmra.mxu0 %v581_v32  ;;  %5240 = vmatprep.subr.bf16.mxu1 %v5892_v56  ;;  %v5914_v32 = vld [vmem:[%s7760_s4 + $0x10] sm:$0xff]  }
 0x183   :  { %v2801_v38 = vadd.f32 %v2800_v37, %v7169_v27  ;;  %3103 = vmatpush1.bf16.msra.mxu0 %v5880_v36  ;;  %3126 = vmatprep.mubr.bf16.mxu0 %v6033_v40  ;;  %v5917_v36 = vld [vmem:[%s7762_s6 + $0x48] sm:$0xff]   ;;  %v5920_v37 = vld [vmem:[%s7760_s4 + $0x40] sm:$0xff]  }
 0x184   :  { %v2802_v41 = vpop.f32.mrf.mxu0  ;;  %v2841_v44 = vpop.f32.mrf.mxu1  ;;  %3086 = vmatmul.mubr.bf16.vlgmr.msra.gmra.mxu1 %v597_v28  ;;  %3104 = vmatprep.subr.bf16.mxu0 %v5885_v63  ;;  %v5918_v28 = vld [vmem:[%s7760_s4 + $0x8] sm:$0xff]  }
 0x185   :  { %v2803_v46 = vadd.f32 %v2802_v41, %v7177_v33  ;;  %v2842_v49 = vadd.f32 %v2841_v44, %v2801_v38  ;;  %v5889_v33 = vld [vmem:[%s7758_s2 + $0xc00] ss:$8 sps:$4 sm:$0xff]   ;;  %5241 = vmatpush3.bf16.msra.mxu1 %v5894_v57  ;;  %s4708_s2 = sshll.u32 %s6037_s13, 4  ;;  %s4709_s2 = int_to_ptr.vmem [resolvable:$true] %s4708_s2 }
 0x186   :  { %v2804_v27 = vpop.f32.mrf.mxu0  ;;  %v2843_v50 = vpop.f32.mrf.mxu1  ;;  %5242 = vmatprep.subr.bf16.mxu1 %v5896_v59  ;;  %v5919_v63 = vld [vmem:[%s7762_s6 + $0x8] sm:$0xff]   ;;  %v5921_v38 = vld [vmem:[%s7762_s6 + $0x40] sm:$0xff]  }
 0x187   :  { %v2844_v24 = vadd.f32 %v2843_v50, %v2803_v46  ;;  %3105 = vmatpush1.bf16.msra.mxu0 %v5883_v39  ;;  %v5922_v39 = vld [vmem:[%s7760_s4] sm:$0xff]  }
 0x188   :  { %v2805_v52 = vpop.f32.mrf.mxu0  ;;  %3106 = vmatprep.subr.bf16.mxu0 %v5888_v45  ;;  %v2845_v54 = vpop.f32.mrf.mxu1  ;;  %v5923_v41 = vld [vmem:[%s7762_s6] sm:$0xff]  }
 0x189   :  { %5243 = vmatpush3.bf16.msra.mxu1 %v5898_v61 }
 0x18a   :  { %v2846_v55 = vpop.f32.mrf.mxu1  ;;  %5244 = vmatprep.subr.bf16.mxu1 %v5900_v4 }
 0x18b   :  { %3107 = vmatpush1.bf16.msra.mxu0 %v5886_v51 }
 0x18c   :  { %3108 = vmatprep.subr.bf16.mxu0 %v5891_v53 }
 0x18d   :  { %5245 = vmatpush3.bf16.msra.mxu1 %v5902_v9 }
 0x18e   :  { %5246 = vmatprep.subr.bf16.mxu1 %v5904_v16  ;;  %v3524_v16 = vld [vmem:[%s7764_s8 + $0xd8] sm:$0x33] }
 0x18f   :  { %3109 = vmatpush1.bf16.msra.mxu0 %v5889_v33 }
 0x190   :  { %5262 = vmatprep.subr.bf16.mxu0 %v5893_v60 }
 0x191   :  { %5247 = vmatpush3.bf16.msra.mxu1 %v5906_v19  ;;  %v5183_v19 = vcombine.high %v3524_v16, %v3524_v16 }
 0x192   :  { %5117 = vmatmul.mubr.msk.bf16.vlgmr.msra.gmra.mxu0 %vm2598_vm0, %v613_v62  ;;  %5248 = vmatprep.subr.bf16.mxu1 %v5908_v23  ;;  %v5930_v23 = vld [vmem:[%s7764_s8 + $0x4] ss:$100 sps:$4 sm:$0xff]  }
 0x193   :  { %5263 = vmatpush3.bf16.msra.mxu0 %v5895_v30 }
 0x194   :  { %5264 = vmatprep.subr.bf16.mxu0 %v5897_v0 }
 0x195   :  { %5249 = vmatpush3.bf16.msra.mxu1 %v5910_v25  ;;  %v5928_v25 = vld [vmem:[%s7764_s8] ss:$100 sps:$4 sm:$0xff]  }
 0x196   :  { %5250 = vmatprep.subr.bf16.mxu1 %v5912_v29  ;;  %v3526_v29 = vld [vmem:[%s7764_s8 + $0xe8] sm:$0x33] }
 0x197   :  { %5265 = vmatpush3.bf16.msra.mxu0 %v5899_v1 }
 0x198   :  { %5266 = vmatprep.subr.bf16.mxu0 %v5901_v6 }
 0x199   :  { %5251 = vmatpush3.bf16.msra.mxu1 %v5914_v32  ;;  %v5187_v32 = vcombine.high %v3526_v29, %v3526_v29 }
 0x19a   :  { %5252 = vmatprep.subr.bf16.mxu1 %v5916_v35 }
 0x19b   :  { %5267 = vmatpush3.bf16.msra.mxu0 %v5903_v10 }
 0x19c   :  { %5268 = vmatprep.subr.bf16.mxu0 %v5905_v17 }
 0x19d   :  { %5253 = vmatpush3.bf16.msra.mxu1 %v5918_v28 }
 0x19e   :  { %5254 = vmatprep.subr.bf16.mxu1 %v5920_v37 }
 0x19f   :  { %5269 = vmatpush3.bf16.msra.mxu0 %v5907_v20  ;;  %v5182_v20 = vcombine.low %v3524_v16, %v3524_v16 }
 0x1a0   :  { %5270 = vmatprep.subr.bf16.mxu0 %v5909_v5  ;;  %v5933_v5 = vld [vmem:[%s7764_s8 + $0x14] ss:$100 sps:$4 sm:$0xff]  }
 0x1a1   :  { %5255 = vmatpush3.bf16.msra.mxu1 %v5922_v39 }
 0x1a3   :  { %5271 = vmatpush3.bf16.msra.mxu0 %v5911_v26  ;;  %v5931_v26 = vld [vmem:[%s7764_s8 + $0x10] ss:$100 sps:$4 sm:$0xff]  }
 0x1a4   :  { %5272 = vmatprep.subr.bf16.mxu0 %v5913_v31 }
 0x1a7   :  { %5273 = vmatpush3.bf16.msra.mxu0 %v5915_v8 }
 0x1a8   :  { %5274 = vmatprep.subr.bf16.mxu0 %v5917_v36  ;;  %v5118_v36 = vld [vmem:[%s7761_s5] ss:$0 sm:$0xff] }
 0x1ab   :  { %5275 = vmatpush3.bf16.msra.mxu0 %v5919_v63  ;;  %v5135_v63 = vld [vmem:[%s7763_s7] ss:$0 sm:$0xff] }
 0x1ac   :  { %5276 = vmatprep.subr.bf16.mxu0 %v5921_v38 }
 0x1af   :  { %5277 = vmatpush3.bf16.msra.mxu0 %v5923_v41 }
 0x1b0   :  { %5207 = vmatprep.subr.msk.bf16.mxu0 %vm3861_vm1, %v5183_v19 }
 0x1c2   :  { %v2882_v3 = vpop.f32.mrf.mxu0 }
 0x1c3   :  { %v2883_v7 = vadd.f32 %v2882_v3, %v2842_v49 }
 0x1c4   :  { %v2884_v11 = vpop.f32.mrf.mxu0  ;;  %v2923_v12 = vpop.f32.mrf.mxu1 }
 0x1c5   :  { %v2885_v13 = vadd.f32 %v2884_v11, %v2844_v24  ;;  %v2924_v14 = vadd.f32 %v2923_v12, %v2883_v7 }
 0x1c6   :  { %v2886_v34 = vpop.f32.mrf.mxu0  ;;  %v2925_v15 = vpop.f32.mrf.mxu1 }
 0x1c7   :  { %v2926_v18 = vadd.f32 %v2925_v15, %v2885_v13  ;;  %v3522_v15 = vld [vmem:[%s7764_s8 + $0xc8] sm:$0x33] }
 0x1c8   :  { %v2887_v21 = vpop.f32.mrf.mxu0  ;;  %v2927_v22 = vpop.f32.mrf.mxu1  ;;  %v5179_v17 = vcombine.high %v3522_v15, %v3522_v15 }
 0x1c9   :  { %v3875_v22 = vsel %vm3861_vm1, %v5182_v20, 0 }
 0x1ca   :  { %v2928_v2 = vpop.f32.mrf.mxu1  ;;  %5203 = vmatprep.subr.msk.bf16.mxu1 %vm3861_vm1, %v5179_v17 }
 0x1cb   :  { %v3523_v2 = vld [vmem:[%s7764_s8 + $0xd0] sm:$0x33] }
 0x1cc   :  { %v5181_v31 = vcombine.high %v3523_v2, %v3523_v2 }
 0x202   :  { %v2964_v44 = vpop.f32.mrf.mxu0 }
 0x203   :  { %v2965_v45 = vadd.f32 %v2964_v44, %v2924_v14 }
 0x204   :  { %v2966_v46 = vpop.f32.mrf.mxu0  ;;  %v3005_v49 = vpop.f32.mrf.mxu1 }
 0x205   :  { %v2967_v27 = vadd.f32 %v2966_v46, %v2926_v18  ;;  %v3006_v50 = vadd.f32 %v3005_v49, %v2965_v45  ;;  %v5178_v18 = vcombine.low %v3522_v15, %v3522_v15 }
 0x206   :  { %v2968_v24 = vpop.f32.mrf.mxu0  ;;  %v3007_v51 = vpop.f32.mrf.mxu1 }
 0x207   :  { %v3008_v52 = vadd.f32 %v3007_v51, %v2967_v27  ;;  %v3863_v21 = vsel %vm3861_vm1, %v5178_v18, 0  ;;  %v3492_v51 = vld [vmem:[%s7757_s1] sm:$0x3] }
 0x208   :  { %v2969_v53 = vpop.f32.mrf.mxu0  ;;  %v3009_v54 = vpop.f32.mrf.mxu1 }
 0x209   :  { %v5180_v53 = vcombine.low %v3523_v2, %v3523_v2  ;;  %v5186_v54 = vcombine.low %v3526_v29, %v3526_v29 }
 0x20a   :  { %v3010_v33 = vpop.f32.mrf.mxu1 }
 0x242   :  { %v3046_v55 = vpop.f32.mrf.mxu0 }
 0x243   :  { %v3047_v30 = vadd.f32 %v3046_v55, %v3006_v50 }
 0x244   :  { %v3048_v56 = vpop.f32.mrf.mxu0  ;;  %v3087_v57 = vpop.f32.mrf.mxu1 }
 0x245   :  { %v3049_v0 = vadd.f32 %v3048_v56, %v3008_v52  ;;  %v3088_v1 = vadd.f32 %v3087_v57, %v3047_v30  ;;  %v3869_v56 = vsel %vm3861_vm1, %v5180_v53, 0  ;;  %v3887_v57 = vsel %vm3861_vm1, %v5186_v54, 0  ;;  %v5938_v30 = vld [vmem:[%s7764_s8 + $0x8] ss:$100 sps:$4 sm:$0xff]  }
 0x246   :  { %v3050_v58 = vpop.f32.mrf.mxu0  ;;  %v3089_v59 = vpop.f32.mrf.mxu1 }
 0x247   :  { %v3090_v4 = vadd.f32 %v3089_v59, %v3049_v0  ;;  %v5940_v58 = vld [vmem:[%s7764_s8 + $0xc] ss:$100 sps:$4 sm:$0xff]   ;;  %v5941_v0 = vld [vmem:[%s7764_s8 + $0x20] ss:$100 sps:$4 sm:$0xff]  }
 0x248   :  { %v3051_v60 = vpop.f32.mrf.mxu0  ;;  %v3091_v61 = vpop.f32.mrf.mxu1 }
 0x249   :  { %v5943_v60 = vld [vmem:[%s7764_s8 + $0x24] ss:$100 sps:$4 sm:$0xff]  }
 0x24a   :  { %v3092_v62 = vpop.f32.mrf.mxu1  ;;  %v3525_v61 = vld [vmem:[%s7764_s8 + $0xe0] sm:$0x33] }
 0x24b   :  { %v3528_v62 = vld [vmem:[%s7764_s8 + $0xf8] sm:$0x33] }
 0x252   :  { %v3128_v3 = vpop.f32.mrf.mxu0 }
 0x253   :  { %v3129_v6 = vadd.f32 %v3128_v3, %v3088_v1  ;;  %v5184_v1 = vcombine.low %v3525_v61, %v3525_v61  ;;  %v5190_v3 = vcombine.low %v3528_v62, %v3528_v62 }
 0x254   :  { %v3130_v7 = vpop.f32.mrf.mxu0 }
 0x255   :  { %v3131_v9 = vadd.f32 %v3130_v7, %v3090_v4  ;;  %v3135_v10 = vmax.f32 %v3129_v6, 0.0  ;;  %v5185_v4 = vcombine.high %v3525_v61, %v3525_v61  ;;  %v5191_v6 = vcombine.high %v3528_v62, %v3528_v62 }
 0x256   :  { %v3132_v11 = vpop.f32.mrf.mxu0  ;;  %v3881_v7 = vsel %vm3861_vm1, %v5184_v1, 0 }
 0x257   :  { %v3136_v12 = vmax.f32 %v3131_v9, 0.0  ;;  %v3137_v34 = vpack.c.bf16 %v3135_v10, %v3135_v10  ;;  %v3899_v9 = vsel %vm3861_vm1, %v5190_v3, 0  ;;  %v5950_v10 = vld [vmem:[%s7764_s8 + $0x1c] ss:$100 sps:$4 sm:$0xff]   ;;  %v5953_v11 = vld [vmem:[%s7764_s8 + $0x34] ss:$100 sps:$4 sm:$0xff]  }
 0x258   :  { %v3133_v13 = vpop.f32.mrf.mxu0 }
 0x259   :  { %v3138_v14 = vpack.c.bf16 %v3136_v12, %v3136_v12  ;;  %v3527_v12 = vld [vmem:[%s7764_s8 + $0xf0] sm:$0x33]  ;;  %v3530_v13 = vld [vmem:[%s7764_s8 + $0x108] sm:$0x33] }
 0x25a   :  { %v5188_v15 = vcombine.low %v3527_v12, %v3527_v12  ;;  %v5194_v16 = vcombine.low %v3530_v13, %v3530_v13  ;;  %v5189_v17 = vcombine.high %v3527_v12, %v3527_v12  ;;  %v5195_v18 = vcombine.high %v3530_v13, %v3530_v13 }
 0x25b   :  { %3306 = vmatprep.mubr.bf16.mxu1 %v3138_v14  ;;  %3481 = vmatprep.mubr.bf16.mxu0 %v3138_v14  ;;  %v5948_v14 = vld [vmem:[%s7764_s8 + $0x18] ss:$100 sps:$4 sm:$0xff]  }
 0x25c   :  { %3307 = vmatmul.mubr.bf16.vlgmr.msra.gmra.mxu1 %v3137_v34  ;;  %3482 = vmatmul.mubr.bf16.vlgmr.msra.gmra.mxu0 %v3137_v34  ;;  %v5951_v34 = vld [vmem:[%s7764_s8 + $0x30] ss:$100 sps:$4 sm:$0xff]   ;;  %v3893_v19 = vsel %vm3861_vm1, %v5188_v15, 0  ;;  %v3911_v20 = vsel %vm3861_vm1, %v5194_v16, 0 }
 0x25d   :  { %3969 = vmatprep.mubr.bf16.mxu1 %v6033_v40  ;;  %4051 = vmatprep.mubr.bf16.mxu0 %v6033_v40 }
 0x25e   :  { %3950 = vmatpush1.bf16.msra.mxu1 %v3863_v21  ;;  %4032 = vmatpush1.bf16.msra.mxu0 %v3875_v22  ;;  %v5960_v21 = vld [vmem:[%s7764_s8 + $0x2c] ss:$100 sps:$4 sm:$0xff]   ;;  %v5963_v22 = vld [vmem:[%s7764_s8 + $0x44] ss:$100 sps:$4 sm:$0xff]  }
 0x25f   :  { %3951 = vmatprep.subr.bf16.mxu1 %v5930_v23  ;;  %4033 = vmatprep.subr.bf16.mxu0 %v5933_v5  ;;  %v3529_v23 = vld [vmem:[%s7764_s8 + $0x100] sm:$0x33]  ;;  %v3532_v5 = vld [vmem:[%s7764_s8 + $0x118] sm:$0x33] }
 0x260   :  { %v5193_v2 = vcombine.high %v3529_v23, %v3529_v23  ;;  %v5192_v29 = vcombine.low %v3529_v23, %v3529_v23 }
 0x262   :  { %3952 = vmatpush1.bf16.msra.mxu1 %v5928_v25  ;;  %4034 = vmatpush1.bf16.msra.mxu0 %v5931_v26  ;;  %v5958_v25 = vld [vmem:[%s7764_s8 + $0x28] ss:$100 sps:$4 sm:$0xff]   ;;  %v5961_v26 = vld [vmem:[%s7764_s8 + $0x40] ss:$100 sps:$4 sm:$0xff]  }
 0x263   :  { %5205 = vmatprep.subr.msk.bf16.mxu1 %vm3861_vm1, %v5181_v31  ;;  %5211 = vmatprep.subr.msk.bf16.mxu0 %vm3861_vm1, %v5187_v32  ;;  %v5199_v31 = vcombine.high %v3532_v5, %v3532_v5  ;;  %v5198_v32 = vcombine.low %v3532_v5, %v3532_v5 }
 0x31c   :  { %v5256_v8 = vpop.f32.mrf.mxu1  ;;  %v5278_v35 = vpop.f32.mrf.mxu0 }
 0x31e   :  { %v5257_v28 = vpop.f32.mrf.mxu1  ;;  %v5279_v37 = vpop.f32.mrf.mxu0 }
 0x31f   :  { %v5258_v38 = vadd.f32 %v5257_v28, %v5256_v8  ;;  %v5280_v39 = vadd.f32 %v5279_v37, %v5278_v35  ;;  %v3905_v8 = vsel %vm3861_vm1, %v5192_v29, 0  ;;  %v3923_v35 = vsel %vm3861_vm1, %v5198_v32, 0  ;;  %v5973_v28 = vld [vmem:[%s7764_s8 + $0x54] ss:$100 sps:$4 sm:$0xff]  }
 0x320   :  { %v5259_v41 = vpop.f32.mrf.mxu1  ;;  %v5281_v44 = vpop.f32.mrf.mxu0  ;;  %v5968_v37 = vld [vmem:[%s7764_s8 + $0x38] ss:$100 sps:$4 sm:$0xff]  }
 0x321   :  { %v3309_v45 = vadd.f32 %v5258_v38, %v5118_v36  ;;  %v3484_v46 = vadd.f32 %v5280_v39, %v5135_v63  ;;  %v5970_v36 = vld [vmem:[%s7764_s8 + $0x3c] ss:$100 sps:$4 sm:$0xff]   ;;  %v3531_v63 = vld [vmem:[%s7764_s8 + $0x110] sm:$0x33] }
 0x322   :  { %v5260_v49 = vpop.f32.mrf.mxu1  ;;  %v5282_v27 = vpop.f32.mrf.mxu0  ;;  %v5971_v38 = vld [vmem:[%s7764_s8 + $0x50] ss:$100 sps:$4 sm:$0xff]   ;;  %v5197_v39 = vcombine.high %v3531_v63, %v3531_v63  ;;  %v5196_v41 = vcombine.low %v3531_v63, %v3531_v63  ;;  %v5976_v44 = vld [vmem:[%s7764_s8 + $0x128] ss:$0 sps:$4 sm:$0x33]  }
 0x323   :  { %v3489_v50 = vmul.f32 0.5, %v3484_v46  ;;  %4470 = vst.msk [vmem:[#allocation2] sm:$0x3] %vm4469_vm2, %v3309_v45  ;;  %4471 = vst.msk [vmem:[#allocation4] sm:$0x3] %vm4469_vm2, %v3484_v46  ;;  %v6034_v46 = vmov 0.0  }
 0x324   :  { %v3935_v49 = vsel %vm3861_vm1, %v5976_v44, 0  ;;  %v5979_v27 = vld [vmem:[%s7764_s8 + $0x4c] ss:$100 sps:$4 sm:$0xff]  }
 0x325   :  { %v3490_v24 = vmul.f32 1.442695, %v3489_v50  ;;  %v3533_v50 = vld [vmem:[%s7764_s8 + $0x120] sm:$0x33] }
 0x326   :  { %v5200_v53 = vcombine.low %v3533_v50, %v3533_v50 }
 0x327   :  { %5986 = vpow2.f32 %v3490_v24  ;;  %v5977_v24 = vld [vmem:[%s7764_s8 + $0x48] ss:$100 sps:$4 sm:$0xff]  }
 0x328   :  { %v3929_v54 = vsel %vm3861_vm1, %v5200_v53, 0 }
 0x334   :  { %v5987_v52 = vpop.eup %5986 }
 0x335   :  { %v3493_v33 = vmul.f32 %v5987_v52, %v3492_v51  ;;  %v5980_v51 = vld [vmem:[%s7764_s8 + $0x60] ss:$100 sps:$4 sm:$0xff]   ;;  %v5201_v52 = vcombine.high %v3533_v50, %v3533_v50 }
 0x337   :  { %v3494_v55 = vadd.f32 %v3493_v33, %v3309_v45  ;;  %v3917_v45 = vsel %vm3861_vm1, %v5196_v41, 0  ;;  %v5985_v33 = vld [vmem:[%s7764_s8 + $0x5c] ss:$100 sps:$4 sm:$0xff]  }
 0x339   :  { %v7516_v59 = vpack.c.bf16 %v3494_v55, %v3494_v55  ;;  %v5983_v55 = vld [vmem:[%s7764_s8 + $0x58] ss:$100 sps:$4 sm:$0xff]  }
 0x33b   :  { %5204 = vmatmul.mubr.msk.bf16.vlgmr.msra.gmra.mxu1 %vm3857_vm3, %v7516_v59  ;;  %5208 = vmatmul.mubr.msk.bf16.vlgmr.msra.gmra.mxu0 %vm3857_vm3, %v7516_v59 }
 0x33c   :  { %3991 = vmatpush1.bf16.msra.mxu1 %v3869_v56  ;;  %4114 = vmatpush1.bf16.msra.mxu0 %v3887_v57 }
 0x33d   :  { %3992 = vmatprep.subr.bf16.mxu1 %v5940_v58  ;;  %4115 = vmatprep.subr.bf16.mxu0 %v5943_v60 }
 0x33e   :  { %4010 = vmatprep.mubr.bf16.mxu1 %v6033_v40  ;;  %4133 = vmatprep.mubr.bf16.mxu0 %v6033_v40 }
 0x340   :  { %3993 = vmatpush1.bf16.msra.mxu1 %v5938_v30  ;;  %4116 = vmatpush1.bf16.msra.mxu0 %v5941_v0 }
 0x341   :  { %5209 = vmatprep.subr.msk.bf16.mxu1 %vm3861_vm1, %v5185_v4  ;;  %5215 = vmatprep.subr.msk.bf16.mxu0 %vm3861_vm1, %v5191_v6 }
 0x343   :  { %5206 = vmatmul.mubr.msk.bf16.vlgmr.msra.gmra.mxu1 %vm3857_vm3, %v7516_v59  ;;  %5212 = vmatmul.mubr.msk.bf16.vlgmr.msra.gmra.mxu0 %vm3857_vm3, %v7516_v59 }
 0x344   :  { %4073 = vmatpush1.bf16.msra.mxu1 %v3881_v7  ;;  %4196 = vmatpush1.bf16.msra.mxu0 %v3899_v9 }
 0x345   :  { %4074 = vmatprep.subr.bf16.mxu1 %v5950_v10  ;;  %4197 = vmatprep.subr.bf16.mxu0 %v5953_v11 }
 0x346   :  { %4092 = vmatprep.mubr.bf16.mxu1 %v6033_v40  ;;  %4215 = vmatprep.mubr.bf16.mxu0 %v6033_v40 }
 0x348   :  { %4075 = vmatpush1.bf16.msra.mxu1 %v5948_v14  ;;  %4198 = vmatpush1.bf16.msra.mxu0 %v5951_v34 }
 0x349   :  { %5213 = vmatprep.subr.msk.bf16.mxu1 %vm3861_vm1, %v5189_v17  ;;  %5219 = vmatprep.subr.msk.bf16.mxu0 %vm3861_vm1, %v5195_v18 }
 0x34b   :  { %5210 = vmatmul.mubr.msk.bf16.vlgmr.msra.gmra.mxu1 %vm3857_vm3, %v7516_v59  ;;  %5216 = vmatmul.mubr.msk.bf16.vlgmr.msra.gmra.mxu0 %vm3857_vm3, %v7516_v59 }
 0x34c   :  { %4155 = vmatpush1.bf16.msra.mxu1 %v3893_v19  ;;  %4278 = vmatpush1.bf16.msra.mxu0 %v3911_v20 }
 0x34d   :  { %4156 = vmatprep.subr.bf16.mxu1 %v5960_v21  ;;  %4279 = vmatprep.subr.bf16.mxu0 %v5963_v22 }
 0x34e   :  { %4174 = vmatprep.mubr.bf16.mxu1 %v6033_v40  ;;  %4297 = vmatprep.mubr.bf16.mxu0 %v6033_v40 }
 0x350   :  { %4157 = vmatpush1.bf16.msra.mxu1 %v5958_v25  ;;  %4280 = vmatpush1.bf16.msra.mxu0 %v5961_v26 }
 0x351   :  { %5217 = vmatprep.subr.msk.bf16.mxu1 %vm3861_vm1, %v5193_v2  ;;  %5223 = vmatprep.subr.msk.bf16.mxu0 %vm3861_vm1, %v5199_v31 }
 0x353   :  { %5214 = vmatmul.mubr.msk.bf16.vlgmr.msra.gmra.mxu1 %vm3857_vm3, %v7516_v59  ;;  %5220 = vmatmul.mubr.msk.bf16.vlgmr.msra.gmra.mxu0 %vm3857_vm3, %v7516_v59 }
 0x354   :  { %4237 = vmatpush1.bf16.msra.mxu1 %v3905_v8  ;;  %4360 = vmatpush1.bf16.msra.mxu0 %v3923_v35 }
 0x355   :  { %4238 = vmatprep.subr.bf16.mxu1 %v5970_v36  ;;  %4361 = vmatprep.subr.bf16.mxu0 %v5973_v28 }
 0x356   :  { %4256 = vmatprep.mubr.bf16.mxu1 %v6033_v40  ;;  %4379 = vmatprep.mubr.bf16.mxu0 %v6033_v40 }
 0x358   :  { %4239 = vmatpush1.bf16.msra.mxu1 %v5968_v37  ;;  %4362 = vmatpush1.bf16.msra.mxu0 %v5971_v38 }
 0x359   :  { %5221 = vmatprep.subr.msk.bf16.mxu1 %vm3861_vm1, %v5197_v39  ;;  %5287 = vmatprep.subr.bf16.mxu0 %v6034_v46 }
 0x35b   :  { %5218 = vmatmul.mubr.msk.bf16.vlgmr.msra.gmra.mxu1 %vm3857_vm3, %v7516_v59  ;;  %5224 = vmatmul.mubr.msk.bf16.vlgmr.msra.gmra.mxu0 %vm3857_vm3, %v7516_v59 }
 0x35c   :  { %4319 = vmatpush1.bf16.msra.mxu1 %v3917_v45  ;;  %5288 = vmatpush3.bf16.msra.mxu0 %v3935_v49 }
 0x35d   :  { %4320 = vmatprep.subr.bf16.mxu1 %v5979_v27  ;;  %5289 = vmatprep.subr.bf16.mxu0 %v6034_v46 }
 0x35e   :  { %4338 = vmatprep.mubr.bf16.mxu1 %v6033_v40  ;;  %5291 = vmatprep.mubr.msk.bf16.mxu0 %vm6035_vm4, %v6034_v46 }
 0x360   :  { %4321 = vmatpush1.bf16.msra.mxu1 %v5977_v24  ;;  %5290 = vmatpush3.bf16.msra.mxu0 %v5980_v51 }
 0x361   :  { %5225 = vmatprep.subr.msk.bf16.mxu1 %vm3861_vm1, %v5201_v52 }
 0x363   :  { %5222 = vmatmul.mubr.msk.bf16.vlgmr.msra.gmra.mxu1 %vm3857_vm3, %v7516_v59  ;;  %5292 = vmatmul.mubr.msk.bf16.vlgmr.msra.gmra.mxu0 %vm3857_vm3, %v7516_v59 }
 0x364   :  { %4401 = vmatpush1.bf16.msra.mxu1 %v3929_v54  ;;  %4420 = vmatprep.mubr.bf16.mxu1 %v6033_v40 }
 0x365   :  { %4402 = vmatprep.subr.bf16.mxu1 %v5985_v33 }
 0x368   :  { %4403 = vmatpush1.bf16.msra.mxu1 %v5983_v55 }
 0x36b   :  { %5226 = vmatmul.mubr.msk.bf16.vlgmr.msra.gmra.mxu1 %vm3857_vm3, %v7516_v59 }
 0x36c   :  { %5999 = shalt.err (!%p5996_p4)
}
 0x36d   :  { %4701 = dma.vmem_to_hbm [thread:$0]  %s4699_s30, 32, %s7766_s10, [#allocation3]  }
 0x36e   :  { %s6008_s16 = scalar_lea.vmem %s4709_s2, 32  ;;  %p6013_p6 = scmp.lt.s32.totalorder %s4709_s2, %s4709_s2 }
 0x36f   :  { %p6009_p5 = scmp.ne.s32.totalorder %s4709_s2, %s6008_s16  ;;  %p6014_p7 = scmp.lt.s32.totalorder %s6008_s16, %s6008_s16 }
 0x371   :  { %p6015_p8 = por %p6014_p7, %p6013_p6 }
 0x373   :  { %p6016_p9 = pnand %p6015_p8, %p6009_p5 }
 0x375   :  { %6019 = shalt.err (!%p6016_p9)
}
 0x376   :  { %4711 = dma.vmem_to_hbm [thread:$0]  %s4709_s2, 32, %s7767_s11, [#allocation5]   ;;  %v7665_v59 = vsub.s32 3, %v6220_v42  ;;  %v7668_v62 = vsub.s32 2, %v6220_v42  ;;  %v3535_v30 = vld [vmem:[%s7765_s9] sm:$0xff]  ;;  %v7674_v3 = vsub.s32 5, %v6220_v42 }
 0x377   :  { %v7680_v9 = vsub.s32 4, %v6220_v42  ;;  %v3550_v10 = vrot.slane %v3535_v30, %v6935_v47  ;;  %v7685_v14 = vsub.s32 6, %v6220_v42  ;;  %v3546_v34 = vrot.slane %v3535_v30, %v6924_v43  ;;  %v3536_v49 = vld [vmem:[%s7765_s9 + $0x8] sm:$0xff] }
 0x378   :  { %v3558_v4 = vrot.slane %v3535_v30, %v7665_v59  ;;  %v3554_v11 = vrot.slane %v3535_v30, %v7668_v62  ;;  %v3566_v15 = vrot.slane %v3535_v30, %v7674_v3  ;;  %v7690_v17 = vsub.s32 7, %v6220_v42 }
 0x379   :  { %v3562_v20 = vrot.slane %v3535_v30, %v7680_v9  ;;  %v3570_v25 = vrot.slane %v3535_v30, %v7685_v14  ;;  %v3590_v53 = vrot.slane %v3536_v49, %v7665_v59  ;;  %v3582_v55 = vrot.slane %v3536_v49, %v6935_v47 }
 0x37a   :  { %v3574_v31 = vrot.slane %v3535_v30, %v7690_v17  ;;  %vm4690_vm5 = vcmask 516096  }
 0x3fb   :  { %v3971_v40 = vpop.f32.mrf.mxu1  ;;  %v4053_v56 = vpop.f32.mrf.mxu0 }
 0x3fc   :  { %v3972_v26 = vadd.f32 %v3971_v40, %v3546_v34  ;;  %v4054_v35 = vadd.f32 %v4053_v56, %v3562_v20  ;;  %v3586_v56 = vrot.slane %v3536_v49, %v7668_v62 }
 0x3fd   :  { %v3973_v57 = vpop.f32.mrf.mxu1  ;;  %v4055_v58 = vpop.f32.mrf.mxu0 }
 0x3fe   :  { %v3974_v21 = vadd.f32 %v3973_v57, %v3550_v10  ;;  %v4056_v2 = vadd.f32 %v4055_v58, %v3566_v15  ;;  %v3578_v57 = vrot.slane %v3536_v49, %v6924_v43 }
 0x3ff   :  { %v3975_v60 = vpop.f32.mrf.mxu1  ;;  %v4057_v61 = vpop.f32.mrf.mxu0 }
 0x400   :  { %v5228_v42 = vpack.c.bf16 %v3974_v21, %v3972_v26  ;;  %v5230_v63 = vpack.c.bf16 %v4056_v2, %v4054_v35 }
 0x401   :  { %v3976_v0 = vpop.f32.mrf.mxu1  ;;  %v4058_v1 = vpop.f32.mrf.mxu0 }
 0x402   :  { %v4532_v45 = vrot.slane %v5228_v42, %v6235_v48  ;;  %v4546_v24 = vrot.slane %v5230_v63, %v6235_v48  ;;  %v3598_v0 = vrot.slane %v3536_v49, %v7674_v3 }
 0x403   :  { %v4012_v6 = vpop.f32.mrf.mxu1  ;;  %v7677_v7 = vpop.f32.mrf.mxu0 }
 0x404   :  { %v4013_v22 = vadd.f32 %v4012_v6, %v3554_v11  ;;  %v3594_v11 = vrot.slane %v3536_v49, %v7680_v9 }
 0x405   :  { %v4014_v12 = vpop.f32.mrf.mxu1  ;;  %v4137_v13 = vpop.f32.mrf.mxu0 }
 0x406   :  { %v4015_v16 = vadd.f32 %v4014_v12, %v3558_v4  ;;  %v4138_v10 = vadd.f32 %v4137_v13, %v3582_v55 }
 0x407   :  { %v4016_v18 = vpop.f32.mrf.mxu1  ;;  %v4139_v19 = vpop.f32.mrf.mxu0 }
 0x408   :  { %v5229_v29 = vpack.c.bf16 %v4015_v16, %v4013_v22  ;;  %v3602_v18 = vrot.slane %v3536_v49, %v7685_v14  ;;  %v4136_v19 = vadd.f32 %v7677_v7, %v3578_v57  ;;  %v3606_v22 = vrot.slane %v3536_v49, %v7690_v17 }
 0x409   :  { %v4017_v23 = vpop.f32.mrf.mxu1  ;;  %v4140_v5 = vpop.f32.mrf.mxu0 }
 0x40a   :  { %v4539_v37 = vrot.slane %v5229_v29, %v6235_v48  ;;  %v5232_v5 = vpack.c.bf16 %v4138_v10, %v4136_v19 }
 0x40b   :  { %v4094_v32 = vpop.f32.mrf.mxu1  ;;  %v4217_v8 = vpop.f32.mrf.mxu0 }
 0x40c   :  { %v4095_v38 = vadd.f32 %v4094_v32, %v3570_v25  ;;  %v4554_v51 = vcombine.low %v4532_v45, %v4539_v37  ;;  %v4218_v25 = vadd.f32 %v4217_v8, %v3594_v11  ;;  %v5152_v8 = vld [vmem:[%s7765_s9 + $0x18] ss:$0 sm:$0xff] }
 0x40d   :  { %v4096_v36 = vpop.f32.mrf.mxu1  ;;  %v4219_v28 = vpop.f32.mrf.mxu0 }
 0x40e   :  { %v4097_v39 = vadd.f32 %v4096_v36, %v3574_v31  ;;  %v4562_v61 = vrot.slane %v4554_v51, %v6235_v48  ;;  %v4220_v20 = vadd.f32 %v4219_v28, %v3598_v0  ;;  %v4581_v36 = vrot.slane %v5232_v5, %v6235_v48  ;;  %v3537_v28 = vld [vmem:[%s7765_s9 + $0x10] sm:$0xff] }
 0x40f   :  { %v4098_v41 = vpop.f32.mrf.mxu1  ;;  %v4221_v44 = vpop.f32.mrf.mxu0  ;;  %v3622_v45 = vrot.slane %v3537_v28, %v7665_v59 }
 0x410   :  { %v5231_v46 = vpack.c.bf16 %v4097_v39, %v4095_v38  ;;  %v5234_v29 = vpack.c.bf16 %v4220_v20, %v4218_v25 }
 0x411   :  { %v4099_v27 = vpop.f32.mrf.mxu1  ;;  %v4222_v50 = vpop.f32.mrf.mxu0 }
 0x412   :  { %v4553_v52 = vrot.slane %v5231_v46, %v6235_v48  ;;  %v4595_v39 = vrot.slane %v5234_v29, %v6235_v48  ;;  %v3614_v27 = vrot.slane %v3537_v28, %v6935_v47 }
 0x413   :  { %v4176_v54 = vpop.f32.mrf.mxu1  ;;  %v7703_v33 = vpop.f32.mrf.mxu0 }
 0x414   :  { %v4555_v40 = vcombine.low %v4546_v24, %v4553_v52  ;;  %v4177_v34 = vadd.f32 %v4176_v54, %v3586_v56  ;;  %v3618_v24 = vrot.slane %v3537_v28, %v7668_v62  ;;  %v3610_v52 = vrot.slane %v3537_v28, %v6924_v43 }
 0x415   :  { %v4178_v58 = vpop.f32.mrf.mxu1  ;;  %v4301_v60 = vpop.f32.mrf.mxu0 }
 0x416   :  { %v4569_v30 = vrot.slane %v4555_v40, %v6235_v48  ;;  %v4179_v1 = vadd.f32 %v4178_v58, %v3590_v53  ;;  %v3630_v53 = vrot.slane %v3537_v28, %v7674_v3  ;;  %v3626_v58 = vrot.slane %v3537_v28, %v7680_v9 }
 0x417   :  { %v4180_v4 = vpop.f32.mrf.mxu1  ;;  %v4303_v6 = vpop.f32.mrf.mxu0  ;;  %v4300_v10 = vadd.f32 %v7703_v33, %v3610_v52 }
 0x418   :  { %v4570_v12 = vcombine.low %v4562_v61, %v4569_v30  ;;  %v5233_v21 = vpack.c.bf16 %v4179_v1, %v4177_v34  ;;  %v4302_v30 = vadd.f32 %v4301_v60, %v3614_v27  ;;  %v3634_v4 = vrot.slane %v3537_v28, %v7685_v14 }
 0x419   :  { %v4181_v15 = vpop.f32.mrf.mxu1  ;;  %v4304_v16 = vpop.f32.mrf.mxu0  ;;  %v3638_v6 = vrot.slane %v3537_v28, %v7690_v17 }
 0x41a   :  { %4687 = vst [vmem:[%s7768_s12] sm:$0xff] %v4570_v12  ;;  %v4588_v31 = vrot.slane %v5233_v21, %v6235_v48  ;;  %v5236_v34 = vpack.c.bf16 %v4302_v30, %v4300_v10 }
 0x41b   :  { %v4258_v23 = vpop.f32.mrf.mxu1  ;;  %v4381_v13 = vpop.f32.mrf.mxu0 }
 0x41c   :  { %v4259_v32 = vadd.f32 %v4258_v23, %v3602_v18  ;;  %v4603_v41 = vcombine.low %v4581_v36, %v4588_v31  ;;  %v4382_v15 = vadd.f32 %v4381_v13, %v3626_v58  ;;  %v4630_v20 = vrot.slane %v5236_v34, %v6235_v48 }
 0x41d   :  { %v4260_v26 = vpop.f32.mrf.mxu1  ;;  %v4383_v2 = vpop.f32.mrf.mxu0 }
 0x41e   :  { %v4261_v35 = vadd.f32 %v4260_v26, %v3606_v22  ;;  %v4611_v40 = vrot.slane %v4603_v41, %v6235_v48  ;;  %v4384_v9 = vadd.f32 %v4383_v2, %v3630_v53 }
 0x41f   :  { %v4262_v7 = vpop.f32.mrf.mxu1  ;;  %v4385_v42 = vpop.f32.mrf.mxu0 }
 0x420   :  { %v5235_v63 = vpack.c.bf16 %v4261_v35, %v4259_v32  ;;  %v5238_v16 = vpack.c.bf16 %v4384_v9, %v4382_v15 }
 0x421   :  { %v4263_v37 = vpop.f32.mrf.mxu1  ;;  %v4386_v38 = vpop.f32.mrf.mxu0 }
 0x422   :  { %v4602_v44 = vrot.slane %v5235_v63, %v6235_v48  ;;  %v4644_v23 = vrot.slane %v5238_v16, %v6235_v48 }
 0x423   :  { %v4340_v46 = vpop.f32.mrf.mxu1  ;;  %v4463_v49 = vpop.f32.mrf.mxu0 }
 0x424   :  { %v4604_v50 = vcombine.low %v4595_v39, %v4602_v44  ;;  %v4464_v51 = vadd.f32 %v5152_v8, %v4463_v49  ;;  %v4341_v62 = vadd.f32 %v4340_v46, %v3618_v24 }
 0x425   :  { %v4342_v54 = vpop.f32.mrf.mxu1  ;;  %v5293_v55 = vpop.f32.mrf.mxu0 }
 0x426   :  { %v4618_v56 = vrot.slane %v4604_v50, %v6235_v48  ;;  %v4496_v57 = vpack.c.bf16 %v4464_v51, %v4464_v51  ;;  %v4343_v59 = vadd.f32 %v4342_v54, %v3622_v45 }
 0x427   :  { %v4344_v61 = vpop.f32.mrf.mxu1  ;;  %v4466_v47 = vpop.f32.mrf.mxu0 }
 0x428   :  { %v4619_v0 = vcombine.low %v4611_v40, %v4618_v56  ;;  %v4675_v1 = vrot.slane %v4496_v57, %v6235_v48  ;;  %v5237_v11 = vpack.c.bf16 %v4343_v59, %v4341_v62 }
 0x429   :  { %v4345_v43 = vpop.f32.mrf.mxu1  ;;  %v5294_v3 = vpop.f32.mrf.mxu0 }
 0x42a   :  { %4688 = vst [vmem:[%s7768_s12 + $0x8] sm:$0xff] %v4619_v0  ;;  %v4682_v60 = vrot.slane %v4675_v1, %v6235_v48  ;;  %v4637_v17 = vrot.slane %v5237_v11, %v6235_v48 }
 0x42b   :  { %v4422_v12 = vpop.f32.mrf.mxu1 }
 0x42c   :  { %4691 = vst.msk [vmem:[%s7768_s12 + $0x18] sm:$0x1] %vm4690_vm5, %v4682_v60  ;;  %v4423_v33 = vadd.f32 %v4422_v12, %v3634_v4  ;;  %v4652_v5 = vcombine.low %v4630_v20, %v4637_v17 }
 0x42d   :  { %v4424_v14 = vpop.f32.mrf.mxu1 }
 0x42e   :  { %v4425_v18 = vadd.f32 %v4424_v14, %v3638_v6  ;;  %v4660_v26 = vrot.slane %v4652_v5, %v6235_v48 }
 0x42f   :  { %v4426_v19 = vpop.f32.mrf.mxu1 }
 0x430   :  { %v5239_v21 = vpack.c.bf16 %v4425_v18, %v4423_v33 }
 0x431   :  { %v4427_v22 = vpop.f32.mrf.mxu1 }
 0x432   :  { %v4651_v13 = vrot.slane %v5239_v21, %v6235_v48 }
 0x434   :  { %v4653_v25 = vcombine.low %v4644_v23, %v4651_v13 }
 0x436   :  { %v4667_v2 = vrot.slane %v4653_v25, %v6235_v48 }
 0x438   :  { %v4668_v29 = vcombine.low %v4660_v26, %v4667_v2 }
 0x43a   :  { %4689 = vst [vmem:[%s7768_s12 + $0x10] sm:$0xff] %v4668_v29 }
 0x43b   :  { %6028 = dma.done.wait [#allocation3], 32  }
 0x43c   :  { %6029 = vsyncadd [#allocation3], 4294967264 }
 0x43d   :  { %6030 = dma.done.wait [#allocation5], 32  }
 0x43e   :  { %6031 = vsyncadd [#allocation5], 4294967264 }
 0x43f   :  { %4722 = vsyncpa [#allocation3], 1 }
 0x440   :  { %4723 = vsyncpa [#allocation5], 1 }

// kernel: vae_forward.12
= control target key start
LH: loop header
LB: loop body
LE: loop exit
PB: predicated region body
PF: predicated region fallthrough
CT: control target
= control target key end

     0   :  { %v2812_v0 = vmov 0   ;;  %v2813_v24 = vmov 0.0   ;;  %vm2814_vm0 = vmmov 0   ;;  %vm1074_vm1 = vcmask 523264   ;;  %s3836_s1 = inlined_call_operand.vmem [shape: bf16[576,32], index: 1, kind: input, shape index: {}]   ;;  %s3837_s0 = inlined_call_operand.vmem [shape: bf16[392,576], index: 0, kind: input, shape index: {}]   ;;  %s3838_s2 = inlined_call_operand.vmem [shape: f32[1,32], index: 2, kind: input, shape index: {}]   ;;  %s3839_s3 = inlined_call_operand.vmem [shape: bf16[392,32], index: 3, kind: output, shape index: {}]  }
   0x1   :  { %1150 = vmatprep.subr.bf16.mxu0 %v2812_v0  ;;  %2568 = vmatprep.subr.bf16.mxu1 %v2812_v0  ;;  %v2603_v1 = vld [vmem:[%s3836_s1 + $0x38] sm:$0xff]   ;;  %v2604_v2 = vld [vmem:[%s3836_s1 + $0x30] sm:$0xff]   ;;  %v2605_v3 = vld [vmem:[%s3836_s1 + $0x28] sm:$0xff]   ;;  %vm2092_vm2 = vcmask 257024  }
   0x2   :  { %1151 = vmatpush1.bf16.msra.mxu0 %v2603_v1  ;;  %2584 = vmatpush1.bf16.msra.mxu1 %v2603_v1  ;;  %v2606_v4 = vld [vmem:[%s3836_s1 + $0x20] sm:$0xff]   ;;  %v2607_v5 = vld [vmem:[%s3836_s1 + $0x18] sm:$0xff]   ;;  %v2608_v7 = vld [vmem:[%s3836_s1 + $0x10] sm:$0xff]  }
   0x3   :  { %1152 = vmatprep.subr.bf16.mxu0 %v2812_v0  ;;  %2569 = vmatprep.subr.bf16.mxu1 %v2812_v0  ;;  %v2621_v6 = vld [vmem:[%s3837_s0 + $0x4] ss:$20 sps:$4 sm:$0xff]   ;;  %v2624_v8 = vld [vmem:[%s3837_s0 + $0x20c] ss:$20 sps:$4 sm:$0xff]   ;;  %v2612_v12 = vld [vmem:[%s3836_s1 + $0x70] sm:$0xff]  }
   0x4   :  { %1182 = vmatprep.mubr.bf16.mxu0 %v2621_v6  ;;  %1286 = vmatprep.mubr.bf16.mxu1 %v2624_v8  ;;  %v2609_v9 = vld [vmem:[%s3836_s1 + $0x8] sm:$0xff]   ;;  %v2610_v10 = vld [vmem:[%s3836_s1] sm:$0xff]   ;;  %v2611_v11 = vld [vmem:[%s3836_s1 + $0x78] sm:$0xff]  }
   0x5   :  { %v2613_v13 = vld [vmem:[%s3836_s1 + $0x68] sm:$0xff]   ;;  %v2614_v14 = vld [vmem:[%s3836_s1 + $0x60] sm:$0xff]   ;;  %v2615_v15 = vld [vmem:[%s3836_s1 + $0x58] sm:$0xff]  }
   0x6   :  { %1153 = vmatpush1.bf16.msra.mxu0 %v2604_v2  ;;  %2585 = vmatpush1.bf16.msra.mxu1 %v2604_v2  ;;  %v2616_v16 = vld [vmem:[%s3836_s1 + $0x50] sm:$0xff]   ;;  %v2617_v17 = vld [vmem:[%s3836_s1 + $0x48] sm:$0xff]   ;;  %v2618_v18 = vld [vmem:[%s3836_s1 + $0x40] sm:$0xff]  }
   0x7   :  { %1154 = vmatprep.subr.bf16.mxu0 %v2812_v0  ;;  %2570 = vmatprep.subr.bf16.mxu1 %v2812_v0  ;;  %v2619_v19 = vld [vmem:[%s3837_s0] ss:$20 sps:$4 sm:$0xff]   ;;  %v2622_v20 = vld [vmem:[%s3837_s0 + $0x208] ss:$20 sps:$4 sm:$0xff]   ;;  %v2632_v29 = vld [vmem:[%s3837_s0 + $0x230] ss:$20 sps:$4 sm:$0xff]  }
   0x8   :  { %v2625_v21 = vld [vmem:[%s3836_s1 + $0x118] sm:$0xff]   ;;  %v2626_v22 = vld [vmem:[%s3837_s0 + $0x2c] ss:$20 sps:$4 sm:$0xff]   ;;  %v2628_v23 = vld [vmem:[%s3837_s0 + $0x234] ss:$20 sps:$4 sm:$0xff]  }
   0x9   :  { %v2630_v25 = vld [vmem:[%s3836_s1 + $0xb8] sm:$0xff]   ;;  %v2648_v26 = vld [vmem:[%s3836_s1 + $0x110] sm:$0xff]   ;;  %v2640_v32 = vld [vmem:[%s3836_s1 + $0xa8] sm:$0xff]  }
   0xa   :  { %1155 = vmatpush1.bf16.msra.mxu0 %v2605_v3  ;;  %2586 = vmatpush1.bf16.msra.mxu1 %v2605_v3  ;;  %v2633_v27 = vld [vmem:[%s3836_s1 + $0xb0] sm:$0xff]   ;;  %v2631_v28 = vld [vmem:[%s3837_s0 + $0x28] ss:$20 sps:$4 sm:$0xff]   ;;  %v2647_v34 = vld [vmem:[%s3836_s1 + $0xa0] sm:$0xff]  }
   0xb   :  { %1156 = vmatprep.subr.bf16.mxu0 %v2812_v0  ;;  %2571 = vmatprep.subr.bf16.mxu1 %v2812_v0  ;;  %v2634_v30 = vld [vmem:[%s3837_s0 + $0x54] ss:$20 sps:$4 sm:$0xff]   ;;  %v2636_v31 = vld [vmem:[%s3837_s0 + $0x25c] ss:$20 sps:$4 sm:$0xff]   ;;  %v2699_v35 = vld [vmem:[%s3836_s1 + $0x100] sm:$0xff]  }
   0xc   :  { %v2671_v33 = vld [vmem:[%s3836_s1 + $0x108] sm:$0xff]   ;;  %v2638_v36 = vld [vmem:[%s3837_s0 + $0x50] ss:$20 sps:$4 sm:$0xff]   ;;  %v2653_v40 = vld [vmem:[%s3836_s1 + $0x98] sm:$0xff]  }
   0xd   :  { %v2639_v37 = vld [vmem:[%s3837_s0 + $0x258] ss:$20 sps:$4 sm:$0xff]   ;;  %v2641_v38 = vld [vmem:[%s3837_s0 + $0x7c] ss:$20 sps:$4 sm:$0xff]   ;;  %v2646_v42 = vld [vmem:[%s3837_s0 + $0x280] ss:$20 sps:$4 sm:$0xff]  }
   0xe   :  { %1157 = vmatpush1.bf16.msra.mxu0 %v2606_v4  ;;  %2587 = vmatpush1.bf16.msra.mxu1 %v2606_v4  ;;  %v2643_v39 = vld [vmem:[%s3837_s0 + $0x284] ss:$20 sps:$4 sm:$0xff]   ;;  %v2656_v43 = vld [vmem:[%s3836_s1 + $0x90] sm:$0xff]   ;;  %v2651_v45 = vld [vmem:[%s3837_s0 + $0x2ac] ss:$20 sps:$4 sm:$0xff]  }
   0xf   :  { %1158 = vmatprep.subr.bf16.mxu0 %v2812_v0  ;;  %2572 = vmatprep.subr.bf16.mxu1 %v2812_v0  ;;  %v2645_v41 = vld [vmem:[%s3837_s0 + $0x78] ss:$20 sps:$4 sm:$0xff]   ;;  %v2670_v47 = vld [vmem:[%s3836_s1 + $0x80] sm:$0xff]   ;;  %v2655_v49 = vld [vmem:[%s3837_s0 + $0x2a8] ss:$20 sps:$4 sm:$0xff]  }
  0x10   :  { %v2649_v44 = vld [vmem:[%s3837_s0 + $0xa4] ss:$20 sps:$4 sm:$0xff]   ;;  %v2663_v46 = vld [vmem:[%s3836_s1 + $0x88] sm:$0xff]   ;;  %v2654_v48 = vld [vmem:[%s3837_s0 + $0xa0] ss:$20 sps:$4 sm:$0xff]  }
  0x11   :  { %v2657_v50 = vld [vmem:[%s3837_s0 + $0xcc] ss:$20 sps:$4 sm:$0xff]   ;;  %v2659_v51 = vld [vmem:[%s3837_s0 + $0x2d4] ss:$20 sps:$4 sm:$0xff]   ;;  %v2676_v52 = vld [vmem:[%s3836_s1 + $0xf8] sm:$0xff]  }
  0x12   :  { %1159 = vmatpush1.bf16.msra.mxu0 %v2607_v5  ;;  %2588 = vmatpush1.bf16.msra.mxu1 %v2607_v5  ;;  %v2679_v53 = vld [vmem:[%s3836_s1 + $0xf0] sm:$0xff]   ;;  %v2661_v54 = vld [vmem:[%s3837_s0 + $0xc8] ss:$20 sps:$4 sm:$0xff]   ;;  %v2693_v59 = vld [vmem:[%s3836_s1 + $0xe0] sm:$0xff]  }
  0x13   :  { %1160 = vmatprep.subr.bf16.mxu0 %v2812_v0  ;;  %2573 = vmatprep.subr.bf16.mxu1 %v2812_v0  ;;  %v2662_v55 = vld [vmem:[%s3837_s0 + $0x2d0] ss:$20 sps:$4 sm:$0xff]   ;;  %v2664_v56 = vld [vmem:[%s3837_s0 + $0xf4] ss:$20 sps:$4 sm:$0xff]   ;;  %v2669_v61 = vld [vmem:[%s3837_s0 + $0x2f8] ss:$20 sps:$4 sm:$0xff]  }
  0x14   :  { %v2666_v57 = vld [vmem:[%s3837_s0 + $0x2fc] ss:$20 sps:$4 sm:$0xff]   ;;  %v2686_v58 = vld [vmem:[%s3836_s1 + $0xe8] sm:$0xff]   ;;  %v2674_v63 = vld [vmem:[%s3837_s0 + $0x324] ss:$20 sps:$4 sm:$0xff]  }
  0x15   :  { %v2668_v60 = vld [vmem:[%s3837_s0 + $0xf0] ss:$20 sps:$4 sm:$0xff]   ;;  %v2698_v1 = vld [vmem:[%s3836_s1 + $0xd8] sm:$0xff]   ;;  %v2678_v4 = vld [vmem:[%s3837_s0 + $0x320] ss:$20 sps:$4 sm:$0xff]  }
  0x16   :  { %1161 = vmatpush1.bf16.msra.mxu0 %v2608_v7  ;;  %2589 = vmatpush1.bf16.msra.mxu1 %v2608_v7  ;;  %v2672_v62 = vld [vmem:[%s3837_s0 + $0x11c] ss:$20 sps:$4 sm:$0xff]   ;;  %v2677_v3 = vld [vmem:[%s3837_s0 + $0x118] ss:$20 sps:$4 sm:$0xff]   ;;  %v2709_v8 = vld [vmem:[%s3836_s1 + $0xc0] sm:$0xff]  }
  0x17   :  { %1162 = vmatprep.subr.bf16.mxu0 %v2812_v0  ;;  %2574 = vmatprep.subr.bf16.mxu1 %v2812_v0  ;;  %v2702_v2 = vld [vmem:[%s3836_s1 + $0xd0] sm:$0xff]   ;;  %v2680_v5 = vld [vmem:[%s3837_s0 + $0x144] ss:$20 sps:$4 sm:$0xff]   ;;  %v2682_v6 = vld [vmem:[%s3837_s0 + $0x34c] ss:$20 sps:$4 sm:$0xff]  }
  0x18   :  { %v2708_v7 = vld [vmem:[%s3836_s1 + $0xc8] sm:$0xff]  }
  0x1a   :  { %1163 = vmatpush1.bf16.msra.mxu0 %v2609_v9  ;;  %2590 = vmatpush1.bf16.msra.mxu1 %v2609_v9  ;;  %v2684_v9 = vld [vmem:[%s3837_s0 + $0x140] ss:$20 sps:$4 sm:$0xff]  }
  0x1b   :  { %1164 = vmatprep.subr.bf16.mxu0 %v2812_v0  ;;  %2575 = vmatprep.subr.bf16.mxu1 %v2812_v0 }
  0x1e   :  { %1165 = vmatpush1.bf16.msra.mxu0 %v2610_v10  ;;  %2591 = vmatpush1.bf16.msra.mxu1 %v2610_v10  ;;  %v2685_v10 = vld [vmem:[%s3837_s0 + $0x348] ss:$20 sps:$4 sm:$0xff]  }
  0x1f   :  { %1166 = vmatprep.subr.bf16.mxu0 %v2812_v0  ;;  %2576 = vmatprep.subr.bf16.mxu1 %v2812_v0 }
  0x22   :  { %1167 = vmatpush2.bf16.msra.mxu0 %v2611_v11  ;;  %2592 = vmatpush2.bf16.msra.mxu1 %v2611_v11  ;;  %v2687_v11 = vld [vmem:[%s3837_s0 + $0x16c] ss:$20 sps:$4 sm:$0xff]  }
  0x23   :  { %1168 = vmatprep.subr.bf16.mxu0 %v2812_v0  ;;  %2577 = vmatprep.subr.bf16.mxu1 %v2812_v0 }
  0x26   :  { %1169 = vmatpush2.bf16.msra.mxu0 %v2612_v12  ;;  %2593 = vmatpush2.bf16.msra.mxu1 %v2612_v12  ;;  %v2689_v12 = vld [vmem:[%s3837_s0 + $0x374] ss:$20 sps:$4 sm:$0xff]  }
  0x27   :  { %1170 = vmatprep.subr.bf16.mxu0 %v2812_v0  ;;  %2578 = vmatprep.subr.bf16.mxu1 %v2812_v0 }
  0x2a   :  { %1171 = vmatpush2.bf16.msra.mxu0 %v2613_v13  ;;  %2594 = vmatpush2.bf16.msra.mxu1 %v2613_v13  ;;  %v2692_v13 = vld [vmem:[%s3837_s0 + $0x370] ss:$20 sps:$4 sm:$0xff]  }
  0x2b   :  { %1172 = vmatprep.subr.bf16.mxu0 %v2812_v0  ;;  %2579 = vmatprep.subr.bf16.mxu1 %v2812_v0 }
  0x2e   :  { %1173 = vmatpush2.bf16.msra.mxu0 %v2614_v14  ;;  %2595 = vmatpush2.bf16.msra.mxu1 %v2614_v14  ;;  %v2694_v14 = vld [vmem:[%s3837_s0 + $0x194] ss:$20 sps:$4 sm:$0xff]  }
  0x2f   :  { %1174 = vmatprep.subr.bf16.mxu0 %v2812_v0  ;;  %2580 = vmatprep.subr.bf16.mxu1 %v2812_v0 }
  0x32   :  { %1175 = vmatpush2.bf16.msra.mxu0 %v2615_v15  ;;  %2596 = vmatpush2.bf16.msra.mxu1 %v2615_v15  ;;  %v2696_v15 = vld [vmem:[%s3837_s0 + $0x39c] ss:$20 sps:$4 sm:$0xff]  }
  0x33   :  { %1176 = vmatprep.subr.bf16.mxu0 %v2812_v0  ;;  %2581 = vmatprep.subr.bf16.mxu1 %v2812_v0 }
  0x36   :  { %1177 = vmatpush2.bf16.msra.mxu0 %v2616_v16  ;;  %2597 = vmatpush2.bf16.msra.mxu1 %v2616_v16  ;;  %v159_v16 = vld [vmem:[%s3837_s0 + $0x3c0] sm:$0xff] }
  0x37   :  { %1178 = vmatprep.subr.bf16.mxu0 %v2812_v0  ;;  %2582 = vmatprep.subr.bf16.mxu1 %v2812_v0 }
  0x3a   :  { %1179 = vmatpush2.bf16.msra.mxu0 %v2617_v17  ;;  %2598 = vmatpush2.bf16.msra.mxu1 %v2617_v17  ;;  %v2700_v17 = vld [vmem:[%s3837_s0 + $0x190] ss:$20 sps:$4 sm:$0xff]  }
  0x3b   :  { %1180 = vmatprep.subr.bf16.mxu0 %v2812_v0  ;;  %2583 = vmatprep.subr.bf16.mxu1 %v2812_v0 }
  0x3e   :  { %1181 = vmatpush2.bf16.msra.mxu0 %v2618_v18  ;;  %2599 = vmatpush2.bf16.msra.mxu1 %v2618_v18  ;;  %v2701_v18 = vld [vmem:[%s3837_s0 + $0x398] ss:$20 sps:$4 sm:$0xff]  }
  0x3f   :  { %2460 = vmatprep.subr.bf16.mxu0 %v2813_v24  ;;  %1382 = vmatprep.subr.bf16.mxu1 %v2812_v0 }
  0x41   :  { %1183 = vmatmul.mubr.bf16.vlgmr.msra.gmra.mxu0 %v2619_v19  ;;  %1287 = vmatmul.mubr.bf16.vlgmr.msra.gmra.mxu1 %v2622_v20  ;;  %v2703_v19 = vld [vmem:[%s3837_s0 + $0x1bc] ss:$20 sps:$4 sm:$0xff]   ;;  %v2268_v20 = vcombine.high %v159_v16, %v159_v16 }
  0x42   :  { %2461 = vmatpush3.bf16.msra.mxu0 %v2625_v21  ;;  %1190 = vmatprep.mubr.bf16.mxu0 %v2626_v22  ;;  %v2706_v21 = vld [vmem:[%s3837_s0 + $0x1b8] ss:$20 sps:$4 sm:$0xff]   ;;  %v2267_v22 = vcombine.low %v159_v16, %v159_v16 }
  0x43   :  { %1294 = vmatprep.mubr.bf16.mxu1 %v2628_v23  ;;  %1383 = vmatpush1.bf16.msra.mxu1 %v2630_v25  ;;  %v2710_v23 = vld [vmem:[%s3837_s0 + $0x1e4] ss:$20 sps:$4 sm:$0xff]   ;;  %v2714_v25 = vld [vmem:[%s3837_s0 + $0xc] ss:$20 sps:$4 sm:$0xff]  }
  0x44   :  { %1384 = vmatprep.subr.bf16.mxu1 %v2812_v0  ;;  %2462 = vmatprep.subr.bf16.mxu0 %v2813_v24 }
  0x46   :  { %2463 = vmatpush3.bf16.msra.mxu0 %v2648_v26  ;;  %v2712_v26 = vld [vmem:[%s3837_s0 + $0x8] ss:$20 sps:$4 sm:$0xff]  }
  0x47   :  { %1385 = vmatpush1.bf16.msra.mxu1 %v2633_v27  ;;  %2464 = vmatprep.subr.bf16.mxu0 %v2813_v24  ;;  %v2715_v27 = vld [vmem:[%s3837_s0 + $0x1e0] ss:$20 sps:$4 sm:$0xff]  }
  0x48   :  { %1386 = vmatprep.subr.bf16.mxu1 %v2812_v0 }
  0x49   :  { %1191 = vmatmul.mubr.bf16.gmra.mxu0 %v2631_v28  ;;  %1295 = vmatmul.mubr.bf16.gmra.mxu1 %v2632_v29  ;;  %v2716_v28 = vld [vmem:[%s3837_s0 + $0x34] ss:$20 sps:$4 sm:$0xff]   ;;  %v2718_v29 = vld [vmem:[%s3837_s0 + $0x30] ss:$20 sps:$4 sm:$0xff]  }
  0x4a   :  { %1198 = vmatprep.mubr.bf16.mxu0 %v2634_v30  ;;  %1302 = vmatprep.mubr.bf16.mxu1 %v2636_v31  ;;  %v2719_v30 = vld [vmem:[%s3837_s0 + $0x10] ss:$20 sps:$4 sm:$0xff]  }
  0x4b   :  { %1387 = vmatpush1.bf16.msra.mxu1 %v2640_v32  ;;  %2465 = vmatpush3.bf16.msra.mxu0 %v2671_v33  ;;  %v2720_v31 = vld [vmem:[%s3837_s0 + $0x5c] ss:$20 sps:$4 sm:$0xff]   ;;  %v2722_v32 = vld [vmem:[%s3837_s0 + $0x58] ss:$20 sps:$4 sm:$0xff]  }
  0x4c   :  { %1388 = vmatprep.subr.bf16.mxu1 %v2812_v0  ;;  %2466 = vmatprep.subr.bf16.mxu0 %v2813_v24  ;;  %v2723_v33 = vld [vmem:[%s3837_s0 + $0x38] ss:$20 sps:$4 sm:$0xff]  }
  0x4f   :  { %1389 = vmatpush1.bf16.msra.mxu1 %v2647_v34  ;;  %2467 = vmatpush3.bf16.msra.mxu0 %v2699_v35  ;;  %v2724_v34 = vld [vmem:[%s3837_s0 + $0x84] ss:$20 sps:$4 sm:$0xff]   ;;  %v2726_v35 = vld [vmem:[%s3837_s0 + $0x80] ss:$20 sps:$4 sm:$0xff]  }
  0x50   :  { %1390 = vmatprep.subr.bf16.mxu1 %v2812_v0 }
  0x51   :  { %1199 = vmatmul.mubr.bf16.gmra.mxu0 %v2638_v36  ;;  %1303 = vmatmul.mubr.bf16.gmra.mxu1 %v2639_v37  ;;  %v2727_v36 = vld [vmem:[%s3837_s0 + $0x60] ss:$20 sps:$4 sm:$0xff]  }
  0x52   :  { %1206 = vmatprep.mubr.bf16.mxu0 %v2641_v38  ;;  %1310 = vmatprep.mubr.bf16.mxu1 %v2643_v39  ;;  %v2728_v37 = vld [vmem:[%s3837_s0 + $0xac] ss:$20 sps:$4 sm:$0xff]   ;;  %v2730_v38 = vld [vmem:[%s3837_s0 + $0xa8] ss:$20 sps:$4 sm:$0xff]  }
  0x53   :  { %1391 = vmatpush1.bf16.msra.mxu1 %v2653_v40  ;;  %v2731_v39 = vld [vmem:[%s3837_s0 + $0x88] ss:$20 sps:$4 sm:$0xff]  }
  0x54   :  { %1392 = vmatprep.subr.bf16.mxu1 %v2812_v0  ;;  %v2732_v40 = vld [vmem:[%s3837_s0 + $0xd4] ss:$20 sps:$4 sm:$0xff]  }
  0x57   :  { %1393 = vmatpush1.bf16.msra.mxu1 %v2656_v43  ;;  %v2736_v43 = vld [vmem:[%s3837_s0 + $0xfc] ss:$20 sps:$4 sm:$0xff]  }
  0x58   :  { %1394 = vmatprep.subr.bf16.mxu1 %v2812_v0 }
  0x59   :  { %1207 = vmatmul.mubr.bf16.gmra.mxu0 %v2645_v41  ;;  %1311 = vmatmul.mubr.bf16.gmra.mxu1 %v2646_v42  ;;  %v2734_v41 = vld [vmem:[%s3837_s0 + $0xd0] ss:$20 sps:$4 sm:$0xff]  }
  0x5a   :  { %1214 = vmatprep.mubr.bf16.mxu0 %v2649_v44  ;;  %1318 = vmatprep.mubr.bf16.mxu1 %v2651_v45  ;;  %v2735_v42 = vld [vmem:[%s3837_s0 + $0xb0] ss:$20 sps:$4 sm:$0xff]   ;;  %v2738_v44 = vld [vmem:[%s3837_s0 + $0xf8] ss:$20 sps:$4 sm:$0xff]  }
  0x5b   :  { %1395 = vmatpush1.bf16.msra.mxu1 %v2663_v46  ;;  %v2739_v45 = vld [vmem:[%s3837_s0 + $0xd8] ss:$20 sps:$4 sm:$0xff]  }
  0x5c   :  { %1396 = vmatprep.subr.bf16.mxu1 %v2812_v0  ;;  %v2740_v46 = vld [vmem:[%s3837_s0 + $0x124] ss:$20 sps:$4 sm:$0xff]  }
  0x5f   :  { %1397 = vmatpush1.bf16.msra.mxu1 %v2670_v47  ;;  %v2742_v47 = vld [vmem:[%s3837_s0 + $0x120] ss:$20 sps:$4 sm:$0xff]  }
  0x60   :  { %1398 = vmatprep.subr.bf16.mxu1 %v2812_v0 }
  0x61   :  { %1215 = vmatmul.mubr.bf16.gmra.mxu0 %v2654_v48  ;;  %1319 = vmatmul.mubr.bf16.gmra.mxu1 %v2655_v49  ;;  %v2743_v48 = vld [vmem:[%s3837_s0 + $0x100] ss:$20 sps:$4 sm:$0xff]  }
  0x62   :  { %1222 = vmatprep.mubr.bf16.mxu0 %v2657_v50  ;;  %1326 = vmatprep.mubr.bf16.mxu1 %v2659_v51  ;;  %v2744_v49 = vld [vmem:[%s3837_s0 + $0x14c] ss:$20 sps:$4 sm:$0xff]   ;;  %v2746_v50 = vld [vmem:[%s3837_s0 + $0x148] ss:$20 sps:$4 sm:$0xff]  }
  0x63   :  { %1399 = vmatpush2.bf16.msra.mxu1 %v2676_v52  ;;  %v2747_v51 = vld [vmem:[%s3837_s0 + $0x128] ss:$20 sps:$4 sm:$0xff]  }
  0x64   :  { %1400 = vmatprep.subr.bf16.mxu1 %v2812_v0  ;;  %v2748_v52 = vld [vmem:[%s3837_s0 + $0x174] ss:$20 sps:$4 sm:$0xff]  }
  0x67   :  { %1401 = vmatpush2.bf16.msra.mxu1 %v2679_v53  ;;  %v2750_v53 = vld [vmem:[%s3837_s0 + $0x170] ss:$20 sps:$4 sm:$0xff]  }
  0x68   :  { %1402 = vmatprep.subr.bf16.mxu1 %v2812_v0 }
  0x69   :  { %1223 = vmatmul.mubr.bf16.gmra.mxu0 %v2661_v54  ;;  %1327 = vmatmul.mubr.bf16.gmra.mxu1 %v2662_v55  ;;  %v2751_v54 = vld [vmem:[%s3837_s0 + $0x150] ss:$20 sps:$4 sm:$0xff]  }
  0x6a   :  { %1230 = vmatprep.mubr.bf16.mxu0 %v2664_v56  ;;  %1334 = vmatprep.mubr.bf16.mxu1 %v2666_v57  ;;  %v2752_v55 = vld [vmem:[%s3837_s0 + $0x19c] ss:$20 sps:$4 sm:$0xff]   ;;  %v2754_v56 = vld [vmem:[%s3837_s0 + $0x198] ss:$20 sps:$4 sm:$0xff]  }
  0x6b   :  { %1403 = vmatpush2.bf16.msra.mxu1 %v2686_v58  ;;  %v2755_v57 = vld [vmem:[%s3837_s0 + $0x178] ss:$20 sps:$4 sm:$0xff]  }
  0x6c   :  { %1404 = vmatprep.subr.bf16.mxu1 %v2812_v0  ;;  %v2756_v58 = vld [vmem:[%s3837_s0 + $0x1c4] ss:$20 sps:$4 sm:$0xff]  }
  0x6f   :  { %1405 = vmatpush2.bf16.msra.mxu1 %v2693_v59  ;;  %v2758_v59 = vld [vmem:[%s3837_s0 + $0x1c0] ss:$20 sps:$4 sm:$0xff]  }
  0x70   :  { %1406 = vmatprep.subr.bf16.mxu1 %v2812_v0 }
  0x71   :  { %1231 = vmatmul.mubr.bf16.gmra.mxu0 %v2668_v60  ;;  %1335 = vmatmul.mubr.bf16.gmra.mxu1 %v2669_v61  ;;  %v2759_v60 = vld [vmem:[%s3837_s0 + $0x1a0] ss:$20 sps:$4 sm:$0xff]  }
  0x72   :  { %1238 = vmatprep.mubr.bf16.mxu0 %v2672_v62  ;;  %1342 = vmatprep.mubr.bf16.mxu1 %v2674_v63  ;;  %v2760_v61 = vld [vmem:[%s3837_s0 + $0x1ec] ss:$20 sps:$4 sm:$0xff]   ;;  %v2762_v62 = vld [vmem:[%s3837_s0 + $0x1e8] ss:$20 sps:$4 sm:$0xff]  }
  0x73   :  { %1407 = vmatpush2.bf16.msra.mxu1 %v2698_v1  ;;  %v2763_v63 = vld [vmem:[%s3837_s0 + $0x1c8] ss:$20 sps:$4 sm:$0xff]  }
  0x74   :  { %1408 = vmatprep.subr.bf16.mxu1 %v2812_v0  ;;  %v2764_v1 = vld [vmem:[%s3837_s0 + $0x214] ss:$20 sps:$4 sm:$0xff]  }
  0x77   :  { %1409 = vmatpush2.bf16.msra.mxu1 %v2702_v2 }
  0x78   :  { %1410 = vmatprep.subr.bf16.mxu1 %v2812_v0 }
  0x79   :  { %1239 = vmatmul.mubr.bf16.gmra.mxu0 %v2677_v3  ;;  %1343 = vmatmul.mubr.bf16.gmra.mxu1 %v2678_v4 }
  0x7a   :  { %1246 = vmatprep.mubr.bf16.mxu0 %v2680_v5  ;;  %1350 = vmatprep.mubr.bf16.mxu1 %v2682_v6 }
  0x7b   :  { %1411 = vmatpush2.bf16.msra.mxu1 %v2708_v7 }
  0x7c   :  { %1412 = vmatprep.subr.bf16.mxu1 %v2812_v0  ;;  %v2691_v0 = vld [vmem:[%s3837_s0 + $0x168] ss:$20 sps:$4 sm:$0xff]  }
  0x7f   :  { %1413 = vmatpush2.bf16.msra.mxu1 %v2709_v8  ;;  %v2766_v8 = vld [vmem:[%s3837_s0 + $0x210] ss:$20 sps:$4 sm:$0xff]  }
  0x81   :  { %1247 = vmatmul.mubr.bf16.gmra.mxu0 %v2684_v9  ;;  %1351 = vmatmul.mubr.bf16.gmra.mxu1 %v2685_v10  ;;  %v2767_v9 = vld [vmem:[%s3837_s0 + $0x1f0] ss:$20 sps:$4 sm:$0xff]  }
  0x82   :  { %1254 = vmatprep.mubr.bf16.mxu0 %v2687_v11  ;;  %1358 = vmatprep.mubr.bf16.mxu1 %v2689_v12  ;;  %v2768_v10 = vld [vmem:[%s3837_s0 + $0x23c] ss:$20 sps:$4 sm:$0xff]  }
  0x89   :  { %1255 = vmatmul.mubr.bf16.gmra.mxu0 %v2691_v0  ;;  %1359 = vmatmul.mubr.bf16.gmra.mxu1 %v2692_v13 }
  0x8a   :  { %1262 = vmatprep.mubr.bf16.mxu0 %v2694_v14  ;;  %1366 = vmatprep.mubr.bf16.mxu1 %v2696_v15 }
  0x91   :  { %1263 = vmatmul.mubr.bf16.gmra.mxu0 %v2700_v17  ;;  %1367 = vmatmul.mubr.bf16.gmra.mxu1 %v2701_v18  ;;  %v2770_v18 = vld [vmem:[%s3837_s0 + $0x238] ss:$20 sps:$4 sm:$0xff]  }
  0x92   :  { %1270 = vmatprep.mubr.bf16.mxu0 %v2703_v19  ;;  %1374 = vmatprep.mubr.bf16.mxu1 %v2268_v20  ;;  %v2771_v19 = vld [vmem:[%s3837_s0 + $0x218] ss:$20 sps:$4 sm:$0xff]  }
  0x93   :  { %v2772_v20 = vld [vmem:[%s3837_s0 + $0x264] ss:$20 sps:$4 sm:$0xff]  }
  0x99   :  { %1271 = vmatmul.mubr.bf16.gmra.mxu0 %v2706_v21  ;;  %1375 = vmatmul.mubr.bf16.gmra.mxu1 %v2267_v22 }
  0x9a   :  { %1278 = vmatprep.mubr.bf16.mxu0 %v2710_v23  ;;  %1414 = vmatprep.mubr.bf16.mxu1 %v2714_v25 }
  0xa1   :  { %1279 = vmatmul.mubr.bf16.gmra.mxu0 %v2715_v27  ;;  %1415 = vmatmul.mubr.bf16.vlgmr.msra.gmra.mxu1 %v2712_v26 }
  0xa2   :  { %1422 = vmatprep.mubr.bf16.mxu1 %v2716_v28  ;;  %2468 = vmatprep.mubr.msk.bf16.mxu0 %vm2814_vm0, %v2813_v24 }
  0xa9   :  { %1423 = vmatmul.mubr.bf16.gmra.mxu1 %v2718_v29  ;;  %2469 = vmatmul.mubr.msk.bf16.vlgmr.msra.gmra.mxu0 %vm1074_vm1, %v2719_v30  ;;  %v2774_v30 = vld [vmem:[%s3837_s0 + $0x260] ss:$20 sps:$4 sm:$0xff]  }
  0xaa   :  { %1430 = vmatprep.mubr.bf16.mxu1 %v2720_v31  ;;  %2472 = vmatprep.mubr.msk.bf16.mxu0 %vm2814_vm0, %v2813_v24  ;;  %v2775_v31 = vld [vmem:[%s3837_s0 + $0x240] ss:$20 sps:$4 sm:$0xff]  }
  0xb1   :  { %1431 = vmatmul.mubr.bf16.gmra.mxu1 %v2722_v32  ;;  %2473 = vmatmul.mubr.msk.bf16.gmra.mxu0 %vm1074_vm1, %v2723_v33  ;;  %v2778_v32 = vld [vmem:[%s3837_s0 + $0x28c] ss:$20 sps:$4 sm:$0xff]  }
  0xb2   :  { %1438 = vmatprep.mubr.bf16.mxu1 %v2724_v34  ;;  %2476 = vmatprep.mubr.msk.bf16.mxu0 %vm2814_vm0, %v2813_v24 }
  0xb9   :  { %1439 = vmatmul.mubr.bf16.gmra.mxu1 %v2726_v35  ;;  %2477 = vmatmul.mubr.msk.bf16.gmra.mxu0 %vm1074_vm1, %v2727_v36 }
  0xba   :  { %1446 = vmatprep.mubr.bf16.mxu1 %v2728_v37  ;;  %2480 = vmatprep.mubr.msk.bf16.mxu0 %vm2814_vm0, %v2813_v24 }
  0xc1   :  { %1447 = vmatmul.mubr.bf16.gmra.mxu1 %v2730_v38  ;;  %2481 = vmatmul.mubr.msk.bf16.gmra.mxu0 %vm1074_vm1, %v2731_v39 }
  0xc2   :  { %1454 = vmatprep.mubr.bf16.mxu1 %v2732_v40  ;;  %2484 = vmatprep.mubr.msk.bf16.mxu0 %vm2814_vm0, %v2813_v24 }
  0xc9   :  { %1455 = vmatmul.mubr.bf16.gmra.mxu1 %v2734_v41  ;;  %2485 = vmatmul.mubr.msk.bf16.gmra.mxu0 %vm1074_vm1, %v2735_v42  ;;  %v2776_v41 = vld [vmem:[%s3837_s0 + $0x288] ss:$20 sps:$4 sm:$0xff]  }
  0xca   :  { %1462 = vmatprep.mubr.bf16.mxu1 %v2736_v43  ;;  %2488 = vmatprep.mubr.msk.bf16.mxu0 %vm2814_vm0, %v2813_v24  ;;  %v2779_v42 = vld [vmem:[%s3837_s0 + $0x268] ss:$20 sps:$4 sm:$0xff]  }
  0xcb   :  { %v2782_v43 = vld [vmem:[%s3837_s0 + $0x2b4] ss:$20 sps:$4 sm:$0xff]  }
  0xd1   :  { %1463 = vmatmul.mubr.bf16.gmra.mxu1 %v2738_v44  ;;  %2489 = vmatmul.mubr.msk.bf16.gmra.mxu0 %vm1074_vm1, %v2739_v45 }
  0xd2   :  { %1470 = vmatprep.mubr.bf16.mxu1 %v2740_v46  ;;  %2492 = vmatprep.mubr.msk.bf16.mxu0 %vm2814_vm0, %v2813_v24 }
  0xd9   :  { %1471 = vmatmul.mubr.bf16.gmra.mxu1 %v2742_v47  ;;  %2493 = vmatmul.mubr.msk.bf16.gmra.mxu0 %vm1074_vm1, %v2743_v48 }
  0xda   :  { %1478 = vmatprep.mubr.bf16.mxu1 %v2744_v49  ;;  %2496 = vmatprep.mubr.msk.bf16.mxu0 %vm2814_vm0, %v2813_v24 }
  0xe1   :  { %1479 = vmatmul.mubr.bf16.gmra.mxu1 %v2746_v50  ;;  %2497 = vmatmul.mubr.msk.bf16.gmra.mxu0 %vm1074_vm1, %v2747_v51 }
  0xe2   :  { %1486 = vmatprep.mubr.bf16.mxu1 %v2748_v52  ;;  %2500 = vmatprep.mubr.msk.bf16.mxu0 %vm2814_vm0, %v2813_v24  ;;  %v2780_v52 = vld [vmem:[%s3837_s0 + $0x2b0] ss:$20 sps:$4 sm:$0xff]  }
  0xe9   :  { %1487 = vmatmul.mubr.bf16.gmra.mxu1 %v2750_v53  ;;  %2501 = vmatmul.mubr.msk.bf16.gmra.mxu0 %vm1074_vm1, %v2751_v54  ;;  %v2783_v53 = vld [vmem:[%s3837_s0 + $0x290] ss:$20 sps:$4 sm:$0xff]  }
  0xea   :  { %1494 = vmatprep.mubr.bf16.mxu1 %v2752_v55  ;;  %2504 = vmatprep.mubr.msk.bf16.mxu0 %vm2814_vm0, %v2813_v24  ;;  %v2786_v54 = vld [vmem:[%s3837_s0 + $0x2dc] ss:$20 sps:$4 sm:$0xff]  }
  0xf1   :  { %1495 = vmatmul.mubr.bf16.gmra.mxu1 %v2754_v56  ;;  %2505 = vmatmul.mubr.msk.bf16.gmra.mxu0 %vm1074_vm1, %v2755_v57 }
  0xf2   :  { %1502 = vmatprep.mubr.bf16.mxu1 %v2756_v58  ;;  %2508 = vmatprep.mubr.msk.bf16.mxu0 %vm2814_vm0, %v2813_v24 }
  0xf9   :  { %1503 = vmatmul.mubr.bf16.gmra.mxu1 %v2758_v59  ;;  %2509 = vmatmul.mubr.msk.bf16.gmra.mxu0 %vm1074_vm1, %v2759_v60 }
  0xfa   :  { %1510 = vmatprep.mubr.bf16.mxu1 %v2760_v61  ;;  %2512 = vmatprep.mubr.msk.bf16.mxu0 %vm2814_vm0, %v2813_v24 }
 0x101   :  { %v3294_v2 = vpop.f32.mrf.mxu0  ;;  %v3296_v3 = vpop.f32.mrf.mxu1  ;;  %1511 = vmatmul.mubr.bf16.gmra.mxu1 %v2762_v62  ;;  %2513 = vmatmul.mubr.msk.bf16.gmra.mxu0 %vm1074_vm1, %v2763_v63  ;;  %v2784_v63 = vld [vmem:[%s3837_s0 + $0x2d8] ss:$20 sps:$4 sm:$0xff]  }
 0x102   :  { %1518 = vmatprep.mubr.bf16.mxu1 %v2764_v1  ;;  %2516 = vmatprep.mubr.msk.bf16.mxu0 %vm2814_vm0, %v2813_v24  ;;  %v2787_v1 = vld [vmem:[%s3837_s0 + $0x2b8] ss:$20 sps:$4 sm:$0xff]  }
 0x103   :  { %v1186_v4 = vpop.f32.mrf.mxu0  ;;  %v1290_v5 = vpop.f32.mrf.mxu1 }
 0x104   :  { %v2790_v4 = vld [vmem:[%s3837_s0 + $0x304] ss:$20 sps:$4 sm:$0xff]  }
 0x105   :  { %v3301_v6 = vpop.f32.mrf.mxu0  ;;  %v3303_v7 = vpop.f32.mrf.mxu1 }
 0x107   :  { %v1189_v11 = vpop.f32.mrf.mxu0  ;;  %v1293_v12 = vpop.f32.mrf.mxu1 }
 0x109   :  { %v3314_v0 = vpop.f32.mrf.mxu0  ;;  %v3316_v13 = vpop.f32.mrf.mxu1  ;;  %1519 = vmatmul.mubr.bf16.gmra.mxu1 %v2766_v8  ;;  %2517 = vmatmul.mubr.msk.bf16.gmra.mxu0 %vm1074_vm1, %v2767_v9 }
 0x10a   :  { %1526 = vmatprep.mubr.bf16.mxu1 %v2768_v10  ;;  %2520 = vmatprep.mubr.msk.bf16.mxu0 %vm2814_vm0, %v2813_v24 }
 0x10b   :  { %v1194_v14 = vpop.f32.mrf.mxu0  ;;  %v1298_v15 = vpop.f32.mrf.mxu1 }
 0x10d   :  { %v3321_v16 = vpop.f32.mrf.mxu0  ;;  %v3323_v17 = vpop.f32.mrf.mxu1 }
 0x10f   :  { %v1197_v21 = vpop.f32.mrf.mxu0  ;;  %v1301_v22 = vpop.f32.mrf.mxu1 }
 0x111   :  { %v3334_v23 = vpop.f32.mrf.mxu0  ;;  %v3336_v25 = vpop.f32.mrf.mxu1  ;;  %1527 = vmatmul.mubr.bf16.gmra.mxu1 %v2770_v18  ;;  %2521 = vmatmul.mubr.msk.bf16.gmra.mxu0 %vm1074_vm1, %v2771_v19  ;;  %v2788_v18 = vld [vmem:[%s3837_s0 + $0x300] ss:$20 sps:$4 sm:$0xff]  }
 0x112   :  { %1534 = vmatprep.mubr.bf16.mxu1 %v2772_v20  ;;  %2524 = vmatprep.mubr.msk.bf16.mxu0 %vm2814_vm0, %v2813_v24  ;;  %v2791_v19 = vld [vmem:[%s3837_s0 + $0x2e0] ss:$20 sps:$4 sm:$0xff]  }
 0x113   :  { %v1202_v26 = vpop.f32.mrf.mxu0  ;;  %v1306_v27 = vpop.f32.mrf.mxu1  ;;  %v2794_v20 = vld [vmem:[%s3837_s0 + $0x32c] ss:$20 sps:$4 sm:$0xff]  }
 0x115   :  { %v3341_v28 = vpop.f32.mrf.mxu0  ;;  %v3343_v29 = vpop.f32.mrf.mxu1 }
 0x117   :  { %v1205_v33 = vpop.f32.mrf.mxu0  ;;  %v1309_v34 = vpop.f32.mrf.mxu1 }
 0x118   :  { %v2792_v34 = vld [vmem:[%s3837_s0 + $0x328] ss:$20 sps:$4 sm:$0xff]  }
 0x119   :  { %v3354_v35 = vpop.f32.mrf.mxu0  ;;  %v3356_v36 = vpop.f32.mrf.mxu1  ;;  %1535 = vmatmul.mubr.bf16.gmra.mxu1 %v2774_v30  ;;  %2525 = vmatmul.mubr.msk.bf16.gmra.mxu0 %vm1074_vm1, %v2775_v31 }
 0x11a   :  { %1542 = vmatprep.mubr.bf16.mxu1 %v2778_v32  ;;  %2528 = vmatprep.mubr.msk.bf16.mxu0 %vm2814_vm0, %v2813_v24 }
 0x11b   :  { %v1210_v37 = vpop.f32.mrf.mxu0  ;;  %v1314_v38 = vpop.f32.mrf.mxu1 }
 0x11c   :  { %v2795_v37 = vld [vmem:[%s3837_s0 + $0x308] ss:$20 sps:$4 sm:$0xff]  }
 0x11d   :  { %v3361_v39 = vpop.f32.mrf.mxu0  ;;  %v3363_v40 = vpop.f32.mrf.mxu1  ;;  %v2798_v38 = vld [vmem:[%s3837_s0 + $0x354] ss:$20 sps:$4 sm:$0xff]  }
 0x11f   :  { %v1213_v44 = vpop.f32.mrf.mxu0  ;;  %v1317_v45 = vpop.f32.mrf.mxu1 }
 0x121   :  { %v3374_v46 = vpop.f32.mrf.mxu0  ;;  %v3376_v47 = vpop.f32.mrf.mxu1  ;;  %1543 = vmatmul.mubr.bf16.gmra.mxu1 %v2776_v41  ;;  %2529 = vmatmul.mubr.msk.bf16.gmra.mxu0 %vm1074_vm1, %v2779_v42 }
 0x122   :  { %1550 = vmatprep.mubr.bf16.mxu1 %v2782_v43  ;;  %2532 = vmatprep.mubr.msk.bf16.mxu0 %vm2814_vm0, %v2813_v24 }
 0x123   :  { %v1218_v48 = vpop.f32.mrf.mxu0  ;;  %v1322_v49 = vpop.f32.mrf.mxu1 }
 0x125   :  { %v3381_v50 = vpop.f32.mrf.mxu0  ;;  %v3383_v51 = vpop.f32.mrf.mxu1 }
 0x127   :  { %v1221_v55 = vpop.f32.mrf.mxu0  ;;  %v1325_v56 = vpop.f32.mrf.mxu1 }
 0x128   :  { %v2802_v55 = vld [vmem:[%s3837_s0 + $0x37c] ss:$20 sps:$4 sm:$0xff]  }
 0x129   :  { %v3394_v57 = vpop.f32.mrf.mxu0  ;;  %v3396_v58 = vpop.f32.mrf.mxu1  ;;  %1551 = vmatmul.mubr.bf16.gmra.mxu1 %v2780_v52  ;;  %2533 = vmatmul.mubr.msk.bf16.gmra.mxu0 %vm1074_vm1, %v2783_v53  ;;  %v2796_v53 = vld [vmem:[%s3837_s0 + $0x350] ss:$20 sps:$4 sm:$0xff]  }
 0x12a   :  { %1558 = vmatprep.mubr.bf16.mxu1 %v2786_v54  ;;  %2536 = vmatprep.mubr.msk.bf16.mxu0 %vm2814_vm0, %v2813_v24  ;;  %v2799_v54 = vld [vmem:[%s3837_s0 + $0x330] ss:$20 sps:$4 sm:$0xff]  }
 0x12b   :  { %v1226_v59 = vpop.f32.mrf.mxu0  ;;  %v1330_v60 = vpop.f32.mrf.mxu1 }
 0x12d   :  { %v3401_v61 = vpop.f32.mrf.mxu0  ;;  %v3403_v62 = vpop.f32.mrf.mxu1 }
 0x12f   :  { %v1229_v5 = vpop.f32.mrf.mxu0  ;;  %v1333_v8 = vpop.f32.mrf.mxu1 }
 0x131   :  { %v3414_v9 = vpop.f32.mrf.mxu0  ;;  %v3416_v10 = vpop.f32.mrf.mxu1  ;;  %1559 = vmatmul.mubr.bf16.gmra.mxu1 %v2784_v63  ;;  %2537 = vmatmul.mubr.msk.bf16.gmra.mxu0 %vm1074_vm1, %v2787_v1 }
 0x132   :  { %1566 = vmatprep.mubr.bf16.mxu1 %v2790_v4  ;;  %2540 = vmatprep.mubr.msk.bf16.mxu0 %vm2814_vm0, %v2813_v24 }
 0x133   :  { %v1234_v11 = vpop.f32.mrf.mxu0  ;;  %v1338_v12 = vpop.f32.mrf.mxu1 }
 0x134   :  { %v2800_v11 = vld [vmem:[%s3837_s0 + $0x378] ss:$20 sps:$4 sm:$0xff]  }
 0x135   :  { %v3421_v14 = vpop.f32.mrf.mxu0  ;;  %v3423_v15 = vpop.f32.mrf.mxu1  ;;  %v2803_v12 = vld [vmem:[%s3837_s0 + $0x358] ss:$20 sps:$4 sm:$0xff]  }
 0x137   :  { %v1237_v21 = vpop.f32.mrf.mxu0  ;;  %v1341_v22 = vpop.f32.mrf.mxu1 }
 0x139   :  { %v3434_v26 = vpop.f32.mrf.mxu0  ;;  %v3436_v27 = vpop.f32.mrf.mxu1  ;;  %1567 = vmatmul.mubr.bf16.gmra.mxu1 %v2788_v18  ;;  %2541 = vmatmul.mubr.msk.bf16.gmra.mxu0 %vm1074_vm1, %v2791_v19  ;;  %v2806_v18 = vld [vmem:[%s3837_s0 + $0x3a4] ss:$20 sps:$4 sm:$0xff]  }
 0x13a   :  { %1574 = vmatprep.mubr.bf16.mxu1 %v2794_v20  ;;  %2544 = vmatprep.mubr.msk.bf16.mxu0 %vm2814_vm0, %v2813_v24 }
 0x13b   :  { %v1242_v30 = vpop.f32.mrf.mxu0  ;;  %v1346_v31 = vpop.f32.mrf.mxu1 }
 0x13d   :  { %v3441_v32 = vpop.f32.mrf.mxu0  ;;  %v3443_v33 = vpop.f32.mrf.mxu1 }
 0x13f   :  { %v1245_v41 = vpop.f32.mrf.mxu0  ;;  %v1349_v42 = vpop.f32.mrf.mxu1 }
 0x140   :  { %v2804_v41 = vld [vmem:[%s3837_s0 + $0x3a0] ss:$20 sps:$4 sm:$0xff]  }
 0x141   :  { %v3454_v43 = vpop.f32.mrf.mxu0  ;;  %v3456_v44 = vpop.f32.mrf.mxu1  ;;  %1575 = vmatmul.mubr.bf16.gmra.mxu1 %v2792_v34  ;;  %2545 = vmatmul.mubr.msk.bf16.gmra.mxu0 %vm1074_vm1, %v2795_v37  ;;  %v160_v34 = vld [vmem:[%s3837_s0 + $0x3c8] sm:$0xff]  ;;  %v2807_v42 = vld [vmem:[%s3837_s0 + $0x380] ss:$20 sps:$4 sm:$0xff]  }
 0x142   :  { %1582 = vmatprep.mubr.bf16.mxu1 %v2798_v38  ;;  %2548 = vmatprep.mubr.msk.bf16.mxu0 %vm2814_vm0, %v2813_v24 }
 0x143   :  { %v1250_v45 = vpop.f32.mrf.mxu0  ;;  %v1354_v48 = vpop.f32.mrf.mxu1 }
 0x144   :  { %v2270_v45 = vcombine.high %v160_v34, %v160_v34 }
 0x145   :  { %v3461_v49 = vpop.f32.mrf.mxu0  ;;  %v3463_v52 = vpop.f32.mrf.mxu1 }
 0x147   :  { %v1253_v56 = vpop.f32.mrf.mxu0  ;;  %v1357_v59 = vpop.f32.mrf.mxu1 }
 0x149   :  { %v3474_v60 = vpop.f32.mrf.mxu0  ;;  %v3476_v63 = vpop.f32.mrf.mxu1  ;;  %1583 = vmatmul.mubr.bf16.gmra.mxu1 %v2796_v53  ;;  %2549 = vmatmul.mubr.msk.bf16.gmra.mxu0 %vm1074_vm1, %v2799_v54 }
 0x14a   :  { %1590 = vmatprep.mubr.bf16.mxu1 %v2802_v55  ;;  %2552 = vmatprep.mubr.msk.bf16.mxu0 %vm2814_vm0, %v2813_v24 }
 0x14b   :  { %v1258_v1 = vpop.f32.mrf.mxu0  ;;  %v1362_v4 = vpop.f32.mrf.mxu1 }
 0x14d   :  { %v3481_v5 = vpop.f32.mrf.mxu0  ;;  %v3483_v8 = vpop.f32.mrf.mxu1 }
 0x14e   :  { %3840 = vst [vmem:[#allocation2_spill] sm:$0xff] %v3483_v8 }
 0x14f   :  { %v1261_v19 = vpop.f32.mrf.mxu0  ;;  %v1365_v20 = vpop.f32.mrf.mxu1 }
 0x151   :  { %v3494_v21 = vpop.f32.mrf.mxu0  ;;  %v3496_v22 = vpop.f32.mrf.mxu1  ;;  %1591 = vmatmul.mubr.bf16.gmra.mxu1 %v2800_v11  ;;  %2553 = vmatmul.mubr.msk.bf16.gmra.mxu0 %vm1074_vm1, %v2803_v12  ;;  %v2269_v11 = vcombine.low %v160_v34, %v160_v34  ;;  %v2810_v12 = vld [vmem:[%s3837_s0 + $0x3a8] ss:$20 sps:$4 sm:$0xff]  }
 0x152   :  { %3841 = vst [vmem:[#allocation3_spill] sm:$0xff] %v3496_v22  ;;  %1598 = vmatprep.mubr.bf16.mxu1 %v2806_v18  ;;  %2556 = vmatprep.mubr.msk.bf16.mxu0 %vm2814_vm0, %v2813_v24 }
 0x153   :  { %v1266_v30 = vpop.f32.mrf.mxu0  ;;  %v1370_v31 = vpop.f32.mrf.mxu1 }
 0x154   :  { %v3534_v31 = vld [vmem:[%s3838_s2] ss:$0 sm:$0xff] }
 0x155   :  { %v3504_v37 = vpop.f32.mrf.mxu0  ;;  %v3506_v38 = vpop.f32.mrf.mxu1 }
 0x156   :  { %3842 = vst [vmem:[#allocation4_spill] sm:$0xff] %v3506_v38 }
 0x157   :  { %v1269_v48 = vpop.f32.mrf.mxu0  ;;  %v1373_v53 = vpop.f32.mrf.mxu1 }
 0x158   :  { %v2811_v48 = vld [vmem:[%s3837_s0 + $0x3d0] ss:$0 sps:$4 sm:$0xff]   ;;  %v1185_v53 = vadd.f32 %v3534_v31, %v3294_v2  ;;  %v1193_v2 = vadd.f32 %v3534_v31, %v3314_v0 }
 0x159   :  { %v3514_v54 = vpop.f32.mrf.mxu0  ;;  %v3516_v55 = vpop.f32.mrf.mxu1  ;;  %1599 = vmatmul.mubr.bf16.gmra.mxu1 %v2804_v41  ;;  %2557 = vmatmul.mubr.msk.bf16.gmra.mxu0 %vm1074_vm1, %v2807_v42 }
 0x15a   :  { %3843 = vst [vmem:[#allocation5_spill] sm:$0xff] %v3516_v55  ;;  %1606 = vmatprep.mubr.bf16.mxu1 %v2270_v45  ;;  %2560 = vmatprep.mubr.msk.bf16.mxu0 %vm2814_vm0, %v2813_v24 }
 0x15b   :  { %v1274_v56 = vpop.f32.mrf.mxu0  ;;  %v1378_v59 = vpop.f32.mrf.mxu1 }
 0x15d   :  { %v3521_v1 = vpop.f32.mrf.mxu0  ;;  %v1379_v4 = vpop.f32.mrf.mxu1 }
 0x15f   :  { %v1277_v18 = vpop.f32.mrf.mxu0  ;;  %v1380_v19 = vpop.f32.mrf.mxu1 }
 0x161   :  { %v3526_v20 = vpop.f32.mrf.mxu0  ;;  %v1416_v30 = vpop.f32.mrf.mxu1  ;;  %1607 = vmatmul.mubr.bf16.gmra.mxu1 %v2269_v11  ;;  %2561 = vmatmul.mubr.msk.bf16.gmra.mxu0 %vm1074_vm1, %v2810_v12  ;;  %v1188_v12 = vadd.f32 %v3534_v31, %v3301_v6 }
 0x162   :  { %2564 = vmatprep.mubr.msk.bf16.mxu0 %vm2814_vm0, %v2813_v24  ;;  %v1417_v24 = vadd.f32 %v1416_v30, %v1185_v53 }
 0x163   :  { %v1282_v34 = vpop.f32.mrf.mxu0  ;;  %v1418_v41 = vpop.f32.mrf.mxu1 }
 0x165   :  { %v3536_v42 = vpop.f32.mrf.mxu0  ;;  %v1419_v45 = vpop.f32.mrf.mxu1 }
 0x166   :  { %v1420_v41 = vadd.f32 %v1419_v45, %v1188_v12 }
 0x167   :  { %v1285_v56 = vpop.f32.mrf.mxu0  ;;  %v1421_v59 = vpop.f32.mrf.mxu1 }
 0x169   :  { %v1424_v4 = vpop.f32.mrf.mxu1  ;;  %v1648_v11 = vpop.f32.mrf.mxu0  ;;  %2565 = vmatmul.mubr.msk.bf16.gmra.mxu0 %vm1074_vm1, %v2811_v48 }
 0x16a   :  { %v1649_v18 = vadd.f32 %v1648_v11, %v1417_v24  ;;  %v1425_v8 = vadd.f32 %v1424_v4, %v1193_v2  ;;  %v1196_v24 = vadd.f32 %v3534_v31, %v3321_v16 }
 0x16b   :  { %v1426_v19 = vpop.f32.mrf.mxu1  ;;  %v2470_v34 = vpop.f32.mrf.mxu0 }
 0x16c   :  { %v1846_v55 = vmax.f32 %v1649_v18, 0.0  ;;  %v1201_v34 = vadd.f32 %v3534_v31, %v3334_v23 }
 0x16d   :  { %v1427_v38 = vpop.f32.mrf.mxu1  ;;  %v1651_v22 = vpop.f32.mrf.mxu0 }
 0x16e   :  { %v2382_v56 = vpack.c.bf16 %v1846_v55, %v1846_v55  ;;  %v1652_v30 = vadd.f32 %v1651_v22, %v1420_v41  ;;  %v1428_v55 = vadd.f32 %v1427_v38, %v1196_v24 }
 0x16f   :  { %v1429_v53 = vpop.f32.mrf.mxu1  ;;  %v2471_v59 = vpop.f32.mrf.mxu0 }
 0x170   :  { %2093 = vst.msk [vmem:[%s3839_s3] sm:$0xf] %vm2092_vm2, %v2382_v56  ;;  %v1847_v6 = vmax.f32 %v1652_v30, 0.0  ;;  %v1204_v59 = vadd.f32 %v3534_v31, %v3341_v28 }
 0x171   :  { %v1432_v48 = vpop.f32.mrf.mxu1  ;;  %v1656_v45 = vpop.f32.mrf.mxu0 }
 0x172   :  { %v2383_v11 = vpack.c.bf16 %v1847_v6, %v1847_v6  ;;  %v1657_v12 = vadd.f32 %v1656_v45, %v1425_v8  ;;  %v1433_v30 = vadd.f32 %v1432_v48, %v1201_v34 }
 0x173   :  { %v1434_v18 = vpop.f32.mrf.mxu1  ;;  %v2474_v0 = vpop.f32.mrf.mxu0 }
 0x174   :  { %2094 = vst.msk [vmem:[%s3839_s3 + $0x4] sm:$0xf] %vm2092_vm2, %v2383_v11  ;;  %v1848_v22 = vmax.f32 %v1657_v12, 0.0  ;;  %v1209_v0 = vadd.f32 %v3534_v31, %v3354_v35 }
 0x175   :  { %v1435_v4 = vpop.f32.mrf.mxu1  ;;  %v1659_v19 = vpop.f32.mrf.mxu0 }
 0x176   :  { %v2384_v41 = vpack.c.bf16 %v1848_v22, %v1848_v22  ;;  %v1660_v2 = vadd.f32 %v1659_v19, %v1428_v55  ;;  %v1436_v11 = vadd.f32 %v1435_v4, %v1204_v59 }
 0x177   :  { %v1437_v56 = vpop.f32.mrf.mxu1  ;;  %v2475_v16 = vpop.f32.mrf.mxu0 }
 0x178   :  { %2095 = vst.msk [vmem:[%s3839_s3 + $0x8] sm:$0xf] %vm2092_vm2, %v2384_v41  ;;  %v1849_v8 = vmax.f32 %v1660_v2, 0.0  ;;  %v1212_v56 = vadd.f32 %v3534_v31, %v3361_v39 }
 0x179   :  { %v1440_v38 = vpop.f32.mrf.mxu1  ;;  %v1664_v53 = vpop.f32.mrf.mxu0 }
 0x17a   :  { %v2385_v6 = vpack.c.bf16 %v1849_v8, %v1849_v8  ;;  %v1665_v45 = vadd.f32 %v1664_v53, %v1433_v30  ;;  %v1441_v34 = vadd.f32 %v1440_v38, %v1209_v0 }
 0x17b   :  { %v1442_v24 = vpop.f32.mrf.mxu1  ;;  %v2478_v23 = vpop.f32.mrf.mxu0 }
 0x17c   :  { %2096 = vst.msk [vmem:[%s3839_s3 + $0xc] sm:$0xf] %vm2092_vm2, %v2385_v6  ;;  %v1850_v48 = vmax.f32 %v1665_v45, 0.0  ;;  %v1217_v45 = vadd.f32 %v3534_v31, %v3374_v46 }
 0x17d   :  { %v1443_v12 = vpop.f32.mrf.mxu1  ;;  %v1667_v18 = vpop.f32.mrf.mxu0 }
 0x17e   :  { %v2386_v55 = vpack.c.bf16 %v1850_v48, %v1850_v48  ;;  %v1668_v22 = vadd.f32 %v1667_v18, %v1436_v11  ;;  %v1444_v53 = vadd.f32 %v1443_v12, %v1212_v56  ;;  %v1225_v56 = vadd.f32 %v3534_v31, %v3394_v57 }
 0x17f   :  { %v1445_v19 = vpop.f32.mrf.mxu1  ;;  %v2479_v28 = vpop.f32.mrf.mxu0 }
 0x180   :  { %2097 = vst.msk [vmem:[%s3839_s3 + $0x10] sm:$0xf] %vm2092_vm2, %v2386_v55  ;;  %v1851_v4 = vmax.f32 %v1668_v22, 0.0  ;;  %v1220_v55 = vadd.f32 %v3534_v31, %v3381_v50 }
 0x181   :  { %v1448_v41 = vpop.f32.mrf.mxu1  ;;  %v1672_v2 = vpop.f32.mrf.mxu0 }
 0x182   :  { %v2387_v16 = vpack.c.bf16 %v1851_v4, %v1851_v4  ;;  %v1673_v30 = vadd.f32 %v1672_v2, %v1441_v34  ;;  %v1449_v48 = vadd.f32 %v1448_v41, %v1217_v45 }
 0x183   :  { %v1450_v8 = vpop.f32.mrf.mxu1  ;;  %v2482_v35 = vpop.f32.mrf.mxu0 }
 0x184   :  { %2098 = vst.msk [vmem:[%s3839_s3 + $0x14] sm:$0xf] %vm2092_vm2, %v2387_v16  ;;  %v1852_v38 = vmax.f32 %v1673_v30, 0.0 }
 0x185   :  { %v1451_v59 = vpop.f32.mrf.mxu1  ;;  %v1675_v6 = vpop.f32.mrf.mxu0 }
 0x186   :  { %v2388_v24 = vpack.c.bf16 %v1852_v38, %v1852_v38  ;;  %v1676_v23 = vadd.f32 %v1675_v6, %v1444_v53  ;;  %v1452_v34 = vadd.f32 %v1451_v59, %v1220_v55  ;;  %v1228_v6 = vadd.f32 %v3534_v31, %v3401_v61 }
 0x187   :  { %v1453_v11 = vpop.f32.mrf.mxu1  ;;  %v2483_v39 = vpop.f32.mrf.mxu0 }
 0x188   :  { %2099 = vst.msk [vmem:[%s3839_s3 + $0x18] sm:$0xf] %vm2092_vm2, %v2388_v24  ;;  %v1853_v12 = vmax.f32 %v1676_v23, 0.0 }
 0x189   :  { %v1456_v18 = vpop.f32.mrf.mxu1  ;;  %v1680_v0 = vpop.f32.mrf.mxu0 }
 0x18a   :  { %v2389_v22 = vpack.c.bf16 %v1853_v12, %v1853_v12  ;;  %v1681_v19 = vadd.f32 %v1680_v0, %v1449_v48  ;;  %v1457_v35 = vadd.f32 %v1456_v18, %v1225_v56  ;;  %v1233_v18 = vadd.f32 %v3534_v31, %v3414_v9 }
 0x18b   :  { %v1458_v28 = vpop.f32.mrf.mxu1  ;;  %v2486_v46 = vpop.f32.mrf.mxu0 }
 0x18c   :  { %2100 = vst.msk [vmem:[%s3839_s3 + $0x1c] sm:$0xf] %vm2092_vm2, %v2389_v22  ;;  %v1854_v4 = vmax.f32 %v1681_v19, 0.0 }
 0x18d   :  { %v1459_v41 = vpop.f32.mrf.mxu1  ;;  %v1683_v2 = vpop.f32.mrf.mxu0 }
 0x18e   :  { %v2390_v16 = vpack.c.bf16 %v1854_v4, %v1854_v4  ;;  %v1684_v30 = vadd.f32 %v1683_v2, %v1452_v34  ;;  %v1460_v11 = vadd.f32 %v1459_v41, %v1228_v6  ;;  %v1236_v4 = vadd.f32 %v3534_v31, %v3421_v14 }
 0x18f   :  { %v1461_v8 = vpop.f32.mrf.mxu1  ;;  %v2487_v50 = vpop.f32.mrf.mxu0 }
 0x190   :  { %2101 = vst.msk [vmem:[%s3839_s3 + $0x20] sm:$0xf] %vm2092_vm2, %v2390_v16  ;;  %v1855_v53 = vmax.f32 %v1684_v30, 0.0 }
 0x191   :  { %v1464_v38 = vpop.f32.mrf.mxu1  ;;  %v1688_v59 = vpop.f32.mrf.mxu0 }
 0x192   :  { %v2391_v45 = vpack.c.bf16 %v1855_v53, %v1855_v53  ;;  %v1689_v24 = vadd.f32 %v1688_v59, %v1457_v35  ;;  %v1465_v19 = vadd.f32 %v1464_v38, %v1233_v18  ;;  %v1241_v35 = vadd.f32 %v3534_v31, %v3434_v26 }
 0x193   :  { %v1466_v23 = vpop.f32.mrf.mxu1  ;;  %v2490_v57 = vpop.f32.mrf.mxu0 }
 0x194   :  { %2102 = vst.msk [vmem:[%s3839_s3 + $0x24] sm:$0xf] %vm2092_vm2, %v2391_v45  ;;  %v1856_v39 = vmax.f32 %v1689_v24, 0.0  ;;  %v1244_v57 = vadd.f32 %v3534_v31, %v3441_v32 }
 0x195   :  { %v1467_v48 = vpop.f32.mrf.mxu1  ;;  %v1691_v12 = vpop.f32.mrf.mxu0 }
 0x196   :  { %v2392_v0 = vpack.c.bf16 %v1856_v39, %v1856_v39  ;;  %v1692_v55 = vadd.f32 %v1691_v12, %v1460_v11  ;;  %v1468_v16 = vadd.f32 %v1467_v48, %v1236_v4 }
 0x197   :  { %v1469_v22 = vpop.f32.mrf.mxu1  ;;  %v2491_v61 = vpop.f32.mrf.mxu0 }
 0x198   :  { %2103 = vst.msk [vmem:[%s3839_s3 + $0x28] sm:$0xf] %vm2092_vm2, %v2392_v0  ;;  %v1857_v28 = vmax.f32 %v1692_v55, 0.0  ;;  %v1249_v22 = vadd.f32 %v3534_v31, %v3454_v43 }
 0x199   :  { %v1472_v46 = vpop.f32.mrf.mxu1  ;;  %v1696_v34 = vpop.f32.mrf.mxu0 }
 0x19a   :  { %v2393_v41 = vpack.c.bf16 %v1857_v28, %v1857_v28  ;;  %v1697_v2 = vadd.f32 %v1696_v34, %v1465_v19  ;;  %v1473_v6 = vadd.f32 %v1472_v46, %v1241_v35 }
 0x19b   :  { %v1474_v56 = vpop.f32.mrf.mxu1  ;;  %v2494_v9 = vpop.f32.mrf.mxu0 }
 0x19c   :  { %2104 = vst.msk [vmem:[%s3839_s3 + $0x2c] sm:$0xf] %vm2092_vm2, %v2393_v41  ;;  %v1858_v30 = vmax.f32 %v1697_v2, 0.0  ;;  %v1252_v2 = vadd.f32 %v3534_v31, %v3461_v49 }
 0x19d   :  { %v1475_v8 = vpop.f32.mrf.mxu1  ;;  %v1699_v50 = vpop.f32.mrf.mxu0 }
 0x19e   :  { %v2394_v53 = vpack.c.bf16 %v1858_v30, %v1858_v30  ;;  %v1700_v38 = vadd.f32 %v1699_v50, %v1468_v16  ;;  %v1476_v12 = vadd.f32 %v1475_v8, %v1244_v57  ;;  %v1260_v57 = vadd.f32 %v3534_v31, %v3481_v5 }
 0x19f   :  { %v1477_v59 = vpop.f32.mrf.mxu1  ;;  %v2495_v14 = vpop.f32.mrf.mxu0 }
 0x1a0   :  { %2105 = vst.msk [vmem:[%s3839_s3 + $0x30] sm:$0xf] %vm2092_vm2, %v2394_v53  ;;  %v1859_v45 = vmax.f32 %v1700_v38, 0.0  ;;  %v1257_v53 = vadd.f32 %v3534_v31, %v3474_v60 }
 0x1a1   :  { %v1480_v24 = vpop.f32.mrf.mxu1  ;;  %v1704_v23 = vpop.f32.mrf.mxu0 }
 0x1a2   :  { %v2395_v11 = vpack.c.bf16 %v1859_v45, %v1859_v45  ;;  %v1705_v39 = vadd.f32 %v1704_v23, %v1473_v6  ;;  %v1481_v46 = vadd.f32 %v1480_v24, %v1249_v22 }
 0x1a3   :  { %v1482_v48 = vpop.f32.mrf.mxu1  ;;  %v2498_v26 = vpop.f32.mrf.mxu0 }
 0x1a4   :  { %2106 = vst.msk [vmem:[%s3839_s3 + $0x34] sm:$0xf] %vm2092_vm2, %v2395_v11  ;;  %v1860_v18 = vmax.f32 %v1705_v39, 0.0 }
 0x1a5   :  { %v1483_v0 = vpop.f32.mrf.mxu1  ;;  %v1707_v55 = vpop.f32.mrf.mxu0 }
 0x1a6   :  { %v2396_v61 = vpack.c.bf16 %v1860_v18, %v1860_v18  ;;  %v1708_v19 = vadd.f32 %v1707_v55, %v1476_v12  ;;  %v1484_v30 = vadd.f32 %v1483_v0, %v1252_v2  ;;  %v1265_v55 = vadd.f32 %v3534_v31, %v3494_v21 }
 0x1a7   :  { %v1485_v28 = vpop.f32.mrf.mxu1  ;;  %v2499_v32 = vpop.f32.mrf.mxu0 }
 0x1a8   :  { %2107 = vst.msk [vmem:[%s3839_s3 + $0x38] sm:$0xf] %vm2092_vm2, %v2396_v61  ;;  %v1861_v34 = vmax.f32 %v1708_v19, 0.0 }
 0x1a9   :  { %v1488_v4 = vpop.f32.mrf.mxu1  ;;  %v1712_v41 = vpop.f32.mrf.mxu0 }
 0x1aa   :  { %v2397_v56 = vpack.c.bf16 %v1861_v34, %v1861_v34  ;;  %v1713_v9 = vadd.f32 %v1712_v41, %v1481_v46  ;;  %v1489_v6 = vadd.f32 %v1488_v4, %v1257_v53  ;;  %v1268_v4 = vadd.f32 %v3534_v31, %v3504_v37 }
 0x1ab   :  { %v1490_v16 = vpop.f32.mrf.mxu1  ;;  %v2502_v43 = vpop.f32.mrf.mxu0 }
 0x1ac   :  { %2108 = vst.msk [vmem:[%s3839_s3 + $0x3c] sm:$0xf] %vm2092_vm2, %v2397_v56  ;;  %v1862_v8 = vmax.f32 %v1713_v9, 0.0 }
 0x1ad   :  { %v1491_v50 = vpop.f32.mrf.mxu1  ;;  %v1715_v35 = vpop.f32.mrf.mxu0 }
 0x1ae   :  { %v2398_v38 = vpack.c.bf16 %v1862_v8, %v1862_v8  ;;  %v1716_v59 = vadd.f32 %v1715_v35, %v1484_v30  ;;  %v1492_v26 = vadd.f32 %v1491_v50, %v1260_v57  ;;  %v1273_v8 = vadd.f32 %v3534_v31, %v3514_v54 }
 0x1af   :  { %v1493_v14 = vpop.f32.mrf.mxu1  ;;  %v2503_v49 = vpop.f32.mrf.mxu0 }
 0x1b0   :  { %2109 = vst.msk [vmem:[%s3839_s3 + $0x40] sm:$0xf] %vm2092_vm2, %v2398_v38  ;;  %v1863_v45 = vmax.f32 %v1716_v59, 0.0 }
 0x1b1   :  { %v1496_v24 = vpop.f32.mrf.mxu1  ;;  %v1720_v23 = vpop.f32.mrf.mxu0 }
 0x1b2   :  { %v2399_v11 = vpack.c.bf16 %v1863_v45, %v1863_v45  ;;  %v1721_v39 = vadd.f32 %v1720_v23, %v1489_v6  ;;  %v1497_v28 = vadd.f32 %v1496_v24, %v1265_v55  ;;  %v1276_v6 = vadd.f32 %v3534_v31, %v3521_v1 }
 0x1b3   :  { %v1498_v48 = vpop.f32.mrf.mxu1  ;;  %v2506_v60 = vpop.f32.mrf.mxu0 }
 0x1b4   :  { %2110 = vst.msk [vmem:[%s3839_s3 + $0x44] sm:$0xf] %vm2092_vm2, %v2399_v11  ;;  %v1864_v12 = vmax.f32 %v1721_v39, 0.0  ;;  %v1281_v60 = vadd.f32 %v3534_v31, %v3526_v20 }
 0x1b5   :  { %v1499_v18 = vpop.f32.mrf.mxu1  ;;  %v1723_v0 = vpop.f32.mrf.mxu0 }
 0x1b6   :  { %v2400_v22 = vpack.c.bf16 %v1864_v12, %v1864_v12  ;;  %v1724_v61 = vadd.f32 %v1723_v0, %v1492_v26  ;;  %v1500_v9 = vadd.f32 %v1499_v18, %v1268_v4 }
 0x1b7   :  { %v1501_v19 = vpop.f32.mrf.mxu1  ;;  %v2507_v5 = vpop.f32.mrf.mxu0 }
 0x1b8   :  { %2111 = vst.msk [vmem:[%s3839_s3 + $0x48] sm:$0xf] %vm2092_vm2, %v2400_v22  ;;  %v1865_v32 = vmax.f32 %v1724_v61, 0.0  ;;  %v1284_v19 = vadd.f32 %v3534_v31, %v3536_v42 }
 0x1b9   :  { %v1504_v46 = vpop.f32.mrf.mxu1  ;;  %v1728_v34 = vpop.f32.mrf.mxu0 }
 0x1ba   :  { %v2401_v41 = vpack.c.bf16 %v1865_v32, %v1865_v32  ;;  %v1729_v2 = vadd.f32 %v1728_v34, %v1497_v28  ;;  %v1505_v38 = vadd.f32 %v1504_v46, %v1273_v8 }
 0x1bb   :  { %v1506_v56 = vpop.f32.mrf.mxu1  ;;  %v2510_v21 = vpop.f32.mrf.mxu0 }
 0x1bc   :  { %2112 = vst.msk [vmem:[%s3839_s3 + $0x4c] sm:$0xf] %vm2092_vm2, %v2401_v41  ;;  %v1866_v16 = vmax.f32 %v1729_v2, 0.0  ;;  %v1289_v2 = vadd.f32 %v3534_v31, %v3296_v3 }
 0x1bd   :  { %v1507_v43 = vpop.f32.mrf.mxu1  ;;  %v1731_v30 = vpop.f32.mrf.mxu0 }
 0x1be   :  { %v2402_v50 = vpack.c.bf16 %v1866_v16, %v1866_v16  ;;  %v1732_v35 = vadd.f32 %v1731_v30, %v1500_v9  ;;  %v1508_v57 = vadd.f32 %v1507_v43, %v1276_v6  ;;  %v1297_v6 = vadd.f32 %v3534_v31, %v3316_v13 }
 0x1bf   :  { %v1509_v53 = vpop.f32.mrf.mxu1  ;;  %v2511_v37 = vpop.f32.mrf.mxu0 }
 0x1c0   :  { %2113 = vst.msk [vmem:[%s3839_s3 + $0x50] sm:$0xf] %vm2092_vm2, %v2402_v50  ;;  %v1867_v59 = vmax.f32 %v1732_v35, 0.0  ;;  %v1292_v50 = vadd.f32 %v3534_v31, %v3303_v7 }
 0x1c1   :  { %v1512_v14 = vpop.f32.mrf.mxu1  ;;  %v1736_v49 = vpop.f32.mrf.mxu0 }
 0x1c2   :  { %v2403_v45 = vpack.c.bf16 %v1867_v59, %v1867_v59  ;;  %v1737_v24 = vadd.f32 %v1736_v49, %v1505_v38  ;;  %v1513_v0 = vadd.f32 %v1512_v14, %v1281_v60 }
 0x1c3   :  { %v1514_v23 = vpop.f32.mrf.mxu1  ;;  %v2514_v54 = vpop.f32.mrf.mxu0 }
 0x1c4   :  { %2114 = vst.msk [vmem:[%s3839_s3 + $0x54] sm:$0xf] %vm2092_vm2, %v2403_v45  ;;  %v1868_v11 = vmax.f32 %v1737_v24, 0.0 }
 0x1c5   :  { %v1515_v39 = vpop.f32.mrf.mxu1  ;;  %v1739_v48 = vpop.f32.mrf.mxu0 }
 0x1c6   :  { %v2404_v26 = vpack.c.bf16 %v1868_v11, %v1868_v11  ;;  %v1740_v12 = vadd.f32 %v1739_v48, %v1508_v57  ;;  %v1516_v46 = vadd.f32 %v1515_v39, %v1284_v19  ;;  %v1300_v48 = vadd.f32 %v3534_v31, %v3323_v17 }
 0x1c7   :  { %v1517_v18 = vpop.f32.mrf.mxu1  ;;  %v2515_v1 = vpop.f32.mrf.mxu0 }
 0x1c8   :  { %2115 = vst.msk [vmem:[%s3839_s3 + $0x58] sm:$0xf] %vm2092_vm2, %v2404_v26  ;;  %v1869_v55 = vmax.f32 %v1740_v12, 0.0 }
 0x1c9   :  { %v1520_v22 = vpop.f32.mrf.mxu1  ;;  %v1744_v61 = vpop.f32.mrf.mxu0 }
 0x1ca   :  { %v2405_v5 = vpack.c.bf16 %v1869_v55, %v1869_v55  ;;  %v1745_v28 = vadd.f32 %v1744_v61, %v1513_v0  ;;  %v1521_v16 = vadd.f32 %v1520_v22, %v1289_v2  ;;  %v1305_v22 = vadd.f32 %v3534_v31, %v3336_v25 }
 0x1cb   :  { %v1522_v32 = vpop.f32.mrf.mxu1  ;;  %v2518_v20 = vpop.f32.mrf.mxu0 }
 0x1cc   :  { %2116 = vst.msk [vmem:[%s3839_s3 + $0x5c] sm:$0xf] %vm2092_vm2, %v2405_v5  ;;  %v1870_v34 = vmax.f32 %v1745_v28, 0.0 }
 0x1cd   :  { %v1523_v4 = vpop.f32.mrf.mxu1  ;;  %v1747_v41 = vpop.f32.mrf.mxu0 }
 0x1ce   :  { %v2406_v56 = vpack.c.bf16 %v1870_v34, %v1870_v34  ;;  %v1748_v21 = vadd.f32 %v1747_v41, %v1516_v46  ;;  %v1524_v38 = vadd.f32 %v1523_v4, %v1292_v50  ;;  %v1308_v34 = vadd.f32 %v3534_v31, %v3343_v29 }
 0x1cf   :  { %v1525_v9 = vpop.f32.mrf.mxu1  ;;  %v2519_v42 = vpop.f32.mrf.mxu0 }
 0x1d0   :  { %2117 = vst.msk [vmem:[%s3839_s3 + $0x60] sm:$0xf] %vm2092_vm2, %v2406_v56  ;;  %v1871_v43 = vmax.f32 %v1748_v21, 0.0 }
 0x1d1   :  { %v1528_v30 = vpop.f32.mrf.mxu1  ;;  %v1752_v8 = vpop.f32.mrf.mxu0 }
 0x1d2   :  { %v2407_v35 = vpack.c.bf16 %v1871_v43, %v1871_v43  ;;  %v1753_v53 = vadd.f32 %v1752_v8, %v1521_v16  ;;  %v1529_v54 = vadd.f32 %v1528_v30, %v1297_v6  ;;  %v1313_v16 = vadd.f32 %v3534_v31, %v3356_v36 }
 0x1d3   :  { %v1530_v37 = vpop.f32.mrf.mxu1  ;;  %v2522_v3 = vpop.f32.mrf.mxu0 }
 0x1d4   :  { %2118 = vst.msk [vmem:[%s3839_s3 + $0x64] sm:$0xf] %vm2092_vm2, %v2407_v35  ;;  %v1872_v59 = vmax.f32 %v1753_v53, 0.0  ;;  %v1316_v3 = vadd.f32 %v3534_v31, %v3363_v40 }
 0x1d5   :  { %v1531_v14 = vpop.f32.mrf.mxu1  ;;  %v1755_v49 = vpop.f32.mrf.mxu0 }
 0x1d6   :  { %v2408_v45 = vpack.c.bf16 %v1872_v59, %v1872_v59  ;;  %v1756_v24 = vadd.f32 %v1755_v49, %v1524_v38  ;;  %v1532_v18 = vadd.f32 %v1531_v14, %v1300_v48 }
 0x1d7   :  { %v1533_v23 = vpop.f32.mrf.mxu1  ;;  %v2523_v7 = vpop.f32.mrf.mxu0 }
 0x1d8   :  { %2119 = vst.msk [vmem:[%s3839_s3 + $0x68] sm:$0xf] %vm2092_vm2, %v2408_v45  ;;  %v1873_v57 = vmax.f32 %v1756_v24, 0.0  ;;  %v1321_v23 = vadd.f32 %v3534_v31, %v3376_v47 }
 0x1d9   :  { %v1536_v11 = vpop.f32.mrf.mxu1  ;;  %v1760_v39 = vpop.f32.mrf.mxu0 }
 0x1da   :  { %v2409_v60 = vpack.c.bf16 %v1873_v57, %v1873_v57  ;;  %v1761_v26 = vadd.f32 %v1760_v39, %v1529_v54  ;;  %v1537_v28 = vadd.f32 %v1536_v11, %v1305_v22 }
 0x1db   :  { %v1538_v12 = vpop.f32.mrf.mxu1  ;;  %v2526_v13 = vpop.f32.mrf.mxu0 }
 0x1dc   :  { %2120 = vst.msk [vmem:[%s3839_s3 + $0x6c] sm:$0xf] %vm2092_vm2, %v2409_v60  ;;  %v1874_v1 = vmax.f32 %v1761_v26, 0.0  ;;  %v1324_v26 = vadd.f32 %v3534_v31, %v3383_v51 }
 0x1dd   :  { %v1539_v0 = vpop.f32.mrf.mxu1  ;;  %v1763_v55 = vpop.f32.mrf.mxu0 }
 0x1de   :  { %v2410_v61 = vpack.c.bf16 %v1874_v1, %v1874_v1  ;;  %v1764_v19 = vadd.f32 %v1763_v55, %v1532_v18  ;;  %v1540_v56 = vadd.f32 %v1539_v0, %v1308_v34  ;;  %v1332_v34 = vadd.f32 %v3534_v31, %v3403_v62 }
 0x1df   :  { %v1541_v5 = vpop.f32.mrf.mxu1  ;;  %v2527_v17 = vpop.f32.mrf.mxu0 }
 0x1e0   :  { %2121 = vst.msk [vmem:[%s3839_s3 + $0x70] sm:$0xf] %vm2092_vm2, %v2410_v61  ;;  %v1875_v32 = vmax.f32 %v1764_v19, 0.0  ;;  %v1329_v61 = vadd.f32 %v3534_v31, %v3396_v58 }
 0x1e1   :  { %v1544_v20 = vpop.f32.mrf.mxu1  ;;  %v1768_v46 = vpop.f32.mrf.mxu0 }
 0x1e2   :  { %v2411_v4 = vpack.c.bf16 %v1875_v32, %v1875_v32  ;;  %v1769_v41 = vadd.f32 %v1768_v46, %v1537_v28  ;;  %v1545_v50 = vadd.f32 %v1544_v20, %v1313_v16 }
 0x1e3   :  { %v1546_v2 = vpop.f32.mrf.mxu1  ;;  %v2530_v25 = vpop.f32.mrf.mxu0 }
 0x1e4   :  { %2122 = vst.msk [vmem:[%s3839_s3 + $0x74] sm:$0xf] %vm2092_vm2, %v2411_v4  ;;  %v1876_v21 = vmax.f32 %v1769_v41, 0.0 }
 0x1e5   :  { %v1547_v9 = vpop.f32.mrf.mxu1  ;;  %v1771_v42 = vpop.f32.mrf.mxu0 }
 0x1e6   :  { %v2412_v43 = vpack.c.bf16 %v1876_v21, %v1876_v21  ;;  %v1772_v30 = vadd.f32 %v1771_v42, %v1540_v56  ;;  %v1548_v49 = vadd.f32 %v1547_v9, %v1316_v3  ;;  %v1337_v42 = vadd.f32 %v3534_v31, %v3416_v10 }
 0x1e7   :  { %v1549_v8 = vpop.f32.mrf.mxu1  ;;  %v2531_v29 = vpop.f32.mrf.mxu0 }
 0x1e8   :  { %2123 = vst.msk [vmem:[%s3839_s3 + $0x78] sm:$0xf] %vm2092_vm2, %v2412_v43  ;;  %v1877_v35 = vmax.f32 %v1772_v30, 0.0 }
 0x1e9   :  { %v1552_v53 = vpop.f32.mrf.mxu1  ;;  %v1776_v37 = vpop.f32.mrf.mxu0 }
 0x1ea   :  { %v2413_v38 = vpack.c.bf16 %v1877_v35, %v1877_v35  ;;  %v1777_v59 = vadd.f32 %v1776_v37, %v1545_v50  ;;  %v1553_v11 = vadd.f32 %v1552_v53, %v1321_v23  ;;  %v1340_v53 = vadd.f32 %v3534_v31, %v3423_v15 }
 0x1eb   :  { %v1554_v14 = vpop.f32.mrf.mxu1  ;;  %v2534_v36 = vpop.f32.mrf.mxu0 }
 0x1ec   :  { %2124 = vst.msk [vmem:[%s3839_s3 + $0x7c] sm:$0xf] %vm2092_vm2, %v2413_v38  ;;  %v1878_v6 = vmax.f32 %v1777_v59, 0.0 }
 0x1ed   :  { %v1555_v45 = vpop.f32.mrf.mxu1  ;;  %v1779_v24 = vpop.f32.mrf.mxu0 }
 0x1ee   :  { %v2414_v7 = vpack.c.bf16 %v1878_v6, %v1878_v6  ;;  %v1780_v54 = vadd.f32 %v1779_v24, %v1548_v49  ;;  %v1556_v1 = vadd.f32 %v1555_v45, %v1324_v26  ;;  %v1345_v6 = vadd.f32 %v3534_v31, %v3436_v27 }
 0x1ef   :  { %v1557_v57 = vpop.f32.mrf.mxu1  ;;  %v2535_v40 = vpop.f32.mrf.mxu0 }
 0x1f0   :  { %2125 = vst.msk [vmem:[%s3839_s3 + $0x80] sm:$0xf] %vm2092_vm2, %v2414_v7  ;;  %v1879_v39 = vmax.f32 %v1780_v54, 0.0 }
 0x1f1   :  { %v1560_v48 = vpop.f32.mrf.mxu1  ;;  %v1784_v60 = vpop.f32.mrf.mxu0 }
 0x1f2   :  { %v2415_v12 = vpack.c.bf16 %v1879_v39, %v1879_v39  ;;  %v1785_v13 = vadd.f32 %v1784_v60, %v1553_v11  ;;  %v1561_v28 = vadd.f32 %v1560_v48, %v1329_v61  ;;  %v1348_v11 = vadd.f32 %v3534_v31, %v3443_v33 }
 0x1f3   :  { %v1562_v18 = vpop.f32.mrf.mxu1  ;;  %v2538_v47 = vpop.f32.mrf.mxu0 }
 0x1f4   :  { %2126 = vst.msk [vmem:[%s3839_s3 + $0x84] sm:$0xf] %vm2092_vm2, %v2415_v12  ;;  %v1880_v0 = vmax.f32 %v1785_v13, 0.0  ;;  %v1353_v47 = vadd.f32 %v3534_v31, %v3456_v44 }
 0x1f5   :  { %v1563_v55 = vpop.f32.mrf.mxu1  ;;  %v1787_v22 = vpop.f32.mrf.mxu0 }
 0x1f6   :  { %v2416_v19 = vpack.c.bf16 %v1880_v0, %v1880_v0  ;;  %v1788_v5 = vadd.f32 %v1787_v22, %v1556_v1  ;;  %v1564_v25 = vadd.f32 %v1563_v55, %v1332_v34 }
 0x1f7   :  { %v1565_v17 = vpop.f32.mrf.mxu1  ;;  %v2539_v51 = vpop.f32.mrf.mxu0 }
 0x1f8   :  { %2127 = vst.msk [vmem:[%s3839_s3 + $0x88] sm:$0xf] %vm2092_vm2, %v2416_v19  ;;  %v1881_v32 = vmax.f32 %v1788_v5, 0.0  ;;  %v1356_v17 = vadd.f32 %v3534_v31, %v3463_v52 }
 0x1f9   :  { %v1568_v20 = vpop.f32.mrf.mxu1  ;;  %v1792_v46 = vpop.f32.mrf.mxu0 }
 0x1fa   :  { %v2417_v4 = vpack.c.bf16 %v1881_v32, %v1881_v32  ;;  %v1793_v41 = vadd.f32 %v1792_v46, %v1561_v28  ;;  %v1569_v8 = vadd.f32 %v1568_v20, %v1337_v42 }
 0x1fb   :  { %v1570_v2 = vpop.f32.mrf.mxu1  ;;  %v2542_v58 = vpop.f32.mrf.mxu0 }
 0x1fc   :  { %2128 = vst.msk [vmem:[%s3839_s3 + $0x8c] sm:$0xf] %vm2092_vm2, %v2417_v4  ;;  %v1882_v56 = vmax.f32 %v1793_v41, 0.0  ;;  %v1361_v41 = vadd.f32 %v3534_v31, %v3476_v63 }
 0x1fd   :  { %v1571_v21 = vpop.f32.mrf.mxu1  ;;  %v1795_v9 = vpop.f32.mrf.mxu0 }
 0x1fe   :  { %v2418_v16 = vpack.c.bf16 %v1882_v56, %v1882_v56  ;;  %v1796_v43 = vadd.f32 %v1795_v9, %v1564_v25  ;;  %v1572_v59 = vadd.f32 %v1571_v21, %v1340_v53 }
 0x1ff   :  { %v1573_v30 = vpop.f32.mrf.mxu1  ;;  %v2543_v62 = vpop.f32.mrf.mxu0 }
 0x200   :  { %2129 = vst.msk [vmem:[%s3839_s3 + $0x90] sm:$0xf] %vm2092_vm2, %v2418_v16  ;;  %v1883_v29 = vmax.f32 %v1796_v43, 0.0  ;;  %v3844_v16 = vld [vmem:[#allocation2_spill] sm:$0xff] }
 0x201   :  { %v1576_v50 = vpop.f32.mrf.mxu1  ;;  %v1800_v35 = vpop.f32.mrf.mxu0  ;;  %v1364_v43 = vadd.f32 %v3534_v31, %v3844_v16 }
 0x202   :  { %v2419_v37 = vpack.c.bf16 %v1883_v29, %v1883_v29  ;;  %v1801_v3 = vadd.f32 %v1800_v35, %v1569_v8  ;;  %v1577_v7 = vadd.f32 %v1576_v50, %v1345_v6 }
 0x203   :  { %v1578_v38 = vpop.f32.mrf.mxu1  ;;  %v2546_v10 = vpop.f32.mrf.mxu0 }
 0x204   :  { %2130 = vst.msk [vmem:[%s3839_s3 + $0x94] sm:$0xf] %vm2092_vm2, %v2419_v37  ;;  %v1884_v14 = vmax.f32 %v1801_v3, 0.0  ;;  %v3845_v37 = vld [vmem:[#allocation3_spill] sm:$0xff] }
 0x205   :  { %v1579_v36 = vpop.f32.mrf.mxu1  ;;  %v1803_v49 = vpop.f32.mrf.mxu0  ;;  %v1369_v3 = vadd.f32 %v3534_v31, %v3845_v37 }
 0x206   :  { %v2420_v45 = vpack.c.bf16 %v1884_v14, %v1884_v14  ;;  %v1804_v24 = vadd.f32 %v1803_v49, %v1572_v59  ;;  %v1580_v26 = vadd.f32 %v1579_v36, %v1348_v11 }
 0x207   :  { %v1581_v23 = vpop.f32.mrf.mxu1  ;;  %v2547_v15 = vpop.f32.mrf.mxu0 }
 0x208   :  { %2131 = vst.msk [vmem:[%s3839_s3 + $0x98] sm:$0xf] %vm2092_vm2, %v2420_v45  ;;  %v1885_v54 = vmax.f32 %v1804_v24, 0.0  ;;  %v3846_v24 = vld [vmem:[#allocation4_spill] sm:$0xff] }
 0x209   :  { %v1584_v57 = vpop.f32.mrf.mxu1  ;;  %v1808_v40 = vpop.f32.mrf.mxu0  ;;  %v1372_v23 = vadd.f32 %v3534_v31, %v3846_v24 }
 0x20a   :  { %v2421_v39 = vpack.c.bf16 %v1885_v54, %v1885_v54  ;;  %v1809_v48 = vadd.f32 %v1808_v40, %v1577_v7  ;;  %v1585_v22 = vadd.f32 %v1584_v57, %v1353_v47 }
 0x20b   :  { %v1586_v60 = vpop.f32.mrf.mxu1  ;;  %v2550_v27 = vpop.f32.mrf.mxu0 }
 0x20c   :  { %2132 = vst.msk [vmem:[%s3839_s3 + $0x9c] sm:$0xf] %vm2092_vm2, %v2421_v39  ;;  %v1886_v12 = vmax.f32 %v1809_v48, 0.0  ;;  %v3847_v60 = vld [vmem:[#allocation5_spill] sm:$0xff] }
 0x20d   :  { %v1587_v13 = vpop.f32.mrf.mxu1  ;;  %v1811_v18 = vpop.f32.mrf.mxu0  ;;  %v1377_v27 = vadd.f32 %v3534_v31, %v3847_v60 }
 0x20e   :  { %v2422_v1 = vpack.c.bf16 %v1886_v12, %v1886_v12  ;;  %v1812_v0 = vadd.f32 %v1811_v18, %v1580_v26  ;;  %v1588_v20 = vadd.f32 %v1587_v13, %v1356_v17 }
 0x20f   :  { %v1589_v55 = vpop.f32.mrf.mxu1  ;;  %v2551_v33 = vpop.f32.mrf.mxu0 }
 0x210   :  { %2133 = vst.msk [vmem:[%s3839_s3 + $0xa0] sm:$0xf] %vm2092_vm2, %v2422_v1  ;;  %v1887_v61 = vmax.f32 %v1812_v0, 0.0 }
 0x211   :  { %v1592_v19 = vpop.f32.mrf.mxu1  ;;  %v1816_v5 = vpop.f32.mrf.mxu0 }
 0x212   :  { %v2423_v51 = vpack.c.bf16 %v1887_v61, %v1887_v61  ;;  %v1817_v28 = vadd.f32 %v1816_v5, %v1585_v22  ;;  %v1593_v56 = vadd.f32 %v1592_v19, %v1361_v41 }
 0x213   :  { %v1594_v32 = vpop.f32.mrf.mxu1  ;;  %v2554_v44 = vpop.f32.mrf.mxu0 }
 0x214   :  { %2134 = vst.msk [vmem:[%s3839_s3 + $0xa4] sm:$0xf] %vm2092_vm2, %v2423_v51  ;;  %v1888_v46 = vmax.f32 %v1817_v28, 0.0 }
 0x215   :  { %v1595_v34 = vpop.f32.mrf.mxu1  ;;  %v1819_v4 = vpop.f32.mrf.mxu0 }
 0x216   :  { %v2424_v2 = vpack.c.bf16 %v1888_v46, %v1888_v46  ;;  %v1820_v58 = vadd.f32 %v1819_v4, %v1588_v20  ;;  %v1596_v29 = vadd.f32 %v1595_v34, %v1364_v43 }
 0x217   :  { %v1597_v25 = vpop.f32.mrf.mxu1  ;;  %v2555_v52 = vpop.f32.mrf.mxu0 }
 0x218   :  { %2135 = vst.msk [vmem:[%s3839_s3 + $0xa8] sm:$0xf] %vm2092_vm2, %v2424_v2  ;;  %v1889_v21 = vmax.f32 %v1820_v58, 0.0 }
 0x219   :  { %v1600_v9 = vpop.f32.mrf.mxu1  ;;  %v1824_v42 = vpop.f32.mrf.mxu0 }
 0x21a   :  { %v2425_v30 = vpack.c.bf16 %v1889_v21, %v1889_v21  ;;  %v1825_v62 = vadd.f32 %v1824_v42, %v1593_v56  ;;  %v1601_v36 = vadd.f32 %v1600_v9, %v1369_v3 }
 0x21b   :  { %v1602_v8 = vpop.f32.mrf.mxu1  ;;  %v2558_v63 = vpop.f32.mrf.mxu0 }
 0x21c   :  { %2136 = vst.msk [vmem:[%s3839_s3 + $0xac] sm:$0xf] %vm2092_vm2, %v2425_v30  ;;  %v1890_v50 = vmax.f32 %v1825_v62, 0.0 }
 0x21d   :  { %v1603_v35 = vpop.f32.mrf.mxu1  ;;  %v1827_v53 = vpop.f32.mrf.mxu0 }
 0x21e   :  { %v2426_v38 = vpack.c.bf16 %v1890_v50, %v1890_v50  ;;  %v1828_v10 = vadd.f32 %v1827_v53, %v1596_v29  ;;  %v1604_v40 = vadd.f32 %v1603_v35, %v1372_v23 }
 0x21f   :  { %v1605_v59 = vpop.f32.mrf.mxu1  ;;  %v2559_v14 = vpop.f32.mrf.mxu0 }
 0x220   :  { %2137 = vst.msk [vmem:[%s3839_s3 + $0xb0] sm:$0xf] %vm2092_vm2, %v2426_v38  ;;  %v1891_v49 = vmax.f32 %v1828_v10, 0.0 }
 0x221   :  { %v1608_v6 = vpop.f32.mrf.mxu1  ;;  %v1832_v45 = vpop.f32.mrf.mxu0 }
 0x222   :  { %v2427_v15 = vpack.c.bf16 %v1891_v49, %v1891_v49  ;;  %v1833_v7 = vadd.f32 %v1832_v45, %v1601_v36  ;;  %v1609_v47 = vadd.f32 %v1608_v6, %v1377_v27 }
 0x223   :  { %v2562_v54 = vpop.f32.mrf.mxu0  ;;  %v1610_v57 = vpop.f32.mrf.mxu1 }
 0x224   :  { %2138 = vst.msk [vmem:[%s3839_s3 + $0xb4] sm:$0xf] %vm2092_vm2, %v2427_v15  ;;  %v1892_v11 = vmax.f32 %v1833_v7, 0.0 }
 0x225   :  { %v1835_v39 = vpop.f32.mrf.mxu0  ;;  %v1611_v48 = vpop.f32.mrf.mxu1 }
 0x226   :  { %v2428_v26 = vpack.c.bf16 %v1892_v11, %v1892_v11  ;;  %v1836_v12 = vadd.f32 %v1835_v39, %v1604_v40 }
 0x227   :  { %v2563_v13 = vpop.f32.mrf.mxu0  ;;  %v1612_v18 = vpop.f32.mrf.mxu1 }
 0x228   :  { %2139 = vst.msk [vmem:[%s3839_s3 + $0xb8] sm:$0xf] %vm2092_vm2, %v2428_v26  ;;  %v1893_v1 = vmax.f32 %v1836_v12, 0.0 }
 0x229   :  { %v1840_v0 = vpop.f32.mrf.mxu0 }
 0x22a   :  { %v2429_v55 = vpack.c.bf16 %v1893_v1, %v1893_v1  ;;  %v1841_v33 = vadd.f32 %v1840_v0, %v1609_v47 }
 0x22b   :  { %v2566_v22 = vpop.f32.mrf.mxu0 }
 0x22c   :  { %2140 = vst.msk [vmem:[%s3839_s3 + $0xbc] sm:$0xf] %vm2092_vm2, %v2429_v55  ;;  %v1894_v31 = vmax.f32 %v1841_v33, 0.0 }
 0x22d   :  { %v1843_v61 = vpop.f32.mrf.mxu0 }
 0x22e   :  { %v2430_v19 = vpack.c.bf16 %v1894_v31, %v1894_v31 }
 0x22f   :  { %v2567_v5 = vpop.f32.mrf.mxu0 }
 0x230   :  { %2141 = vst.msk [vmem:[%s3839_s3 + $0xc0] sm:$0xf] %vm2092_vm2, %v2430_v19 }

// kernel: vae_forward.13
= control target key start
LH: loop header
LB: loop body
LE: loop exit
PB: predicated region body
PF: predicated region fallthrough
CT: control target
= control target key end

     0   :  { %s3525_s12 = smov 0   ;;  %s3527_s13 = smov 0   ;;  %s4272_s0 = inlined_call_operand.vmem [shape: bf16[1568,288], index: 0, kind: input, shape index: {}]   ;;  %s4273_s1 = inlined_call_operand.vmem [shape: bf16[288,128], index: 1, kind: input, shape index: {}]   ;;  %s4274_s2 = inlined_call_operand.vmem [shape: f32[1,128], index: 2, kind: input, shape index: {}]   ;;  %s4275_s3 = inlined_call_operand.vmem [shape: f32[1568,128], index: 3, kind: output, shape index: {}]  }
   0x1   :  { %s3529_s14 = smov 0  }
   0x2 LB: > { %s3538_s15 = sadd.s32 4294967295, %s3470_s14   ;;  %s3540_s16 = sadd.s32 1, %s3470_s14   ;;  %s3470_s14 = sphi %s3529_s14, %s4284_s14   ;;  %s3466_s13 = sphi %s3527_s13, %s4283_s13   ;;  %s3462_s12 = sphi %s3525_s12, %s4282_s12  }
   0x3   : > { %s85_s17 = ssub.s32 %s3470_s14, %s3540_s16  ;;  %s88_s18 = sadd.s32 1, %s3466_s13 }
   0x4   : > { %p86_p0 = scmp.eq.s32.totalorder %s85_s17, 0  ;;  %p98_p1 = scmp.ne.s32.totalorder %s3466_s13, %s3462_s12 }
   0x5   : > { %p99_p2 = scmp.eq.s32.totalorder %s3538_s15, 3  ;;  %p2554_p3 = scmp.ge.s32.totalorder %s3470_s14, 1 }
   0x6   : > { %s3548_s19 = scalar_select %p86_p0, %s3466_s13, %s88_s18  }
   0x7   : > { %p3550_p4 = por %p99_p2, %p98_p1  ;;  %p149_p5 = scmp.lt.s32.totalorder %s3470_s14, 5 }
   0x9   : > { %p150_p6 = pnand %p2554_p3, %p149_p5 }
   0xa   : > { %s3560_s23 = sshll.u32 (!%p150_p6), %s3538_s15, 6  ;;  %s175_s25 = sand.u32 (!%p150_p6), 1, %s3462_s12  }
   0xb   : > { %153 = sbr.rel (%p150_p6) target bundleno = 576 (0x240), region = 32  ;;  %p184_p7 = scmp.lt.s32.totalorder (!%p150_p6), %s3560_s23, 195 }
   0xc   : > { %s2555_s12 = sshll.u32 (!%p150_p6), %s175_s25, 9 }
   0xd   : > { %s3893_s26 = scalar_lea.vmem (!%p150_p6), [#allocation2], %s2555_s12  }
  0x10   : > { %v3013_v0 = vld [vmem:[%s4273_s1 + $0x38] sm:$0xff]   ;;  %v3504_v1 = vmov 0   ;;  %v3014_v2 = vld [vmem:[%s4273_s1 + $0x30] sm:$0xff]   ;;  %v3015_v3 = vld [vmem:[%s4273_s1 + $0x28] sm:$0xff]   ;;  %s185_s28 = scalar_select %p184_p7, %s3560_s23, 195  ;;  %vm960_vm0 = vcmask 261120  }
  0x11   : > { %1057 = vmatprep.subr.bf16.mxu0 %v3504_v1  ;;  %2891 = vmatprep.subr.bf16.mxu1 %v3504_v1  ;;  %v3016_v4 = vld [vmem:[%s4273_s1 + $0x20] sm:$0xff]   ;;  %v3017_v5 = vld [vmem:[%s4273_s1 + $0x18] sm:$0xff]   ;;  %v3018_v7 = vld [vmem:[%s4273_s1 + $0x10] sm:$0xff]   ;;  %s2091_s29 = ssub.s32 (%p3550_p4), 196, %s3560_s23  ;;  %s2786_s30 = sshll.u32 (%p3550_p4), %s3538_s15, 9 }
  0x12   : > { %1058 = vmatpush1.bf16.msra.mxu0 %v3013_v0  ;;  %2907 = vmatpush1.bf16.msra.mxu1 %v3013_v0  ;;  %s2923_s4 = smul.u32 12, %s185_s28  ;;  %v3019_v9 = vld [vmem:[%s4273_s1 + $0x8] sm:$0xff]   ;;  %v3020_v10 = vld [vmem:[%s4273_s1] sm:$0xff]   ;;  %v3021_v11 = vld [vmem:[%s4273_s1 + $0x78] sm:$0xff]   ;;  %p2092_p8 = scmp.lt.s32.totalorder (%p3550_p4), %s2091_s29, 64 }
  0x13   : > { %1059 = vmatprep.subr.bf16.mxu0 %v3504_v1  ;;  %2892 = vmatprep.subr.bf16.mxu1 %v3504_v1  ;;  %v3022_v12 = vld [vmem:[%s4273_s1 + $0x70] sm:$0xff]   ;;  %v3023_v13 = vld [vmem:[%s4273_s1 + $0x68] sm:$0xff]   ;;  %v3024_v14 = vld [vmem:[%s4273_s1 + $0x60] sm:$0xff]   ;;  %s4073_s6 = scalar_lea.vmem (%p3550_p4), %s4275_s3, %s2786_s30  }
  0x14   : > { %s3585_s9 = scalar_lea.vmem %s4272_s0, %s2923_s4  ;;  %v3025_v15 = vld [vmem:[%s4273_s1 + $0x58] sm:$0xff]   ;;  %v3026_v16 = vld [vmem:[%s4273_s1 + $0x50] sm:$0xff]   ;;  %v3027_v17 = vld [vmem:[%s4273_s1 + $0x48] sm:$0xff]  }
  0x15   : > { %v3031_v6 = vld [vmem:[%s3585_s9 + $0x4] ss:$12 sps:$4 sm:$0xff]   ;;  %v3035_v19 = vld [vmem:[%s4273_s1 + $0x88] sm:$0xff]   ;;  %v3042_v27 = vld [vmem:[%s3585_s9 + $0x34] ss:$12 sps:$4 sm:$0xff]  }
  0x16   : > { %1060 = vmatpush1.bf16.msra.mxu0 %v3014_v2  ;;  %2908 = vmatpush1.bf16.msra.mxu1 %v3014_v2  ;;  %v3034_v8 = vld [vmem:[%s3585_s9 + $0x244] ss:$12 sps:$4 sm:$0xff]   ;;  %v3029_v20 = vld [vmem:[%s3585_s9] ss:$12 sps:$4 sm:$0xff]   ;;  %v3036_v22 = vld [vmem:[%s3585_s9 + $0x1c] ss:$12 sps:$4 sm:$0xff]  }
  0x17   : > { %1061 = vmatprep.subr.bf16.mxu0 %v3504_v1  ;;  %2893 = vmatprep.subr.bf16.mxu1 %v3504_v1  ;;  %v3028_v18 = vld [vmem:[%s4273_s1 + $0x40] sm:$0xff]   ;;  %v3038_v23 = vld [vmem:[%s3585_s9 + $0x25c] ss:$12 sps:$4 sm:$0xff]   ;;  %v3048_v31 = vld [vmem:[%s3585_s9 + $0x4c] ss:$12 sps:$4 sm:$0xff]  }
  0x18   : > { %1089 = vmatprep.mubr.bf16.mxu0 %v3031_v6  ;;  %1281 = vmatprep.mubr.bf16.mxu1 %v3034_v8  ;;  %v3032_v21 = vld [vmem:[%s3585_s9 + $0x240] ss:$12 sps:$4 sm:$0xff]   ;;  %v3040_v25 = vld [vmem:[%s3585_s9 + $0x18] ss:$12 sps:$4 sm:$0xff]   ;;  %v3046_v29 = vld [vmem:[%s3585_s9 + $0x30] ss:$12 sps:$4 sm:$0xff]  }
  0x19   : > { %v3060_v24 = vld [vmem:[%s4273_s1 + $0x80] sm:$0xff]   ;;  %v3047_v30 = vld [vmem:[%s3585_s9 + $0x270] ss:$12 sps:$4 sm:$0xff]   ;;  %v3050_v32 = vld [vmem:[%s3585_s9 + $0x28c] ss:$12 sps:$4 sm:$0xff]  }
  0x1a   : > { %1062 = vmatpush1.bf16.msra.mxu0 %v3015_v3  ;;  %2909 = vmatpush1.bf16.msra.mxu1 %v3015_v3  ;;  %v3041_v26 = vld [vmem:[%s3585_s9 + $0x258] ss:$12 sps:$4 sm:$0xff]   ;;  %v3044_v28 = vld [vmem:[%s3585_s9 + $0x274] ss:$12 sps:$4 sm:$0xff]   ;;  %v3061_v39 = vld [vmem:[%s3585_s9 + $0x7c] ss:$12 sps:$4 sm:$0xff]  }
  0x1b   : > { %1063 = vmatprep.subr.bf16.mxu0 %v3504_v1  ;;  %2894 = vmatprep.subr.bf16.mxu1 %v3504_v1  ;;  %v3052_v33 = vld [vmem:[%s3585_s9 + $0x48] ss:$12 sps:$4 sm:$0xff]   ;;  %v3054_v35 = vld [vmem:[%s3585_s9 + $0x64] ss:$12 sps:$4 sm:$0xff]   ;;  %v3058_v37 = vld [vmem:[%s3585_s9 + $0x60] ss:$12 sps:$4 sm:$0xff]  }
  0x1c   : > { %v3053_v34 = vld [vmem:[%s3585_s9 + $0x288] ss:$12 sps:$4 sm:$0xff]   ;;  %v3056_v36 = vld [vmem:[%s3585_s9 + $0x2a4] ss:$12 sps:$4 sm:$0xff]   ;;  %v3059_v38 = vld [vmem:[%s3585_s9 + $0x2a0] ss:$12 sps:$4 sm:$0xff]  }
  0x1d   : > { %v3063_v40 = vld [vmem:[%s3585_s9 + $0x2bc] ss:$12 sps:$4 sm:$0xff]   ;;  %v3065_v41 = vld [vmem:[%s3585_s9 + $0x78] ss:$12 sps:$4 sm:$0xff]   ;;  %v3067_v43 = vld [vmem:[%s3585_s9 + $0x94] ss:$12 sps:$4 sm:$0xff]  }
  0x1e   : > { %1064 = vmatpush1.bf16.msra.mxu0 %v3016_v4  ;;  %2910 = vmatpush1.bf16.msra.mxu1 %v3016_v4  ;;  %v3066_v42 = vld [vmem:[%s3585_s9 + $0x2b8] ss:$12 sps:$4 sm:$0xff]   ;;  %v3069_v44 = vld [vmem:[%s3585_s9 + $0x2d4] ss:$12 sps:$4 sm:$0xff]   ;;  %v3071_v45 = vld [vmem:[%s3585_s9 + $0x90] ss:$12 sps:$4 sm:$0xff]  }
  0x1f   : > { %1065 = vmatprep.subr.bf16.mxu0 %v3504_v1  ;;  %2895 = vmatprep.subr.bf16.mxu1 %v3504_v1  ;;  %v3072_v46 = vld [vmem:[%s3585_s9 + $0x2d0] ss:$12 sps:$4 sm:$0xff]   ;;  %v3073_v47 = vld [vmem:[%s3585_s9 + $0xac] ss:$12 sps:$4 sm:$0xff]   ;;  %v3077_v49 = vld [vmem:[%s3585_s9 + $0xa8] ss:$12 sps:$4 sm:$0xff]  }
  0x20   : > { %v3075_v48 = vld [vmem:[%s3585_s9 + $0x2ec] ss:$12 sps:$4 sm:$0xff]   ;;  %v3078_v50 = vld [vmem:[%s3585_s9 + $0x2e8] ss:$12 sps:$4 sm:$0xff]   ;;  %v3079_v51 = vld [vmem:[%s3585_s9 + $0xc4] ss:$12 sps:$4 sm:$0xff]  }
  0x21   : > { %v3081_v52 = vld [vmem:[%s3585_s9 + $0x8] ss:$12 sps:$4 sm:$0xff]   ;;  %v3082_v53 = vld [vmem:[%s3585_s9 + $0xc0] ss:$12 sps:$4 sm:$0xff]   ;;  %v3086_v56 = vld [vmem:[%s3585_s9 + $0x38] ss:$12 sps:$4 sm:$0xff]  }
  0x22   : > { %1066 = vmatpush1.bf16.msra.mxu0 %v3017_v5  ;;  %2911 = vmatpush1.bf16.msra.mxu1 %v3017_v5  ;;  %v3083_v54 = vld [vmem:[%s3585_s9 + $0x20] ss:$12 sps:$4 sm:$0xff]   ;;  %v3084_v55 = vld [vmem:[%s3585_s9 + $0xdc] ss:$12 sps:$4 sm:$0xff]   ;;  %v3087_v57 = vld [vmem:[%s3585_s9 + $0xd8] ss:$12 sps:$4 sm:$0xff]  }
  0x23   : > { %1067 = vmatprep.subr.bf16.mxu0 %v3504_v1  ;;  %2896 = vmatprep.subr.bf16.mxu1 %v3504_v1  ;;  %v3088_v58 = vld [vmem:[%s3585_s9 + $0x50] ss:$12 sps:$4 sm:$0xff]   ;;  %v3089_v59 = vld [vmem:[%s3585_s9 + $0xf4] ss:$12 sps:$4 sm:$0xff]   ;;  %v3094_v63 = vld [vmem:[%s3585_s9 + $0x10c] ss:$12 sps:$4 sm:$0xff]  }
  0x24   : > { %v3091_v60 = vld [vmem:[%s3585_s9 + $0x68] ss:$12 sps:$4 sm:$0xff]   ;;  %v3092_v61 = vld [vmem:[%s3585_s9 + $0xf0] ss:$12 sps:$4 sm:$0xff]   ;;  %v3093_v62 = vld [vmem:[%s3585_s9 + $0x80] ss:$12 sps:$4 sm:$0xff]  }
  0x25   : > { %v3096_v0 = vld [vmem:[%s3585_s9 + $0x98] ss:$12 sps:$4 sm:$0xff]   ;;  %v3098_v2 = vld [vmem:[%s3585_s9 + $0xb0] ss:$12 sps:$4 sm:$0xff]   ;;  %v3101_v4 = vld [vmem:[%s3585_s9 + $0xc8] ss:$12 sps:$4 sm:$0xff]  }
  0x26   : > { %1068 = vmatpush1.bf16.msra.mxu0 %v3018_v7  ;;  %2912 = vmatpush1.bf16.msra.mxu1 %v3018_v7  ;;  %v3099_v3 = vld [vmem:[%s3585_s9 + $0x124] ss:$12 sps:$4 sm:$0xff]   ;;  %v3102_v5 = vld [vmem:[%s3585_s9 + $0x120] ss:$12 sps:$4 sm:$0xff]   ;;  %v3104_v7 = vld [vmem:[%s3585_s9 + $0x13c] ss:$12 sps:$4 sm:$0xff]  }
  0x27   : > { %1069 = vmatprep.subr.bf16.mxu0 %v3504_v1  ;;  %2897 = vmatprep.subr.bf16.mxu1 %v3504_v1  ;;  %v3103_v6 = vld [vmem:[%s3585_s9 + $0xe0] ss:$12 sps:$4 sm:$0xff]   ;;  %v3106_v8 = vld [vmem:[%s3585_s9 + $0xf8] ss:$12 sps:$4 sm:$0xff]  }
  0x2a   : > { %1070 = vmatpush1.bf16.msra.mxu0 %v3019_v9  ;;  %2913 = vmatpush1.bf16.msra.mxu1 %v3019_v9  ;;  %v3107_v9 = vld [vmem:[%s3585_s9 + $0x138] ss:$12 sps:$4 sm:$0xff]  }
  0x2b   : > { %1071 = vmatprep.subr.bf16.mxu0 %v3504_v1  ;;  %2898 = vmatprep.subr.bf16.mxu1 %v3504_v1 }
  0x2e   : > { %1072 = vmatpush1.bf16.msra.mxu0 %v3020_v10  ;;  %2914 = vmatpush1.bf16.msra.mxu1 %v3020_v10  ;;  %v3108_v10 = vld [vmem:[%s3585_s9 + $0x110] ss:$12 sps:$4 sm:$0xff]  }
  0x2f   : > { %1073 = vmatprep.subr.bf16.mxu0 %v3504_v1  ;;  %2899 = vmatprep.subr.bf16.mxu1 %v3504_v1 }
  0x32   : > { %1074 = vmatpush2.bf16.msra.mxu0 %v3021_v11  ;;  %2915 = vmatpush2.bf16.msra.mxu1 %v3021_v11  ;;  %v3109_v11 = vld [vmem:[%s3585_s9 + $0x154] ss:$12 sps:$4 sm:$0xff]  }
  0x33   : > { %1075 = vmatprep.subr.bf16.mxu0 %v3504_v1  ;;  %2900 = vmatprep.subr.bf16.mxu1 %v3504_v1 }
  0x36   : > { %1076 = vmatpush2.bf16.msra.mxu0 %v3022_v12  ;;  %2916 = vmatpush2.bf16.msra.mxu1 %v3022_v12  ;;  %v3111_v12 = vld [vmem:[%s3585_s9 + $0x128] ss:$12 sps:$4 sm:$0xff]  }
  0x37   : > { %1077 = vmatprep.subr.bf16.mxu0 %v3504_v1  ;;  %2901 = vmatprep.subr.bf16.mxu1 %v3504_v1 }
  0x3a   : > { %1078 = vmatpush2.bf16.msra.mxu0 %v3023_v13  ;;  %2917 = vmatpush2.bf16.msra.mxu1 %v3023_v13  ;;  %v3112_v13 = vld [vmem:[%s3585_s9 + $0x150] ss:$12 sps:$4 sm:$0xff]  }
  0x3b   : > { %1079 = vmatprep.subr.bf16.mxu0 %v3504_v1  ;;  %2902 = vmatprep.subr.bf16.mxu1 %v3504_v1 }
  0x3e   : > { %1080 = vmatpush2.bf16.msra.mxu0 %v3024_v14  ;;  %2918 = vmatpush2.bf16.msra.mxu1 %v3024_v14  ;;  %v3113_v14 = vld [vmem:[%s3585_s9 + $0x140] ss:$12 sps:$4 sm:$0xff]  }
  0x3f   : > { %1081 = vmatprep.subr.bf16.mxu0 %v3504_v1  ;;  %2903 = vmatprep.subr.bf16.mxu1 %v3504_v1 }
  0x42   : > { %1082 = vmatpush2.bf16.msra.mxu0 %v3025_v15  ;;  %2919 = vmatpush2.bf16.msra.mxu1 %v3025_v15  ;;  %v3114_v15 = vld [vmem:[%s3585_s9 + $0x16c] ss:$12 sps:$4 sm:$0xff]  }
  0x43   : > { %1083 = vmatprep.subr.bf16.mxu0 %v3504_v1  ;;  %2904 = vmatprep.subr.bf16.mxu1 %v3504_v1 }
  0x46   : > { %1084 = vmatpush2.bf16.msra.mxu0 %v3026_v16  ;;  %2920 = vmatpush2.bf16.msra.mxu1 %v3026_v16  ;;  %v3116_v16 = vld [vmem:[%s3585_s9 + $0x158] ss:$12 sps:$4 sm:$0xff]  }
  0x47   : > { %1085 = vmatprep.subr.bf16.mxu0 %v3504_v1  ;;  %2905 = vmatprep.subr.bf16.mxu1 %v3504_v1 }
  0x4a   : > { %1086 = vmatpush2.bf16.msra.mxu0 %v3027_v17  ;;  %2921 = vmatpush2.bf16.msra.mxu1 %v3027_v17  ;;  %v3117_v17 = vld [vmem:[%s3585_s9 + $0x168] ss:$12 sps:$4 sm:$0xff]  }
  0x4b   : > { %1087 = vmatprep.subr.bf16.mxu0 %v3504_v1  ;;  %2906 = vmatprep.subr.bf16.mxu1 %v3504_v1  ;;  %v3097_v1 = vld [vmem:[%s3585_s9 + $0x108] ss:$12 sps:$4 sm:$0xff]  }
  0x4e   : > { %1088 = vmatpush2.bf16.msra.mxu0 %v3028_v18  ;;  %2922 = vmatpush2.bf16.msra.mxu1 %v3028_v18  ;;  %v3118_v18 = vld [vmem:[%s3585_s9 + $0x170] ss:$12 sps:$4 sm:$0xff]  }
  0x4f   : > { %2823 = vmatprep.subr.bf16.mxu1 %v3035_v19 }
  0x51   : > { %1090 = vmatmul.mubr.bf16.vlgmr.msra.gmra.mxu0 %v3029_v20  ;;  %1282 = vmatmul.mubr.bf16.vlgmr.msra.gmra.mxu1 %v3032_v21  ;;  %v3121_v20 = vld [vmem:[%s3585_s9 + $0x188] ss:$12 sps:$4 sm:$0xff]   ;;  %v3122_v21 = vld [vmem:[%s3585_s9 + $0x180] ss:$12 sps:$4 sm:$0xff]  }
  0x52   : > { %2824 = vmatpush3.bf16.msra.mxu1 %v3035_v19  ;;  %1097 = vmatprep.mubr.bf16.mxu0 %v3036_v22  ;;  %v3119_v19 = vld [vmem:[%s3585_s9 + $0x184] ss:$12 sps:$4 sm:$0xff]   ;;  %v3123_v22 = vld [vmem:[%s3585_s9 + $0x1a0] ss:$12 sps:$4 sm:$0xff]  }
  0x53   : > { %1289 = vmatprep.mubr.bf16.mxu1 %v3038_v23  ;;  %2825 = vmatprep.subr.bf16.mxu1 %v3060_v24  ;;  %v3124_v23 = vld [vmem:[%s3585_s9 + $0x19c] ss:$12 sps:$4 sm:$0xff]  }
  0x56   : > { %2826 = vmatpush3.bf16.msra.mxu1 %v3060_v24  ;;  %v3126_v24 = vld [vmem:[%s3585_s9 + $0x1b8] ss:$12 sps:$4 sm:$0xff]  }
  0x59   : > { %1098 = vmatmul.mubr.bf16.gmra.mxu0 %v3040_v25  ;;  %1290 = vmatmul.mubr.bf16.gmra.mxu1 %v3041_v26  ;;  %v3127_v25 = vld [vmem:[%s3585_s9 + $0x198] ss:$12 sps:$4 sm:$0xff]   ;;  %v3128_v26 = vld [vmem:[%s3585_s9 + $0x1d0] ss:$12 sps:$4 sm:$0xff]  }
  0x5a   : > { %1105 = vmatprep.mubr.bf16.mxu0 %v3042_v27  ;;  %1297 = vmatprep.mubr.bf16.mxu1 %v3044_v28  ;;  %v3129_v27 = vld [vmem:[%s3585_s9 + $0x1b4] ss:$12 sps:$4 sm:$0xff]  }
  0x5b   : > { %v3131_v28 = vld [vmem:[%s3585_s9 + $0x1e8] ss:$12 sps:$4 sm:$0xff]  }
  0x61   : > { %1106 = vmatmul.mubr.bf16.gmra.mxu0 %v3046_v29  ;;  %1298 = vmatmul.mubr.bf16.gmra.mxu1 %v3047_v30  ;;  %v3132_v29 = vld [vmem:[%s3585_s9 + $0x1b0] ss:$12 sps:$4 sm:$0xff]   ;;  %v3133_v30 = vld [vmem:[%s3585_s9 + $0x200] ss:$12 sps:$4 sm:$0xff]  }
  0x62   : > { %1113 = vmatprep.mubr.bf16.mxu0 %v3048_v31  ;;  %1305 = vmatprep.mubr.bf16.mxu1 %v3050_v32  ;;  %v3134_v31 = vld [vmem:[%s3585_s9 + $0x1cc] ss:$12 sps:$4 sm:$0xff]  }
  0x63   : > { %v3136_v32 = vld [vmem:[%s3585_s9 + $0x218] ss:$12 sps:$4 sm:$0xff]  }
  0x69   : > { %1114 = vmatmul.mubr.bf16.gmra.mxu0 %v3052_v33  ;;  %1306 = vmatmul.mubr.bf16.gmra.mxu1 %v3053_v34  ;;  %v3137_v33 = vld [vmem:[%s3585_s9 + $0x1c8] ss:$12 sps:$4 sm:$0xff]   ;;  %v3138_v34 = vld [vmem:[%s3585_s9 + $0x230] ss:$12 sps:$4 sm:$0xff]  }
  0x6a   : > { %1121 = vmatprep.mubr.bf16.mxu0 %v3054_v35  ;;  %1313 = vmatprep.mubr.bf16.mxu1 %v3056_v36  ;;  %v3139_v35 = vld [vmem:[%s3585_s9 + $0x1e4] ss:$12 sps:$4 sm:$0xff]   ;;  %v3141_v36 = vld [vmem:[%s3585_s9 + $0x248] ss:$12 sps:$4 sm:$0xff]  }
  0x71   : > { %1122 = vmatmul.mubr.bf16.gmra.mxu0 %v3058_v37  ;;  %1314 = vmatmul.mubr.bf16.gmra.mxu1 %v3059_v38  ;;  %v3142_v37 = vld [vmem:[%s3585_s9 + $0x1e0] ss:$12 sps:$4 sm:$0xff]  }
  0x72   : > { %1129 = vmatprep.mubr.bf16.mxu0 %v3061_v39  ;;  %1321 = vmatprep.mubr.bf16.mxu1 %v3063_v40  ;;  %v3143_v38 = vld [vmem:[%s3585_s9 + $0x260] ss:$12 sps:$4 sm:$0xff]   ;;  %v3144_v39 = vld [vmem:[%s3585_s9 + $0x1fc] ss:$12 sps:$4 sm:$0xff]   ;;  %v3146_v40 = vld [vmem:[%s3585_s9 + $0x278] ss:$12 sps:$4 sm:$0xff]  }
  0x79   : > { %1130 = vmatmul.mubr.bf16.gmra.mxu0 %v3065_v41  ;;  %1322 = vmatmul.mubr.bf16.gmra.mxu1 %v3066_v42  ;;  %v3147_v41 = vld [vmem:[%s3585_s9 + $0x1f8] ss:$12 sps:$4 sm:$0xff]   ;;  %v3148_v42 = vld [vmem:[%s3585_s9 + $0x290] ss:$12 sps:$4 sm:$0xff]  }
  0x7a   : > { %1137 = vmatprep.mubr.bf16.mxu0 %v3067_v43  ;;  %1329 = vmatprep.mubr.bf16.mxu1 %v3069_v44  ;;  %v3149_v43 = vld [vmem:[%s3585_s9 + $0x214] ss:$12 sps:$4 sm:$0xff]  }
  0x7b   : > { %v3151_v44 = vld [vmem:[%s3585_s9 + $0x2a8] ss:$12 sps:$4 sm:$0xff]  }
  0x81   : > { %1138 = vmatmul.mubr.bf16.gmra.mxu0 %v3071_v45  ;;  %1330 = vmatmul.mubr.bf16.gmra.mxu1 %v3072_v46  ;;  %v3152_v45 = vld [vmem:[%s3585_s9 + $0x210] ss:$12 sps:$4 sm:$0xff]   ;;  %v3153_v46 = vld [vmem:[%s3585_s9 + $0x2c0] ss:$12 sps:$4 sm:$0xff]  }
  0x82   : > { %1145 = vmatprep.mubr.bf16.mxu0 %v3073_v47  ;;  %1337 = vmatprep.mubr.bf16.mxu1 %v3075_v48  ;;  %v3154_v47 = vld [vmem:[%s3585_s9 + $0x22c] ss:$12 sps:$4 sm:$0xff]  }
  0x83   : > { %v3156_v48 = vld [vmem:[%s3585_s9 + $0x2d8] ss:$12 sps:$4 sm:$0xff]  }
  0x89   : > { %1146 = vmatmul.mubr.bf16.gmra.mxu0 %v3077_v49  ;;  %1338 = vmatmul.mubr.bf16.gmra.mxu1 %v3078_v50  ;;  %v3157_v49 = vld [vmem:[%s3585_s9 + $0x228] ss:$12 sps:$4 sm:$0xff]   ;;  %v3158_v50 = vld [vmem:[%s3585_s9 + $0x2f0] ss:$12 sps:$4 sm:$0xff]  }
  0x8a   : > { %1153 = vmatprep.mubr.bf16.mxu0 %v3079_v51  ;;  %2827 = vmatprep.mubr.msk.bf16.mxu1 %vm960_vm0, %v3081_v52 }
  0x91   : > { %1154 = vmatmul.mubr.bf16.gmra.mxu0 %v3082_v53  ;;  %2828 = vmatmul.mubr.msk.bf16.vlgmr.msra.gmra.mxu1 %vm960_vm0, %v3083_v54 }
  0x92   : > { %1161 = vmatprep.mubr.bf16.mxu0 %v3084_v55  ;;  %2831 = vmatprep.mubr.msk.bf16.mxu1 %vm960_vm0, %v3086_v56 }
  0x99   : > { %1162 = vmatmul.mubr.bf16.gmra.mxu0 %v3087_v57  ;;  %2832 = vmatmul.mubr.msk.bf16.gmra.mxu1 %vm960_vm0, %v3088_v58 }
  0x9a   : > { %1169 = vmatprep.mubr.bf16.mxu0 %v3089_v59  ;;  %2835 = vmatprep.mubr.msk.bf16.mxu1 %vm960_vm0, %v3091_v60 }
  0xa1   : > { %1170 = vmatmul.mubr.bf16.gmra.mxu0 %v3092_v61  ;;  %2836 = vmatmul.mubr.msk.bf16.gmra.mxu1 %vm960_vm0, %v3093_v62 }
  0xa2   : > { %1177 = vmatprep.mubr.bf16.mxu0 %v3094_v63  ;;  %2839 = vmatprep.mubr.msk.bf16.mxu1 %vm960_vm0, %v3096_v0 }
  0xa9   : > { %1178 = vmatmul.mubr.bf16.gmra.mxu0 %v3097_v1  ;;  %2840 = vmatmul.mubr.msk.bf16.gmra.mxu1 %vm960_vm0, %v3098_v2 }
  0xaa   : > { %1185 = vmatprep.mubr.bf16.mxu0 %v3099_v3  ;;  %2843 = vmatprep.mubr.msk.bf16.mxu1 %vm960_vm0, %v3101_v4 }
  0xb1   : > { %1186 = vmatmul.mubr.bf16.gmra.mxu0 %v3102_v5  ;;  %2844 = vmatmul.mubr.msk.bf16.gmra.mxu1 %vm960_vm0, %v3103_v6 }
  0xb2   : > { %1193 = vmatprep.mubr.bf16.mxu0 %v3104_v7  ;;  %2847 = vmatprep.mubr.msk.bf16.mxu1 %vm960_vm0, %v3106_v8 }
  0xb9   : > { %1194 = vmatmul.mubr.bf16.gmra.mxu0 %v3107_v9  ;;  %2848 = vmatmul.mubr.msk.bf16.gmra.mxu1 %vm960_vm0, %v3108_v10 }
  0xba   : > { %1201 = vmatprep.mubr.bf16.mxu0 %v3109_v11  ;;  %2851 = vmatprep.mubr.msk.bf16.mxu1 %vm960_vm0, %v3111_v12 }
  0xc1   : > { %1202 = vmatmul.mubr.bf16.gmra.mxu0 %v3112_v13  ;;  %2852 = vmatmul.mubr.msk.bf16.gmra.mxu1 %vm960_vm0, %v3113_v14 }
  0xc2   : > { %1209 = vmatprep.mubr.bf16.mxu0 %v3114_v15  ;;  %2855 = vmatprep.mubr.msk.bf16.mxu1 %vm960_vm0, %v3116_v16 }
  0xc9   : > { %1210 = vmatmul.mubr.bf16.gmra.mxu0 %v3117_v17  ;;  %2856 = vmatmul.mubr.msk.bf16.gmra.mxu1 %vm960_vm0, %v3118_v18 }
  0xca   : > { %1217 = vmatprep.mubr.bf16.mxu0 %v3119_v19  ;;  %2859 = vmatprep.mubr.msk.bf16.mxu1 %vm960_vm0, %v3121_v20 }
  0xd1   : > { %1218 = vmatmul.mubr.bf16.gmra.mxu0 %v3122_v21  ;;  %2860 = vmatmul.mubr.msk.bf16.gmra.mxu1 %vm960_vm0, %v3123_v22 }
  0xd2   : > { %1225 = vmatprep.mubr.bf16.mxu0 %v3124_v23  ;;  %2863 = vmatprep.mubr.msk.bf16.mxu1 %vm960_vm0, %v3126_v24 }
  0xd9   : > { %1226 = vmatmul.mubr.bf16.gmra.mxu0 %v3127_v25  ;;  %2864 = vmatmul.mubr.msk.bf16.gmra.mxu1 %vm960_vm0, %v3128_v26 }
  0xda   : > { %1233 = vmatprep.mubr.bf16.mxu0 %v3129_v27  ;;  %2867 = vmatprep.mubr.msk.bf16.mxu1 %vm960_vm0, %v3131_v28 }
  0xe1   : > { %1234 = vmatmul.mubr.bf16.gmra.mxu0 %v3132_v29  ;;  %2868 = vmatmul.mubr.msk.bf16.gmra.mxu1 %vm960_vm0, %v3133_v30 }
  0xe2   : > { %1241 = vmatprep.mubr.bf16.mxu0 %v3134_v31  ;;  %2871 = vmatprep.mubr.msk.bf16.mxu1 %vm960_vm0, %v3136_v32 }
  0xe9   : > { %1242 = vmatmul.mubr.bf16.gmra.mxu0 %v3137_v33  ;;  %2872 = vmatmul.mubr.msk.bf16.gmra.mxu1 %vm960_vm0, %v3138_v34 }
  0xea   : > { %1249 = vmatprep.mubr.bf16.mxu0 %v3139_v35  ;;  %2875 = vmatprep.mubr.msk.bf16.mxu1 %vm960_vm0, %v3141_v36 }
  0xf1   : > { %1250 = vmatmul.mubr.bf16.gmra.mxu0 %v3142_v37  ;;  %2876 = vmatmul.mubr.msk.bf16.gmra.mxu1 %vm960_vm0, %v3143_v38 }
  0xf2   : > { %1257 = vmatprep.mubr.bf16.mxu0 %v3144_v39  ;;  %2879 = vmatprep.mubr.msk.bf16.mxu1 %vm960_vm0, %v3146_v40 }
  0xf9   : > { %1258 = vmatmul.mubr.bf16.gmra.mxu0 %v3147_v41  ;;  %2880 = vmatmul.mubr.msk.bf16.gmra.mxu1 %vm960_vm0, %v3148_v42 }
  0xfa   : > { %1265 = vmatprep.mubr.bf16.mxu0 %v3149_v43  ;;  %2883 = vmatprep.mubr.msk.bf16.mxu1 %vm960_vm0, %v3151_v44 }
 0x101   : > { %1266 = vmatmul.mubr.bf16.gmra.mxu0 %v3152_v45  ;;  %2884 = vmatmul.mubr.msk.bf16.gmra.mxu1 %vm960_vm0, %v3153_v46 }
 0x102   : > { %1273 = vmatprep.mubr.bf16.mxu0 %v3154_v47  ;;  %2887 = vmatprep.mubr.msk.bf16.mxu1 %vm960_vm0, %v3156_v48 }
 0x109   : > { %1274 = vmatmul.mubr.bf16.gmra.mxu0 %v3157_v49  ;;  %2888 = vmatmul.mubr.msk.bf16.gmra.mxu1 %vm960_vm0, %v3158_v50  ;;  %v3839_v49 = vld [vmem:[%s4274_s2] ss:$0 sm:$0xff] }
 0x111   : > { %v3778_v51 = vpop.f32.mrf.mxu0  ;;  %v3780_v52 = vpop.f32.mrf.mxu1 }
 0x113   : > { %v1093_v53 = vpop.f32.mrf.mxu0  ;;  %v1285_v54 = vpop.f32.mrf.mxu1 }
 0x115   : > { %v3782_v55 = vpop.f32.mrf.mxu0  ;;  %v3784_v56 = vpop.f32.mrf.mxu1 }
 0x117   : > { %v1096_v57 = vpop.f32.mrf.mxu0  ;;  %v1288_v58 = vpop.f32.mrf.mxu1 }
 0x119   : > { %v1099_v59 = vpop.f32.mrf.mxu0  ;;  %v3786_v60 = vpop.f32.mrf.mxu1 }
 0x11a   : > { %v1100_v54 = vadd.f32 %v3839_v49, %v1099_v59 }
 0x11b   : > { %v1101_v61 = vpop.f32.mrf.mxu0  ;;  %v1293_v62 = vpop.f32.mrf.mxu1 }
 0x11c   : > { %v1092_v61 = vadd.f32 %v3839_v49, %v3778_v51 }
 0x11d   : > { %v1102_v63 = vpop.f32.mrf.mxu0  ;;  %v3788_v0 = vpop.f32.mrf.mxu1 }
 0x11f   : > { %v1104_v1 = vpop.f32.mrf.mxu0  ;;  %v1296_v2 = vpop.f32.mrf.mxu1 }
 0x121   : > { %v3790_v3 = vpop.f32.mrf.mxu0  ;;  %v3792_v4 = vpop.f32.mrf.mxu1 }
 0x123   : > { %v1109_v5 = vpop.f32.mrf.mxu0  ;;  %v1301_v6 = vpop.f32.mrf.mxu1 }
 0x124   : > { %v1103_v5 = vadd.f32 %v3839_v49, %v1102_v63 }
 0x125   : > { %v3794_v7 = vpop.f32.mrf.mxu0  ;;  %v3796_v8 = vpop.f32.mrf.mxu1 }
 0x127   : > { %v1112_v9 = vpop.f32.mrf.mxu0  ;;  %v1304_v10 = vpop.f32.mrf.mxu1 }
 0x129   : > { %v1115_v11 = vpop.f32.mrf.mxu0  ;;  %v3798_v12 = vpop.f32.mrf.mxu1 }
 0x12a   : > { %v1116_v51 = vadd.f32 %v3839_v49, %v1115_v11 }
 0x12b   : > { %v1117_v13 = vpop.f32.mrf.mxu0  ;;  %v1309_v14 = vpop.f32.mrf.mxu1 }
 0x12c   : > { %v1095_v14 = vadd.f32 %v3839_v49, %v3782_v55 }
 0x12d   : > { %v3800_v15 = vpop.f32.mrf.mxu0  ;;  %v3802_v16 = vpop.f32.mrf.mxu1 }
 0x12f   : > { %v1120_v17 = vpop.f32.mrf.mxu0  ;;  %v1312_v18 = vpop.f32.mrf.mxu1 }
 0x131   : > { %v3804_v19 = vpop.f32.mrf.mxu0  ;;  %v3806_v20 = vpop.f32.mrf.mxu1 }
 0x133   : > { %v1125_v21 = vpop.f32.mrf.mxu0  ;;  %v1317_v22 = vpop.f32.mrf.mxu1 }
 0x135   : > { %v3808_v23 = vpop.f32.mrf.mxu0  ;;  %v3810_v24 = vpop.f32.mrf.mxu1 }
 0x137   : > { %v1128_v25 = vpop.f32.mrf.mxu0  ;;  %v1320_v26 = vpop.f32.mrf.mxu1 }
 0x139   : > { %v3812_v27 = vpop.f32.mrf.mxu0  ;;  %v3814_v28 = vpop.f32.mrf.mxu1 }
 0x13b   : > { %v1133_v29 = vpop.f32.mrf.mxu0  ;;  %v1325_v30 = vpop.f32.mrf.mxu1 }
 0x13c   : > { %v1108_v29 = vadd.f32 %v3839_v49, %v3790_v3 }
 0x13d   : > { %v3816_v31 = vpop.f32.mrf.mxu0  ;;  %v3818_v32 = vpop.f32.mrf.mxu1 }
 0x13f   : > { %v1136_v33 = vpop.f32.mrf.mxu0  ;;  %v1328_v34 = vpop.f32.mrf.mxu1 }
 0x141   : > { %v3820_v35 = vpop.f32.mrf.mxu0  ;;  %v3822_v36 = vpop.f32.mrf.mxu1 }
 0x143   : > { %v1141_v37 = vpop.f32.mrf.mxu0  ;;  %v1333_v38 = vpop.f32.mrf.mxu1 }
 0x144   : > { %v1119_v37 = vadd.f32 %v3839_v49, %v3800_v15 }
 0x145   : > { %v3824_v39 = vpop.f32.mrf.mxu0  ;;  %v3826_v40 = vpop.f32.mrf.mxu1 }
 0x147   : > { %v1144_v41 = vpop.f32.mrf.mxu0  ;;  %v1336_v42 = vpop.f32.mrf.mxu1 }
 0x149   : > { %v3828_v43 = vpop.f32.mrf.mxu0  ;;  %v3830_v44 = vpop.f32.mrf.mxu1 }
 0x14b   : > { %v1149_v45 = vpop.f32.mrf.mxu0  ;;  %v1341_v46 = vpop.f32.mrf.mxu1 }
 0x14c   : > { %v1111_v45 = vadd.f32 %v3839_v49, %v3794_v7 }
 0x14d   : > { %v3832_v47 = vpop.f32.mrf.mxu0  ;;  %v3834_v48 = vpop.f32.mrf.mxu1 }
 0x14f   : > { %v1152_v50 = vpop.f32.mrf.mxu0  ;;  %v1344_v53 = vpop.f32.mrf.mxu1 }
 0x151   : > { %v3842_v57 = vpop.f32.mrf.mxu0  ;;  %v2829_v58 = vpop.f32.mrf.mxu1 }
 0x152   : > { %v1389_v62 = vadd.f32 %v2829_v58, %v1100_v54  ;;  %v1132_v54 = vadd.f32 %v3839_v49, %v3812_v27 }
 0x153   : > { %v1157_v1 = vpop.f32.mrf.mxu0  ;;  %v1380_v2 = vpop.f32.mrf.mxu1 }
 0x154   : > { %v2707_v6 = vmul.f32 -1.442695, %v1389_v62  ;;  %v1381_v9 = vadd.f32 %v1380_v2, %v1092_v61  ;;  %v1124_v1 = vadd.f32 %v3839_v49, %v3804_v19  ;;  %v1127_v19 = vadd.f32 %v3839_v49, %v3808_v23 }
 0x155   : > { %v3847_v10 = vpop.f32.mrf.mxu0  ;;  %v2830_v13 = vpop.f32.mrf.mxu1 }
 0x156   : > { %3159 = vpow2.f32 %v2707_v6  ;;  %v2705_v59 = vmul.f32 -1.442695, %v1381_v9  ;;  %v1392_v17 = vadd.f32 %v2830_v13, %v1103_v5 }
 0x157   : > { %v1160_v18 = vpop.f32.mrf.mxu0  ;;  %v1383_v21 = vpop.f32.mrf.mxu1 }
 0x158   : > { %3161 = vpow2.f32 %v2705_v59  ;;  %v2708_v22 = vmul.f32 -1.442695, %v1392_v17  ;;  %v1384_v25 = vadd.f32 %v1383_v21, %v1095_v14  ;;  %v1135_v17 = vadd.f32 %v3839_v49, %v3816_v31 }
 0x159   : > { %v3852_v26 = vpop.f32.mrf.mxu0  ;;  %v2833_v63 = vpop.f32.mrf.mxu1  ;;  %v1148_v31 = vadd.f32 %v3839_v49, %v3828_v43 }
 0x15a   : > { %3163 = vpow2.f32 %v2708_v22  ;;  %v2706_v30 = vmul.f32 -1.442695, %v1384_v25  ;;  %v1405_v33 = vadd.f32 %v2833_v63, %v1116_v51 }
 0x15b   : > { %v1165_v55 = vpop.f32.mrf.mxu0  ;;  %v1396_v34 = vpop.f32.mrf.mxu1 }
 0x15c   : > { %3165 = vpow2.f32 %v2706_v30  ;;  %v2711_v38 = vmul.f32 -1.442695, %v1405_v33  ;;  %v1397_v11 = vadd.f32 %v1396_v34, %v1108_v29 }
 0x15d   : > { %v3858_v41 = vpop.f32.mrf.mxu0  ;;  %v2834_v42 = vpop.f32.mrf.mxu1 }
 0x15e   : > { %3167 = vpow2.f32 %v2711_v38  ;;  %v2709_v46 = vmul.f32 -1.442695, %v1397_v11  ;;  %v1408_v3 = vadd.f32 %v2834_v42, %v1119_v37  ;;  %v1140_v11 = vadd.f32 %v3839_v49, %v3820_v35 }
 0x15f   : > { %v1168_v50 = vpop.f32.mrf.mxu0  ;;  %v1399_v53 = vpop.f32.mrf.mxu1 }
 0x160   : > { %3169 = vpow2.f32 %v2709_v46  ;;  %v2712_v58 = vmul.f32 -1.442695, %v1408_v3  ;;  %v1400_v15 = vadd.f32 %v1399_v53, %v1111_v45 }
 0x161   : > { %v3864_v61 = vpop.f32.mrf.mxu0  ;;  %v2837_v62 = vpop.f32.mrf.mxu1 }
 0x162   : > { %3171 = vpow2.f32 %v2712_v58  ;;  %v2710_v2 = vmul.f32 -1.442695, %v1400_v15  ;;  %v1421_v7 = vadd.f32 %v2837_v62, %v1132_v54  ;;  %v1151_v15 = vadd.f32 %v3839_v49, %v3832_v47 }
 0x163   : > { %v3160_v5 = vpop.eup %3159  ;;  %v1173_v6 = vpop.f32.mrf.mxu0 }
 0x164   : > { %v1412_v9 = vpop.f32.mrf.mxu1  ;;  %v1829_v13 = vadd.f32 1.0, %v3160_v5  ;;  %3173 = vpow2.f32 %v2710_v2  ;;  %v2715_v14 = vmul.f32 -1.442695, %v1421_v7  ;;  %v1143_v2 = vadd.f32 %v3839_v49, %v3824_v39 }
 0x165   : > { %v1413_v59 = vadd.f32 %v1412_v9, %v1124_v1  ;;  %v3162_v27 = vpop.eup %3161  ;;  %v3870_v18 = vpop.f32.mrf.mxu0 }
 0x166   : > { %v2838_v21 = vpop.f32.mrf.mxu1  ;;  %3175 = vrcp.f32 %v1829_v13  ;;  %v1827_v51 = vadd.f32 1.0, %v3162_v27 }
 0x167   : > { %v2713_v22 = vmul.f32 -1.442695, %v1413_v59  ;;  %v3164_v25 = vpop.eup %3163  ;;  %3177 = vpow2.f32 %v2715_v14  ;;  %v1424_v63 = vadd.f32 %v2838_v21, %v1135_v17  ;;  %v1176_v29 = vpop.f32.mrf.mxu0  ;;  %v1164_v17 = vadd.f32 %v3839_v49, %v3852_v26 }
 0x168   : > { %v1415_v30 = vpop.f32.mrf.mxu1  ;;  %3179 = vrcp.f32 %v1827_v51  ;;  %v1830_v33 = vadd.f32 1.0, %v3164_v25  ;;  %v1156_v51 = vadd.f32 %v3839_v49, %v3842_v57  ;;  %v1167_v26 = vadd.f32 %v3839_v49, %v3858_v41 }
 0x169   : > { %v1416_v55 = vadd.f32 %v1415_v30, %v1127_v19  ;;  %v3166_v34 = vpop.eup %3165  ;;  %3181 = vpow2.f32 %v2713_v22  ;;  %v2716_v37 = vmul.f32 -1.442695, %v1424_v63  ;;  %v3876_v38 = vpop.f32.mrf.mxu0 }
 0x16a   : > { %v2841_v23 = vpop.f32.mrf.mxu1  ;;  %3183 = vrcp.f32 %v1830_v33  ;;  %v1828_v42 = vadd.f32 1.0, %v3166_v34 }
 0x16b   : > { %v2714_v45 = vmul.f32 -1.442695, %v1416_v55  ;;  %v3168_v46 = vpop.eup %3167  ;;  %3185 = vpow2.f32 %v2716_v37  ;;  %v1437_v3 = vadd.f32 %v2841_v23, %v1148_v31  ;;  %v1181_v50 = vpop.f32.mrf.mxu0 }
 0x16c   : > { %v1428_v53 = vpop.f32.mrf.mxu1  ;;  %3187 = vrcp.f32 %v1828_v42  ;;  %v1833_v54 = vadd.f32 1.0, %v3168_v46 }
 0x16d   : > { %v1429_v43 = vadd.f32 %v1428_v53, %v1140_v11  ;;  %v3170_v58 = vpop.eup %3169  ;;  %3189 = vpow2.f32 %v2714_v45  ;;  %v2719_v62 = vmul.f32 -1.442695, %v1437_v3  ;;  %v3883_v1 = vpop.f32.mrf.mxu0  ;;  %v1159_v45 = vadd.f32 %v3839_v49, %v3847_v10 }
 0x16e   : > { %v2842_v35 = vpop.f32.mrf.mxu1  ;;  %3191 = vrcp.f32 %v1833_v54  ;;  %v1831_v7 = vadd.f32 1.0, %v3170_v58  ;;  %v1180_v58 = vadd.f32 %v3839_v49, %v3876_v38 }
 0x16f   : > { %v2717_v5 = vmul.f32 -1.442695, %v1429_v43  ;;  %v3172_v6 = vpop.eup %3171  ;;  %3193 = vpow2.f32 %v2719_v62  ;;  %v1440_v9 = vadd.f32 %v2842_v35, %v1151_v15  ;;  %v1184_v13 = vpop.f32.mrf.mxu0 }
 0x170   : > { %v1431_v14 = vpop.f32.mrf.mxu1  ;;  %3195 = vrcp.f32 %v1831_v7  ;;  %v1834_v59 = vadd.f32 1.0, %v3172_v6  ;;  %v1172_v6 = vadd.f32 %v3839_v49, %v3864_v61 }
 0x171   : > { %v1432_v47 = vadd.f32 %v1431_v14, %v1143_v2  ;;  %v3174_v27 = vpop.eup %3173  ;;  %3197 = vpow2.f32 %v2717_v5  ;;  %v2720_v21 = vmul.f32 -1.442695, %v1440_v9  ;;  %v3889_v19 = vpop.f32.mrf.mxu0 }
 0x172   : > { %v2845_v39 = vpop.f32.mrf.mxu1  ;;  %3199 = vrcp.f32 %v1834_v59  ;;  %v1832_v22 = vadd.f32 1.0, %v3174_v27 }
 0x173   : > { %v2718_v25 = vmul.f32 -1.442695, %v1432_v47  ;;  %v3176_v63 = vpop.eup %3175  ;;  %3201 = vpow2.f32 %v2720_v21  ;;  %v1453_v29 = vadd.f32 %v2845_v39, %v1164_v17  ;;  %v1189_v30 = vpop.f32.mrf.mxu0  ;;  %v1183_v17 = vadd.f32 %v3839_v49, %v3883_v1 }
 0x174   : > { %v1444_v33 = vpop.f32.mrf.mxu1  ;;  %v3178_v55 = vpop.eup %3177  ;;  %2021 = vst [vmem:[%s3893_s26 + $0x10] sm:$0xff] %v3176_v63  ;;  %3203 = vrcp.f32 %v1832_v22 }
 0x175   : > { %v1445_v34 = vadd.f32 %v1444_v33, %v1156_v51  ;;  %v3180_v57 = vpop.eup %3179  ;;  %v1837_v31 = vadd.f32 1.0, %v3178_v55  ;;  %3205 = vpow2.f32 %v2718_v25  ;;  %v2723_v37 = vmul.f32 -1.442695, %v1453_v29  ;;  %v3898_v23 = vpop.f32.mrf.mxu0 }
 0x176   : > { %v2846_v11 = vpop.f32.mrf.mxu1  ;;  %v3182_v42 = vpop.eup %3181  ;;  %2019 = vst [vmem:[%s3893_s26] sm:$0xff] %v3180_v57  ;;  %v1175_v29 = vadd.f32 %v3839_v49, %v3870_v18 }
 0x177   : > { %v2721_v46 = vmul.f32 -1.442695, %v1445_v34  ;;  %v1456_v3 = vadd.f32 %v2846_v11, %v1167_v26  ;;  %v3184_v50 = vpop.eup %3183  ;;  %3207 = vrcp.f32 %v1837_v31  ;;  %v1835_v41 = vadd.f32 1.0, %v3182_v42  ;;  %v1192_v53 = vpop.f32.mrf.mxu0 }
 0x178   : > { %v1447_v54 = vpop.f32.mrf.mxu1  ;;  %v3186_v43 = vpop.eup %3185  ;;  %2022 = vst [vmem:[%s3893_s26 + $0x18] sm:$0xff] %v3184_v50  ;;  %3209 = vpow2.f32 %v2723_v37  ;;  %v1188_v50 = vadd.f32 %v3839_v49, %v3889_v19 }
 0x179   : > { %v2724_v15 = vmul.f32 -1.442695, %v1456_v3  ;;  %v1448_v62 = vadd.f32 %v1447_v54, %v1159_v45  ;;  %v3188_v35 = vpop.eup %3187  ;;  %3211 = vrcp.f32 %v1835_v41  ;;  %v1838_v10 = vadd.f32 1.0, %v3186_v43  ;;  %v1195_v2 = vpop.f32.mrf.mxu0 }
 0x17a   : > { %v2849_v7 = vpop.f32.mrf.mxu1  ;;  %v3190_v5 = vpop.eup %3189  ;;  %2020 = vst [vmem:[%s3893_s26 + $0x8] sm:$0xff] %v3188_v35  ;;  %3213 = vpow2.f32 %v2721_v46  ;;  %v1196_v31 = vadd.f32 %v3839_v49, %v1195_v2 }
 0x17b   : > { %v2722_v9 = vmul.f32 -1.442695, %v1448_v62  ;;  %v1469_v13 = vadd.f32 %v2849_v7, %v1180_v58  ;;  %v3192_v14 = vpop.eup %3191  ;;  %3215 = vrcp.f32 %v1838_v10  ;;  %v1836_v38 = vadd.f32 1.0, %v3190_v5  ;;  %v1197_v59 = vpop.f32.mrf.mxu0 }
 0x17c   : > { %v1460_v47 = vpop.f32.mrf.mxu1  ;;  %v3194_v27 = vpop.eup %3193  ;;  %2025 = vst [vmem:[%s3893_s26 + $0x30] sm:$0xff] %v3192_v14  ;;  %3217 = vpow2.f32 %v2724_v15 }
 0x17d   : > { %v2727_v21 = vmul.f32 -1.442695, %v1469_v13  ;;  %v1461_v39 = vadd.f32 %v1460_v47, %v1172_v6  ;;  %v3196_v51 = vpop.eup %3195  ;;  %3219 = vrcp.f32 %v1836_v38  ;;  %v1841_v61 = vadd.f32 1.0, %v3194_v27  ;;  %v1198_v22 = vpop.f32.mrf.mxu0 }
 0x17e   : > { %v2850_v25 = vpop.f32.mrf.mxu1  ;;  %v3198_v63 = vpop.eup %3197  ;;  %2023 = vst [vmem:[%s3893_s26 + $0x20] sm:$0xff] %v3196_v51  ;;  %3221 = vpow2.f32 %v2722_v9  ;;  %v1199_v2 = vadd.f32 %v3839_v49, %v1198_v22  ;;  %v1191_v9 = vadd.f32 %v3839_v49, %v3898_v23 }
 0x17f   : > { %v2725_v30 = vmul.f32 -1.442695, %v1461_v39  ;;  %v1472_v33 = vadd.f32 %v2850_v25, %v1183_v17  ;;  %v3200_v55 = vpop.eup %3199  ;;  %3223 = vrcp.f32 %v1841_v61  ;;  %v1839_v1 = vadd.f32 1.0, %v3198_v63  ;;  %v1200_v26 = vpop.f32.mrf.mxu0 }
 0x180   : > { %v1463_v34 = vpop.f32.mrf.mxu1  ;;  %v3202_v57 = vpop.eup %3201  ;;  %2026 = vst [vmem:[%s3893_s26 + $0x38] sm:$0xff] %v3200_v55  ;;  %3225 = vpow2.f32 %v2727_v21 }
 0x181   : > { %v2728_v37 = vmul.f32 -1.442695, %v1472_v33  ;;  %v1464_v11 = vadd.f32 %v1463_v34, %v1175_v29  ;;  %v3204_v42 = vpop.eup %3203  ;;  %3227 = vrcp.f32 %v1839_v1  ;;  %v1842_v45 = vadd.f32 1.0, %v3202_v57  ;;  %v1203_v18 = vpop.f32.mrf.mxu0 }
 0x182   : > { %v2853_v46 = vpop.f32.mrf.mxu1  ;;  %v3206_v3 = vpop.eup %3205  ;;  %2024 = vst [vmem:[%s3893_s26 + $0x28] sm:$0xff] %v3204_v42  ;;  %3229 = vpow2.f32 %v2725_v30  ;;  %v1204_v51 = vadd.f32 %v3839_v49, %v1203_v18 }
 0x183   : > { %v2726_v41 = vmul.f32 -1.442695, %v1464_v11  ;;  %v1485_v53 = vadd.f32 %v2853_v46, %v1196_v31  ;;  %3231 = vrcp.f32 %v1842_v45  ;;  %v1840_v54 = vadd.f32 1.0, %v3206_v3  ;;  %v1205_v43 = vpop.f32.mrf.mxu0 }
 0x184   : > { %v1476_v58 = vpop.f32.mrf.mxu1  ;;  %v3208_v15 = vpop.eup %3207  ;;  %3233 = vpow2.f32 %v2728_v37 }
 0x185   : > { %v2731_v62 = vmul.f32 -1.442695, %v1485_v53  ;;  %v1477_v35 = vadd.f32 %v1476_v58, %v1188_v50  ;;  %v3210_v10 = vpop.eup %3209  ;;  %2029 = vst [vmem:[%s3893_s26 + $0x50] sm:$0xff] %v3208_v15  ;;  %3235 = vrcp.f32 %v1840_v54  ;;  %v1206_v7 = vpop.f32.mrf.mxu0 }
 0x186   : > { %v2854_v5 = vpop.f32.mrf.mxu1  ;;  %v3212_v19 = vpop.eup %3211  ;;  %v1845_v6 = vadd.f32 1.0, %v3210_v10  ;;  %3237 = vpow2.f32 %v2726_v41  ;;  %v1207_v46 = vadd.f32 %v3839_v49, %v1206_v7 }
 0x187   : > { %v2729_v13 = vmul.f32 -1.442695, %v1477_v35  ;;  %v3214_v14 = vpop.eup %3213  ;;  %2027 = vst [vmem:[%s3893_s26 + $0x40] sm:$0xff] %v3212_v19  ;;  %3239 = vpow2.f32 %v2731_v62  ;;  %v1488_v38 = vadd.f32 %v2854_v5, %v1199_v2  ;;  %v1208_v59 = vpop.f32.mrf.mxu0 }
 0x188   : > { %v1479_v47 = vpop.f32.mrf.mxu1  ;;  %v3216_v27 = vpop.eup %3215  ;;  %3241 = vrcp.f32 %v1845_v6  ;;  %v1843_v17 = vadd.f32 1.0, %v3214_v14 }
 0x189   : > { %v1480_v21 = vadd.f32 %v1479_v47, %v1191_v9  ;;  %v3218_v39 = vpop.eup %3217  ;;  %2030 = vst [vmem:[%s3893_s26 + $0x58] sm:$0xff] %v3216_v27  ;;  %3243 = vpow2.f32 %v2729_v13  ;;  %v2732_v61 = vmul.f32 -1.442695, %v1488_v38  ;;  %v1211_v23 = vpop.f32.mrf.mxu0 }
 0x18a   : > { %v2857_v22 = vpop.f32.mrf.mxu1  ;;  %v3220_v25 = vpop.eup %3219  ;;  %3245 = vrcp.f32 %v1843_v17  ;;  %v1846_v63 = vadd.f32 1.0, %v3218_v39  ;;  %v1212_v30 = vadd.f32 %v3839_v49, %v1211_v23 }
 0x18b   : > { %v2730_v29 = vmul.f32 -1.442695, %v1480_v21  ;;  %v3222_v33 = vpop.eup %3221  ;;  %2028 = vst [vmem:[%s3893_s26 + $0x48] sm:$0xff] %v3220_v25  ;;  %3247 = vpow2.f32 %v2732_v61  ;;  %v1213_v55 = vpop.f32.mrf.mxu0 }
 0x18c   : > { %v1492_v1 = vpop.f32.mrf.mxu1  ;;  %v3224_v26 = vpop.eup %3223  ;;  %3249 = vrcp.f32 %v1846_v63  ;;  %v1844_v34 = vadd.f32 1.0, %v3222_v33  ;;  %v1501_v57 = vadd.f32 %v2857_v22, %v1212_v30 }
 0x18d   : > { %v1493_v31 = vadd.f32 %v1492_v1, %v1204_v51  ;;  %v3226_v37 = vpop.eup %3225  ;;  %2033 = vst [vmem:[%s3893_s26 + $0x70] sm:$0xff] %v3224_v26  ;;  %3251 = vpow2.f32 %v2730_v29  ;;  %v1214_v11 = vpop.f32.mrf.mxu0 }
 0x18e   : > { %v2858_v42 = vpop.f32.mrf.mxu1  ;;  %v3228_v45 = vpop.eup %3227  ;;  %3253 = vrcp.f32 %v1844_v34  ;;  %v1849_v18 = vadd.f32 1.0, %v3226_v37  ;;  %v2735_v3 = vmul.f32 -1.442695, %v1501_v57  ;;  %v1215_v53 = vadd.f32 %v3839_v49, %v1214_v11 }
 0x18f   : > { %v3230_v50 = vpop.eup %3229  ;;  %2031 = vst [vmem:[%s3893_s26 + $0x60] sm:$0xff] %v3228_v45  ;;  %v2733_v41 = vmul.f32 -1.442695, %v1493_v31  ;;  %v1216_v54 = vpop.f32.mrf.mxu0 }
 0x190   : > { %v1495_v43 = vpop.f32.mrf.mxu1  ;;  %v3232_v58 = vpop.eup %3231  ;;  %3255 = vrcp.f32 %v1849_v18  ;;  %v1847_v15 = vadd.f32 1.0, %v3230_v50  ;;  %v1504_v10 = vadd.f32 %v2858_v42, %v1215_v53 }
 0x191   : > { %v1496_v62 = vadd.f32 %v1495_v43, %v1207_v46  ;;  %v3234_v35 = vpop.eup %3233  ;;  %2034 = vst [vmem:[%s3893_s26 + $0x78] sm:$0xff] %v3232_v58  ;;  %3257 = vpow2.f32 %v2735_v3  ;;  %v1219_v2 = vpop.f32.mrf.mxu0 }
 0x192   : > { %v2861_v5 = vpop.f32.mrf.mxu1  ;;  %v3236_v7 = vpop.eup %3235  ;;  %3259 = vrcp.f32 %v1847_v15  ;;  %v1850_v19 = vadd.f32 1.0, %v3234_v35  ;;  %v1220_v6 = vadd.f32 %v3839_v49, %v1219_v2  ;;  %v2736_v13 = vmul.f32 -1.442695, %v1504_v10 }
 0x193   : > { %v3238_v9 = vpop.eup %3237  ;;  %2032 = vst [vmem:[%s3893_s26 + $0x68] sm:$0xff] %v3236_v7  ;;  %3261 = vpow2.f32 %v2733_v41  ;;  %v1221_v14 = vpop.f32.mrf.mxu0  ;;  %v2734_v27 = vmul.f32 -1.442695, %v1496_v62 }
 0x194   : > { %v1508_v38 = vpop.f32.mrf.mxu1  ;;  %v3240_v59 = vpop.eup %3239  ;;  %3263 = vrcp.f32 %v1850_v19  ;;  %v1848_v47 = vadd.f32 1.0, %v3238_v9 }
 0x195   : > { %v1509_v17 = vadd.f32 %v1508_v38, %v1220_v6  ;;  %v3242_v21 = vpop.eup %3241  ;;  %v1853_v39 = vadd.f32 1.0, %v3240_v59  ;;  %3265 = vpow2.f32 %v2736_v13  ;;  %v1222_v51 = vpop.f32.mrf.mxu0 }
 0x196   : > { %v2862_v61 = vpop.f32.mrf.mxu1  ;;  %v3244_v23 = vpop.eup %3243  ;;  %2037 = vst [vmem:[%s3893_s26 + $0x90] sm:$0xff] %v3242_v21  ;;  %3267 = vrcp.f32 %v1848_v47  ;;  %v1223_v25 = vadd.f32 %v3839_v49, %v1222_v51 }
 0x197   : > { %v2737_v22 = vmul.f32 -1.442695, %v1509_v17  ;;  %v3246_v63 = vpop.eup %3245  ;;  %3269 = vrcp.f32 %v1853_v39  ;;  %v1851_v29 = vadd.f32 1.0, %v3244_v23  ;;  %v1224_v30 = vpop.f32.mrf.mxu0 }
 0x198   : > { %v1511_v33 = vpop.f32.mrf.mxu1  ;;  %v3248_v55 = vpop.eup %3247  ;;  %2035 = vst [vmem:[%s3893_s26 + $0x80] sm:$0xff] %v3246_v63  ;;  %3271 = vpow2.f32 %v2734_v27 }
 0x199   : > { %v1512_v1 = vadd.f32 %v1511_v33, %v1223_v25  ;;  %v3250_v26 = vpop.eup %3249  ;;  %3273 = vrcp.f32 %v1851_v29  ;;  %v1854_v34 = vadd.f32 1.0, %v3248_v55  ;;  %v1227_v57 = vpop.f32.mrf.mxu0 }
 0x19a   : > { %v3939_v31 = vpop.f32.mrf.mxu1  ;;  %v3252_v37 = vpop.eup %3251  ;;  %2038 = vst [vmem:[%s3893_s26 + $0x98] sm:$0xff] %v3250_v26  ;;  %3275 = vpow2.f32 %v2737_v22  ;;  %v1228_v42 = vadd.f32 %v3839_v49, %v1227_v57 }
 0x19b   : > { %v2738_v11 = vmul.f32 -1.442695, %v1512_v1  ;;  %v3254_v45 = vpop.eup %3253  ;;  %3277 = vrcp.f32 %v1854_v34  ;;  %v1852_v18 = vadd.f32 1.0, %v3252_v37  ;;  %v1229_v46 = vpop.f32.mrf.mxu0 }
 0x19c   : > { %v1524_v3 = vpop.f32.mrf.mxu1  ;;  %2036 = vst [vmem:[%s3893_s26 + $0x88] sm:$0xff] %v3254_v45  ;;  %v1517_v50 = vadd.f32 %v2861_v5, %v1228_v42 }
 0x19d   : > { %3279 = vpow2.f32 %v2738_v11  ;;  %v3256_v41 = vpop.eup %3255  ;;  %v1230_v53 = vpop.f32.mrf.mxu0 }
 0x19e   : > { %3281 = vrcp.f32 %v1852_v18  ;;  %v3944_v54 = vpop.f32.mrf.mxu1  ;;  %v3258_v43 = vpop.eup %3257  ;;  %2041 = vst [vmem:[%s3893_s26 + $0xb0] sm:$0xff] %v3256_v41  ;;  %v2739_v58 = vmul.f32 -1.442695, %v1517_v50  ;;  %v1231_v15 = vadd.f32 %v3839_v49, %v1230_v53 }
 0x19f   : > { %v3260_v62 = vpop.eup %3259  ;;  %v1857_v35 = vadd.f32 1.0, %v3258_v43  ;;  %v1232_v10 = vpop.f32.mrf.mxu0 }
 0x1a0   : > { %v1527_v2 = vpop.f32.mrf.mxu1  ;;  %v3262_v7 = vpop.eup %3261  ;;  %2039 = vst [vmem:[%s3893_s26 + $0xa0] sm:$0xff] %v3260_v62  ;;  %3283 = vpow2.f32 %v2739_v58  ;;  %v1520_v19 = vadd.f32 %v2862_v61, %v1231_v15 }
 0x1a1   : > { %v3264_v5 = vpop.eup %3263  ;;  %3285 = vrcp.f32 %v1857_v35  ;;  %v1855_v6 = vadd.f32 1.0, %v3262_v7  ;;  %v1235_v9 = vpop.f32.mrf.mxu0 }
 0x1a2   : > { %v3949_v13 = vpop.f32.mrf.mxu1  ;;  %v3266_v14 = vpop.eup %3265  ;;  %2042 = vst [vmem:[%s3893_s26 + $0xb8] sm:$0xff] %v3264_v5  ;;  %v2740_v38 = vmul.f32 -1.442695, %v1520_v19  ;;  %v1236_v59 = vadd.f32 %v3839_v49, %v1235_v9 }
 0x1a3   : > { %v3268_v47 = vpop.eup %3267  ;;  %3287 = vrcp.f32 %v1855_v6  ;;  %v1858_v27 = vadd.f32 1.0, %v3266_v14  ;;  %v1237_v17 = vpop.f32.mrf.mxu0  ;;  %v1284_v14 = vadd.f32 %v3839_v49, %v3780_v52 }
 0x1a4   : > { %v3953_v21 = vpop.f32.mrf.mxu1  ;;  %v3270_v39 = vpop.eup %3269  ;;  %2040 = vst [vmem:[%s3893_s26 + $0xa8] sm:$0xff] %v3268_v47  ;;  %3289 = vpow2.f32 %v2740_v38  ;;  %v1525_v51 = vadd.f32 %v1524_v3, %v1236_v59 }
 0x1a5   : > { %v3272_v61 = vpop.eup %3271  ;;  %2045 = vst [vmem:[%s3893_s26 + $0xd0] sm:$0xff] %v3270_v39  ;;  %3291 = vrcp.f32 %v1858_v27  ;;  %v1238_v23 = vpop.f32.mrf.mxu0 }
 0x1a6   : > { %v3957_v22 = vpop.f32.mrf.mxu1  ;;  %v3274_v25 = vpop.eup %3273  ;;  %v1856_v63 = vadd.f32 1.0, %v3272_v61  ;;  %v2741_v29 = vmul.f32 -1.442695, %v1525_v51  ;;  %v1239_v30 = vadd.f32 %v3839_v49, %v1238_v23 }
 0x1a7   : > { %v3276_v33 = vpop.eup %3275  ;;  %2043 = vst [vmem:[%s3893_s26 + $0xc0] sm:$0xff] %v3274_v25  ;;  %v1240_v55 = vpop.f32.mrf.mxu0 }
 0x1a8   : > { %v3961_v1 = vpop.f32.mrf.mxu1  ;;  %v3278_v26 = vpop.eup %3277  ;;  %3293 = vrcp.f32 %v1856_v63  ;;  %v1859_v34 = vadd.f32 1.0, %v3276_v33  ;;  %v1528_v57 = vadd.f32 %v1527_v2, %v1239_v30  ;;  %v1287_v63 = vadd.f32 %v3839_v49, %v3784_v56 }
 0x1a9   : > { %2046 = vst [vmem:[%s3893_s26 + $0xd8] sm:$0xff] %v3278_v26  ;;  %3295 = vpow2.f32 %v2741_v29  ;;  %v1243_v11 = vpop.f32.mrf.mxu0  ;;  %v1295_v29 = vadd.f32 %v3839_v49, %v3788_v0 }
 0x1aa   : > { %v3280_v37 = vpop.eup %3279  ;;  %v3964_v42 = vpop.f32.mrf.mxu1  ;;  %3297 = vrcp.f32 %v1859_v34  ;;  %v2742_v46 = vmul.f32 -1.442695, %v1528_v57  ;;  %v1244_v3 = vadd.f32 %v3839_v49, %v1243_v11 }
 0x1ab   : > { %v3282_v45 = vpop.eup %3281  ;;  %v1860_v18 = vadd.f32 1.0, %v3280_v37  ;;  %v1245_v50 = vpop.f32.mrf.mxu0 }
 0x1ac   : > { %2044 = vst [vmem:[%s3893_s26 + $0xc8] sm:$0xff] %v3282_v45  ;;  %v3968_v41 = vpop.f32.mrf.mxu1  ;;  %v1533_v53 = vadd.f32 %v3939_v31, %v1244_v3  ;;  %v1292_v31 = vadd.f32 %v3839_v49, %v3786_v60  ;;  %v1300_v3 = vadd.f32 %v3839_v49, %v3792_v4  ;;  %v1308_v50 = vadd.f32 %v3839_v49, %v3798_v12 }
 0x1ad   : > { %3299 = vrcp.f32 %v1860_v18  ;;  %v3284_v43 = vpop.eup %3283  ;;  %v1246_v58 = vpop.f32.mrf.mxu0 }
 0x1ae   : > { %3301 = vpow2.f32 %v2742_v46  ;;  %v3971_v15 = vpop.f32.mrf.mxu1  ;;  %v3286_v62 = vpop.eup %3285  ;;  %v1861_v35 = vadd.f32 1.0, %v3284_v43  ;;  %v2743_v10 = vmul.f32 -1.442695, %v1533_v53  ;;  %v1247_v2 = vadd.f32 %v3839_v49, %v1246_v58 }
 0x1af   : > { %2049 = vst [vmem:[%s3893_s26 + $0xf0] sm:$0xff] %v3286_v62  ;;  %v1248_v7 = vpop.f32.mrf.mxu0 }
 0x1b0   : > { %v3975_v19 = vpop.f32.mrf.mxu1  ;;  %v3288_v5 = vpop.eup %3287  ;;  %3303 = vrcp.f32 %v1861_v35  ;;  %v1536_v6 = vadd.f32 %v3944_v54, %v1247_v2 }
 0x1b1   : > { %v3290_v9 = vpop.eup %3289  ;;  %2047 = vst [vmem:[%s3893_s26 + $0xe0] sm:$0xff] %v3288_v5  ;;  %3305 = vpow2.f32 %v2743_v10  ;;  %v1251_v38 = vpop.f32.mrf.mxu0 }
 0x1b2   : > { %v2877_v59 = vpop.f32.mrf.mxu1  ;;  %v3292_v47 = vpop.eup %3291  ;;  %v1862_v27 = vadd.f32 1.0, %v3290_v9  ;;  %v2744_v17 = vmul.f32 -1.442695, %v1536_v6  ;;  %v1252_v39 = vadd.f32 %v3839_v49, %v1251_v38  ;;  %v1303_v9 = vadd.f32 %v3839_v49, %v3796_v8 }
 0x1b3   : > { %v1581_v51 = vadd.f32 %v2877_v59, %v1292_v31  ;;  %2050 = vst [vmem:[%s3893_s26 + $0xf8] sm:$0xff] %v3292_v47  ;;  %v1253_v60 = vpop.f32.mrf.mxu0 }
 0x1b4   : > { %v1572_v61 = vpop.f32.mrf.mxu1  ;;  %3307 = vrcp.f32 %v1862_v27  ;;  %v1541_v54 = vadd.f32 %v3953_v21, %v1252_v39 }
 0x1b5   : > { %v2755_v23 = vmul.f32 -1.442695, %v1581_v51  ;;  %v1573_v25 = vadd.f32 %v1572_v61, %v1284_v14  ;;  %v3294_v52 = vpop.eup %3293  ;;  %3309 = vpow2.f32 %v2744_v17  ;;  %v1254_v30 = vpop.f32.mrf.mxu0  ;;  %v1311_v14 = vadd.f32 %v3839_v49, %v3802_v16 }
 0x1b6   : > { %v2878_v33 = vpop.f32.mrf.mxu1  ;;  %v3296_v55 = vpop.eup %3295  ;;  %2048 = vst [vmem:[%s3893_s26 + $0xe8] sm:$0xff] %v3294_v52  ;;  %v2745_v26 = vmul.f32 -1.442695, %v1541_v54  ;;  %v1255_v21 = vadd.f32 %v3839_v49, %v1254_v30 }
 0x1b7   : > { %3311 = vpow2.f32 %v2755_v23  ;;  %v2753_v34 = vmul.f32 -1.442695, %v1573_v25  ;;  %v3298_v57 = vpop.eup %3297  ;;  %v1863_v37 = vadd.f32 1.0, %v3296_v55  ;;  %v1584_v11 = vadd.f32 %v2878_v33, %v1295_v29  ;;  %v1256_v45 = vpop.f32.mrf.mxu0 }
 0x1b8   : > { %v1575_v56 = vpop.f32.mrf.mxu1  ;;  %2051 = vst [vmem:[%s3893_s26 + $0x100] sm:$0xff] %v3298_v57  ;;  %3313 = vpow2.f32 %v2745_v26  ;;  %v1544_v0 = vadd.f32 %v3961_v1, %v1255_v21 }
 0x1b9   : > { %v1576_v18 = vadd.f32 %v1575_v56, %v1287_v63  ;;  %3315 = vrcp.f32 %v1863_v37  ;;  %v2756_v53 = vmul.f32 -1.442695, %v1584_v11  ;;  %v1259_v43 = vpop.f32.mrf.mxu0 }
 0x1ba   : > { %v3300_v46 = vpop.eup %3299  ;;  %v2881_v58 = vpop.f32.mrf.mxu1  ;;  %3317 = vpow2.f32 %v2753_v34  ;;  %v2746_v35 = vmul.f32 -1.442695, %v1544_v0  ;;  %v1260_v2 = vadd.f32 %v3839_v49, %v1259_v43 }
 0x1bb   : > { %v3302_v62 = vpop.eup %3301  ;;  %2052 = vst [vmem:[%s3893_s26 + $0x108] sm:$0xff] %v3300_v46  ;;  %v2754_v10 = vmul.f32 -1.442695, %v1576_v18  ;;  %3319 = vpow2.f32 %v2756_v53  ;;  %v1597_v7 = vadd.f32 %v2881_v58, %v1308_v50  ;;  %v1261_v5 = vpop.f32.mrf.mxu0 }
 0x1bc   : > { %v1864_v1 = vadd.f32 1.0, %v3302_v62  ;;  %v1588_v4 = vpop.f32.mrf.mxu1  ;;  %3321 = vpow2.f32 %v2746_v35  ;;  %v1549_v12 = vadd.f32 %v3949_v13, %v1260_v2 }
 0x1bd   : > { %v1589_v31 = vadd.f32 %v1588_v4, %v1300_v3  ;;  %v3304_v6 = vpop.eup %3303  ;;  %v2759_v38 = vmul.f32 -1.442695, %v1597_v7  ;;  %v1262_v59 = vpop.f32.mrf.mxu0 }
 0x1be   : > { %3323 = vrcp.f32 %v1864_v1  ;;  %v2882_v47 = vpop.f32.mrf.mxu1  ;;  %v3306_v27 = vpop.eup %3305  ;;  %2053 = vst [vmem:[%s3893_s26 + $0x110] sm:$0xff] %v3304_v6  ;;  %v2747_v17 = vmul.f32 -1.442695, %v1549_v12  ;;  %v1263_v13 = vadd.f32 %v3839_v49, %v1262_v59  ;;  %v4012_v49 = vld [vmem:[%s4274_s2] ss:$0 sm:$0xff] }
 0x1bf   : > { %3325 = vpow2.f32 %v2754_v10  ;;  %v2757_v39 = vmul.f32 -1.442695, %v1589_v31  ;;  %v1865_v51 = vadd.f32 1.0, %v3306_v27  ;;  %v1600_v60 = vadd.f32 %v2882_v47, %v1311_v14  ;;  %v1264_v61 = vpop.f32.mrf.mxu0 }
 0x1c0   : > { %3327 = vpow2.f32 %v2759_v38  ;;  %v1591_v8 = vpop.f32.mrf.mxu1  ;;  %v1552_v16 = vadd.f32 %v3957_v22, %v1263_v13  ;;  %v1324_v22 = vadd.f32 %v4012_v49, %v3814_v28  ;;  %v1316_v3 = vadd.f32 %v4012_v49, %v3806_v20 }
 0x1c1   : > { %3329 = vpow2.f32 %v2747_v17  ;;  %v1592_v54 = vadd.f32 %v1591_v8, %v1303_v9  ;;  %v3308_v23 = vpop.eup %3307  ;;  %v2760_v25 = vmul.f32 -1.442695, %v1600_v60  ;;  %v1267_v52 = vpop.f32.mrf.mxu0  ;;  %v1327_v6 = vadd.f32 %v4012_v49, %v3818_v32 }
 0x1c2   : > { %3331 = vrcp.f32 %v1865_v51  ;;  %v2885_v63 = vpop.f32.mrf.mxu1  ;;  %v3310_v29 = vpop.eup %3309  ;;  %2054 = vst [vmem:[%s3893_s26 + $0x118] sm:$0xff] %v3308_v23  ;;  %v2748_v30 = vmul.f32 -1.442695, %v1552_v16  ;;  %v1268_v33 = vadd.f32 %v4012_v49, %v1267_v52  ;;  %v1319_v32 = vadd.f32 %v4012_v49, %v3810_v24 }
 0x1c3   : > { %3333 = vpow2.f32 %v2757_v39  ;;  %v1866_v26 = vadd.f32 1.0, %v3310_v29  ;;  %v2758_v34 = vmul.f32 -1.442695, %v1592_v54  ;;  %v1269_v21 = vpop.f32.mrf.mxu0  ;;  %v1613_v56 = vadd.f32 %v2885_v63, %v1324_v22 }
 0x1c4   : > { %v3312_v55 = vpop.eup %3311  ;;  %3335 = vpow2.f32 %v2760_v25  ;;  %v1604_v57 = vpop.f32.mrf.mxu1  ;;  %v1557_v11 = vadd.f32 %v3968_v41, %v1268_v33  ;;  %v1332_v54 = vadd.f32 %v4012_v49, %v3822_v36 }
 0x1c5   : > { %v1877_v37 = vadd.f32 1.0, %v3312_v55  ;;  %3337 = vpow2.f32 %v2748_v30  ;;  %v3314_v45 = vpop.eup %3313  ;;  %v1270_v0 = vpop.f32.mrf.mxu0  ;;  %v1605_v35 = vadd.f32 %v1604_v57, %v1316_v3  ;;  %v2763_v1 = vmul.f32 -1.442695, %v1613_v56 }
 0x1c6   : > { %3339 = vrcp.f32 %v1866_v26  ;;  %v2886_v18 = vpop.f32.mrf.mxu1  ;;  %v3316_v46 = vpop.eup %3315  ;;  %v1867_v28 = vadd.f32 1.0, %v3314_v45  ;;  %v2749_v50 = vmul.f32 -1.442695, %v1557_v11  ;;  %v1271_v7 = vadd.f32 %v4012_v49, %v1270_v0 }
 0x1c7   : > { %3341 = vrcp.f32 %v1877_v37  ;;  %v3318_v53 = vpop.eup %3317  ;;  %2055 = vst [vmem:[%s3893_s26 + $0x120] sm:$0xff] %v3316_v46  ;;  %v1272_v43 = vpop.f32.mrf.mxu0  ;;  %v2761_v59 = vmul.f32 -1.442695, %v1605_v35  ;;  %v1616_v39 = vadd.f32 %v2886_v18, %v1327_v6  ;;  %v1343_v56 = vadd.f32 %v4012_v49, %v3834_v48 }
 0x1c8   : > { %3343 = vpow2.f32 %v2758_v34  ;;  %v1607_v58 = vpop.f32.mrf.mxu1  ;;  %v3320_v62 = vpop.eup %3319  ;;  %v1875_v41 = vadd.f32 1.0, %v3318_v53  ;;  %v1560_v17 = vadd.f32 %v3975_v19, %v1271_v7  ;;  %v1340_v19 = vadd.f32 %v4012_v49, %v3830_v44 }
 0x1c9   : > { %3345 = vrcp.f32 %v1867_v28  ;;  %v3322_v10 = vpop.eup %3321  ;;  %v1878_v2 = vadd.f32 1.0, %v3320_v62  ;;  %v1275_v20 = vpop.f32.mrf.mxu0  ;;  %v1608_v63 = vadd.f32 %v1607_v58, %v1319_v32  ;;  %v2764_v33 = vmul.f32 -1.442695, %v1616_v39 }
 0x1ca   : > { %3347 = vpow2.f32 %v2749_v50  ;;  %v2889_v5 = vpop.f32.mrf.mxu1  ;;  %v1868_v12 = vadd.f32 1.0, %v3322_v10  ;;  %v1276_v8 = vadd.f32 %v4012_v49, %v1275_v20  ;;  %v2750_v30 = vmul.f32 -1.442695, %v1560_v17 }
 0x1cb   : > { %v3324_v4 = vpop.eup %3323  ;;  %3349 = vrcp.f32 %v1875_v41  ;;  %v1277_v9 = vpop.f32.mrf.mxu0  ;;  %v1629_v44 = vadd.f32 %v2889_v5, %v1340_v19  ;;  %v2762_v37 = vmul.f32 -1.442695, %v1608_v63  ;;  %v1335_v46 = vadd.f32 %v4012_v49, %v3826_v40 }
 0x1cc   : > { %v3326_v31 = vpop.eup %3325  ;;  %2056 = vst [vmem:[%s3893_s26 + $0x128] sm:$0xff] %v3324_v4  ;;  %3351 = vrcp.f32 %v1878_v2  ;;  %v1620_v13 = vpop.f32.mrf.mxu1  ;;  %v1565_v26 = vadd.f32 %v3964_v42, %v1276_v8 }
 0x1cd   : > { %v3328_v14 = vpop.eup %3327  ;;  %3353 = vrcp.f32 %v1868_v12  ;;  %v1876_v38 = vadd.f32 1.0, %v3326_v31  ;;  %v1278_v51 = vpop.f32.mrf.mxu0  ;;  %v1621_v11 = vadd.f32 %v1620_v13, %v1332_v54  ;;  %v2767_v43 = vmul.f32 -1.442695, %v1629_v44 }
 0x1ce   : > { %v3330_v47 = vpop.eup %3329  ;;  %v1881_v27 = vadd.f32 1.0, %v3328_v14  ;;  %3355 = vpow2.f32 %v2763_v1  ;;  %v2890_v55 = vpop.f32.mrf.mxu1  ;;  %v1279_v34 = vadd.f32 %v4012_v49, %v1278_v51  ;;  %v2751_v3 = vmul.f32 -1.442695, %v1565_v26 }
 0x1cf   : > { %v3332_v60 = vpop.eup %3331  ;;  %3357 = vrcp.f32 %v1876_v38  ;;  %v1869_v61 = vadd.f32 1.0, %v3330_v47  ;;  %v1280_v23 = vpop.f32.mrf.mxu0  ;;  %v1632_v48 = vadd.f32 %v2890_v55, %v1343_v56  ;;  %v2765_v62 = vmul.f32 -1.442695, %v1621_v11 }
 0x1d0   : > { %v3334_v16 = vpop.eup %3333  ;;  %2057 = vst [vmem:[%s3893_s26 + $0x130] sm:$0xff] %v3332_v60  ;;  %3359 = vrcp.f32 %v1881_v27  ;;  %v1623_v42 = vpop.f32.mrf.mxu1  ;;  %v1568_v28 = vadd.f32 %v3971_v15, %v1279_v34 }
 0x1d1   : > { %v3336_v25 = vpop.eup %3335  ;;  %3361 = vrcp.f32 %v1869_v61  ;;  %v1879_v52 = vadd.f32 1.0, %v3334_v16  ;;  %v1624_v41 = vadd.f32 %v1623_v42, %v1335_v46  ;;  %v2768_v2 = vmul.f32 -1.442695, %v1632_v48 }
 0x1d2   : > { %v3338_v24 = vpop.eup %3337  ;;  %v1882_v29 = vadd.f32 1.0, %v3336_v25  ;;  %3363 = vpow2.f32 %v2761_v59  ;;  %v2752_v15 = vmul.f32 -1.442695, %v1568_v28 }
 0x1d3   : > { %v3340_v22 = vpop.eup %3339  ;;  %3365 = vrcp.f32 %v1879_v52  ;;  %v1870_v36 = vadd.f32 1.0, %v3338_v24  ;;  %v2766_v7 = vmul.f32 -1.442695, %v1624_v41 }
 0x1d4   : > { %v3342_v21 = vpop.eup %3341  ;;  %2058 = vst [vmem:[%s3893_s26 + $0x138] sm:$0xff] %v3340_v22  ;;  %3367 = vrcp.f32 %v1882_v29 }
 0x1d5   : > { %v3344_v57 = vpop.eup %3343  ;;  %2069 = vst [vmem:[%s3893_s26 + $0x190] sm:$0xff] %v3342_v21  ;;  %3369 = vrcp.f32 %v1870_v36 }
 0x1d6   : > { %v3346_v45 = vpop.eup %3345  ;;  %v1880_v0 = vadd.f32 1.0, %v3344_v57  ;;  %3371 = vpow2.f32 %v2750_v30 }
 0x1d7   : > { %v3348_v18 = vpop.eup %3347  ;;  %2059 = vst [vmem:[%s3893_s26 + $0x140] sm:$0xff] %v3346_v45  ;;  %3373 = vpow2.f32 %v2764_v33 }
 0x1d8   : > { %v3350_v50 = vpop.eup %3349  ;;  %3375 = vrcp.f32 %v1880_v0  ;;  %v1871_v53 = vadd.f32 1.0, %v3348_v18 }
 0x1d9   : > { %v3352_v58 = vpop.eup %3351  ;;  %2067 = vst [vmem:[%s3893_s26 + $0x180] sm:$0xff] %v3350_v50  ;;  %3377 = vpow2.f32 %v2762_v37 }
 0x1da   : > { %v3354_v35 = vpop.eup %3353  ;;  %2070 = vst [vmem:[%s3893_s26 + $0x198] sm:$0xff] %v3352_v58  ;;  %3379 = vrcp.f32 %v1871_v53 }
 0x1db   : > { %v3356_v40 = vpop.eup %3355  ;;  %2060 = vst [vmem:[%s3893_s26 + $0x148] sm:$0xff] %v3354_v35  ;;  %3381 = vpow2.f32 %v2751_v3 }
 0x1dc   : > { %v3358_v49 = vpop.eup %3357  ;;  %v1885_v10 = vadd.f32 1.0, %v3356_v40  ;;  %3383 = vpow2.f32 %v2767_v43 }
 0x1dd   : > { %v3360_v1 = vpop.eup %3359  ;;  %2068 = vst [vmem:[%s3893_s26 + $0x188] sm:$0xff] %v3358_v49  ;;  %3385 = vpow2.f32 %v2765_v62 }
 0x1de   : > { %v3362_v20 = vpop.eup %3361  ;;  %2073 = vst [vmem:[%s3893_s26 + $0x1b0] sm:$0xff] %v3360_v1  ;;  %3387 = vrcp.f32 %v1885_v10 }
 0x1df   : > { %v3364_v5 = vpop.eup %3363  ;;  %2061 = vst [vmem:[%s3893_s26 + $0x150] sm:$0xff] %v3362_v20  ;;  %3389 = vpow2.f32 %v2752_v15 }
 0x1e0   : > { %v3366_v4 = vpop.eup %3365  ;;  %v1883_v12 = vadd.f32 1.0, %v3364_v5  ;;  %3391 = vpow2.f32 %v2768_v2 }
 0x1e1   : > { %v3368_v31 = vpop.eup %3367  ;;  %2071 = vst [vmem:[%s3893_s26 + $0x1a0] sm:$0xff] %v3366_v4  ;;  %3393 = vpow2.f32 %v2766_v7 }
 0x1e2   : > { %v3370_v6 = vpop.eup %3369  ;;  %2074 = vst [vmem:[%s3893_s26 + $0x1b8] sm:$0xff] %v3368_v31  ;;  %3395 = vrcp.f32 %v1883_v12 }
 0x1e3   : > { %v3372_v9 = vpop.eup %3371  ;;  %2062 = vst [vmem:[%s3893_s26 + $0x158] sm:$0xff] %v3370_v6 }
 0x1e4   : > { %v3374_v14 = vpop.eup %3373  ;;  %v1872_v38 = vadd.f32 1.0, %v3372_v9 }
 0x1e5   : > { %v3376_v59 = vpop.eup %3375  ;;  %v1886_v47 = vadd.f32 1.0, %v3374_v14 }
 0x1e6   : > { %v3378_v27 = vpop.eup %3377  ;;  %2072 = vst [vmem:[%s3893_s26 + $0x1a8] sm:$0xff] %v3376_v59  ;;  %3397 = vrcp.f32 %v1872_v38 }
 0x1e7   : > { %v3380_v17 = vpop.eup %3379  ;;  %3399 = vrcp.f32 %v1886_v47  ;;  %v1884_v39 = vadd.f32 1.0, %v3378_v27 }
 0x1e8   : > { %v3382_v13 = vpop.eup %3381  ;;  %2063 = vst [vmem:[%s3893_s26 + $0x160] sm:$0xff] %v3380_v17 }
 0x1e9   : > { %v3384_v51 = vpop.eup %3383  ;;  %3401 = vrcp.f32 %v1884_v39  ;;  %v1873_v60 = vadd.f32 1.0, %v3382_v13 }
 0x1ea   : > { %v3386_v32 = vpop.eup %3385  ;;  %v1889_v61 = vadd.f32 1.0, %v3384_v51 }
 0x1eb   : > { %v3388_v8 = vpop.eup %3387  ;;  %3403 = vrcp.f32 %v1873_v60  ;;  %v1887_v16 = vadd.f32 1.0, %v3386_v32 }
 0x1ec   : > { %v3390_v54 = vpop.eup %3389  ;;  %2077 = vst [vmem:[%s3893_s26 + $0x1d0] sm:$0xff] %v3388_v8  ;;  %3405 = vrcp.f32 %v1889_v61 }
 0x1ed   : > { %v3392_v23 = vpop.eup %3391  ;;  %3407 = vrcp.f32 %v1887_v16  ;;  %v1874_v25 = vadd.f32 1.0, %v3390_v54 }
 0x1ee   : > { %v3394_v19 = vpop.eup %3393  ;;  %v1890_v52 = vadd.f32 1.0, %v3392_v23 }
 0x1ef   : > { %v3396_v63 = vpop.eup %3395  ;;  %3409 = vrcp.f32 %v1874_v25  ;;  %v1888_v24 = vadd.f32 1.0, %v3394_v19 }
 0x1f0   : > { %2075 = vst [vmem:[%s3893_s26 + $0x1c0] sm:$0xff] %v3396_v63  ;;  %3411 = vrcp.f32 %v1890_v52 }
 0x1f1   : > { %3413 = vrcp.f32 %v1888_v24 }
 0x1f3   : > { %v3398_v29 = vpop.eup %3397 }
 0x1f4   : > { %v3400_v30 = vpop.eup %3399  ;;  %2064 = vst [vmem:[%s3893_s26 + $0x168] sm:$0xff] %v3398_v29 }
 0x1f5   : > { %2078 = vst [vmem:[%s3893_s26 + $0x1d8] sm:$0xff] %v3400_v30 }
 0x1f6   : > { %v3402_v33 = vpop.eup %3401 }
 0x1f7   : > { %2076 = vst [vmem:[%s3893_s26 + $0x1c8] sm:$0xff] %v3402_v33 }
 0x1f8   : > { %v3404_v55 = vpop.eup %3403 }
 0x1f9   : > { %v3406_v22 = vpop.eup %3405  ;;  %2065 = vst [vmem:[%s3893_s26 + $0x170] sm:$0xff] %v3404_v55 }
 0x1fa   : > { %v3408_v36 = vpop.eup %3407  ;;  %2081 = vst [vmem:[%s3893_s26 + $0x1f0] sm:$0xff] %v3406_v22 }
 0x1fb   : > { %2079 = vst [vmem:[%s3893_s26 + $0x1e0] sm:$0xff] %v3408_v36  ;;  %2089 = sbr.rel (!%p3550_p4) target bundleno = 576 (0x240), region = 36 }
 0x1fc   : > { %v3410_v26 = vpop.eup %3409 }
 0x1fd   : > { %v3412_v34 = vpop.eup %3411  ;;  %2066 = vst [vmem:[%s3893_s26 + $0x178] sm:$0xff] %v3410_v26 }
 0x1fe   : > { %v3414_v21 = vpop.eup %3413  ;;  %2082 = vst [vmem:[%s3893_s26 + $0x1f8] sm:$0xff] %v3412_v34 }
 0x1ff   : > { %2080 = vst [vmem:[%s3893_s26 + $0x1e8] sm:$0xff] %v3414_v21 }
 0x200   : > { %s4286_s29 = smov (!%p2092_p8, %s2091_s29), 64 }
 0x201   : > { %s2771_s7 = sshll.u32 %s4286_s29, 7 }
 0x202   : > { %p2774_p9 = scmp.eq.s32.totalorder %s2771_s7, 0 }
 0x203   : > { %s4079_s8 = sshrl.u32 (!%p2774_p9), %s4286_s29, 6 }
 0x204   : > { %2100 = sbr.rel (%p2774_p9) target bundleno = 576 (0x240), region = 40  ;;  %p2775_p10 = scmp.le.s32.totalorder (!%p2774_p9), %s4079_s8, 0 }
 0x209   : > { %2507 = sbr.rel (%p2775_p10) target bundleno = 559 (0x22f), region = 116  ;;  %s4277_s15 = smov (!%p2775_p10), %s4073_s6 }
 0x20a   : > { %s4278_s20 = smov (!%p2775_p10), %s3893_s26  ;;  %s4088_s23 = smov (!%p2775_p10), 0  }
 0x20b   : > { %s4090_s10 = smov (!%p2775_p10), 0  }
 0x20e LB: >> { %v2289_v44 = vld [vmem:[%s3478_s20] sm:$0xff]  ;;  %v2291_v57 = vld [vmem:[%s3478_s20 + $0x8] sm:$0xff]  ;;  %v2293_v37 = vld [vmem:[%s3478_s20 + $0x10] sm:$0xff]  ;;  %s2417_s11 = sadd.s32 1, %s3482_s23  ;;  %s2283_s10 = sadd.s32 1, %s3486_s10   ;;  %s3486_s10 = sphi %s4090_s10, %s2283_s10   ;;  %s3482_s23 = sphi %s4088_s23, %s4281_s23   ;;  %s3478_s20 = sphi %s4278_s20, %s4280_s20   ;;  %s3474_s15 = sphi %s4277_s15, %s4279_s15  }
 0x20f   : >> { %2290 = vst [vmem:[%s3474_s15] sm:$0xff] %v2289_v44  ;;  %2292 = vst [vmem:[%s3474_s15 + $0x8] sm:$0xff] %v2291_v57  ;;  %v2295_v11 = vld [vmem:[%s3478_s20 + $0x18] sm:$0xff]  ;;  %v2297_v45 = vld [vmem:[%s3478_s20 + $0x20] sm:$0xff]  ;;  %p2418_p11 = scmp.ge.s32.totalorder %s2417_s11, %s4079_s8  ;;  %p2282_p12 = scmp.ge.s32.totalorder %s2283_s10, %s4079_s8 }
 0x210   : >> { %2294 = vst [vmem:[%s3474_s15 + $0x10] sm:$0xff] %v2293_v37  ;;  %v2299_v56 = vld [vmem:[%s3478_s20 + $0x28] sm:$0xff]  ;;  %2296 = vst [vmem:[%s3474_s15 + $0x18] sm:$0xff] %v2295_v11  ;;  %v2301_v0 = vld [vmem:[%s3478_s20 + $0x30] sm:$0xff] }
 0x211   : >> { %2298 = vst [vmem:[%s3474_s15 + $0x20] sm:$0xff] %v2297_v45  ;;  %2300 = vst [vmem:[%s3474_s15 + $0x28] sm:$0xff] %v2299_v56  ;;  %v2303_v42 = vld [vmem:[%s3478_s20 + $0x38] sm:$0xff]  ;;  %v2305_v18 = vld [vmem:[%s3478_s20 + $0x40] sm:$0xff]  ;;  %s4288_s11 = smov (%p2418_p11, %s2417_s11), 0 }
 0x212   : >> { %2302 = vst [vmem:[%s3474_s15 + $0x30] sm:$0xff] %v2301_v0  ;;  %2304 = vst [vmem:[%s3474_s15 + $0x38] sm:$0xff] %v2303_v42  ;;  %v2307_v46 = vld [vmem:[%s3478_s20 + $0x48] sm:$0xff]  ;;  %v2309_v3 = vld [vmem:[%s3478_s20 + $0x50] sm:$0xff]  ;;  %s2776_s14 = sshll.u32 %s4288_s11, 9  ;;  %s4281_s23 = smov %s4288_s11 }
 0x213   : >> { %2306 = vst [vmem:[%s3474_s15 + $0x40] sm:$0xff] %v2305_v18  ;;  %v2311_v28 = vld [vmem:[%s3478_s20 + $0x58] sm:$0xff]  ;;  %2308 = vst [vmem:[%s3474_s15 + $0x48] sm:$0xff] %v2307_v46  ;;  %v2313_v50 = vld [vmem:[%s3478_s20 + $0x60] sm:$0xff]  ;;  %s4146_s17 = scalar_lea.vmem %s3893_s26, %s2776_s14 [#allocation2]   ;;  %s4149_s18 = scalar_lea.vmem %s4073_s6, %s2776_s14  }
 0x214   : >> { %2310 = vst [vmem:[%s3474_s15 + $0x50] sm:$0xff] %v2309_v3  ;;  %2312 = vst [vmem:[%s3474_s15 + $0x58] sm:$0xff] %v2311_v28  ;;  %v2315_v53 = vld [vmem:[%s3478_s20 + $0x68] sm:$0xff]  ;;  %v2317_v43 = vld [vmem:[%s3478_s20 + $0x70] sm:$0xff] }
 0x215   : >> { %2314 = vst [vmem:[%s3474_s15 + $0x60] sm:$0xff] %v2313_v50  ;;  %2316 = vst [vmem:[%s3474_s15 + $0x68] sm:$0xff] %v2315_v53  ;;  %v2319_v48 = vld [vmem:[%s3478_s20 + $0x78] sm:$0xff]  ;;  %v2321_v58 = vld [vmem:[%s3478_s20 + $0x80] sm:$0xff] }
 0x216   : >> { %2318 = vst [vmem:[%s3474_s15 + $0x70] sm:$0xff] %v2317_v43  ;;  %v2323_v62 = vld [vmem:[%s3478_s20 + $0x88] sm:$0xff]  ;;  %2320 = vst [vmem:[%s3474_s15 + $0x78] sm:$0xff] %v2319_v48  ;;  %v2325_v41 = vld [vmem:[%s3478_s20 + $0x90] sm:$0xff] }
 0x217   : >> { %2322 = vst [vmem:[%s3474_s15 + $0x80] sm:$0xff] %v2321_v58  ;;  %2324 = vst [vmem:[%s3474_s15 + $0x88] sm:$0xff] %v2323_v62  ;;  %v2327_v35 = vld [vmem:[%s3478_s20 + $0x98] sm:$0xff]  ;;  %v2329_v40 = vld [vmem:[%s3478_s20 + $0xa0] sm:$0xff] }
 0x218   : >> { %2326 = vst [vmem:[%s3474_s15 + $0x90] sm:$0xff] %v2325_v41  ;;  %2328 = vst [vmem:[%s3474_s15 + $0x98] sm:$0xff] %v2327_v35  ;;  %v2331_v15 = vld [vmem:[%s3478_s20 + $0xa8] sm:$0xff]  ;;  %v2333_v49 = vld [vmem:[%s3478_s20 + $0xb0] sm:$0xff] }
 0x219   : >> { %2330 = vst [vmem:[%s3474_s15 + $0xa0] sm:$0xff] %v2329_v40  ;;  %v2335_v10 = vld [vmem:[%s3478_s20 + $0xb8] sm:$0xff]  ;;  %2332 = vst [vmem:[%s3474_s15 + $0xa8] sm:$0xff] %v2331_v15  ;;  %v2337_v2 = vld [vmem:[%s3478_s20 + $0xc0] sm:$0xff] }
 0x21a   : >> { %2334 = vst [vmem:[%s3474_s15 + $0xb0] sm:$0xff] %v2333_v49  ;;  %2336 = vst [vmem:[%s3474_s15 + $0xb8] sm:$0xff] %v2335_v10  ;;  %v2339_v1 = vld [vmem:[%s3478_s20 + $0xc8] sm:$0xff]  ;;  %v2341_v7 = vld [vmem:[%s3478_s20 + $0xd0] sm:$0xff] }
 0x21b   : >> { %2338 = vst [vmem:[%s3474_s15 + $0xc0] sm:$0xff] %v2337_v2  ;;  %2340 = vst [vmem:[%s3474_s15 + $0xc8] sm:$0xff] %v2339_v1  ;;  %v2343_v20 = vld [vmem:[%s3478_s20 + $0xd8] sm:$0xff]  ;;  %v2345_v5 = vld [vmem:[%s3478_s20 + $0xe0] sm:$0xff] }
 0x21c   : >> { %2342 = vst [vmem:[%s3474_s15 + $0xd0] sm:$0xff] %v2341_v7  ;;  %v2347_v4 = vld [vmem:[%s3478_s20 + $0xe8] sm:$0xff]  ;;  %2344 = vst [vmem:[%s3474_s15 + $0xd8] sm:$0xff] %v2343_v20  ;;  %v2349_v12 = vld [vmem:[%s3478_s20 + $0xf0] sm:$0xff] }
 0x21d   : >> { %2346 = vst [vmem:[%s3474_s15 + $0xe0] sm:$0xff] %v2345_v5  ;;  %2348 = vst [vmem:[%s3474_s15 + $0xe8] sm:$0xff] %v2347_v4  ;;  %v2351_v31 = vld [vmem:[%s3478_s20 + $0xf8] sm:$0xff]  ;;  %v2353_v6 = vld [vmem:[%s3478_s20 + $0x100] sm:$0xff] }
 0x21e   : >> { %2350 = vst [vmem:[%s3474_s15 + $0xf0] sm:$0xff] %v2349_v12  ;;  %2352 = vst [vmem:[%s3474_s15 + $0xf8] sm:$0xff] %v2351_v31  ;;  %v2355_v9 = vld [vmem:[%s3478_s20 + $0x108] sm:$0xff]  ;;  %v2357_v14 = vld [vmem:[%s3478_s20 + $0x110] sm:$0xff] }
 0x21f   : >> { %2354 = vst [vmem:[%s3474_s15 + $0x100] sm:$0xff] %v2353_v6  ;;  %v2359_v38 = vld [vmem:[%s3478_s20 + $0x118] sm:$0xff]  ;;  %2356 = vst [vmem:[%s3474_s15 + $0x108] sm:$0xff] %v2355_v9  ;;  %v2361_v59 = vld [vmem:[%s3478_s20 + $0x120] sm:$0xff] }
 0x220   : >> { %2358 = vst [vmem:[%s3474_s15 + $0x110] sm:$0xff] %v2357_v14  ;;  %2360 = vst [vmem:[%s3474_s15 + $0x118] sm:$0xff] %v2359_v38  ;;  %v2363_v47 = vld [vmem:[%s3478_s20 + $0x128] sm:$0xff]  ;;  %v2365_v27 = vld [vmem:[%s3478_s20 + $0x130] sm:$0xff] }
 0x221   : >> { %2362 = vst [vmem:[%s3474_s15 + $0x120] sm:$0xff] %v2361_v59  ;;  %2364 = vst [vmem:[%s3474_s15 + $0x128] sm:$0xff] %v2363_v47  ;;  %v2367_v17 = vld [vmem:[%s3478_s20 + $0x138] sm:$0xff]  ;;  %v2369_v39 = vld [vmem:[%s3478_s20 + $0x140] sm:$0xff] }
 0x222   : >> { %2366 = vst [vmem:[%s3474_s15 + $0x130] sm:$0xff] %v2365_v27  ;;  %v2371_v13 = vld [vmem:[%s3478_s20 + $0x148] sm:$0xff]  ;;  %2368 = vst [vmem:[%s3474_s15 + $0x138] sm:$0xff] %v2367_v17  ;;  %v2373_v51 = vld [vmem:[%s3478_s20 + $0x150] sm:$0xff] }
 0x223   : >> { %2370 = vst [vmem:[%s3474_s15 + $0x140] sm:$0xff] %v2369_v39  ;;  %2372 = vst [vmem:[%s3474_s15 + $0x148] sm:$0xff] %v2371_v13  ;;  %v2375_v60 = vld [vmem:[%s3478_s20 + $0x158] sm:$0xff]  ;;  %v2377_v32 = vld [vmem:[%s3478_s20 + $0x160] sm:$0xff] }
 0x224   : >> { %2374 = vst [vmem:[%s3474_s15 + $0x150] sm:$0xff] %v2373_v51  ;;  %2376 = vst [vmem:[%s3474_s15 + $0x158] sm:$0xff] %v2375_v60  ;;  %v2379_v61 = vld [vmem:[%s3478_s20 + $0x168] sm:$0xff]  ;;  %v2381_v8 = vld [vmem:[%s3478_s20 + $0x170] sm:$0xff] }
 0x225   : >> { %2378 = vst [vmem:[%s3474_s15 + $0x160] sm:$0xff] %v2377_v32  ;;  %v2383_v16 = vld [vmem:[%s3478_s20 + $0x178] sm:$0xff]  ;;  %2380 = vst [vmem:[%s3474_s15 + $0x168] sm:$0xff] %v2379_v61  ;;  %v2385_v54 = vld [vmem:[%s3478_s20 + $0x180] sm:$0xff] }
 0x226   : >> { %2382 = vst [vmem:[%s3474_s15 + $0x170] sm:$0xff] %v2381_v8  ;;  %2384 = vst [vmem:[%s3474_s15 + $0x178] sm:$0xff] %v2383_v16  ;;  %v2387_v23 = vld [vmem:[%s3478_s20 + $0x188] sm:$0xff]  ;;  %v2389_v25 = vld [vmem:[%s3478_s20 + $0x190] sm:$0xff] }
 0x227   : >> { %2386 = vst [vmem:[%s3474_s15 + $0x180] sm:$0xff] %v2385_v54  ;;  %2388 = vst [vmem:[%s3474_s15 + $0x188] sm:$0xff] %v2387_v23  ;;  %v2391_v19 = vld [vmem:[%s3478_s20 + $0x198] sm:$0xff]  ;;  %v2393_v52 = vld [vmem:[%s3478_s20 + $0x1a0] sm:$0xff] }
 0x228   : >> { %2390 = vst [vmem:[%s3474_s15 + $0x190] sm:$0xff] %v2389_v25  ;;  %v2395_v63 = vld [vmem:[%s3478_s20 + $0x1a8] sm:$0xff]  ;;  %2392 = vst [vmem:[%s3474_s15 + $0x198] sm:$0xff] %v2391_v19  ;;  %v2397_v24 = vld [vmem:[%s3478_s20 + $0x1b0] sm:$0xff] }
 0x229   : >> { %2394 = vst [vmem:[%s3474_s15 + $0x1a0] sm:$0xff] %v2393_v52  ;;  %2396 = vst [vmem:[%s3474_s15 + $0x1a8] sm:$0xff] %v2395_v63  ;;  %v2399_v29 = vld [vmem:[%s3478_s20 + $0x1b8] sm:$0xff]  ;;  %v2401_v30 = vld [vmem:[%s3478_s20 + $0x1c0] sm:$0xff] }
 0x22a   : >> { %2398 = vst [vmem:[%s3474_s15 + $0x1b0] sm:$0xff] %v2397_v24  ;;  %2400 = vst [vmem:[%s3474_s15 + $0x1b8] sm:$0xff] %v2399_v29  ;;  %v2403_v33 = vld [vmem:[%s3478_s20 + $0x1c8] sm:$0xff]  ;;  %v2405_v55 = vld [vmem:[%s3478_s20 + $0x1d0] sm:$0xff]  ;;  %2285 = sbr.rel (!%p2282_p12) target bundleno = 526 (0x20e), region = 122 }
 0x22b   : >> { %2402 = vst [vmem:[%s3474_s15 + $0x1c0] sm:$0xff] %v2401_v30  ;;  %v2407_v22 = vld [vmem:[%s3478_s20 + $0x1d8] sm:$0xff]  ;;  %2404 = vst [vmem:[%s3474_s15 + $0x1c8] sm:$0xff] %v2403_v33  ;;  %v2409_v36 = vld [vmem:[%s3478_s20 + $0x1e0] sm:$0xff] }
 0x22c   : >> { %2406 = vst [vmem:[%s3474_s15 + $0x1d0] sm:$0xff] %v2405_v55  ;;  %2408 = vst [vmem:[%s3474_s15 + $0x1d8] sm:$0xff] %v2407_v22  ;;  %v2411_v26 = vld [vmem:[%s3478_s20 + $0x1e8] sm:$0xff]  ;;  %v2413_v34 = vld [vmem:[%s3478_s20 + $0x1f0] sm:$0xff] }
 0x22d   : >> { %2410 = vst [vmem:[%s3474_s15 + $0x1e0] sm:$0xff] %v2409_v36  ;;  %2412 = vst [vmem:[%s3474_s15 + $0x1e8] sm:$0xff] %v2411_v26  ;;  %v2415_v21 = vld [vmem:[%s3478_s20 + $0x1f8] sm:$0xff]  ;;  %s4280_s20 = smov %s4146_s17 }
 0x22e   : >> { %2414 = vst [vmem:[%s3474_s15 + $0x1f0] sm:$0xff] %v2413_v34  ;;  %2416 = vst [vmem:[%s3474_s15 + $0x1f8] sm:$0xff] %v2415_v21  ;;  %s4279_s15 = smov %s4149_s18 }
 0x22f PF: > { %s4254_s21 = sand.u32 63, %s4286_s29   ;;  %s2787_s22 = sshll.u32 %s4079_s8, 9 }
 0x230   : > { %s2428_s9 = scalar_lea.vmem %s3893_s26, %s2787_s22 [#allocation2]   ;;  %s2430_s24 = scalar_lea.vmem %s4073_s6, %s2787_s22  }
 0x231   : > { %p2781_p13 = scmp.le.s32.totalorder %s4254_s21, 0 }
 0x232   : > { %s3488_s25 = smov (!%p2781_p13), %s2430_s24   ;;  %s3492_s12 = smov (!%p2781_p13), %s2428_s9  }
 0x233   : > { %2521 = sbr.rel (%p2781_p13) target bundleno = 576 (0x240), region = 127  ;;  %s3496_s27 = smov (!%p2781_p13), 0  }
 0x234   : > { %s3500_s28 = smov (!%p2781_p13), 0  }
 0x238 LB: >> { %v2440_v44 = vld [vmem:[%s3494_s12] sm:$0xff]  ;;  %s2442_s29 = sadd.s32 1, %s3498_s27  ;;  %s2434_s28 = sadd.s32 1, %s3502_s28   ;;  %s3502_s28 = sphi %s3500_s28, %s2434_s28   ;;  %s3498_s27 = sphi %s3496_s27, %s3497_s27   ;;  %s3494_s12 = sphi %s3492_s12, %s2447_s12   ;;  %s3490_s25 = sphi %s3488_s25, %s2448_s25  }
 0x239   : >> { %2441 = vst [vmem:[%s3490_s25] sm:$0xff] %v2440_v44  ;;  %p2443_p0 = scmp.ge.s32.totalorder %s2442_s29, %s4254_s21  ;;  %p2433_p1 = scmp.ge.s32.totalorder %s2434_s28, %s4254_s21 }
 0x23b   : >> { %s4290_s29 = smov (%p2443_p0, %s2442_s29), 0  ;;  %2436 = sbr.rel (!%p2433_p1) target bundleno = 568 (0x238), region = 133 }
 0x23c   : >> { %s2782_s26 = sshll.u32 %s4290_s29, 3  ;;  %s3497_s27 = smov %s4290_s29  }
 0x23d   : >> { %s2447_s12 = scalar_lea.vmem %s2428_s9, %s2782_s26 [#allocation2]   ;;  %s2448_s25 = scalar_lea.vmem %s2430_s24, %s2782_s26  }
 0x240 PF: > { %p10_p2 = scmp.ge.s32.totalorder %s3540_s16, 6   ;;  %s4282_s12 = smov %s3466_s13 }
 0x241   : > { %s4283_s13 = smov %s3548_s19  ;;  %s4284_s14 = smov %s3540_s16 }
 0x242   :  { %12 = sbr.rel (!%p10_p2) target bundleno = 2 (0x2), region = 144 }

// kernel: squeeze.0
= control target key start
LH: loop header
LB: loop body
LE: loop exit
PB: predicated region body
PF: predicated region fallthrough
CT: control target
= control target key end

     0   :  { %s236_s6 = smov 3  ;;  %s239_s7 = smov 3  ;;  %vm241_vm0 = vcmask 850944   ;;  %vm280_vm1 = vcmask 916480   ;;  %vm261_vm2 = vcmask 883712   ;;  %vm298_vm3 = vcmask 949248   ;;  %s1098_s0 = inlined_call_operand.vmem [shape: f32[1568], index: 0, kind: input, shape index: {}]   ;;  %s1099_s1 = inlined_call_operand.hbm [shape: f32[2,1,28,28], index: 1, kind: output, shape index: {}]  }
   0x1   :  { %v826_v0 = vld [vmem:[%s1098_s0 + $0x4] ss:$7 sm:%s236_s6]   ;;  %v827_v1 = vld [vmem:[%s1098_s0 + $0x5] ss:$7 sm:%s239_s7]   ;;  %s275_s12 = smov 3  ;;  %s278_s15 = smov 3 }
   0x2   :  { %v242_v2 = vsel %vm241_vm0, %v827_v1, %v826_v0  ;;  %v276_v3 = vld [vmem:[%s1098_s0] ss:$7 sm:%s275_s12]   ;;  %v831_v4 = vld [vmem:[%s1098_s0 + $0x5] sm:$0x1]   ;;  %s891_s18 = smov 24   ;;  %s256_s21 = smov 3 }
   0x3   :  { %243 = vrot.lane.b32.xlu0 %v242_v2, %s891_s18  ;;  %v830_v5 = vld [vmem:[%s1098_s0 + $0x1] ss:$7 sm:%s278_s15]   ;;  %s259_s22 = smov 3  ;;  %v832_v6 = vld [vmem:[%s1098_s0 + $0x6] sm:$0x1]   ;;  %s892_s29 = smov 16  }
   0x4   :  { %v281_v7 = vsel %vm280_vm1, %v830_v5, %v276_v3  ;;  %v828_v8 = vld [vmem:[%s1098_s0 + $0x2] ss:$7 sm:%s256_s21]   ;;  %v829_v9 = vld [vmem:[%s1098_s0 + $0x3] ss:$7 sm:%s259_s22]   ;;  %s309_s30 = smov 3  ;;  %s312_s2 = smov 3  ;;  %v299_v11 = vsel %vm298_vm3, %v832_v6, %v831_v4 }
   0x5   :  { %282 = vrot.lane.b32.xlu1 %v281_v7, %s892_s29  ;;  %v262_v10 = vsel %vm261_vm2, %v829_v9, %v828_v8  ;;  %vm314_vm4 = vcmask 982016   ;;  %v833_v12 = vld [vmem:[%s1098_s0 + $0x3] ss:$7 sm:%s309_s30]   ;;  %s329_s7 = smov 3  ;;  %s893_s8 = smov 20   ;;  %vm334_vm5 = vcmask 1014784  }
   0x6   :  { %v834_v13 = vld [vmem:[%s1098_s0 + $0x4] ss:$7 sm:%s312_s2]   ;;  %s332_s11 = smov 3  ;;  %s894_s14 = smov 12   ;;  %v807_v21 = vld [vmem:[%s1098_s0 + $0x6] sm:$0x1]  }
   0x7   :  { %263 = vrot.lane.b32.xlu0 %v262_v10, %s893_s8  ;;  %v835_v14 = vld [vmem:[%s1098_s0 + $0x1] ss:$7 sm:%s329_s7]   ;;  %v315_v15 = vsel %vm314_vm4, %v834_v13, %v833_v12  ;;  %s10_s15 = smov 3  ;;  %s895_s16 = smov 8  }
   0x8   :  { %v836_v16 = vld [vmem:[%s1098_s0 + $0x2] ss:$7 sm:%s332_s11]   ;;  %s20_s17 = smov 3  ;;  %s896_s20 = smov 4  }
   0x9   :  { %300 = vrot.lane.b32.xlu1 %v299_v11, %s894_s14  ;;  %v335_v17 = vsel %vm334_vm5, %v836_v16, %v835_v14  ;;  %v804_v18 = vld [vmem:[%s1098_s0 + $0x5] ss:$7 sm:%s10_s15]   ;;  %s30_s21 = smov 3  ;;  %s897_s24 = smov 124  }
   0xa   :  { %v805_v19 = vld [vmem:[%s1098_s0 + $0x3] ss:$7 sm:%s20_s17]   ;;  %v806_v20 = vld [vmem:[%s1098_s0 + $0x1] ss:$7 sm:%s30_s21]   ;;  %s898_s27 = smov 120   ;;  %s47_s28 = smov 3 }
   0xb   :  { %316 = vrot.lane.b32.xlu0 %v315_v15, %s895_s16  ;;  %s899_s2 = smov 116   ;;  %s57_s3 = smov 3 }
   0xd   :  { %336 = vrot.lane.b32.xlu1 %v335_v17, %s896_s20 }
   0xf   :  { %12 = vrot.lane.b32.xlu0 %v804_v18, %s897_s24 }
  0x11   :  { %22 = vrot.lane.b32.xlu1 %v805_v19, %s898_s27 }
  0x13   :  { %32 = vrot.lane.b32.xlu0 %v806_v20, %s899_s2 }
  0x14   :  { %2 = vsyncpa [#allocation1], 0  ;;  %v808_v22 = vld [vmem:[%s1098_s0 + $0x4] ss:$7 sm:%s47_s28]   ;;  %s900_s6 = smov 112   ;;  %s66_s7 = smov 3 }
  0x15   :  { %41 = vrot.lane.b32.xlu1 %v807_v21, %s900_s6  ;;  %v809_v23 = vld [vmem:[%s1098_s0 + $0x2] ss:$7 sm:%s57_s3]   ;;  %s901_s10 = smov 108   ;;  %s902_s13 = smov 104   ;;  %v813_v28 = vld [vmem:[%s1098_s0 + $0x6] sm:$0x1]  }
  0x16   :  { %v67_v24 = vld [vmem:[%s1098_s0] ss:$7 sm:%s66_s7]   ;;  %s83_s14 = smov 3  ;;  %v810_v25 = vld [vmem:[%s1098_s0 + $0x5] sm:$0x1]   ;;  %s903_s17 = smov 100  }
  0x17   :  { %49 = vrot.lane.b32.xlu0 %v808_v22, %s901_s10  ;;  %s93_s18 = smov 3  ;;  %v811_v26 = vld [vmem:[%s1098_s0 + $0x3] ss:$7 sm:%s83_s14]   ;;  %s904_s21 = smov 96   ;;  %v816_v32 = vld [vmem:[%s1098_s0 + $0x5] sm:$0x1]  }
  0x18   :  { %v812_v27 = vld [vmem:[%s1098_s0 + $0x1] ss:$7 sm:%s93_s18]   ;;  %s905_s24 = smov 92   ;;  %s110_s25 = smov 3  ;;  %v819_v35 = vld [vmem:[%s1098_s0 + $0x6] sm:$0x1]  }
  0x19   :  { %59 = vrot.lane.b32.xlu1 %v809_v23, %s902_s13  ;;  %s906_s28 = smov 88   ;;  %s120_s29 = smov 3  ;;  %v814_v29 = vld [vmem:[%s1098_s0 + $0x4] ss:$7 sm:%s110_s25]   ;;  %vm5_vm6 = vcmask 228352   ;;  %vm245_vm7 = vcmask 195584  }
  0x1a   :  { %s907_s3 = smov 84   ;;  %s129_s4 = smov 3  ;;  %v815_v30 = vld [vmem:[%s1098_s0 + $0x2] ss:$7 sm:%s120_s29]   ;;  %v825_v45 = vld [vmem:[%s1098_s0 + $0x6] sm:$0x1]  }
  0x1b   :  { %68 = vrot.lane.b32.xlu0 %v67_v24, %s903_s17  ;;  %s908_s7 = smov 80   ;;  %v130_v31 = vld [vmem:[%s1098_s0] ss:$7 sm:%s129_s4]   ;;  %s909_s10 = smov 76   ;;  %v822_v40 = vld [vmem:[%s1098_s0 + $0x5] sm:$0x1]  }
  0x1c   :  { %s146_s11 = smov 3  ;;  %s910_s14 = smov 72   ;;  %vm250_vm8 = vcmask 228544   ;;  %vm284_vm9 = vcmask 130048   ;;  %vm289_vm10 = vcmask 228480   ;;  %vm265_vm11 = vcmask 162816  }
  0x1d   :  { %77 = vrot.lane.b32.xlu1 %v810_v25, %s904_s21  ;;  %s156_s15 = smov 3  ;;  %v817_v33 = vld [vmem:[%s1098_s0 + $0x3] ss:$7 sm:%s146_s11]   ;;  %s911_s18 = smov 68   ;;  %vm270_vm12 = vcmask 228512   ;;  %vm302_vm13 = vcmask 97280  }
  0x1e   :  { %v818_v34 = vld [vmem:[%s1098_s0 + $0x1] ss:$7 sm:%s156_s15]   ;;  %s912_s21 = smov 64   ;;  %s173_s22 = smov 3  ;;  %vm305_vm14 = vcmask 228448   ;;  %vm318_vm15 = vcmask 64512  }
  0x1f   :  { %85 = vrot.lane.b32.xlu0 %v811_v26, %s905_s24  ;;  %s913_s25 = smov 60   ;;  %s183_s26 = smov 3  ;;  %v820_v36 = vld [vmem:[%s1098_s0 + $0x4] ss:$7 sm:%s173_s22]   ;;  %vm323_vm0 = vcmask 228416   ;;  %vm338_vm1 = vcmask 31744  }
  0x20   :  { %s3_s29 = smov 3  ;;  %s914_s30 = smov 56   ;;  %v821_v38 = vld [vmem:[%s1098_s0 + $0x2] ss:$7 sm:%s183_s26]   ;;  %vm343_vm2 = vcmask 228384  }
  0x21   :  { %95 = vrot.lane.b32.xlu1 %v812_v27, %s906_s28  ;;  %s192_s2 = smov 3  ;;  %v4_v37 = vld [vmem:[%s1098_s0] ss:$7 sm:%s3_s29]   ;;  %s209_s11 = smov 3 }
  0x22   :  { %6 = vst.msk [vmem:[#allocation2] sm:$0x1] %vm5_vm6, %v4_v37   ;;  %8 = vst.msk [vmem:[#allocation2 + $0xff] sm:$0x2] %vm5_vm6, %v4_v37   ;;  %v193_v39 = vld [vmem:[%s1098_s0] ss:$7 sm:%s192_s2]  }
  0x23   :  { %104 = vrot.lane.b32.xlu0 %v813_v28, %s907_s3  ;;  %s219_s15 = smov 3  ;;  %v823_v41 = vld [vmem:[%s1098_s0 + $0x3] ss:$7 sm:%s209_s11]   ;;  %s921_s24 = smov 28  }
  0x24   :  { %v824_v44 = vld [vmem:[%s1098_s0 + $0x1] ss:$7 sm:%s219_s15]   ;;  %s920_s0 = smov 32  }
  0x25   :  { %112 = vrot.lane.b32.xlu1 %v814_v29, %s908_s7  ;;  %s915_s7 = smov 52  }
  0x27   :  { %122 = vrot.lane.b32.xlu0 %v815_v30, %s909_s10  ;;  %s916_s10 = smov 48  }
  0x29   :  { %131 = vrot.lane.b32.xlu1 %v130_v31, %s910_s14  ;;  %s917_s14 = smov 44   ;;  %v352_v42 = vld [vmem:[#allocation2] sm:$0x1] }
  0x2a   :  { %v573_v43 = vld [vmem:[#allocation2 + $0x100] sm:$0x1]  ;;  %355 = vst [vmem:[#allocation0] sm:$0x1] %v352_v42 }
  0x2b   :  { %140 = vrot.lane.b32.xlu0 %v816_v32, %s911_s18  ;;  %s918_s18 = smov 40   ;;  %578 = vst [vmem:[#allocation0 + $0x20] sm:$0x1] %v573_v43 }
  0x2d   :  { %148 = vrot.lane.b32.xlu1 %v817_v33, %s912_s21  ;;  %s919_s21 = smov 36  }
  0x2f   :  { %158 = vrot.lane.b32.xlu0 %v818_v34, %s913_s25  ;;  %s922_s25 = smov [#allocation0]  }
  0x30   :  { %s744_s26 = sshll.u32 %s922_s25, 4  ;;  %s745_s26 = int_to_ptr.vmem [resolvable:$true] %s744_s26 }
  0x31   :  { %167 = vrot.lane.b32.xlu1 %v819_v35, %s914_s30  ;;  %s869_s27 = scalar_lea.vmem %s745_s26, 896  ;;  %p874_p1 = scmp.lt.s32.totalorder %s745_s26, %s745_s26 }
  0x32   :  { %p870_p0 = scmp.ne.s32.totalorder %s745_s26, %s869_s27  ;;  %p875_p2 = scmp.lt.s32.totalorder %s869_s27, %s869_s27 }
  0x33   :  { %175 = vrot.lane.b32.xlu0 %v820_v36, %s915_s7 }
  0x34   :  { %p876_p3 = por %p875_p2, %p874_p1 }
  0x35   :  { %185 = vrot.lane.b32.xlu1 %v821_v38, %s916_s10 }
  0x36   :  { %p877_p4 = pnand %p876_p3, %p870_p0 }
  0x37   :  { %194 = vrot.lane.b32.xlu0 %v193_v39, %s917_s14 }
  0x39   :  { %203 = vrot.lane.b32.xlu1 %v822_v40, %s918_s18 }
  0x3b   :  { %211 = vrot.lane.b32.xlu0 %v823_v41, %s919_s21 }
  0x3d   :  { %221 = vrot.lane.b32.xlu1 %v824_v44, %s920_s0 }
  0x3f   :  { %230 = vrot.lane.b32.xlu0 %v825_v45, %s921_s24 }
  0x75   :  { %v244_v46 = vpop.permute.xlu0 %243  }
  0x76   :  { %247 = vst.msk [vmem:[#allocation2 + $0xb0] sm:$0x1] %vm245_vm7, %v244_v46   ;;  %249 = vst.msk [vmem:[#allocation2 + $0x1af] sm:$0x2] %vm245_vm7, %v244_v46  }
  0x77   :  { %252 = vst.msk [vmem:[#allocation2 + $0xb0] sm:$0x1] %vm250_vm8, %v244_v46   ;;  %254 = vst.msk [vmem:[#allocation2 + $0x1af] sm:$0x2] %vm250_vm8, %v244_v46   ;;  %v283_v47 = vpop.permute.xlu1 %282  }
  0x78   :  { %286 = vst.msk [vmem:[#allocation2 + $0x20] sm:$0x1] %vm284_vm9, %v283_v47   ;;  %288 = vst.msk [vmem:[#allocation2 + $0x11f] sm:$0x2] %vm284_vm9, %v283_v47  }
  0x79   :  { %291 = vst.msk [vmem:[#allocation2 + $0x20] sm:$0x1] %vm289_vm10, %v283_v47   ;;  %293 = vst.msk [vmem:[#allocation2 + $0x11f] sm:$0x2] %vm289_vm10, %v283_v47   ;;  %v264_v48 = vpop.permute.xlu0 %263  }
  0x7a   :  { %267 = vst.msk [vmem:[#allocation2 + $0x68] sm:$0x1] %vm265_vm11, %v264_v48   ;;  %269 = vst.msk [vmem:[#allocation2 + $0x167] sm:$0x2] %vm265_vm11, %v264_v48  }
  0x7b   :  { %272 = vst.msk [vmem:[#allocation2 + $0x68] sm:$0x1] %vm270_vm12, %v264_v48   ;;  %274 = vst.msk [vmem:[#allocation2 + $0x167] sm:$0x2] %vm270_vm12, %v264_v48   ;;  %v301_v49 = vpop.permute.xlu1 %300  }
  0x7c   :  { %304 = vst.msk [vmem:[#allocation2 + $0xd8] sm:$0x1] %vm302_vm13, %v301_v49  }
  0x7d   :  { %307 = vst.msk [vmem:[#allocation2 + $0xd8] sm:$0x1] %vm305_vm14, %v301_v49   ;;  %v317_v50 = vpop.permute.xlu0 %316  }
  0x7e   :  { %v503_v51 = vld [vmem:[#allocation2 + $0xb0] sm:$0x1]  ;;  %320 = vst.msk [vmem:[#allocation2 + $0x90] sm:$0x1] %vm318_vm15, %v317_v50   ;;  %322 = vst.msk [vmem:[#allocation2 + $0x18f] sm:$0x2] %vm318_vm15, %v317_v50  }
  0x7f   :  { %v727_v52 = vld [vmem:[#allocation2 + $0x1b0] sm:$0x1]  ;;  %508 = vst [vmem:[#allocation0 + $0x16] sm:$0x1] %v503_v51  ;;  %325 = vst.msk [vmem:[#allocation2 + $0x90] sm:$0x1] %vm323_vm0, %v317_v50   ;;  %v337_v53 = vpop.permute.xlu1 %336  }
  0x80   :  { %732 = vst [vmem:[#allocation0 + $0x36] sm:$0x1] %v727_v52  ;;  %327 = vst.msk [vmem:[#allocation2 + $0x18f] sm:$0x2] %vm323_vm0, %v317_v50   ;;  %v377_v54 = vld [vmem:[#allocation2 + $0x20] sm:$0x1] }
  0x81   :  { %v601_v55 = vld [vmem:[#allocation2 + $0x120] sm:$0x1]  ;;  %340 = vst.msk [vmem:[#allocation2 + $0x48] sm:$0x1] %vm338_vm1, %v337_v53   ;;  %342 = vst.msk [vmem:[#allocation2 + $0x147] sm:$0x2] %vm338_vm1, %v337_v53   ;;  %v13_v56 = vpop.permute.xlu0 %12  }
  0x82   :  { %382 = vst [vmem:[#allocation0 + $0x4] sm:$0x1] %v377_v54  ;;  %606 = vst [vmem:[#allocation0 + $0x24] sm:$0x1] %v601_v55  ;;  %v440_v57 = vld [vmem:[#allocation2 + $0x68] sm:$0x1] }
  0x83   :  { %345 = vst.msk [vmem:[#allocation2 + $0x48] sm:$0x1] %vm343_vm2, %v337_v53   ;;  %347 = vst.msk [vmem:[#allocation2 + $0x147] sm:$0x2] %vm343_vm2, %v337_v53   ;;  %v664_v58 = vld [vmem:[#allocation2 + $0x168] sm:$0x1]  ;;  %v23_v59 = vpop.permute.xlu1 %22  }
  0x84   :  { %16 = vst.msk [vmem:[#allocation2 + $0xb8] sm:$0x1] %vm5_vm6, %v13_v56   ;;  %18 = vst.msk [vmem:[#allocation2 + $0x1b7] sm:$0x2] %vm5_vm6, %v13_v56   ;;  %v538_v60 = vld [vmem:[#allocation2 + $0xd8] sm:$0x1] }
  0x85   :  { %445 = vst [vmem:[#allocation0 + $0xd] sm:$0x1] %v440_v57  ;;  %669 = vst [vmem:[#allocation0 + $0x2d] sm:$0x1] %v664_v58  ;;  %v33_v61 = vpop.permute.xlu0 %32  }
  0x86   :  { %26 = vst.msk [vmem:[#allocation2 + $0x70] sm:$0x1] %vm5_vm6, %v23_v59   ;;  %28 = vst.msk [vmem:[#allocation2 + $0x16f] sm:$0x2] %vm5_vm6, %v23_v59   ;;  %v475_v62 = vld [vmem:[#allocation2 + $0x90] sm:$0x1] }
  0x87   :  { %543 = vst [vmem:[#allocation0 + $0x1b] sm:$0x1] %v538_v60  ;;  %v699_v63 = vld [vmem:[#allocation2 + $0x190] sm:$0x1]  ;;  %36 = vst.msk [vmem:[#allocation2 + $0x28] sm:$0x1] %vm5_vm6, %v33_v61   ;;  %v42_v0 = vpop.permute.xlu1 %41  }
  0x88   :  { %38 = vst.msk [vmem:[#allocation2 + $0x127] sm:$0x2] %vm5_vm6, %v33_v61   ;;  %480 = vst [vmem:[#allocation0 + $0x12] sm:$0x1] %v475_v62 }
  0x89   :  { %704 = vst [vmem:[#allocation0 + $0x32] sm:$0x1] %v699_v63  ;;  %45 = vst.msk [vmem:[#allocation2 + $0xe0] sm:$0x1] %vm5_vm6, %v42_v0   ;;  %v50_v5 = vpop.permute.xlu0 %49  }
  0x8a   :  { %v412_v1 = vld [vmem:[#allocation2 + $0x48] sm:$0x1]  ;;  %53 = vst.msk [vmem:[#allocation2 + $0x98] sm:$0x1] %vm5_vm6, %v50_v5   ;;  %55 = vst.msk [vmem:[#allocation2 + $0x197] sm:$0x2] %vm5_vm6, %v50_v5  }
  0x8b   :  { %v636_v2 = vld [vmem:[#allocation2 + $0x148] sm:$0x1]  ;;  %417 = vst [vmem:[#allocation0 + $0x9] sm:$0x1] %v412_v1  ;;  %v510_v3 = vld [vmem:[#allocation2 + $0xb8] sm:$0x1]  ;;  %v60_v8 = vpop.permute.xlu1 %59  }
  0x8c   :  { %641 = vst [vmem:[#allocation0 + $0x29] sm:$0x1] %v636_v2  ;;  %v734_v4 = vld [vmem:[#allocation2 + $0x1b8] sm:$0x1]  ;;  %515 = vst [vmem:[#allocation0 + $0x17] sm:$0x1] %v510_v3 }
  0x8d   :  { %739 = vst [vmem:[#allocation0 + $0x37] sm:$0x1] %v734_v4  ;;  %v447_v6 = vld [vmem:[#allocation2 + $0x70] sm:$0x1]  ;;  %63 = vst.msk [vmem:[#allocation2 + $0x50] sm:$0x1] %vm5_vm6, %v60_v8   ;;  %v69_v11 = vpop.permute.xlu0 %68  }
  0x8e   :  { %v671_v7 = vld [vmem:[#allocation2 + $0x170] sm:$0x1]  ;;  %452 = vst [vmem:[#allocation0 + $0xe] sm:$0x1] %v447_v6  ;;  %65 = vst.msk [vmem:[#allocation2 + $0x14f] sm:$0x2] %vm5_vm6, %v60_v8  }
  0x8f   :  { %676 = vst [vmem:[#allocation0 + $0x2e] sm:$0x1] %v671_v7  ;;  %v384_v9 = vld [vmem:[#allocation2 + $0x28] sm:$0x1]  ;;  %72 = vst.msk [vmem:[#allocation2 + $0x8] sm:$0x1] %vm5_vm6, %v69_v11   ;;  %v78_v13 = vpop.permute.xlu1 %77  }
  0x90   :  { %v608_v10 = vld [vmem:[#allocation2 + $0x128] sm:$0x1]  ;;  %389 = vst [vmem:[#allocation0 + $0x5] sm:$0x1] %v384_v9  ;;  %74 = vst.msk [vmem:[#allocation2 + $0x107] sm:$0x2] %vm5_vm6, %v69_v11  }
  0x91   :  { %613 = vst [vmem:[#allocation0 + $0x25] sm:$0x1] %v608_v10  ;;  %v545_v12 = vld [vmem:[#allocation2 + $0xe0] sm:$0x1]  ;;  %81 = vst.msk [vmem:[#allocation2 + $0xc0] sm:$0x1] %vm5_vm6, %v78_v13   ;;  %v86_v16 = vpop.permute.xlu0 %85  }
  0x92   :  { %550 = vst [vmem:[#allocation0 + $0x1c] sm:$0x1] %v545_v12  ;;  %v482_v14 = vld [vmem:[#allocation2 + $0x98] sm:$0x1]  ;;  %89 = vst.msk [vmem:[#allocation2 + $0x78] sm:$0x1] %vm5_vm6, %v86_v16  }
  0x93   :  { %v706_v15 = vld [vmem:[#allocation2 + $0x198] sm:$0x1]  ;;  %487 = vst [vmem:[#allocation0 + $0x13] sm:$0x1] %v482_v14  ;;  %91 = vst.msk [vmem:[#allocation2 + $0x177] sm:$0x2] %vm5_vm6, %v86_v16   ;;  %v96_v19 = vpop.permute.xlu1 %95  }
  0x94   :  { %711 = vst [vmem:[#allocation0 + $0x33] sm:$0x1] %v706_v15  ;;  %v419_v17 = vld [vmem:[#allocation2 + $0x50] sm:$0x1]  ;;  %99 = vst.msk [vmem:[#allocation2 + $0x30] sm:$0x1] %vm5_vm6, %v96_v19  }
  0x95   :  { %v643_v18 = vld [vmem:[#allocation2 + $0x150] sm:$0x1]  ;;  %424 = vst [vmem:[#allocation0 + $0xa] sm:$0x1] %v419_v17  ;;  %101 = vst.msk [vmem:[#allocation2 + $0x12f] sm:$0x2] %vm5_vm6, %v96_v19   ;;  %v105_v22 = vpop.permute.xlu0 %104  }
  0x96   :  { %648 = vst [vmem:[#allocation0 + $0x2a] sm:$0x1] %v643_v18  ;;  %v357_v20 = vld [vmem:[#allocation2 + $0x8] sm:$0x1]  ;;  %108 = vst.msk [vmem:[#allocation2 + $0xe8] sm:$0x1] %vm5_vm6, %v105_v22  }
  0x97   :  { %v580_v21 = vld [vmem:[#allocation2 + $0x108] sm:$0x1]  ;;  %361 = vst [vmem:[#allocation0 + $0x1] sm:$0x1] %v357_v20  ;;  %v113_v24 = vpop.permute.xlu1 %112  }
  0x98   :  { %585 = vst [vmem:[#allocation0 + $0x21] sm:$0x1] %v580_v21  ;;  %v517_v23 = vld [vmem:[#allocation2 + $0xc0] sm:$0x1]  ;;  %116 = vst.msk [vmem:[#allocation2 + $0xa0] sm:$0x1] %vm5_vm6, %v113_v24  }
  0x99   :  { %522 = vst [vmem:[#allocation0 + $0x18] sm:$0x1] %v517_v23  ;;  %118 = vst.msk [vmem:[#allocation2 + $0x19f] sm:$0x2] %vm5_vm6, %v113_v24   ;;  %v454_v25 = vld [vmem:[#allocation2 + $0x78] sm:$0x1]  ;;  %v123_v27 = vpop.permute.xlu0 %122  }
  0x9a   :  { %v678_v26 = vld [vmem:[#allocation2 + $0x178] sm:$0x1]  ;;  %459 = vst [vmem:[#allocation0 + $0xf] sm:$0x1] %v454_v25  ;;  %126 = vst.msk [vmem:[#allocation2 + $0x58] sm:$0x1] %vm5_vm6, %v123_v27  }
  0x9b   :  { %683 = vst [vmem:[#allocation0 + $0x2f] sm:$0x1] %v678_v26  ;;  %128 = vst.msk [vmem:[#allocation2 + $0x157] sm:$0x2] %vm5_vm6, %v123_v27   ;;  %v391_v28 = vld [vmem:[#allocation2 + $0x30] sm:$0x1]  ;;  %v132_v30 = vpop.permute.xlu1 %131  }
  0x9c   :  { %v615_v29 = vld [vmem:[#allocation2 + $0x130] sm:$0x1]  ;;  %396 = vst [vmem:[#allocation0 + $0x6] sm:$0x1] %v391_v28  ;;  %135 = vst.msk [vmem:[#allocation2 + $0x10] sm:$0x1] %vm5_vm6, %v132_v30  }
  0x9d   :  { %620 = vst [vmem:[#allocation0 + $0x26] sm:$0x1] %v615_v29  ;;  %137 = vst.msk [vmem:[#allocation2 + $0x10f] sm:$0x2] %vm5_vm6, %v132_v30   ;;  %v552_v31 = vld [vmem:[#allocation2 + $0xe8] sm:$0x1]  ;;  %v141_v32 = vpop.permute.xlu0 %140  }
  0x9e   :  { %557 = vst [vmem:[#allocation0 + $0x1d] sm:$0x1] %v552_v31  ;;  %144 = vst.msk [vmem:[#allocation2 + $0xc8] sm:$0x1] %vm5_vm6, %v141_v32  }
  0x9f   :  { %v489_v33 = vld [vmem:[#allocation2 + $0xa0] sm:$0x1]  ;;  %v149_v35 = vpop.permute.xlu1 %148  }
  0xa0   :  { %v713_v34 = vld [vmem:[#allocation2 + $0x1a0] sm:$0x1]  ;;  %494 = vst [vmem:[#allocation0 + $0x14] sm:$0x1] %v489_v33  ;;  %152 = vst.msk [vmem:[#allocation2 + $0x80] sm:$0x1] %vm5_vm6, %v149_v35  }
  0xa1   :  { %718 = vst [vmem:[#allocation0 + $0x34] sm:$0x1] %v713_v34  ;;  %154 = vst.msk [vmem:[#allocation2 + $0x17f] sm:$0x2] %vm5_vm6, %v149_v35   ;;  %v426_v36 = vld [vmem:[#allocation2 + $0x58] sm:$0x1]  ;;  %v159_v38 = vpop.permute.xlu0 %158  }
  0xa2   :  { %v650_v37 = vld [vmem:[#allocation2 + $0x158] sm:$0x1]  ;;  %431 = vst [vmem:[#allocation0 + $0xb] sm:$0x1] %v426_v36  ;;  %162 = vst.msk [vmem:[#allocation2 + $0x38] sm:$0x1] %vm5_vm6, %v159_v38  }
  0xa3   :  { %655 = vst [vmem:[#allocation0 + $0x2b] sm:$0x1] %v650_v37  ;;  %164 = vst.msk [vmem:[#allocation2 + $0x137] sm:$0x2] %vm5_vm6, %v159_v38   ;;  %v363_v39 = vld [vmem:[#allocation2 + $0x10] sm:$0x1]  ;;  %v168_v41 = vpop.permute.xlu1 %167  }
  0xa4   :  { %v587_v40 = vld [vmem:[#allocation2 + $0x110] sm:$0x1]  ;;  %368 = vst [vmem:[#allocation0 + $0x2] sm:$0x1] %v363_v39  ;;  %171 = vst.msk [vmem:[#allocation2 + $0xf0] sm:$0x1] %vm5_vm6, %v168_v41  }
  0xa5   :  { %592 = vst [vmem:[#allocation0 + $0x22] sm:$0x1] %v587_v40  ;;  %v524_v42 = vld [vmem:[#allocation2 + $0xc8] sm:$0x1]  ;;  %v176_v43 = vpop.permute.xlu0 %175  }
  0xa6   :  { %529 = vst [vmem:[#allocation0 + $0x19] sm:$0x1] %v524_v42  ;;  %179 = vst.msk [vmem:[#allocation2 + $0xa8] sm:$0x1] %vm5_vm6, %v176_v43  }
  0xa7   :  { %181 = vst.msk [vmem:[#allocation2 + $0x1a7] sm:$0x2] %vm5_vm6, %v176_v43   ;;  %v461_v44 = vld [vmem:[#allocation2 + $0x80] sm:$0x1]  ;;  %v186_v46 = vpop.permute.xlu1 %185  }
  0xa8   :  { %v685_v45 = vld [vmem:[#allocation2 + $0x180] sm:$0x1]  ;;  %466 = vst [vmem:[#allocation0 + $0x10] sm:$0x1] %v461_v44  ;;  %189 = vst.msk [vmem:[#allocation2 + $0x60] sm:$0x1] %vm5_vm6, %v186_v46  }
  0xa9   :  { %690 = vst [vmem:[#allocation0 + $0x30] sm:$0x1] %v685_v45  ;;  %191 = vst.msk [vmem:[#allocation2 + $0x15f] sm:$0x2] %vm5_vm6, %v186_v46   ;;  %v398_v47 = vld [vmem:[#allocation2 + $0x38] sm:$0x1]  ;;  %v195_v49 = vpop.permute.xlu0 %194  }
  0xaa   :  { %v622_v48 = vld [vmem:[#allocation2 + $0x138] sm:$0x1]  ;;  %403 = vst [vmem:[#allocation0 + $0x7] sm:$0x1] %v398_v47  ;;  %198 = vst.msk [vmem:[#allocation2 + $0x18] sm:$0x1] %vm5_vm6, %v195_v49  }
  0xab   :  { %627 = vst [vmem:[#allocation0 + $0x27] sm:$0x1] %v622_v48  ;;  %200 = vst.msk [vmem:[#allocation2 + $0x117] sm:$0x2] %vm5_vm6, %v195_v49   ;;  %v559_v50 = vld [vmem:[#allocation2 + $0xf0] sm:$0x1]  ;;  %v204_v51 = vpop.permute.xlu1 %203  }
  0xac   :  { %564 = vst [vmem:[#allocation0 + $0x1e] sm:$0x1] %v559_v50  ;;  %207 = vst.msk [vmem:[#allocation2 + $0xd0] sm:$0x1] %vm5_vm6, %v204_v51  }
  0xad   :  { %v496_v52 = vld [vmem:[#allocation2 + $0xa8] sm:$0x1]  ;;  %v212_v54 = vpop.permute.xlu0 %211  }
  0xae   :  { %v720_v53 = vld [vmem:[#allocation2 + $0x1a8] sm:$0x1]  ;;  %501 = vst [vmem:[#allocation0 + $0x15] sm:$0x1] %v496_v52  ;;  %215 = vst.msk [vmem:[#allocation2 + $0x88] sm:$0x1] %vm5_vm6, %v212_v54  }
  0xaf   :  { %725 = vst [vmem:[#allocation0 + $0x35] sm:$0x1] %v720_v53  ;;  %217 = vst.msk [vmem:[#allocation2 + $0x187] sm:$0x2] %vm5_vm6, %v212_v54   ;;  %v433_v55 = vld [vmem:[#allocation2 + $0x60] sm:$0x1]  ;;  %v222_v57 = vpop.permute.xlu1 %221  }
  0xb0   :  { %v657_v56 = vld [vmem:[#allocation2 + $0x160] sm:$0x1]  ;;  %438 = vst [vmem:[#allocation0 + $0xc] sm:$0x1] %v433_v55  ;;  %225 = vst.msk [vmem:[#allocation2 + $0x40] sm:$0x1] %vm5_vm6, %v222_v57  }
  0xb1   :  { %662 = vst [vmem:[#allocation0 + $0x2c] sm:$0x1] %v657_v56  ;;  %227 = vst.msk [vmem:[#allocation2 + $0x13f] sm:$0x2] %vm5_vm6, %v222_v57   ;;  %v370_v58 = vld [vmem:[#allocation2 + $0x18] sm:$0x1]  ;;  %v231_v60 = vpop.permute.xlu0 %230  }
  0xb2   :  { %v594_v59 = vld [vmem:[#allocation2 + $0x118] sm:$0x1]  ;;  %375 = vst [vmem:[#allocation0 + $0x3] sm:$0x1] %v370_v58  ;;  %234 = vst.msk [vmem:[#allocation2 + $0xf8] sm:$0x1] %vm5_vm6, %v231_v60  }
  0xb3   :  { %599 = vst [vmem:[#allocation0 + $0x23] sm:$0x1] %v594_v59  ;;  %v531_v61 = vld [vmem:[#allocation2 + $0xd0] sm:$0x1] }
  0xb4   :  { %536 = vst [vmem:[#allocation0 + $0x1a] sm:$0x1] %v531_v61 }
  0xb5   :  { %v468_v62 = vld [vmem:[#allocation2 + $0x88] sm:$0x1] }
  0xb6   :  { %v692_v63 = vld [vmem:[#allocation2 + $0x188] sm:$0x1]  ;;  %473 = vst [vmem:[#allocation0 + $0x11] sm:$0x1] %v468_v62 }
  0xb7   :  { %697 = vst [vmem:[#allocation0 + $0x31] sm:$0x1] %v692_v63  ;;  %v405_v0 = vld [vmem:[#allocation2 + $0x40] sm:$0x1] }
  0xb8   :  { %v629_v1 = vld [vmem:[#allocation2 + $0x140] sm:$0x1]  ;;  %410 = vst [vmem:[#allocation0 + $0x8] sm:$0x1] %v405_v0 }
  0xb9   :  { %634 = vst [vmem:[#allocation0 + $0x28] sm:$0x1] %v629_v1  ;;  %v566_v2 = vld [vmem:[#allocation2 + $0xf8] sm:$0x1] }
  0xba   :  { %571 = vst [vmem:[#allocation0 + $0x1f] sm:$0x1] %v566_v2 }
  0xbb   :  { %880 = shalt.err (!%p877_p4)
}
  0xbc   :  { %747 = dma.vmem_to_hbm [thread:$0]  %s745_s26, 896, %s1099_s1, [#allocation1]  }
  0xbd   :  { %889 = dma.done.wait [#allocation1], 896  }
  0xbe   :  { %890 = vsyncadd [#allocation1], 4294966400 }
  0xbf   :  { %749 = vsyncpa [#allocation1], 1 }

</bundles_post_ra>
